<compile_context>
chip_gen: v5e
topology: v5e:2x2
jax: 0.10.0
libtpu: 0.0.40
codegen_flags: <defaults>
</compile_context>

<pallas_src>
import functools

import jax
import jax.numpy as jnp
from jax.experimental import pallas as pl
from jax.experimental.pallas import tpu as pltpu


def _gru_attention_kernel(
    x_ref,              # (T*B, SP)       time-major, batch/feature-padded input, flattened over (t, b)
    wih0_ref,           # (SP, 3*HP)      layer-0 input weights, gates packed [r | z | n], lane-padded
    wih_ref,            # (L-1, HP, 3*HP) input weights of layers 1..L-1 (packed, padded)
    whh_ref,            # (L, HP, 3*HP)   hidden weights of all layers (packed, padded)
    bx_ref,             # (L, 1, 3*HP)    bias added to gx:  [b_ih_r+b_hh_r | b_ih_z+b_hh_z | b_ih_n]
    bhn_ref,            # (L, 1, HP)      b_hh_n (added inside the reset gate, PyTorch semantics)
    wa1_ref,            # (HP, A)         attention_layer_1 weight (transposed, row-padded)
    ba1_ref,            # (1, A)
    wa2_ref,            # (1, A)          attention_layer_2 weight as a row vector
    ba2_ref,            # (1, 1)
    wr1_ref, br1_ref,   # (HP, L1), (1, L1)
    wr2_ref, br2_ref,   # (L1, L2), (1, L2)
    wr3_ref, br3_ref,   # (L2, P),  (1, P)
    out_ref,            # (B, P)
    seq_scr,            # (T*B, HP) VMEM scratch: top-layer GRU outputs for the whole sequence
    *, T, B, HP, num_layers,
):
    f32 = jnp.float32
    H3 = 3 * HP

    # ---- layer-0 input transform for ALL timesteps at once (off the recurrent critical path) ----
    gx0 = jnp.dot(x_ref[...], wih0_ref[...], preferred_element_type=f32) + bx_ref[0]   # (T*B, 3*HP)

    # ---- stacked GRU recurrence, statically unrolled over time and layers ----
    h = [jnp.zeros((B, HP), f32) for _ in range(num_layers)]     # PyTorch default h0 = 0
    for t in range(T):
        layer_in = None
        for l in range(num_layers):
            if l == 0:
                gx = gx0[t * B:(t + 1) * B, :]                                        # (B, 3*HP)
            else:
                gx = jnp.dot(layer_in, wih_ref[l - 1], preferred_element_type=f32) + bx_ref[l]
            gh = jnp.dot(h[l], whh_ref[l], preferred_element_type=f32)               # (B, 3*HP)

            # gate slices at exact 128-lane boundaries (vreg aligned, no shuffles)
            r = jax.nn.sigmoid(gx[:, 0:HP] + gh[:, 0:HP])
            z = jax.nn.sigmoid(gx[:, HP:2 * HP] + gh[:, HP:2 * HP])
            n = jnp.tanh(gx[:, 2 * HP:H3] + r * (gh[:, 2 * HP:H3] + bhn_ref[l]))
            h[l] = (1.0 - z) * n + z * h[l]                                           # PyTorch GRU update
            layer_in = h[l]
        seq_scr[pl.ds(t * B, B), :] = layer_in                    # top-layer output of this timestep

    # ---- attention over time (epilogue, batched over all T*B rows) ----
    g = seq_scr[...]                                                                  # (T*B, HP)
    sh = jnp.tanh(jnp.dot(g, wa1_ref[...], preferred_element_type=f32) + ba1_ref[...])  # (T*B, A)
    sc = jnp.sum(sh * wa2_ref[...], axis=1, keepdims=True) + ba2_ref[...]             # (T*B, 1)

    # numerically-stable softmax over the (small, static) time axis, unrolled
    scs = [sc[t * B:(t + 1) * B, :] for t in range(T)]                                # each (B, 1)
    m = scs[0]
    for t in range(1, T):
        m = jnp.maximum(m, scs[t])
    den = jnp.zeros_like(m)
    acc = jnp.zeros((B, HP), f32)
    for t in range(T):
        e = jnp.exp(scs[t] - m)
        den = den + e
        acc = acc + e * g[t * B:(t + 1) * B, :]
    pooled = acc * pl.reciprocal(den, approx=True)                # (B, HP) == sum_t softmax_t * h_t

    # ---- regression head ----
    h1 = jnp.maximum(jnp.dot(pooled, wr1_ref[...], preferred_element_type=f32) + br1_ref[...], 0.0)
    h2 = jnp.maximum(jnp.dot(h1, wr2_ref[...], preferred_element_type=f32) + br2_ref[...], 0.0)
    out = jnp.dot(h2, wr3_ref[...], preferred_element_type=f32) + br3_ref[...]
    out_ref[...] = out.astype(out_ref.dtype)


def gru_attention_forward(x, params):
    """x: (B, T, sensor_num), batch_first like the torch module. Returns (B, predict_sensor).

    `params` uses the natural PyTorch layout:
      w_ih[l]: (3H, in_l)  w_hh[l]: (3H, H)  b_ih[l], b_hh[l]: (3H,)   gate order r, z, n
      wa1: (A, H) ba1: (A,)   wa2: (1, A) ba2: (1,)
      wr1: (L1, H) br1: (L1,)  wr2: (L2, L1) br2: (L2,)  wr3: (P, L2) br3: (P,)
    """
    f32 = jnp.float32
    B, T, S = x.shape
    L = len(params["w_ih"])
    H = params["w_hh"][0].shape[1]
    A = params["wa1"].shape[0]
    L1 = params["wr1"].shape[0]
    L2 = params["wr2"].shape[0]
    P = params["wr3"].shape[0]
    assert L >= 2, "layers 1..L-1 weights are packed together; need num_layers >= 2"
    assert params["w_ih"][0].shape[1] == S

    HP = ((H + 127) // 128) * 128            # per-gate lane padding (vreg aligned gate slices)
    SP = ((S + 7) // 8) * 8                  # input-feature padding (sublane multiple)
    BP = max(8, ((B + 7) // 8) * 8)          # batch padded to full sublanes

    # ---- weight packing (one-time wrapper-side layout plumbing; all zero-padded -> identical math) ----
    def pack_w(w, in_dim, in_pad):
        # w: (3H, in_dim) torch layout, gate order r,z,n -> (in_pad, 3*HP), lane-dense per-gate blocks
        cols = []
        for gidx in range(3):
            blk = w[gidx * H:(gidx + 1) * H, :].T.astype(f32)                 # (in_dim, H)
            blk = jnp.pad(blk, ((0, in_pad - in_dim), (0, HP - H)))
            cols.append(blk)
        return jnp.concatenate(cols, axis=1)                                  # (in_pad, 3*HP)

    def pack_bx(b_ih, b_hh):
        # r,z gates: b_ih+b_hh ; n gate: b_ih only   -> (1, 3*HP)
        segs = []
        for gidx in range(3):
            bi = b_ih[gidx * H:(gidx + 1) * H].astype(f32)
            bh = b_hh[gidx * H:(gidx + 1) * H].astype(f32)
            v = bi + bh if gidx < 2 else bi
            segs.append(jnp.pad(v, (0, HP - H)))
        return jnp.concatenate(segs)[None, :]

    wih0_p = pack_w(params["w_ih"][0], S, SP)                                              # (SP, 3HP)
    wih_p = jnp.stack([pack_w(params["w_ih"][l], H, HP) for l in range(1, L)])             # (L-1, HP, 3HP)
    whh_p = jnp.stack([pack_w(params["w_hh"][l], H, HP) for l in range(L)])                # (L, HP, 3HP)
    bx_p = jnp.stack([pack_bx(params["b_ih"][l], params["b_hh"][l]) for l in range(L)])    # (L, 1, 3HP)
    bhn_p = jnp.stack([jnp.pad(params["b_hh"][l][2 * H:3 * H].astype(f32),
                               (0, HP - H))[None, :] for l in range(L)])                   # (L, 1, HP)

    wa1_p = jnp.pad(params["wa1"].T.astype(f32), ((0, HP - H), (0, 0)))                    # (HP, A)
    ba1_p = params["ba1"].astype(f32)[None, :]                                             # (1, A)
    wa2_p = params["wa2"].astype(f32)                                                      # (1, A)
    ba2_p = params["ba2"].astype(f32)[None, :]                                             # (1, 1)

    wr1_p = jnp.pad(params["wr1"].T.astype(f32), ((0, HP - H), (0, 0)))                    # (HP, L1)
    br1_p = params["br1"].astype(f32)[None, :]
    wr2_p = params["wr2"].T.astype(f32)                                                    # (L1, L2)
    br2_p = params["br2"].astype(f32)[None, :]
    wr3_p = params["wr3"].T.astype(f32)                                                    # (L2, P)
    br3_p = params["br3"].astype(f32)[None, :]

    # time-major, batch/feature zero-padded, flattened over (t, b) -> (T*BP, SP)
    xt = jnp.transpose(x.astype(f32), (1, 0, 2))
    xt = jnp.pad(xt, ((0, 0), (0, BP - B), (0, SP - S)))
    x_flat = xt.reshape(T * BP, SP)

    args = (x_flat,
            wih0_p, wih_p, whh_p, bx_p, bhn_p,
            wa1_p, ba1_p, wa2_p, ba2_p,
            wr1_p, br1_p, wr2_p, br2_p, wr3_p, br3_p)

    def resident(arr):
        zeros = (0,) * arr.ndim
        return pl.BlockSpec(arr.shape, lambda i, _z=zeros: _z)

    in_specs = [resident(a) for a in args]

    # advisory cost hint for the XLA scheduler around the custom call
    flops = (2 * T * BP * SP * 3 * HP
             + T * (2 * L - 1) * 2 * BP * HP * 3 * HP
             + 2 * T * BP * HP * A
             + 2 * BP * (HP * L1 + L1 * L2 + L2 * P))
    transc = T * L * BP * 3 * HP + T * BP * (A + 2)
    bytes_acc = 4 * (x_flat.size + sum(int(a.size) for a in args[1:]) + BP * P)
    cost = pl.CostEstimate(flops=int(flops), transcendentals=int(transc),
                           bytes_accessed=int(bytes_acc))

    kernel = functools.partial(_gru_attention_kernel, T=T, B=BP, HP=HP, num_layers=L)

    out = pl.pallas_call(
        kernel,
        out_shape=jax.ShapeDtypeStruct((BP, P), jnp.float32),
        grid_spec=pltpu.PrefetchScalarGridSpec(
            num_scalar_prefetch=0,
            grid=(1,),                                      # whole forward in one pipeline step
            in_specs=in_specs,
            out_specs=pl.BlockSpec((BP, P), lambda i: (0, 0)),
            scratch_shapes=[
                pltpu.VMEM((T * BP, HP), jnp.float32),      # top-layer output sequence
            ],
        ),
        compiler_params=pltpu.CompilerParams(dimension_semantics=("arbitrary",)),
        cost_estimate=cost,
    )(*args)
    return out[:B]


def reference_forward(x, params):
    """Pure-JAX reference with the same math as torch GRU_attention.forward."""
    hi = jax.lax.Precision.HIGHEST
    B, T, S = x.shape
    L = len(params["w_ih"])
    H = params["w_hh"][0].shape[1]
    hs = [jnp.zeros((B, H), jnp.float32) for _ in range(L)]
    tops = []
    for t in range(T):
        inp = x[:, t, :].astype(jnp.float32)
        for l in range(L):
            wi, wh = params["w_ih"][l], params["w_hh"][l]
            bi, bh = params["b_ih"][l], params["b_hh"][l]
            gi = jnp.dot(inp, wi.T, precision=hi) + bi
            gh = jnp.dot(hs[l], wh.T, precision=hi) + bh
            r = jax.nn.sigmoid(gi[:, :H] + gh[:, :H])
            z = jax.nn.sigmoid(gi[:, H:2 * H] + gh[:, H:2 * H])
            n = jnp.tanh(gi[:, 2 * H:] + r * gh[:, 2 * H:])
            hs[l] = (1.0 - z) * n + z * hs[l]
            inp = hs[l]
        tops.append(hs[L - 1])
    g = jnp.stack(tops, axis=1)                                                        # (B, T, H)
    sh = jnp.tanh(jnp.einsum("bth,ah->bta", g, params["wa1"], precision=hi) + params["ba1"])
    sc = jnp.einsum("bta,a->bt", sh, params["wa2"][0], precision=hi) + params["ba2"][0]
    w = jax.nn.softmax(sc, axis=1)                                                     # softmax over time
    pooled = jnp.einsum("bt,bth->bh", w, g, precision=hi)                              # sum-pooling
    h1 = jax.nn.relu(jnp.dot(pooled, params["wr1"].T, precision=hi) + params["br1"])
    h2 = jax.nn.relu(jnp.dot(h1, params["wr2"].T, precision=hi) + params["br2"])
    return jnp.dot(h2, params["wr3"].T, precision=hi) + params["br3"]


if __name__ == "__main__":
    # module config (small, consistent with GRU_attention defaults)
    input_timestep = 8          # T
    sensor_num = 16             # input features per timestep
    predict_sensor = 4          # output features
    batch = 2
    gru_hidden_size = 64
    gru_hidden_layers = 3
    attention_hidden_size = 32
    linear_hidden_size_1 = 64
    linear_hidden_size_2 = 32

    T, S, P, B = input_timestep, sensor_num, predict_sensor, batch
    H, L, A = gru_hidden_size, gru_hidden_layers, attention_hidden_size
    L1, L2 = linear_hidden_size_1, linear_hidden_size_2

    key = jax.random.PRNGKey(0)
    keys = iter(jax.random.split(key, 40))

    def u(k, shape, fan_in):
        s = 1.0 / (fan_in ** 0.5)
        return jax.random.uniform(k, shape, jnp.float32, -s, s)

    params = {
        "w_ih": [u(next(keys), (3 * H, S if l == 0 else H), H) for l in range(L)],
        "w_hh": [u(next(keys), (3 * H, H), H) for l in range(L)],
        "b_ih": [u(next(keys), (3 * H,), H) for l in range(L)],
        "b_hh": [u(next(keys), (3 * H,), H) for l in range(L)],
        "wa1": u(next(keys), (A, H), H), "ba1": u(next(keys), (A,), H),
        "wa2": u(next(keys), (1, A), A), "ba2": u(next(keys), (1,), A),
        "wr1": u(next(keys), (L1, H), H), "br1": u(next(keys), (L1,), H),
        "wr2": u(next(keys), (L2, L1), L1), "br2": u(next(keys), (L2,), L1),
        "wr3": u(next(keys), (P, L2), L2), "br3": u(next(keys), (P,), L2),
    }
    x = jax.random.normal(next(keys), (B, T, S), dtype=jnp.float32)

    out = jax.jit(gru_attention_forward)(x, params)
    out = jax.block_until_ready(out)

    ref = reference_forward(x, params)
    assert out.shape == (B, P)
    max_err = float(jnp.max(jnp.abs(out - ref)))
    assert jnp.allclose(out, ref, atol=2e-3, rtol=2e-3), f"mismatch vs reference (max abs err {max_err})"

    print("KERNEL_OK")
</pallas_src>

<mosaic_0001>
module attributes {stable_mosaic.version = 11 : i64} {
  func.func @_gru_attention_kernel(%arg0: i32, %arg1: memref<64x16xf32, #tpu.memory_space<vmem>>, %arg2: memref<16x384xf32, #tpu.memory_space<vmem>>, %arg3: memref<2x128x384xf32, #tpu.memory_space<vmem>>, %arg4: memref<3x128x384xf32, #tpu.memory_space<vmem>>, %arg5: memref<3x1x384xf32, #tpu.memory_space<vmem>>, %arg6: memref<3x1x128xf32, #tpu.memory_space<vmem>>, %arg7: memref<128x32xf32, #tpu.memory_space<vmem>>, %arg8: memref<1x32xf32, #tpu.memory_space<vmem>>, %arg9: memref<1x32xf32, #tpu.memory_space<vmem>>, %arg10: memref<1x1xf32, #tpu.memory_space<vmem>>, %arg11: memref<128x64xf32, #tpu.memory_space<vmem>>, %arg12: memref<1x64xf32, #tpu.memory_space<vmem>>, %arg13: memref<64x32xf32, #tpu.memory_space<vmem>>, %arg14: memref<1x32xf32, #tpu.memory_space<vmem>>, %arg15: memref<32x4xf32, #tpu.memory_space<vmem>>, %arg16: memref<1x4xf32, #tpu.memory_space<vmem>>, %arg17: memref<8x4xf32, #tpu.memory_space<vmem>>, %arg18: memref<64x128xf32, #tpu.memory_space<vmem>>) attributes {dimension_semantics = [#tpu.dimension_semantics<arbitrary>], iteration_bounds = array<i64: 1>, scalar_prefetch = 0 : i64, scratch_operands = 1 : i64, tpu.core_type = #tpu.core_type<tc>, window_params = [{pipeline_mode = #tpu.pipeline_mode<synchronous>, transform_indices = @transform_0, window_bounds = array<i64: 64, 16>}, {pipeline_mode = #tpu.pipeline_mode<synchronous>, transform_indices = @transform_1, window_bounds = array<i64: 16, 384>}, {pipeline_mode = #tpu.pipeline_mode<synchronous>, transform_indices = @transform_2, window_bounds = array<i64: 2, 128, 384>}, {pipeline_mode = #tpu.pipeline_mode<synchronous>, transform_indices = @transform_3, window_bounds = array<i64: 3, 128, 384>}, {pipeline_mode = #tpu.pipeline_mode<synchronous>, transform_indices = @transform_4, window_bounds = array<i64: 3, 1, 384>}, {pipeline_mode = #tpu.pipeline_mode<synchronous>, transform_indices = @transform_5, window_bounds = array<i64: 3, 1, 128>}, {pipeline_mode = #tpu.pipeline_mode<synchronous>, transform_indices = @transform_6, window_bounds = array<i64: 128, 32>}, {pipeline_mode = #tpu.pipeline_mode<synchronous>, transform_indices = @transform_7, window_bounds = array<i64: 1, 32>}, {pipeline_mode = #tpu.pipeline_mode<synchronous>, transform_indices = @transform_8, window_bounds = array<i64: 1, 32>}, {pipeline_mode = #tpu.pipeline_mode<synchronous>, transform_indices = @transform_9, window_bounds = array<i64: 1, 1>}, {pipeline_mode = #tpu.pipeline_mode<synchronous>, transform_indices = @transform_10, window_bounds = array<i64: 128, 64>}, {pipeline_mode = #tpu.pipeline_mode<synchronous>, transform_indices = @transform_11, window_bounds = array<i64: 1, 64>}, {pipeline_mode = #tpu.pipeline_mode<synchronous>, transform_indices = @transform_12, window_bounds = array<i64: 64, 32>}, {pipeline_mode = #tpu.pipeline_mode<synchronous>, transform_indices = @transform_13, window_bounds = array<i64: 1, 32>}, {pipeline_mode = #tpu.pipeline_mode<synchronous>, transform_indices = @transform_14, window_bounds = array<i64: 32, 4>}, {pipeline_mode = #tpu.pipeline_mode<synchronous>, transform_indices = @transform_15, window_bounds = array<i64: 1, 4>}, {pipeline_mode = #tpu.pipeline_mode<synchronous>, transform_indices = @transform_16, window_bounds = array<i64: 8, 4>}]} {
    %c0 = arith.constant 0 : index
    %c0_0 = arith.constant 0 : index
    %0 = vector.load %arg1[%c0, %c0_0] : memref<64x16xf32, #tpu.memory_space<vmem>>, vector<64x16xf32>
    %c0_1 = arith.constant 0 : index
    %c0_2 = arith.constant 0 : index
    %1 = vector.load %arg2[%c0_1, %c0_2] : memref<16x384xf32, #tpu.memory_space<vmem>>, vector<16x384xf32>
    %cst = arith.constant dense<0.000000e+00> : vector<64x384xf32>
    %2 = tpu.matmul %0, %1, %cst {dimension_numbers = #tpu.dot_dimension_numbers<[1], [0], [0], [1], [0, 0, 1, 1], [], []>} : vector<64x16xf32>, vector<16x384xf32>, vector<64x384xf32> -> vector<64x384xf32>
    %c0_3 = arith.constant 0 : index
    %c0_4 = arith.constant 0 : index
    %c0_5 = arith.constant 0 : index
    %3 = vector.load %arg5[%c0_3, %c0_4, %c0_5] : memref<3x1x384xf32, #tpu.memory_space<vmem>>, vector<1x1x384xf32>
    %4 = vector.shape_cast %3 : vector<1x1x384xf32> to vector<1x384xf32>
    %5 = vector.broadcast %4 : vector<1x384xf32> to vector<64x384xf32>
    %6 = arith.addf %2, %5 : vector<64x384xf32>
    %cst_6 = arith.constant 0.000000e+00 : f32
    %7 = vector.broadcast %cst_6 : f32 to vector<8x128xf32>
    %cst_7 = arith.constant 0.000000e+00 : f32
    %8 = vector.broadcast %cst_7 : f32 to vector<8x128xf32>
    %cst_8 = arith.constant 0.000000e+00 : f32
    %9 = vector.broadcast %cst_8 : f32 to vector<8x128xf32>
    %10 = vector.extract_strided_slice %6 {offsets = [0, 0], sizes = [8, 384], strides = [1, 1]} : vector<64x384xf32> to vector<8x384xf32>
    %c0_9 = arith.constant 0 : index
    %c0_10 = arith.constant 0 : index
    %c0_11 = arith.constant 0 : index
    %11 = vector.load %arg4[%c0_9, %c0_10, %c0_11] : memref<3x128x384xf32, #tpu.memory_space<vmem>>, vector<1x128x384xf32>
    %12 = vector.shape_cast %11 : vector<1x128x384xf32> to vector<128x384xf32>
    %cst_12 = arith.constant dense<0.000000e+00> : vector<8x384xf32>
    %13 = tpu.matmul %7, %12, %cst_12 {dimension_numbers = #tpu.dot_dimension_numbers<[1], [0], [0], [1], [0, 0, 1, 1], [], []>} : vector<8x128xf32>, vector<128x384xf32>, vector<8x384xf32> -> vector<8x384xf32>
    %14 = vector.extract_strided_slice %10 {offsets = [0, 0], sizes = [8, 128], strides = [1, 1]} : vector<8x384xf32> to vector<8x128xf32>
    %15 = vector.extract_strided_slice %13 {offsets = [0, 0], sizes = [8, 128], strides = [1, 1]} : vector<8x384xf32> to vector<8x128xf32>
    %16 = arith.addf %14, %15 : vector<8x128xf32>
    %17 = arith.negf %16 : vector<8x128xf32>
    %18 = math.exp %17 : vector<8x128xf32>
    %cst_13 = arith.constant 1.000000e+00 : f32
    %19 = vector.broadcast %cst_13 : f32 to vector<8x128xf32>
    %20 = arith.addf %19, %18 : vector<8x128xf32>
    %21 = arith.divf %19, %20 : vector<8x128xf32>
    %22 = vector.extract_strided_slice %10 {offsets = [0, 128], sizes = [8, 128], strides = [1, 1]} : vector<8x384xf32> to vector<8x128xf32>
    %23 = vector.extract_strided_slice %13 {offsets = [0, 128], sizes = [8, 128], strides = [1, 1]} : vector<8x384xf32> to vector<8x128xf32>
    %24 = arith.addf %22, %23 : vector<8x128xf32>
    %25 = arith.negf %24 : vector<8x128xf32>
    %26 = math.exp %25 : vector<8x128xf32>
    %cst_14 = arith.constant 1.000000e+00 : f32
    %27 = vector.broadcast %cst_14 : f32 to vector<8x128xf32>
    %28 = arith.addf %27, %26 : vector<8x128xf32>
    %29 = arith.divf %27, %28 : vector<8x128xf32>
    %30 = vector.extract_strided_slice %10 {offsets = [0, 256], sizes = [8, 128], strides = [1, 1]} : vector<8x384xf32> to vector<8x128xf32>
    %31 = vector.extract_strided_slice %13 {offsets = [0, 256], sizes = [8, 128], strides = [1, 1]} : vector<8x384xf32> to vector<8x128xf32>
    %c0_15 = arith.constant 0 : index
    %c0_16 = arith.constant 0 : index
    %c0_17 = arith.constant 0 : index
    %32 = vector.load %arg6[%c0_15, %c0_16, %c0_17] : memref<3x1x128xf32, #tpu.memory_space<vmem>>, vector<1x1x128xf32>
    %33 = vector.shape_cast %32 : vector<1x1x128xf32> to vector<1x128xf32>
    %34 = vector.broadcast %33 : vector<1x128xf32> to vector<8x128xf32>
    %35 = arith.addf %31, %34 : vector<8x128xf32>
    %36 = arith.mulf %21, %35 : vector<8x128xf32>
    %37 = arith.addf %30, %36 : vector<8x128xf32>
    %38 = math.tanh %37 : vector<8x128xf32>
    %cst_18 = arith.constant 1.000000e+00 : f32
    %39 = vector.broadcast %cst_18 : f32 to vector<8x128xf32>
    %40 = arith.subf %39, %29 : vector<8x128xf32>
    %41 = arith.mulf %40, %38 : vector<8x128xf32>
    %42 = arith.mulf %29, %7 : vector<8x128xf32>
    %43 = arith.addf %41, %42 : vector<8x128xf32>
    %c0_19 = arith.constant 0 : index
    %c0_20 = arith.constant 0 : index
    %c0_21 = arith.constant 0 : index
    %44 = vector.load %arg3[%c0_19, %c0_20, %c0_21] : memref<2x128x384xf32, #tpu.memory_space<vmem>>, vector<1x128x384xf32>
    %45 = vector.shape_cast %44 : vector<1x128x384xf32> to vector<128x384xf32>
    %cst_22 = arith.constant dense<0.000000e+00> : vector<8x384xf32>
    %46 = tpu.matmul %43, %45, %cst_22 {dimension_numbers = #tpu.dot_dimension_numbers<[1], [0], [0], [1], [0, 0, 1, 1], [], []>} : vector<8x128xf32>, vector<128x384xf32>, vector<8x384xf32> -> vector<8x384xf32>
    %c1 = arith.constant 1 : index
    %c0_23 = arith.constant 0 : index
    %c0_24 = arith.constant 0 : index
    %47 = vector.load %arg5[%c1, %c0_23, %c0_24] : memref<3x1x384xf32, #tpu.memory_space<vmem>>, vector<1x1x384xf32>
    %48 = vector.shape_cast %47 : vector<1x1x384xf32> to vector<1x384xf32>
    %49 = vector.broadcast %48 : vector<1x384xf32> to vector<8x384xf32>
    %50 = arith.addf %46, %49 : vector<8x384xf32>
    %c1_25 = arith.constant 1 : index
    %c0_26 = arith.constant 0 : index
    %c0_27 = arith.constant 0 : index
    %51 = vector.load %arg4[%c1_25, %c0_26, %c0_27] : memref<3x128x384xf32, #tpu.memory_space<vmem>>, vector<1x128x384xf32>
    %52 = vector.shape_cast %51 : vector<1x128x384xf32> to vector<128x384xf32>
    %cst_28 = arith.constant dense<0.000000e+00> : vector<8x384xf32>
    %53 = tpu.matmul %8, %52, %cst_28 {dimension_numbers = #tpu.dot_dimension_numbers<[1], [0], [0], [1], [0, 0, 1, 1], [], []>} : vector<8x128xf32>, vector<128x384xf32>, vector<8x384xf32> -> vector<8x384xf32>
    %54 = vector.extract_strided_slice %50 {offsets = [0, 0], sizes = [8, 128], strides = [1, 1]} : vector<8x384xf32> to vector<8x128xf32>
    %55 = vector.extract_strided_slice %53 {offsets = [0, 0], sizes = [8, 128], strides = [1, 1]} : vector<8x384xf32> to vector<8x128xf32>
    %56 = arith.addf %54, %55 : vector<8x128xf32>
    %57 = arith.negf %56 : vector<8x128xf32>
    %58 = math.exp %57 : vector<8x128xf32>
    %cst_29 = arith.constant 1.000000e+00 : f32
    %59 = vector.broadcast %cst_29 : f32 to vector<8x128xf32>
    %60 = arith.addf %59, %58 : vector<8x128xf32>
    %61 = arith.divf %59, %60 : vector<8x128xf32>
    %62 = vector.extract_strided_slice %50 {offsets = [0, 128], sizes = [8, 128], strides = [1, 1]} : vector<8x384xf32> to vector<8x128xf32>
    %63 = vector.extract_strided_slice %53 {offsets = [0, 128], sizes = [8, 128], strides = [1, 1]} : vector<8x384xf32> to vector<8x128xf32>
    %64 = arith.addf %62, %63 : vector<8x128xf32>
    %65 = arith.negf %64 : vector<8x128xf32>
    %66 = math.exp %65 : vector<8x128xf32>
    %cst_30 = arith.constant 1.000000e+00 : f32
    %67 = vector.broadcast %cst_30 : f32 to vector<8x128xf32>
    %68 = arith.addf %67, %66 : vector<8x128xf32>
    %69 = arith.divf %67, %68 : vector<8x128xf32>
    %70 = vector.extract_strided_slice %50 {offsets = [0, 256], sizes = [8, 128], strides = [1, 1]} : vector<8x384xf32> to vector<8x128xf32>
    %71 = vector.extract_strided_slice %53 {offsets = [0, 256], sizes = [8, 128], strides = [1, 1]} : vector<8x384xf32> to vector<8x128xf32>
    %c1_31 = arith.constant 1 : index
    %c0_32 = arith.constant 0 : index
    %c0_33 = arith.constant 0 : index
    %72 = vector.load %arg6[%c1_31, %c0_32, %c0_33] : memref<3x1x128xf32, #tpu.memory_space<vmem>>, vector<1x1x128xf32>
    %73 = vector.shape_cast %72 : vector<1x1x128xf32> to vector<1x128xf32>
    %74 = vector.broadcast %73 : vector<1x128xf32> to vector<8x128xf32>
    %75 = arith.addf %71, %74 : vector<8x128xf32>
    %76 = arith.mulf %61, %75 : vector<8x128xf32>
    %77 = arith.addf %70, %76 : vector<8x128xf32>
    %78 = math.tanh %77 : vector<8x128xf32>
    %cst_34 = arith.constant 1.000000e+00 : f32
    %79 = vector.broadcast %cst_34 : f32 to vector<8x128xf32>
    %80 = arith.subf %79, %69 : vector<8x128xf32>
    %81 = arith.mulf %80, %78 : vector<8x128xf32>
    %82 = arith.mulf %69, %8 : vector<8x128xf32>
    %83 = arith.addf %81, %82 : vector<8x128xf32>
    %c1_35 = arith.constant 1 : index
    %c0_36 = arith.constant 0 : index
    %c0_37 = arith.constant 0 : index
    %84 = vector.load %arg3[%c1_35, %c0_36, %c0_37] : memref<2x128x384xf32, #tpu.memory_space<vmem>>, vector<1x128x384xf32>
    %85 = vector.shape_cast %84 : vector<1x128x384xf32> to vector<128x384xf32>
    %cst_38 = arith.constant dense<0.000000e+00> : vector<8x384xf32>
    %86 = tpu.matmul %83, %85, %cst_38 {dimension_numbers = #tpu.dot_dimension_numbers<[1], [0], [0], [1], [0, 0, 1, 1], [], []>} : vector<8x128xf32>, vector<128x384xf32>, vector<8x384xf32> -> vector<8x384xf32>
    %c2 = arith.constant 2 : index
    %c0_39 = arith.constant 0 : index
    %c0_40 = arith.constant 0 : index
    %87 = vector.load %arg5[%c2, %c0_39, %c0_40] : memref<3x1x384xf32, #tpu.memory_space<vmem>>, vector<1x1x384xf32>
    %88 = vector.shape_cast %87 : vector<1x1x384xf32> to vector<1x384xf32>
    %89 = vector.broadcast %88 : vector<1x384xf32> to vector<8x384xf32>
    %90 = arith.addf %86, %89 : vector<8x384xf32>
    %c2_41 = arith.constant 2 : index
    %c0_42 = arith.constant 0 : index
    %c0_43 = arith.constant 0 : index
    %91 = vector.load %arg4[%c2_41, %c0_42, %c0_43] : memref<3x128x384xf32, #tpu.memory_space<vmem>>, vector<1x128x384xf32>
    %92 = vector.shape_cast %91 : vector<1x128x384xf32> to vector<128x384xf32>
    %cst_44 = arith.constant dense<0.000000e+00> : vector<8x384xf32>
    %93 = tpu.matmul %9, %92, %cst_44 {dimension_numbers = #tpu.dot_dimension_numbers<[1], [0], [0], [1], [0, 0, 1, 1], [], []>} : vector<8x128xf32>, vector<128x384xf32>, vector<8x384xf32> -> vector<8x384xf32>
    %94 = vector.extract_strided_slice %90 {offsets = [0, 0], sizes = [8, 128], strides = [1, 1]} : vector<8x384xf32> to vector<8x128xf32>
    %95 = vector.extract_strided_slice %93 {offsets = [0, 0], sizes = [8, 128], strides = [1, 1]} : vector<8x384xf32> to vector<8x128xf32>
    %96 = arith.addf %94, %95 : vector<8x128xf32>
    %97 = arith.negf %96 : vector<8x128xf32>
    %98 = math.exp %97 : vector<8x128xf32>
    %cst_45 = arith.constant 1.000000e+00 : f32
    %99 = vector.broadcast %cst_45 : f32 to vector<8x128xf32>
    %100 = arith.addf %99, %98 : vector<8x128xf32>
    %101 = arith.divf %99, %100 : vector<8x128xf32>
    %102 = vector.extract_strided_slice %90 {offsets = [0, 128], sizes = [8, 128], strides = [1, 1]} : vector<8x384xf32> to vector<8x128xf32>
    %103 = vector.extract_strided_slice %93 {offsets = [0, 128], sizes = [8, 128], strides = [1, 1]} : vector<8x384xf32> to vector<8x128xf32>
    %104 = arith.addf %102, %103 : vector<8x128xf32>
    %105 = arith.negf %104 : vector<8x128xf32>
    %106 = math.exp %105 : vector<8x128xf32>
    %cst_46 = arith.constant 1.000000e+00 : f32
    %107 = vector.broadcast %cst_46 : f32 to vector<8x128xf32>
    %108 = arith.addf %107, %106 : vector<8x128xf32>
    %109 = arith.divf %107, %108 : vector<8x128xf32>
    %110 = vector.extract_strided_slice %90 {offsets = [0, 256], sizes = [8, 128], strides = [1, 1]} : vector<8x384xf32> to vector<8x128xf32>
    %111 = vector.extract_strided_slice %93 {offsets = [0, 256], sizes = [8, 128], strides = [1, 1]} : vector<8x384xf32> to vector<8x128xf32>
    %c2_47 = arith.constant 2 : index
    %c0_48 = arith.constant 0 : index
    %c0_49 = arith.constant 0 : index
    %112 = vector.load %arg6[%c2_47, %c0_48, %c0_49] : memref<3x1x128xf32, #tpu.memory_space<vmem>>, vector<1x1x128xf32>
    %113 = vector.shape_cast %112 : vector<1x1x128xf32> to vector<1x128xf32>
    %114 = vector.broadcast %113 : vector<1x128xf32> to vector<8x128xf32>
    %115 = arith.addf %111, %114 : vector<8x128xf32>
    %116 = arith.mulf %101, %115 : vector<8x128xf32>
    %117 = arith.addf %110, %116 : vector<8x128xf32>
    %118 = math.tanh %117 : vector<8x128xf32>
    %cst_50 = arith.constant 1.000000e+00 : f32
    %119 = vector.broadcast %cst_50 : f32 to vector<8x128xf32>
    %120 = arith.subf %119, %109 : vector<8x128xf32>
    %121 = arith.mulf %120, %118 : vector<8x128xf32>
    %122 = arith.mulf %109, %9 : vector<8x128xf32>
    %123 = arith.addf %121, %122 : vector<8x128xf32>
    %c0_51 = arith.constant 0 : index
    %c0_52 = arith.constant 0 : index
    %124 = vector.load %arg18[%c0_51, %c0_52] : memref<64x128xf32, #tpu.memory_space<vmem>>, vector<8x128xf32>
    tpu.vector_store %arg18[%c0_51, %c0_52], %123 {strides = array<i32>} : memref<64x128xf32, #tpu.memory_space<vmem>>, vector<8x128xf32>,
    %125 = vector.extract_strided_slice %6 {offsets = [8, 0], sizes = [8, 384], strides = [1, 1]} : vector<64x384xf32> to vector<8x384xf32>
    %c0_53 = arith.constant 0 : index
    %c0_54 = arith.constant 0 : index
    %c0_55 = arith.constant 0 : index
    %126 = vector.load %arg4[%c0_53, %c0_54, %c0_55] : memref<3x128x384xf32, #tpu.memory_space<vmem>>, vector<1x128x384xf32>
    %127 = vector.shape_cast %126 : vector<1x128x384xf32> to vector<128x384xf32>
    %cst_56 = arith.constant dense<0.000000e+00> : vector<8x384xf32>
    %128 = tpu.matmul %43, %127, %cst_56 {dimension_numbers = #tpu.dot_dimension_numbers<[1], [0], [0], [1], [0, 0, 1, 1], [], []>} : vector<8x128xf32>, vector<128x384xf32>, vector<8x384xf32> -> vector<8x384xf32>
    %129 = vector.extract_strided_slice %125 {offsets = [0, 0], sizes = [8, 128], strides = [1, 1]} : vector<8x384xf32> to vector<8x128xf32>
    %130 = vector.extract_strided_slice %128 {offsets = [0, 0], sizes = [8, 128], strides = [1, 1]} : vector<8x384xf32> to vector<8x128xf32>
    %131 = arith.addf %129, %130 : vector<8x128xf32>
    %132 = arith.negf %131 : vector<8x128xf32>
    %133 = math.exp %132 : vector<8x128xf32>
    %cst_57 = arith.constant 1.000000e+00 : f32
    %134 = vector.broadcast %cst_57 : f32 to vector<8x128xf32>
    %135 = arith.addf %134, %133 : vector<8x128xf32>
    %136 = arith.divf %134, %135 : vector<8x128xf32>
    %137 = vector.extract_strided_slice %125 {offsets = [0, 128], sizes = [8, 128], strides = [1, 1]} : vector<8x384xf32> to vector<8x128xf32>
    %138 = vector.extract_strided_slice %128 {offsets = [0, 128], sizes = [8, 128], strides = [1, 1]} : vector<8x384xf32> to vector<8x128xf32>
    %139 = arith.addf %137, %138 : vector<8x128xf32>
    %140 = arith.negf %139 : vector<8x128xf32>
    %141 = math.exp %140 : vector<8x128xf32>
    %cst_58 = arith.constant 1.000000e+00 : f32
    %142 = vector.broadcast %cst_58 : f32 to vector<8x128xf32>
    %143 = arith.addf %142, %141 : vector<8x128xf32>
    %144 = arith.divf %142, %143 : vector<8x128xf32>
    %145 = vector.extract_strided_slice %125 {offsets = [0, 256], sizes = [8, 128], strides = [1, 1]} : vector<8x384xf32> to vector<8x128xf32>
    %146 = vector.extract_strided_slice %128 {offsets = [0, 256], sizes = [8, 128], strides = [1, 1]} : vector<8x384xf32> to vector<8x128xf32>
    %c0_59 = arith.constant 0 : index
    %c0_60 = arith.constant 0 : index
    %c0_61 = arith.constant 0 : index
    %147 = vector.load %arg6[%c0_59, %c0_60, %c0_61] : memref<3x1x128xf32, #tpu.memory_space<vmem>>, vector<1x1x128xf32>
    %148 = vector.shape_cast %147 : vector<1x1x128xf32> to vector<1x128xf32>
    %149 = vector.broadcast %148 : vector<1x128xf32> to vector<8x128xf32>
    %150 = arith.addf %146, %149 : vector<8x128xf32>
    %151 = arith.mulf %136, %150 : vector<8x128xf32>
    %152 = arith.addf %145, %151 : vector<8x128xf32>
    %153 = math.tanh %152 : vector<8x128xf32>
    %cst_62 = arith.constant 1.000000e+00 : f32
    %154 = vector.broadcast %cst_62 : f32 to vector<8x128xf32>
    %155 = arith.subf %154, %144 : vector<8x128xf32>
    %156 = arith.mulf %155, %153 : vector<8x128xf32>
    %157 = arith.mulf %144, %43 : vector<8x128xf32>
    %158 = arith.addf %156, %157 : vector<8x128xf32>
    %c0_63 = arith.constant 0 : index
    %c0_64 = arith.constant 0 : index
    %c0_65 = arith.constant 0 : index
    %159 = vector.load %arg3[%c0_63, %c0_64, %c0_65] : memref<2x128x384xf32, #tpu.memory_space<vmem>>, vector<1x128x384xf32>
    %160 = vector.shape_cast %159 : vector<1x128x384xf32> to vector<128x384xf32>
    %cst_66 = arith.constant dense<0.000000e+00> : vector<8x384xf32>
    %161 = tpu.matmul %158, %160, %cst_66 {dimension_numbers = #tpu.dot_dimension_numbers<[1], [0], [0], [1], [0, 0, 1, 1], [], []>} : vector<8x128xf32>, vector<128x384xf32>, vector<8x384xf32> -> vector<8x384xf32>
    %c1_67 = arith.constant 1 : index
    %c0_68 = arith.constant 0 : index
    %c0_69 = arith.constant 0 : index
    %162 = vector.load %arg5[%c1_67, %c0_68, %c0_69] : memref<3x1x384xf32, #tpu.memory_space<vmem>>, vector<1x1x384xf32>
    %163 = vector.shape_cast %162 : vector<1x1x384xf32> to vector<1x384xf32>
    %164 = vector.broadcast %163 : vector<1x384xf32> to vector<8x384xf32>
    %165 = arith.addf %161, %164 : vector<8x384xf32>
    %c1_70 = arith.constant 1 : index
    %c0_71 = arith.constant 0 : index
    %c0_72 = arith.constant 0 : index
    %166 = vector.load %arg4[%c1_70, %c0_71, %c0_72] : memref<3x128x384xf32, #tpu.memory_space<vmem>>, vector<1x128x384xf32>
    %167 = vector.shape_cast %166 : vector<1x128x384xf32> to vector<128x384xf32>
    %cst_73 = arith.constant dense<0.000000e+00> : vector<8x384xf32>
    %168 = tpu.matmul %83, %167, %cst_73 {dimension_numbers = #tpu.dot_dimension_numbers<[1], [0], [0], [1], [0, 0, 1, 1], [], []>} : vector<8x128xf32>, vector<128x384xf32>, vector<8x384xf32> -> vector<8x384xf32>
    %169 = vector.extract_strided_slice %165 {offsets = [0, 0], sizes = [8, 128], strides = [1, 1]} : vector<8x384xf32> to vector<8x128xf32>
    %170 = vector.extract_strided_slice %168 {offsets = [0, 0], sizes = [8, 128], strides = [1, 1]} : vector<8x384xf32> to vector<8x128xf32>
    %171 = arith.addf %169, %170 : vector<8x128xf32>
    %172 = arith.negf %171 : vector<8x128xf32>
    %173 = math.exp %172 : vector<8x128xf32>
    %cst_74 = arith.constant 1.000000e+00 : f32
    %174 = vector.broadcast %cst_74 : f32 to vector<8x128xf32>
    %175 = arith.addf %174, %173 : vector<8x128xf32>
    %176 = arith.divf %174, %175 : vector<8x128xf32>
    %177 = vector.extract_strided_slice %165 {offsets = [0, 128], sizes = [8, 128], strides = [1, 1]} : vector<8x384xf32> to vector<8x128xf32>
    %178 = vector.extract_strided_slice %168 {offsets = [0, 128], sizes = [8, 128], strides = [1, 1]} : vector<8x384xf32> to vector<8x128xf32>
    %179 = arith.addf %177, %178 : vector<8x128xf32>
    %180 = arith.negf %179 : vector<8x128xf32>
    %181 = math.exp %180 : vector<8x128xf32>
    %cst_75 = arith.constant 1.000000e+00 : f32
    %182 = vector.broadcast %cst_75 : f32 to vector<8x128xf32>
    %183 = arith.addf %182, %181 : vector<8x128xf32>
    %184 = arith.divf %182, %183 : vector<8x128xf32>
    %185 = vector.extract_strided_slice %165 {offsets = [0, 256], sizes = [8, 128], strides = [1, 1]} : vector<8x384xf32> to vector<8x128xf32>
    %186 = vector.extract_strided_slice %168 {offsets = [0, 256], sizes = [8, 128], strides = [1, 1]} : vector<8x384xf32> to vector<8x128xf32>
    %c1_76 = arith.constant 1 : index
    %c0_77 = arith.constant 0 : index
    %c0_78 = arith.constant 0 : index
    %187 = vector.load %arg6[%c1_76, %c0_77, %c0_78] : memref<3x1x128xf32, #tpu.memory_space<vmem>>, vector<1x1x128xf32>
    %188 = vector.shape_cast %187 : vector<1x1x128xf32> to vector<1x128xf32>
    %189 = vector.broadcast %188 : vector<1x128xf32> to vector<8x128xf32>
    %190 = arith.addf %186, %189 : vector<8x128xf32>
    %191 = arith.mulf %176, %190 : vector<8x128xf32>
    %192 = arith.addf %185, %191 : vector<8x128xf32>
    %193 = math.tanh %192 : vector<8x128xf32>
    %cst_79 = arith.constant 1.000000e+00 : f32
    %194 = vector.broadcast %cst_79 : f32 to vector<8x128xf32>
    %195 = arith.subf %194, %184 : vector<8x128xf32>
    %196 = arith.mulf %195, %193 : vector<8x128xf32>
    %197 = arith.mulf %184, %83 : vector<8x128xf32>
    %198 = arith.addf %196, %197 : vector<8x128xf32>
    %c1_80 = arith.constant 1 : index
    %c0_81 = arith.constant 0 : index
    %c0_82 = arith.constant 0 : index
    %199 = vector.load %arg3[%c1_80, %c0_81, %c0_82] : memref<2x128x384xf32, #tpu.memory_space<vmem>>, vector<1x128x384xf32>
    %200 = vector.shape_cast %199 : vector<1x128x384xf32> to vector<128x384xf32>
    %cst_83 = arith.constant dense<0.000000e+00> : vector<8x384xf32>
    %201 = tpu.matmul %198, %200, %cst_83 {dimension_numbers = #tpu.dot_dimension_numbers<[1], [0], [0], [1], [0, 0, 1, 1], [], []>} : vector<8x128xf32>, vector<128x384xf32>, vector<8x384xf32> -> vector<8x384xf32>
    %c2_84 = arith.constant 2 : index
    %c0_85 = arith.constant 0 : index
    %c0_86 = arith.constant 0 : index
    %202 = vector.load %arg5[%c2_84, %c0_85, %c0_86] : memref<3x1x384xf32, #tpu.memory_space<vmem>>, vector<1x1x384xf32>
    %203 = vector.shape_cast %202 : vector<1x1x384xf32> to vector<1x384xf32>
    %204 = vector.broadcast %203 : vector<1x384xf32> to vector<8x384xf32>
    %205 = arith.addf %201, %204 : vector<8x384xf32>
    %c2_87 = arith.constant 2 : index
    %c0_88 = arith.constant 0 : index
    %c0_89 = arith.constant 0 : index
    %206 = vector.load %arg4[%c2_87, %c0_88, %c0_89] : memref<3x128x384xf32, #tpu.memory_space<vmem>>, vector<1x128x384xf32>
    %207 = vector.shape_cast %206 : vector<1x128x384xf32> to vector<128x384xf32>
    %cst_90 = arith.constant dense<0.000000e+00> : vector<8x384xf32>
    %208 = tpu.matmul %123, %207, %cst_90 {dimension_numbers = #tpu.dot_dimension_numbers<[1], [0], [0], [1], [0, 0, 1, 1], [], []>} : vector<8x128xf32>, vector<128x384xf32>, vector<8x384xf32> -> vector<8x384xf32>
    %209 = vector.extract_strided_slice %205 {offsets = [0, 0], sizes = [8, 128], strides = [1, 1]} : vector<8x384xf32> to vector<8x128xf32>
    %210 = vector.extract_strided_slice %208 {offsets = [0, 0], sizes = [8, 128], strides = [1, 1]} : vector<8x384xf32> to vector<8x128xf32>
    %211 = arith.addf %209, %210 : vector<8x128xf32>
    %212 = arith.negf %211 : vector<8x128xf32>
    %213 = math.exp %212 : vector<8x128xf32>
    %cst_91 = arith.constant 1.000000e+00 : f32
    %214 = vector.broadcast %cst_91 : f32 to vector<8x128xf32>
    %215 = arith.addf %214, %213 : vector<8x128xf32>
    %216 = arith.divf %214, %215 : vector<8x128xf32>
    %217 = vector.extract_strided_slice %205 {offsets = [0, 128], sizes = [8, 128], strides = [1, 1]} : vector<8x384xf32> to vector<8x128xf32>
    %218 = vector.extract_strided_slice %208 {offsets = [0, 128], sizes = [8, 128], strides = [1, 1]} : vector<8x384xf32> to vector<8x128xf32>
    %219 = arith.addf %217, %218 : vector<8x128xf32>
    %220 = arith.negf %219 : vector<8x128xf32>
    %221 = math.exp %220 : vector<8x128xf32>
    %cst_92 = arith.constant 1.000000e+00 : f32
    %222 = vector.broadcast %cst_92 : f32 to vector<8x128xf32>
    %223 = arith.addf %222, %221 : vector<8x128xf32>
    %224 = arith.divf %222, %223 : vector<8x128xf32>
    %225 = vector.extract_strided_slice %205 {offsets = [0, 256], sizes = [8, 128], strides = [1, 1]} : vector<8x384xf32> to vector<8x128xf32>
    %226 = vector.extract_strided_slice %208 {offsets = [0, 256], sizes = [8, 128], strides = [1, 1]} : vector<8x384xf32> to vector<8x128xf32>
    %c2_93 = arith.constant 2 : index
    %c0_94 = arith.constant 0 : index
    %c0_95 = arith.constant 0 : index
    %227 = vector.load %arg6[%c2_93, %c0_94, %c0_95] : memref<3x1x128xf32, #tpu.memory_space<vmem>>, vector<1x1x128xf32>
    %228 = vector.shape_cast %227 : vector<1x1x128xf32> to vector<1x128xf32>
    %229 = vector.broadcast %228 : vector<1x128xf32> to vector<8x128xf32>
    %230 = arith.addf %226, %229 : vector<8x128xf32>
    %231 = arith.mulf %216, %230 : vector<8x128xf32>
    %232 = arith.addf %225, %231 : vector<8x128xf32>
    %233 = math.tanh %232 : vector<8x128xf32>
    %cst_96 = arith.constant 1.000000e+00 : f32
    %234 = vector.broadcast %cst_96 : f32 to vector<8x128xf32>
    %235 = arith.subf %234, %224 : vector<8x128xf32>
    %236 = arith.mulf %235, %233 : vector<8x128xf32>
    %237 = arith.mulf %224, %123 : vector<8x128xf32>
    %238 = arith.addf %236, %237 : vector<8x128xf32>
    %c8 = arith.constant 8 : index
    %c0_97 = arith.constant 0 : index
    %239 = vector.load %arg18[%c8, %c0_97] : memref<64x128xf32, #tpu.memory_space<vmem>>, vector<8x128xf32>
    tpu.vector_store %arg18[%c8, %c0_97], %238 {strides = array<i32>} : memref<64x128xf32, #tpu.memory_space<vmem>>, vector<8x128xf32>,
    %240 = vector.extract_strided_slice %6 {offsets = [16, 0], sizes = [8, 384], strides = [1, 1]} : vector<64x384xf32> to vector<8x384xf32>
    %c0_98 = arith.constant 0 : index
    %c0_99 = arith.constant 0 : index
    %c0_100 = arith.constant 0 : index
    %241 = vector.load %arg4[%c0_98, %c0_99, %c0_100] : memref<3x128x384xf32, #tpu.memory_space<vmem>>, vector<1x128x384xf32>
    %242 = vector.shape_cast %241 : vector<1x128x384xf32> to vector<128x384xf32>
    %cst_101 = arith.constant dense<0.000000e+00> : vector<8x384xf32>
    %243 = tpu.matmul %158, %242, %cst_101 {dimension_numbers = #tpu.dot_dimension_numbers<[1], [0], [0], [1], [0, 0, 1, 1], [], []>} : vector<8x128xf32>, vector<128x384xf32>, vector<8x384xf32> -> vector<8x384xf32>
    %244 = vector.extract_strided_slice %240 {offsets = [0, 0], sizes = [8, 128], strides = [1, 1]} : vector<8x384xf32> to vector<8x128xf32>
    %245 = vector.extract_strided_slice %243 {offsets = [0, 0], sizes = [8, 128], strides = [1, 1]} : vector<8x384xf32> to vector<8x128xf32>
    %246 = arith.addf %244, %245 : vector<8x128xf32>
    %247 = arith.negf %246 : vector<8x128xf32>
    %248 = math.exp %247 : vector<8x128xf32>
    %cst_102 = arith.constant 1.000000e+00 : f32
    %249 = vector.broadcast %cst_102 : f32 to vector<8x128xf32>
    %250 = arith.addf %249, %248 : vector<8x128xf32>
    %251 = arith.divf %249, %250 : vector<8x128xf32>
    %252 = vector.extract_strided_slice %240 {offsets = [0, 128], sizes = [8, 128], strides = [1, 1]} : vector<8x384xf32> to vector<8x128xf32>
    %253 = vector.extract_strided_slice %243 {offsets = [0, 128], sizes = [8, 128], strides = [1, 1]} : vector<8x384xf32> to vector<8x128xf32>
    %254 = arith.addf %252, %253 : vector<8x128xf32>
    %255 = arith.negf %254 : vector<8x128xf32>
    %256 = math.exp %255 : vector<8x128xf32>
    %cst_103 = arith.constant 1.000000e+00 : f32
    %257 = vector.broadcast %cst_103 : f32 to vector<8x128xf32>
    %258 = arith.addf %257, %256 : vector<8x128xf32>
    %259 = arith.divf %257, %258 : vector<8x128xf32>
    %260 = vector.extract_strided_slice %240 {offsets = [0, 256], sizes = [8, 128], strides = [1, 1]} : vector<8x384xf32> to vector<8x128xf32>
    %261 = vector.extract_strided_slice %243 {offsets = [0, 256], sizes = [8, 128], strides = [1, 1]} : vector<8x384xf32> to vector<8x128xf32>
    %c0_104 = arith.constant 0 : index
    %c0_105 = arith.constant 0 : index
    %c0_106 = arith.constant 0 : index
    %262 = vector.load %arg6[%c0_104, %c0_105, %c0_106] : memref<3x1x128xf32, #tpu.memory_space<vmem>>, vector<1x1x128xf32>
    %263 = vector.shape_cast %262 : vector<1x1x128xf32> to vector<1x128xf32>
    %264 = vector.broadcast %263 : vector<1x128xf32> to vector<8x128xf32>
    %265 = arith.addf %261, %264 : vector<8x128xf32>
    %266 = arith.mulf %251, %265 : vector<8x128xf32>
    %267 = arith.addf %260, %266 : vector<8x128xf32>
    %268 = math.tanh %267 : vector<8x128xf32>
    %cst_107 = arith.constant 1.000000e+00 : f32
    %269 = vector.broadcast %cst_107 : f32 to vector<8x128xf32>
    %270 = arith.subf %269, %259 : vector<8x128xf32>
    %271 = arith.mulf %270, %268 : vector<8x128xf32>
    %272 = arith.mulf %259, %158 : vector<8x128xf32>
    %273 = arith.addf %271, %272 : vector<8x128xf32>
    %c0_108 = arith.constant 0 : index
    %c0_109 = arith.constant 0 : index
    %c0_110 = arith.constant 0 : index
    %274 = vector.load %arg3[%c0_108, %c0_109, %c0_110] : memref<2x128x384xf32, #tpu.memory_space<vmem>>, vector<1x128x384xf32>
    %275 = vector.shape_cast %274 : vector<1x128x384xf32> to vector<128x384xf32>
    %cst_111 = arith.constant dense<0.000000e+00> : vector<8x384xf32>
    %276 = tpu.matmul %273, %275, %cst_111 {dimension_numbers = #tpu.dot_dimension_numbers<[1], [0], [0], [1], [0, 0, 1, 1], [], []>} : vector<8x128xf32>, vector<128x384xf32>, vector<8x384xf32> -> vector<8x384xf32>
    %c1_112 = arith.constant 1 : index
    %c0_113 = arith.constant 0 : index
    %c0_114 = arith.constant 0 : index
    %277 = vector.load %arg5[%c1_112, %c0_113, %c0_114] : memref<3x1x384xf32, #tpu.memory_space<vmem>>, vector<1x1x384xf32>
    %278 = vector.shape_cast %277 : vector<1x1x384xf32> to vector<1x384xf32>
    %279 = vector.broadcast %278 : vector<1x384xf32> to vector<8x384xf32>
    %280 = arith.addf %276, %279 : vector<8x384xf32>
    %c1_115 = arith.constant 1 : index
    %c0_116 = arith.constant 0 : index
    %c0_117 = arith.constant 0 : index
    %281 = vector.load %arg4[%c1_115, %c0_116, %c0_117] : memref<3x128x384xf32, #tpu.memory_space<vmem>>, vector<1x128x384xf32>
    %282 = vector.shape_cast %281 : vector<1x128x384xf32> to vector<128x384xf32>
    %cst_118 = arith.constant dense<0.000000e+00> : vector<8x384xf32>
    %283 = tpu.matmul %198, %282, %cst_118 {dimension_numbers = #tpu.dot_dimension_numbers<[1], [0], [0], [1], [0, 0, 1, 1], [], []>} : vector<8x128xf32>, vector<128x384xf32>, vector<8x384xf32> -> vector<8x384xf32>
    %284 = vector.extract_strided_slice %280 {offsets = [0, 0], sizes = [8, 128], strides = [1, 1]} : vector<8x384xf32> to vector<8x128xf32>
    %285 = vector.extract_strided_slice %283 {offsets = [0, 0], sizes = [8, 128], strides = [1, 1]} : vector<8x384xf32> to vector<8x128xf32>
    %286 = arith.addf %284, %285 : vector<8x128xf32>
    %287 = arith.negf %286 : vector<8x128xf32>
    %288 = math.exp %287 : vector<8x128xf32>
    %cst_119 = arith.constant 1.000000e+00 : f32
    %289 = vector.broadcast %cst_119 : f32 to vector<8x128xf32>
    %290 = arith.addf %289, %288 : vector<8x128xf32>
    %291 = arith.divf %289, %290 : vector<8x128xf32>
    %292 = vector.extract_strided_slice %280 {offsets = [0, 128], sizes = [8, 128], strides = [1, 1]} : vector<8x384xf32> to vector<8x128xf32>
    %293 = vector.extract_strided_slice %283 {offsets = [0, 128], sizes = [8, 128], strides = [1, 1]} : vector<8x384xf32> to vector<8x128xf32>
    %294 = arith.addf %292, %293 : vector<8x128xf32>
    %295 = arith.negf %294 : vector<8x128xf32>
    %296 = math.exp %295 : vector<8x128xf32>
    %cst_120 = arith.constant 1.000000e+00 : f32
    %297 = vector.broadcast %cst_120 : f32 to vector<8x128xf32>
    %298 = arith.addf %297, %296 : vector<8x128xf32>
    %299 = arith.divf %297, %298 : vector<8x128xf32>
    %300 = vector.extract_strided_slice %280 {offsets = [0, 256], sizes = [8, 128], strides = [1, 1]} : vector<8x384xf32> to vector<8x128xf32>
    %301 = vector.extract_strided_slice %283 {offsets = [0, 256], sizes = [8, 128], strides = [1, 1]} : vector<8x384xf32> to vector<8x128xf32>
    %c1_121 = arith.constant 1 : index
    %c0_122 = arith.constant 0 : index
    %c0_123 = arith.constant 0 : index
    %302 = vector.load %arg6[%c1_121, %c0_122, %c0_123] : memref<3x1x128xf32, #tpu.memory_space<vmem>>, vector<1x1x128xf32>
    %303 = vector.shape_cast %302 : vector<1x1x128xf32> to vector<1x128xf32>
    %304 = vector.broadcast %303 : vector<1x128xf32> to vector<8x128xf32>
    %305 = arith.addf %301, %304 : vector<8x128xf32>
    %306 = arith.mulf %291, %305 : vector<8x128xf32>
    %307 = arith.addf %300, %306 : vector<8x128xf32>
    %308 = math.tanh %307 : vector<8x128xf32>
    %cst_124 = arith.constant 1.000000e+00 : f32
    %309 = vector.broadcast %cst_124 : f32 to vector<8x128xf32>
    %310 = arith.subf %309, %299 : vector<8x128xf32>
    %311 = arith.mulf %310, %308 : vector<8x128xf32>
    %312 = arith.mulf %299, %198 : vector<8x128xf32>
    %313 = arith.addf %311, %312 : vector<8x128xf32>
    %c1_125 = arith.constant 1 : index
    %c0_126 = arith.constant 0 : index
    %c0_127 = arith.constant 0 : index
    %314 = vector.load %arg3[%c1_125, %c0_126, %c0_127] : memref<2x128x384xf32, #tpu.memory_space<vmem>>, vector<1x128x384xf32>
    %315 = vector.shape_cast %314 : vector<1x128x384xf32> to vector<128x384xf32>
    %cst_128 = arith.constant dense<0.000000e+00> : vector<8x384xf32>
    %316 = tpu.matmul %313, %315, %cst_128 {dimension_numbers = #tpu.dot_dimension_numbers<[1], [0], [0], [1], [0, 0, 1, 1], [], []>} : vector<8x128xf32>, vector<128x384xf32>, vector<8x384xf32> -> vector<8x384xf32>
    %c2_129 = arith.constant 2 : index
    %c0_130 = arith.constant 0 : index
    %c0_131 = arith.constant 0 : index
    %317 = vector.load %arg5[%c2_129, %c0_130, %c0_131] : memref<3x1x384xf32, #tpu.memory_space<vmem>>, vector<1x1x384xf32>
    %318 = vector.shape_cast %317 : vector<1x1x384xf32> to vector<1x384xf32>
    %319 = vector.broadcast %318 : vector<1x384xf32> to vector<8x384xf32>
    %320 = arith.addf %316, %319 : vector<8x384xf32>
    %c2_132 = arith.constant 2 : index
    %c0_133 = arith.constant 0 : index
    %c0_134 = arith.constant 0 : index
    %321 = vector.load %arg4[%c2_132, %c0_133, %c0_134] : memref<3x128x384xf32, #tpu.memory_space<vmem>>, vector<1x128x384xf32>
    %322 = vector.shape_cast %321 : vector<1x128x384xf32> to vector<128x384xf32>
    %cst_135 = arith.constant dense<0.000000e+00> : vector<8x384xf32>
    %323 = tpu.matmul %238, %322, %cst_135 {dimension_numbers = #tpu.dot_dimension_numbers<[1], [0], [0], [1], [0, 0, 1, 1], [], []>} : vector<8x128xf32>, vector<128x384xf32>, vector<8x384xf32> -> vector<8x384xf32>
    %324 = vector.extract_strided_slice %320 {offsets = [0, 0], sizes = [8, 128], strides = [1, 1]} : vector<8x384xf32> to vector<8x128xf32>
    %325 = vector.extract_strided_slice %323 {offsets = [0, 0], sizes = [8, 128], strides = [1, 1]} : vector<8x384xf32> to vector<8x128xf32>
    %326 = arith.addf %324, %325 : vector<8x128xf32>
    %327 = arith.negf %326 : vector<8x128xf32>
    %328 = math.exp %327 : vector<8x128xf32>
    %cst_136 = arith.constant 1.000000e+00 : f32
    %329 = vector.broadcast %cst_136 : f32 to vector<8x128xf32>
    %330 = arith.addf %329, %328 : vector<8x128xf32>
    %331 = arith.divf %329, %330 : vector<8x128xf32>
    %332 = vector.extract_strided_slice %320 {offsets = [0, 128], sizes = [8, 128], strides = [1, 1]} : vector<8x384xf32> to vector<8x128xf32>
    %333 = vector.extract_strided_slice %323 {offsets = [0, 128], sizes = [8, 128], strides = [1, 1]} : vector<8x384xf32> to vector<8x128xf32>
    %334 = arith.addf %332, %333 : vector<8x128xf32>
    %335 = arith.negf %334 : vector<8x128xf32>
    %336 = math.exp %335 : vector<8x128xf32>
    %cst_137 = arith.constant 1.000000e+00 : f32
    %337 = vector.broadcast %cst_137 : f32 to vector<8x128xf32>
    %338 = arith.addf %337, %336 : vector<8x128xf32>
    %339 = arith.divf %337, %338 : vector<8x128xf32>
    %340 = vector.extract_strided_slice %320 {offsets = [0, 256], sizes = [8, 128], strides = [1, 1]} : vector<8x384xf32> to vector<8x128xf32>
    %341 = vector.extract_strided_slice %323 {offsets = [0, 256], sizes = [8, 128], strides = [1, 1]} : vector<8x384xf32> to vector<8x128xf32>
    %c2_138 = arith.constant 2 : index
    %c0_139 = arith.constant 0 : index
    %c0_140 = arith.constant 0 : index
    %342 = vector.load %arg6[%c2_138, %c0_139, %c0_140] : memref<3x1x128xf32, #tpu.memory_space<vmem>>, vector<1x1x128xf32>
    %343 = vector.shape_cast %342 : vector<1x1x128xf32> to vector<1x128xf32>
    %344 = vector.broadcast %343 : vector<1x128xf32> to vector<8x128xf32>
    %345 = arith.addf %341, %344 : vector<8x128xf32>
    %346 = arith.mulf %331, %345 : vector<8x128xf32>
    %347 = arith.addf %340, %346 : vector<8x128xf32>
    %348 = math.tanh %347 : vector<8x128xf32>
    %cst_141 = arith.constant 1.000000e+00 : f32
    %349 = vector.broadcast %cst_141 : f32 to vector<8x128xf32>
    %350 = arith.subf %349, %339 : vector<8x128xf32>
    %351 = arith.mulf %350, %348 : vector<8x128xf32>
    %352 = arith.mulf %339, %238 : vector<8x128xf32>
    %353 = arith.addf %351, %352 : vector<8x128xf32>
    %c16 = arith.constant 16 : index
    %c0_142 = arith.constant 0 : index
    %354 = vector.load %arg18[%c16, %c0_142] : memref<64x128xf32, #tpu.memory_space<vmem>>, vector<8x128xf32>
    tpu.vector_store %arg18[%c16, %c0_142], %353 {strides = array<i32>} : memref<64x128xf32, #tpu.memory_space<vmem>>, vector<8x128xf32>,
    %355 = vector.extract_strided_slice %6 {offsets = [24, 0], sizes = [8, 384], strides = [1, 1]} : vector<64x384xf32> to vector<8x384xf32>
    %c0_143 = arith.constant 0 : index
    %c0_144 = arith.constant 0 : index
    %c0_145 = arith.constant 0 : index
    %356 = vector.load %arg4[%c0_143, %c0_144, %c0_145] : memref<3x128x384xf32, #tpu.memory_space<vmem>>, vector<1x128x384xf32>
    %357 = vector.shape_cast %356 : vector<1x128x384xf32> to vector<128x384xf32>
    %cst_146 = arith.constant dense<0.000000e+00> : vector<8x384xf32>
    %358 = tpu.matmul %273, %357, %cst_146 {dimension_numbers = #tpu.dot_dimension_numbers<[1], [0], [0], [1], [0, 0, 1, 1], [], []>} : vector<8x128xf32>, vector<128x384xf32>, vector<8x384xf32> -> vector<8x384xf32>
    %359 = vector.extract_strided_slice %355 {offsets = [0, 0], sizes = [8, 128], strides = [1, 1]} : vector<8x384xf32> to vector<8x128xf32>
    %360 = vector.extract_strided_slice %358 {offsets = [0, 0], sizes = [8, 128], strides = [1, 1]} : vector<8x384xf32> to vector<8x128xf32>
    %361 = arith.addf %359, %360 : vector<8x128xf32>
    %362 = arith.negf %361 : vector<8x128xf32>
    %363 = math.exp %362 : vector<8x128xf32>
    %cst_147 = arith.constant 1.000000e+00 : f32
    %364 = vector.broadcast %cst_147 : f32 to vector<8x128xf32>
    %365 = arith.addf %364, %363 : vector<8x128xf32>
    %366 = arith.divf %364, %365 : vector<8x128xf32>
    %367 = vector.extract_strided_slice %355 {offsets = [0, 128], sizes = [8, 128], strides = [1, 1]} : vector<8x384xf32> to vector<8x128xf32>
    %368 = vector.extract_strided_slice %358 {offsets = [0, 128], sizes = [8, 128], strides = [1, 1]} : vector<8x384xf32> to vector<8x128xf32>
    %369 = arith.addf %367, %368 : vector<8x128xf32>
    %370 = arith.negf %369 : vector<8x128xf32>
    %371 = math.exp %370 : vector<8x128xf32>
    %cst_148 = arith.constant 1.000000e+00 : f32
    %372 = vector.broadcast %cst_148 : f32 to vector<8x128xf32>
    %373 = arith.addf %372, %371 : vector<8x128xf32>
    %374 = arith.divf %372, %373 : vector<8x128xf32>
    %375 = vector.extract_strided_slice %355 {offsets = [0, 256], sizes = [8, 128], strides = [1, 1]} : vector<8x384xf32> to vector<8x128xf32>
    %376 = vector.extract_strided_slice %358 {offsets = [0, 256], sizes = [8, 128], strides = [1, 1]} : vector<8x384xf32> to vector<8x128xf32>
    %c0_149 = arith.constant 0 : index
    %c0_150 = arith.constant 0 : index
    %c0_151 = arith.constant 0 : index
    %377 = vector.load %arg6[%c0_149, %c0_150, %c0_151] : memref<3x1x128xf32, #tpu.memory_space<vmem>>, vector<1x1x128xf32>
    %378 = vector.shape_cast %377 : vector<1x1x128xf32> to vector<1x128xf32>
    %379 = vector.broadcast %378 : vector<1x128xf32> to vector<8x128xf32>
    %380 = arith.addf %376, %379 : vector<8x128xf32>
    %381 = arith.mulf %366, %380 : vector<8x128xf32>
    %382 = arith.addf %375, %381 : vector<8x128xf32>
    %383 = math.tanh %382 : vector<8x128xf32>
    %cst_152 = arith.constant 1.000000e+00 : f32
    %384 = vector.broadcast %cst_152 : f32 to vector<8x128xf32>
    %385 = arith.subf %384, %374 : vector<8x128xf32>
    %386 = arith.mulf %385, %383 : vector<8x128xf32>
    %387 = arith.mulf %374, %273 : vector<8x128xf32>
    %388 = arith.addf %386, %387 : vector<8x128xf32>
    %c0_153 = arith.constant 0 : index
    %c0_154 = arith.constant 0 : index
    %c0_155 = arith.constant 0 : index
    %389 = vector.load %arg3[%c0_153, %c0_154, %c0_155] : memref<2x128x384xf32, #tpu.memory_space<vmem>>, vector<1x128x384xf32>
    %390 = vector.shape_cast %389 : vector<1x128x384xf32> to vector<128x384xf32>
    %cst_156 = arith.constant dense<0.000000e+00> : vector<8x384xf32>
    %391 = tpu.matmul %388, %390, %cst_156 {dimension_numbers = #tpu.dot_dimension_numbers<[1], [0], [0], [1], [0, 0, 1, 1], [], []>} : vector<8x128xf32>, vector<128x384xf32>, vector<8x384xf32> -> vector<8x384xf32>
    %c1_157 = arith.constant 1 : index
    %c0_158 = arith.constant 0 : index
    %c0_159 = arith.constant 0 : index
    %392 = vector.load %arg5[%c1_157, %c0_158, %c0_159] : memref<3x1x384xf32, #tpu.memory_space<vmem>>, vector<1x1x384xf32>
    %393 = vector.shape_cast %392 : vector<1x1x384xf32> to vector<1x384xf32>
    %394 = vector.broadcast %393 : vector<1x384xf32> to vector<8x384xf32>
    %395 = arith.addf %391, %394 : vector<8x384xf32>
    %c1_160 = arith.constant 1 : index
    %c0_161 = arith.constant 0 : index
    %c0_162 = arith.constant 0 : index
    %396 = vector.load %arg4[%c1_160, %c0_161, %c0_162] : memref<3x128x384xf32, #tpu.memory_space<vmem>>, vector<1x128x384xf32>
    %397 = vector.shape_cast %396 : vector<1x128x384xf32> to vector<128x384xf32>
    %cst_163 = arith.constant dense<0.000000e+00> : vector<8x384xf32>
    %398 = tpu.matmul %313, %397, %cst_163 {dimension_numbers = #tpu.dot_dimension_numbers<[1], [0], [0], [1], [0, 0, 1, 1], [], []>} : vector<8x128xf32>, vector<128x384xf32>, vector<8x384xf32> -> vector<8x384xf32>
    %399 = vector.extract_strided_slice %395 {offsets = [0, 0], sizes = [8, 128], strides = [1, 1]} : vector<8x384xf32> to vector<8x128xf32>
    %400 = vector.extract_strided_slice %398 {offsets = [0, 0], sizes = [8, 128], strides = [1, 1]} : vector<8x384xf32> to vector<8x128xf32>
    %401 = arith.addf %399, %400 : vector<8x128xf32>
    %402 = arith.negf %401 : vector<8x128xf32>
    %403 = math.exp %402 : vector<8x128xf32>
    %cst_164 = arith.constant 1.000000e+00 : f32
    %404 = vector.broadcast %cst_164 : f32 to vector<8x128xf32>
    %405 = arith.addf %404, %403 : vector<8x128xf32>
    %406 = arith.divf %404, %405 : vector<8x128xf32>
    %407 = vector.extract_strided_slice %395 {offsets = [0, 128], sizes = [8, 128], strides = [1, 1]} : vector<8x384xf32> to vector<8x128xf32>
    %408 = vector.extract_strided_slice %398 {offsets = [0, 128], sizes = [8, 128], strides = [1, 1]} : vector<8x384xf32> to vector<8x128xf32>
    %409 = arith.addf %407, %408 : vector<8x128xf32>
    %410 = arith.negf %409 : vector<8x128xf32>
    %411 = math.exp %410 : vector<8x128xf32>
    %cst_165 = arith.constant 1.000000e+00 : f32
    %412 = vector.broadcast %cst_165 : f32 to vector<8x128xf32>
    %413 = arith.addf %412, %411 : vector<8x128xf32>
    %414 = arith.divf %412, %413 : vector<8x128xf32>
    %415 = vector.extract_strided_slice %395 {offsets = [0, 256], sizes = [8, 128], strides = [1, 1]} : vector<8x384xf32> to vector<8x128xf32>
    %416 = vector.extract_strided_slice %398 {offsets = [0, 256], sizes = [8, 128], strides = [1, 1]} : vector<8x384xf32> to vector<8x128xf32>
    %c1_166 = arith.constant 1 : index
    %c0_167 = arith.constant 0 : index
    %c0_168 = arith.constant 0 : index
    %417 = vector.load %arg6[%c1_166, %c0_167, %c0_168] : memref<3x1x128xf32, #tpu.memory_space<vmem>>, vector<1x1x128xf32>
    %418 = vector.shape_cast %417 : vector<1x1x128xf32> to vector<1x128xf32>
    %419 = vector.broadcast %418 : vector<1x128xf32> to vector<8x128xf32>
    %420 = arith.addf %416, %419 : vector<8x128xf32>
    %421 = arith.mulf %406, %420 : vector<8x128xf32>
    %422 = arith.addf %415, %421 : vector<8x128xf32>
    %423 = math.tanh %422 : vector<8x128xf32>
    %cst_169 = arith.constant 1.000000e+00 : f32
    %424 = vector.broadcast %cst_169 : f32 to vector<8x128xf32>
    %425 = arith.subf %424, %414 : vector<8x128xf32>
    %426 = arith.mulf %425, %423 : vector<8x128xf32>
    %427 = arith.mulf %414, %313 : vector<8x128xf32>
    %428 = arith.addf %426, %427 : vector<8x128xf32>
    %c1_170 = arith.constant 1 : index
    %c0_171 = arith.constant 0 : index
    %c0_172 = arith.constant 0 : index
    %429 = vector.load %arg3[%c1_170, %c0_171, %c0_172] : memref<2x128x384xf32, #tpu.memory_space<vmem>>, vector<1x128x384xf32>
    %430 = vector.shape_cast %429 : vector<1x128x384xf32> to vector<128x384xf32>
    %cst_173 = arith.constant dense<0.000000e+00> : vector<8x384xf32>
    %431 = tpu.matmul %428, %430, %cst_173 {dimension_numbers = #tpu.dot_dimension_numbers<[1], [0], [0], [1], [0, 0, 1, 1], [], []>} : vector<8x128xf32>, vector<128x384xf32>, vector<8x384xf32> -> vector<8x384xf32>
    %c2_174 = arith.constant 2 : index
    %c0_175 = arith.constant 0 : index
    %c0_176 = arith.constant 0 : index
    %432 = vector.load %arg5[%c2_174, %c0_175, %c0_176] : memref<3x1x384xf32, #tpu.memory_space<vmem>>, vector<1x1x384xf32>
    %433 = vector.shape_cast %432 : vector<1x1x384xf32> to vector<1x384xf32>
    %434 = vector.broadcast %433 : vector<1x384xf32> to vector<8x384xf32>
    %435 = arith.addf %431, %434 : vector<8x384xf32>
    %c2_177 = arith.constant 2 : index
    %c0_178 = arith.constant 0 : index
    %c0_179 = arith.constant 0 : index
    %436 = vector.load %arg4[%c2_177, %c0_178, %c0_179] : memref<3x128x384xf32, #tpu.memory_space<vmem>>, vector<1x128x384xf32>
    %437 = vector.shape_cast %436 : vector<1x128x384xf32> to vector<128x384xf32>
    %cst_180 = arith.constant dense<0.000000e+00> : vector<8x384xf32>
    %438 = tpu.matmul %353, %437, %cst_180 {dimension_numbers = #tpu.dot_dimension_numbers<[1], [0], [0], [1], [0, 0, 1, 1], [], []>} : vector<8x128xf32>, vector<128x384xf32>, vector<8x384xf32> -> vector<8x384xf32>
    %439 = vector.extract_strided_slice %435 {offsets = [0, 0], sizes = [8, 128], strides = [1, 1]} : vector<8x384xf32> to vector<8x128xf32>
    %440 = vector.extract_strided_slice %438 {offsets = [0, 0], sizes = [8, 128], strides = [1, 1]} : vector<8x384xf32> to vector<8x128xf32>
    %441 = arith.addf %439, %440 : vector<8x128xf32>
    %442 = arith.negf %441 : vector<8x128xf32>
    %443 = math.exp %442 : vector<8x128xf32>
    %cst_181 = arith.constant 1.000000e+00 : f32
    %444 = vector.broadcast %cst_181 : f32 to vector<8x128xf32>
    %445 = arith.addf %444, %443 : vector<8x128xf32>
    %446 = arith.divf %444, %445 : vector<8x128xf32>
    %447 = vector.extract_strided_slice %435 {offsets = [0, 128], sizes = [8, 128], strides = [1, 1]} : vector<8x384xf32> to vector<8x128xf32>
    %448 = vector.extract_strided_slice %438 {offsets = [0, 128], sizes = [8, 128], strides = [1, 1]} : vector<8x384xf32> to vector<8x128xf32>
    %449 = arith.addf %447, %448 : vector<8x128xf32>
    %450 = arith.negf %449 : vector<8x128xf32>
    %451 = math.exp %450 : vector<8x128xf32>
    %cst_182 = arith.constant 1.000000e+00 : f32
    %452 = vector.broadcast %cst_182 : f32 to vector<8x128xf32>
    %453 = arith.addf %452, %451 : vector<8x128xf32>
    %454 = arith.divf %452, %453 : vector<8x128xf32>
    %455 = vector.extract_strided_slice %435 {offsets = [0, 256], sizes = [8, 128], strides = [1, 1]} : vector<8x384xf32> to vector<8x128xf32>
    %456 = vector.extract_strided_slice %438 {offsets = [0, 256], sizes = [8, 128], strides = [1, 1]} : vector<8x384xf32> to vector<8x128xf32>
    %c2_183 = arith.constant 2 : index
    %c0_184 = arith.constant 0 : index
    %c0_185 = arith.constant 0 : index
    %457 = vector.load %arg6[%c2_183, %c0_184, %c0_185] : memref<3x1x128xf32, #tpu.memory_space<vmem>>, vector<1x1x128xf32>
    %458 = vector.shape_cast %457 : vector<1x1x128xf32> to vector<1x128xf32>
    %459 = vector.broadcast %458 : vector<1x128xf32> to vector<8x128xf32>
    %460 = arith.addf %456, %459 : vector<8x128xf32>
    %461 = arith.mulf %446, %460 : vector<8x128xf32>
    %462 = arith.addf %455, %461 : vector<8x128xf32>
    %463 = math.tanh %462 : vector<8x128xf32>
    %cst_186 = arith.constant 1.000000e+00 : f32
    %464 = vector.broadcast %cst_186 : f32 to vector<8x128xf32>
    %465 = arith.subf %464, %454 : vector<8x128xf32>
    %466 = arith.mulf %465, %463 : vector<8x128xf32>
    %467 = arith.mulf %454, %353 : vector<8x128xf32>
    %468 = arith.addf %466, %467 : vector<8x128xf32>
    %c24 = arith.constant 24 : index
    %c0_187 = arith.constant 0 : index
    %469 = vector.load %arg18[%c24, %c0_187] : memref<64x128xf32, #tpu.memory_space<vmem>>, vector<8x128xf32>
    tpu.vector_store %arg18[%c24, %c0_187], %468 {strides = array<i32>} : memref<64x128xf32, #tpu.memory_space<vmem>>, vector<8x128xf32>,
    %470 = vector.extract_strided_slice %6 {offsets = [32, 0], sizes = [8, 384], strides = [1, 1]} : vector<64x384xf32> to vector<8x384xf32>
    %c0_188 = arith.constant 0 : index
    %c0_189 = arith.constant 0 : index
    %c0_190 = arith.constant 0 : index
    %471 = vector.load %arg4[%c0_188, %c0_189, %c0_190] : memref<3x128x384xf32, #tpu.memory_space<vmem>>, vector<1x128x384xf32>
    %472 = vector.shape_cast %471 : vector<1x128x384xf32> to vector<128x384xf32>
    %cst_191 = arith.constant dense<0.000000e+00> : vector<8x384xf32>
    %473 = tpu.matmul %388, %472, %cst_191 {dimension_numbers = #tpu.dot_dimension_numbers<[1], [0], [0], [1], [0, 0, 1, 1], [], []>} : vector<8x128xf32>, vector<128x384xf32>, vector<8x384xf32> -> vector<8x384xf32>
    %474 = vector.extract_strided_slice %470 {offsets = [0, 0], sizes = [8, 128], strides = [1, 1]} : vector<8x384xf32> to vector<8x128xf32>
    %475 = vector.extract_strided_slice %473 {offsets = [0, 0], sizes = [8, 128], strides = [1, 1]} : vector<8x384xf32> to vector<8x128xf32>
    %476 = arith.addf %474, %475 : vector<8x128xf32>
    %477 = arith.negf %476 : vector<8x128xf32>
    %478 = math.exp %477 : vector<8x128xf32>
    %cst_192 = arith.constant 1.000000e+00 : f32
    %479 = vector.broadcast %cst_192 : f32 to vector<8x128xf32>
    %480 = arith.addf %479, %478 : vector<8x128xf32>
    %481 = arith.divf %479, %480 : vector<8x128xf32>
    %482 = vector.extract_strided_slice %470 {offsets = [0, 128], sizes = [8, 128], strides = [1, 1]} : vector<8x384xf32> to vector<8x128xf32>
    %483 = vector.extract_strided_slice %473 {offsets = [0, 128], sizes = [8, 128], strides = [1, 1]} : vector<8x384xf32> to vector<8x128xf32>
    %484 = arith.addf %482, %483 : vector<8x128xf32>
    %485 = arith.negf %484 : vector<8x128xf32>
    %486 = math.exp %485 : vector<8x128xf32>
    %cst_193 = arith.constant 1.000000e+00 : f32
    %487 = vector.broadcast %cst_193 : f32 to vector<8x128xf32>
    %488 = arith.addf %487, %486 : vector<8x128xf32>
    %489 = arith.divf %487, %488 : vector<8x128xf32>
    %490 = vector.extract_strided_slice %470 {offsets = [0, 256], sizes = [8, 128], strides = [1, 1]} : vector<8x384xf32> to vector<8x128xf32>
    %491 = vector.extract_strided_slice %473 {offsets = [0, 256], sizes = [8, 128], strides = [1, 1]} : vector<8x384xf32> to vector<8x128xf32>
    %c0_194 = arith.constant 0 : index
    %c0_195 = arith.constant 0 : index
    %c0_196 = arith.constant 0 : index
    %492 = vector.load %arg6[%c0_194, %c0_195, %c0_196] : memref<3x1x128xf32, #tpu.memory_space<vmem>>, vector<1x1x128xf32>
    %493 = vector.shape_cast %492 : vector<1x1x128xf32> to vector<1x128xf32>
    %494 = vector.broadcast %493 : vector<1x128xf32> to vector<8x128xf32>
    %495 = arith.addf %491, %494 : vector<8x128xf32>
    %496 = arith.mulf %481, %495 : vector<8x128xf32>
    %497 = arith.addf %490, %496 : vector<8x128xf32>
    %498 = math.tanh %497 : vector<8x128xf32>
    %cst_197 = arith.constant 1.000000e+00 : f32
    %499 = vector.broadcast %cst_197 : f32 to vector<8x128xf32>
    %500 = arith.subf %499, %489 : vector<8x128xf32>
    %501 = arith.mulf %500, %498 : vector<8x128xf32>
    %502 = arith.mulf %489, %388 : vector<8x128xf32>
    %503 = arith.addf %501, %502 : vector<8x128xf32>
    %c0_198 = arith.constant 0 : index
    %c0_199 = arith.constant 0 : index
    %c0_200 = arith.constant 0 : index
    %504 = vector.load %arg3[%c0_198, %c0_199, %c0_200] : memref<2x128x384xf32, #tpu.memory_space<vmem>>, vector<1x128x384xf32>
    %505 = vector.shape_cast %504 : vector<1x128x384xf32> to vector<128x384xf32>
    %cst_201 = arith.constant dense<0.000000e+00> : vector<8x384xf32>
    %506 = tpu.matmul %503, %505, %cst_201 {dimension_numbers = #tpu.dot_dimension_numbers<[1], [0], [0], [1], [0, 0, 1, 1], [], []>} : vector<8x128xf32>, vector<128x384xf32>, vector<8x384xf32> -> vector<8x384xf32>
    %c1_202 = arith.constant 1 : index
    %c0_203 = arith.constant 0 : index
    %c0_204 = arith.constant 0 : index
    %507 = vector.load %arg5[%c1_202, %c0_203, %c0_204] : memref<3x1x384xf32, #tpu.memory_space<vmem>>, vector<1x1x384xf32>
    %508 = vector.shape_cast %507 : vector<1x1x384xf32> to vector<1x384xf32>
    %509 = vector.broadcast %508 : vector<1x384xf32> to vector<8x384xf32>
    %510 = arith.addf %506, %509 : vector<8x384xf32>
    %c1_205 = arith.constant 1 : index
    %c0_206 = arith.constant 0 : index
    %c0_207 = arith.constant 0 : index
    %511 = vector.load %arg4[%c1_205, %c0_206, %c0_207] : memref<3x128x384xf32, #tpu.memory_space<vmem>>, vector<1x128x384xf32>
    %512 = vector.shape_cast %511 : vector<1x128x384xf32> to vector<128x384xf32>
    %cst_208 = arith.constant dense<0.000000e+00> : vector<8x384xf32>
    %513 = tpu.matmul %428, %512, %cst_208 {dimension_numbers = #tpu.dot_dimension_numbers<[1], [0], [0], [1], [0, 0, 1, 1], [], []>} : vector<8x128xf32>, vector<128x384xf32>, vector<8x384xf32> -> vector<8x384xf32>
    %514 = vector.extract_strided_slice %510 {offsets = [0, 0], sizes = [8, 128], strides = [1, 1]} : vector<8x384xf32> to vector<8x128xf32>
    %515 = vector.extract_strided_slice %513 {offsets = [0, 0], sizes = [8, 128], strides = [1, 1]} : vector<8x384xf32> to vector<8x128xf32>
    %516 = arith.addf %514, %515 : vector<8x128xf32>
    %517 = arith.negf %516 : vector<8x128xf32>
    %518 = math.exp %517 : vector<8x128xf32>
    %cst_209 = arith.constant 1.000000e+00 : f32
    %519 = vector.broadcast %cst_209 : f32 to vector<8x128xf32>
    %520 = arith.addf %519, %518 : vector<8x128xf32>
    %521 = arith.divf %519, %520 : vector<8x128xf32>
    %522 = vector.extract_strided_slice %510 {offsets = [0, 128], sizes = [8, 128], strides = [1, 1]} : vector<8x384xf32> to vector<8x128xf32>
    %523 = vector.extract_strided_slice %513 {offsets = [0, 128], sizes = [8, 128], strides = [1, 1]} : vector<8x384xf32> to vector<8x128xf32>
    %524 = arith.addf %522, %523 : vector<8x128xf32>
    %525 = arith.negf %524 : vector<8x128xf32>
    %526 = math.exp %525 : vector<8x128xf32>
    %cst_210 = arith.constant 1.000000e+00 : f32
    %527 = vector.broadcast %cst_210 : f32 to vector<8x128xf32>
    %528 = arith.addf %527, %526 : vector<8x128xf32>
    %529 = arith.divf %527, %528 : vector<8x128xf32>
    %530 = vector.extract_strided_slice %510 {offsets = [0, 256], sizes = [8, 128], strides = [1, 1]} : vector<8x384xf32> to vector<8x128xf32>
    %531 = vector.extract_strided_slice %513 {offsets = [0, 256], sizes = [8, 128], strides = [1, 1]} : vector<8x384xf32> to vector<8x128xf32>
    %c1_211 = arith.constant 1 : index
    %c0_212 = arith.constant 0 : index
    %c0_213 = arith.constant 0 : index
    %532 = vector.load %arg6[%c1_211, %c0_212, %c0_213] : memref<3x1x128xf32, #tpu.memory_space<vmem>>, vector<1x1x128xf32>
    %533 = vector.shape_cast %532 : vector<1x1x128xf32> to vector<1x128xf32>
    %534 = vector.broadcast %533 : vector<1x128xf32> to vector<8x128xf32>
    %535 = arith.addf %531, %534 : vector<8x128xf32>
    %536 = arith.mulf %521, %535 : vector<8x128xf32>
    %537 = arith.addf %530, %536 : vector<8x128xf32>
    %538 = math.tanh %537 : vector<8x128xf32>
    %cst_214 = arith.constant 1.000000e+00 : f32
    %539 = vector.broadcast %cst_214 : f32 to vector<8x128xf32>
    %540 = arith.subf %539, %529 : vector<8x128xf32>
    %541 = arith.mulf %540, %538 : vector<8x128xf32>
    %542 = arith.mulf %529, %428 : vector<8x128xf32>
    %543 = arith.addf %541, %542 : vector<8x128xf32>
    %c1_215 = arith.constant 1 : index
    %c0_216 = arith.constant 0 : index
    %c0_217 = arith.constant 0 : index
    %544 = vector.load %arg3[%c1_215, %c0_216, %c0_217] : memref<2x128x384xf32, #tpu.memory_space<vmem>>, vector<1x128x384xf32>
    %545 = vector.shape_cast %544 : vector<1x128x384xf32> to vector<128x384xf32>
    %cst_218 = arith.constant dense<0.000000e+00> : vector<8x384xf32>
    %546 = tpu.matmul %543, %545, %cst_218 {dimension_numbers = #tpu.dot_dimension_numbers<[1], [0], [0], [1], [0, 0, 1, 1], [], []>} : vector<8x128xf32>, vector<128x384xf32>, vector<8x384xf32> -> vector<8x384xf32>
    %c2_219 = arith.constant 2 : index
    %c0_220 = arith.constant 0 : index
    %c0_221 = arith.constant 0 : index
    %547 = vector.load %arg5[%c2_219, %c0_220, %c0_221] : memref<3x1x384xf32, #tpu.memory_space<vmem>>, vector<1x1x384xf32>
    %548 = vector.shape_cast %547 : vector<1x1x384xf32> to vector<1x384xf32>
    %549 = vector.broadcast %548 : vector<1x384xf32> to vector<8x384xf32>
    %550 = arith.addf %546, %549 : vector<8x384xf32>
    %c2_222 = arith.constant 2 : index
    %c0_223 = arith.constant 0 : index
    %c0_224 = arith.constant 0 : index
    %551 = vector.load %arg4[%c2_222, %c0_223, %c0_224] : memref<3x128x384xf32, #tpu.memory_space<vmem>>, vector<1x128x384xf32>
    %552 = vector.shape_cast %551 : vector<1x128x384xf32> to vector<128x384xf32>
    %cst_225 = arith.constant dense<0.000000e+00> : vector<8x384xf32>
    %553 = tpu.matmul %468, %552, %cst_225 {dimension_numbers = #tpu.dot_dimension_numbers<[1], [0], [0], [1], [0, 0, 1, 1], [], []>} : vector<8x128xf32>, vector<128x384xf32>, vector<8x384xf32> -> vector<8x384xf32>
    %554 = vector.extract_strided_slice %550 {offsets = [0, 0], sizes = [8, 128], strides = [1, 1]} : vector<8x384xf32> to vector<8x128xf32>
    %555 = vector.extract_strided_slice %553 {offsets = [0, 0], sizes = [8, 128], strides = [1, 1]} : vector<8x384xf32> to vector<8x128xf32>
    %556 = arith.addf %554, %555 : vector<8x128xf32>
    %557 = arith.negf %556 : vector<8x128xf32>
    %558 = math.exp %557 : vector<8x128xf32>
    %cst_226 = arith.constant 1.000000e+00 : f32
    %559 = vector.broadcast %cst_226 : f32 to vector<8x128xf32>
    %560 = arith.addf %559, %558 : vector<8x128xf32>
    %561 = arith.divf %559, %560 : vector<8x128xf32>
    %562 = vector.extract_strided_slice %550 {offsets = [0, 128], sizes = [8, 128], strides = [1, 1]} : vector<8x384xf32> to vector<8x128xf32>
    %563 = vector.extract_strided_slice %553 {offsets = [0, 128], sizes = [8, 128], strides = [1, 1]} : vector<8x384xf32> to vector<8x128xf32>
    %564 = arith.addf %562, %563 : vector<8x128xf32>
    %565 = arith.negf %564 : vector<8x128xf32>
    %566 = math.exp %565 : vector<8x128xf32>
    %cst_227 = arith.constant 1.000000e+00 : f32
    %567 = vector.broadcast %cst_227 : f32 to vector<8x128xf32>
    %568 = arith.addf %567, %566 : vector<8x128xf32>
    %569 = arith.divf %567, %568 : vector<8x128xf32>
    %570 = vector.extract_strided_slice %550 {offsets = [0, 256], sizes = [8, 128], strides = [1, 1]} : vector<8x384xf32> to vector<8x128xf32>
    %571 = vector.extract_strided_slice %553 {offsets = [0, 256], sizes = [8, 128], strides = [1, 1]} : vector<8x384xf32> to vector<8x128xf32>
    %c2_228 = arith.constant 2 : index
    %c0_229 = arith.constant 0 : index
    %c0_230 = arith.constant 0 : index
    %572 = vector.load %arg6[%c2_228, %c0_229, %c0_230] : memref<3x1x128xf32, #tpu.memory_space<vmem>>, vector<1x1x128xf32>
    %573 = vector.shape_cast %572 : vector<1x1x128xf32> to vector<1x128xf32>
    %574 = vector.broadcast %573 : vector<1x128xf32> to vector<8x128xf32>
    %575 = arith.addf %571, %574 : vector<8x128xf32>
    %576 = arith.mulf %561, %575 : vector<8x128xf32>
    %577 = arith.addf %570, %576 : vector<8x128xf32>
    %578 = math.tanh %577 : vector<8x128xf32>
    %cst_231 = arith.constant 1.000000e+00 : f32
    %579 = vector.broadcast %cst_231 : f32 to vector<8x128xf32>
    %580 = arith.subf %579, %569 : vector<8x128xf32>
    %581 = arith.mulf %580, %578 : vector<8x128xf32>
    %582 = arith.mulf %569, %468 : vector<8x128xf32>
    %583 = arith.addf %581, %582 : vector<8x128xf32>
    %c32 = arith.constant 32 : index
    %c0_232 = arith.constant 0 : index
    %584 = vector.load %arg18[%c32, %c0_232] : memref<64x128xf32, #tpu.memory_space<vmem>>, vector<8x128xf32>
    tpu.vector_store %arg18[%c32, %c0_232], %583 {strides = array<i32>} : memref<64x128xf32, #tpu.memory_space<vmem>>, vector<8x128xf32>,
    %585 = vector.extract_strided_slice %6 {offsets = [40, 0], sizes = [8, 384], strides = [1, 1]} : vector<64x384xf32> to vector<8x384xf32>
    %c0_233 = arith.constant 0 : index
    %c0_234 = arith.constant 0 : index
    %c0_235 = arith.constant 0 : index
    %586 = vector.load %arg4[%c0_233, %c0_234, %c0_235] : memref<3x128x384xf32, #tpu.memory_space<vmem>>, vector<1x128x384xf32>
    %587 = vector.shape_cast %586 : vector<1x128x384xf32> to vector<128x384xf32>
    %cst_236 = arith.constant dense<0.000000e+00> : vector<8x384xf32>
    %588 = tpu.matmul %503, %587, %cst_236 {dimension_numbers = #tpu.dot_dimension_numbers<[1], [0], [0], [1], [0, 0, 1, 1], [], []>} : vector<8x128xf32>, vector<128x384xf32>, vector<8x384xf32> -> vector<8x384xf32>
    %589 = vector.extract_strided_slice %585 {offsets = [0, 0], sizes = [8, 128], strides = [1, 1]} : vector<8x384xf32> to vector<8x128xf32>
    %590 = vector.extract_strided_slice %588 {offsets = [0, 0], sizes = [8, 128], strides = [1, 1]} : vector<8x384xf32> to vector<8x128xf32>
    %591 = arith.addf %589, %590 : vector<8x128xf32>
    %592 = arith.negf %591 : vector<8x128xf32>
    %593 = math.exp %592 : vector<8x128xf32>
    %cst_237 = arith.constant 1.000000e+00 : f32
    %594 = vector.broadcast %cst_237 : f32 to vector<8x128xf32>
    %595 = arith.addf %594, %593 : vector<8x128xf32>
    %596 = arith.divf %594, %595 : vector<8x128xf32>
    %597 = vector.extract_strided_slice %585 {offsets = [0, 128], sizes = [8, 128], strides = [1, 1]} : vector<8x384xf32> to vector<8x128xf32>
    %598 = vector.extract_strided_slice %588 {offsets = [0, 128], sizes = [8, 128], strides = [1, 1]} : vector<8x384xf32> to vector<8x128xf32>
    %599 = arith.addf %597, %598 : vector<8x128xf32>
    %600 = arith.negf %599 : vector<8x128xf32>
    %601 = math.exp %600 : vector<8x128xf32>
    %cst_238 = arith.constant 1.000000e+00 : f32
    %602 = vector.broadcast %cst_238 : f32 to vector<8x128xf32>
    %603 = arith.addf %602, %601 : vector<8x128xf32>
    %604 = arith.divf %602, %603 : vector<8x128xf32>
    %605 = vector.extract_strided_slice %585 {offsets = [0, 256], sizes = [8, 128], strides = [1, 1]} : vector<8x384xf32> to vector<8x128xf32>
    %606 = vector.extract_strided_slice %588 {offsets = [0, 256], sizes = [8, 128], strides = [1, 1]} : vector<8x384xf32> to vector<8x128xf32>
    %c0_239 = arith.constant 0 : index
    %c0_240 = arith.constant 0 : index
    %c0_241 = arith.constant 0 : index
    %607 = vector.load %arg6[%c0_239, %c0_240, %c0_241] : memref<3x1x128xf32, #tpu.memory_space<vmem>>, vector<1x1x128xf32>
    %608 = vector.shape_cast %607 : vector<1x1x128xf32> to vector<1x128xf32>
    %609 = vector.broadcast %608 : vector<1x128xf32> to vector<8x128xf32>
    %610 = arith.addf %606, %609 : vector<8x128xf32>
    %611 = arith.mulf %596, %610 : vector<8x128xf32>
    %612 = arith.addf %605, %611 : vector<8x128xf32>
    %613 = math.tanh %612 : vector<8x128xf32>
    %cst_242 = arith.constant 1.000000e+00 : f32
    %614 = vector.broadcast %cst_242 : f32 to vector<8x128xf32>
    %615 = arith.subf %614, %604 : vector<8x128xf32>
    %616 = arith.mulf %615, %613 : vector<8x128xf32>
    %617 = arith.mulf %604, %503 : vector<8x128xf32>
    %618 = arith.addf %616, %617 : vector<8x128xf32>
    %c0_243 = arith.constant 0 : index
    %c0_244 = arith.constant 0 : index
    %c0_245 = arith.constant 0 : index
    %619 = vector.load %arg3[%c0_243, %c0_244, %c0_245] : memref<2x128x384xf32, #tpu.memory_space<vmem>>, vector<1x128x384xf32>
    %620 = vector.shape_cast %619 : vector<1x128x384xf32> to vector<128x384xf32>
    %cst_246 = arith.constant dense<0.000000e+00> : vector<8x384xf32>
    %621 = tpu.matmul %618, %620, %cst_246 {dimension_numbers = #tpu.dot_dimension_numbers<[1], [0], [0], [1], [0, 0, 1, 1], [], []>} : vector<8x128xf32>, vector<128x384xf32>, vector<8x384xf32> -> vector<8x384xf32>
    %c1_247 = arith.constant 1 : index
    %c0_248 = arith.constant 0 : index
    %c0_249 = arith.constant 0 : index
    %622 = vector.load %arg5[%c1_247, %c0_248, %c0_249] : memref<3x1x384xf32, #tpu.memory_space<vmem>>, vector<1x1x384xf32>
    %623 = vector.shape_cast %622 : vector<1x1x384xf32> to vector<1x384xf32>
    %624 = vector.broadcast %623 : vector<1x384xf32> to vector<8x384xf32>
    %625 = arith.addf %621, %624 : vector<8x384xf32>
    %c1_250 = arith.constant 1 : index
    %c0_251 = arith.constant 0 : index
    %c0_252 = arith.constant 0 : index
    %626 = vector.load %arg4[%c1_250, %c0_251, %c0_252] : memref<3x128x384xf32, #tpu.memory_space<vmem>>, vector<1x128x384xf32>
    %627 = vector.shape_cast %626 : vector<1x128x384xf32> to vector<128x384xf32>
    %cst_253 = arith.constant dense<0.000000e+00> : vector<8x384xf32>
    %628 = tpu.matmul %543, %627, %cst_253 {dimension_numbers = #tpu.dot_dimension_numbers<[1], [0], [0], [1], [0, 0, 1, 1], [], []>} : vector<8x128xf32>, vector<128x384xf32>, vector<8x384xf32> -> vector<8x384xf32>
    %629 = vector.extract_strided_slice %625 {offsets = [0, 0], sizes = [8, 128], strides = [1, 1]} : vector<8x384xf32> to vector<8x128xf32>
    %630 = vector.extract_strided_slice %628 {offsets = [0, 0], sizes = [8, 128], strides = [1, 1]} : vector<8x384xf32> to vector<8x128xf32>
    %631 = arith.addf %629, %630 : vector<8x128xf32>
    %632 = arith.negf %631 : vector<8x128xf32>
    %633 = math.exp %632 : vector<8x128xf32>
    %cst_254 = arith.constant 1.000000e+00 : f32
    %634 = vector.broadcast %cst_254 : f32 to vector<8x128xf32>
    %635 = arith.addf %634, %633 : vector<8x128xf32>
    %636 = arith.divf %634, %635 : vector<8x128xf32>
    %637 = vector.extract_strided_slice %625 {offsets = [0, 128], sizes = [8, 128], strides = [1, 1]} : vector<8x384xf32> to vector<8x128xf32>
    %638 = vector.extract_strided_slice %628 {offsets = [0, 128], sizes = [8, 128], strides = [1, 1]} : vector<8x384xf32> to vector<8x128xf32>
    %639 = arith.addf %637, %638 : vector<8x128xf32>
    %640 = arith.negf %639 : vector<8x128xf32>
    %641 = math.exp %640 : vector<8x128xf32>
    %cst_255 = arith.constant 1.000000e+00 : f32
    %642 = vector.broadcast %cst_255 : f32 to vector<8x128xf32>
    %643 = arith.addf %642, %641 : vector<8x128xf32>
    %644 = arith.divf %642, %643 : vector<8x128xf32>
    %645 = vector.extract_strided_slice %625 {offsets = [0, 256], sizes = [8, 128], strides = [1, 1]} : vector<8x384xf32> to vector<8x128xf32>
    %646 = vector.extract_strided_slice %628 {offsets = [0, 256], sizes = [8, 128], strides = [1, 1]} : vector<8x384xf32> to vector<8x128xf32>
    %c1_256 = arith.constant 1 : index
    %c0_257 = arith.constant 0 : index
    %c0_258 = arith.constant 0 : index
    %647 = vector.load %arg6[%c1_256, %c0_257, %c0_258] : memref<3x1x128xf32, #tpu.memory_space<vmem>>, vector<1x1x128xf32>
    %648 = vector.shape_cast %647 : vector<1x1x128xf32> to vector<1x128xf32>
    %649 = vector.broadcast %648 : vector<1x128xf32> to vector<8x128xf32>
    %650 = arith.addf %646, %649 : vector<8x128xf32>
    %651 = arith.mulf %636, %650 : vector<8x128xf32>
    %652 = arith.addf %645, %651 : vector<8x128xf32>
    %653 = math.tanh %652 : vector<8x128xf32>
    %cst_259 = arith.constant 1.000000e+00 : f32
    %654 = vector.broadcast %cst_259 : f32 to vector<8x128xf32>
    %655 = arith.subf %654, %644 : vector<8x128xf32>
    %656 = arith.mulf %655, %653 : vector<8x128xf32>
    %657 = arith.mulf %644, %543 : vector<8x128xf32>
    %658 = arith.addf %656, %657 : vector<8x128xf32>
    %c1_260 = arith.constant 1 : index
    %c0_261 = arith.constant 0 : index
    %c0_262 = arith.constant 0 : index
    %659 = vector.load %arg3[%c1_260, %c0_261, %c0_262] : memref<2x128x384xf32, #tpu.memory_space<vmem>>, vector<1x128x384xf32>
    %660 = vector.shape_cast %659 : vector<1x128x384xf32> to vector<128x384xf32>
    %cst_263 = arith.constant dense<0.000000e+00> : vector<8x384xf32>
    %661 = tpu.matmul %658, %660, %cst_263 {dimension_numbers = #tpu.dot_dimension_numbers<[1], [0], [0], [1], [0, 0, 1, 1], [], []>} : vector<8x128xf32>, vector<128x384xf32>, vector<8x384xf32> -> vector<8x384xf32>
    %c2_264 = arith.constant 2 : index
    %c0_265 = arith.constant 0 : index
    %c0_266 = arith.constant 0 : index
    %662 = vector.load %arg5[%c2_264, %c0_265, %c0_266] : memref<3x1x384xf32, #tpu.memory_space<vmem>>, vector<1x1x384xf32>
    %663 = vector.shape_cast %662 : vector<1x1x384xf32> to vector<1x384xf32>
    %664 = vector.broadcast %663 : vector<1x384xf32> to vector<8x384xf32>
    %665 = arith.addf %661, %664 : vector<8x384xf32>
    %c2_267 = arith.constant 2 : index
    %c0_268 = arith.constant 0 : index
    %c0_269 = arith.constant 0 : index
    %666 = vector.load %arg4[%c2_267, %c0_268, %c0_269] : memref<3x128x384xf32, #tpu.memory_space<vmem>>, vector<1x128x384xf32>
    %667 = vector.shape_cast %666 : vector<1x128x384xf32> to vector<128x384xf32>
    %cst_270 = arith.constant dense<0.000000e+00> : vector<8x384xf32>
    %668 = tpu.matmul %583, %667, %cst_270 {dimension_numbers = #tpu.dot_dimension_numbers<[1], [0], [0], [1], [0, 0, 1, 1], [], []>} : vector<8x128xf32>, vector<128x384xf32>, vector<8x384xf32> -> vector<8x384xf32>
    %669 = vector.extract_strided_slice %665 {offsets = [0, 0], sizes = [8, 128], strides = [1, 1]} : vector<8x384xf32> to vector<8x128xf32>
    %670 = vector.extract_strided_slice %668 {offsets = [0, 0], sizes = [8, 128], strides = [1, 1]} : vector<8x384xf32> to vector<8x128xf32>
    %671 = arith.addf %669, %670 : vector<8x128xf32>
    %672 = arith.negf %671 : vector<8x128xf32>
    %673 = math.exp %672 : vector<8x128xf32>
    %cst_271 = arith.constant 1.000000e+00 : f32
    %674 = vector.broadcast %cst_271 : f32 to vector<8x128xf32>
    %675 = arith.addf %674, %673 : vector<8x128xf32>
    %676 = arith.divf %674, %675 : vector<8x128xf32>
    %677 = vector.extract_strided_slice %665 {offsets = [0, 128], sizes = [8, 128], strides = [1, 1]} : vector<8x384xf32> to vector<8x128xf32>
    %678 = vector.extract_strided_slice %668 {offsets = [0, 128], sizes = [8, 128], strides = [1, 1]} : vector<8x384xf32> to vector<8x128xf32>
    %679 = arith.addf %677, %678 : vector<8x128xf32>
    %680 = arith.negf %679 : vector<8x128xf32>
    %681 = math.exp %680 : vector<8x128xf32>
    %cst_272 = arith.constant 1.000000e+00 : f32
    %682 = vector.broadcast %cst_272 : f32 to vector<8x128xf32>
    %683 = arith.addf %682, %681 : vector<8x128xf32>
    %684 = arith.divf %682, %683 : vector<8x128xf32>
    %685 = vector.extract_strided_slice %665 {offsets = [0, 256], sizes = [8, 128], strides = [1, 1]} : vector<8x384xf32> to vector<8x128xf32>
    %686 = vector.extract_strided_slice %668 {offsets = [0, 256], sizes = [8, 128], strides = [1, 1]} : vector<8x384xf32> to vector<8x128xf32>
    %c2_273 = arith.constant 2 : index
    %c0_274 = arith.constant 0 : index
    %c0_275 = arith.constant 0 : index
    %687 = vector.load %arg6[%c2_273, %c0_274, %c0_275] : memref<3x1x128xf32, #tpu.memory_space<vmem>>, vector<1x1x128xf32>
    %688 = vector.shape_cast %687 : vector<1x1x128xf32> to vector<1x128xf32>
    %689 = vector.broadcast %688 : vector<1x128xf32> to vector<8x128xf32>
    %690 = arith.addf %686, %689 : vector<8x128xf32>
    %691 = arith.mulf %676, %690 : vector<8x128xf32>
    %692 = arith.addf %685, %691 : vector<8x128xf32>
    %693 = math.tanh %692 : vector<8x128xf32>
    %cst_276 = arith.constant 1.000000e+00 : f32
    %694 = vector.broadcast %cst_276 : f32 to vector<8x128xf32>
    %695 = arith.subf %694, %684 : vector<8x128xf32>
    %696 = arith.mulf %695, %693 : vector<8x128xf32>
    %697 = arith.mulf %684, %583 : vector<8x128xf32>
    %698 = arith.addf %696, %697 : vector<8x128xf32>
    %c40 = arith.constant 40 : index
    %c0_277 = arith.constant 0 : index
    %699 = vector.load %arg18[%c40, %c0_277] : memref<64x128xf32, #tpu.memory_space<vmem>>, vector<8x128xf32>
    tpu.vector_store %arg18[%c40, %c0_277], %698 {strides = array<i32>} : memref<64x128xf32, #tpu.memory_space<vmem>>, vector<8x128xf32>,
    %700 = vector.extract_strided_slice %6 {offsets = [48, 0], sizes = [8, 384], strides = [1, 1]} : vector<64x384xf32> to vector<8x384xf32>
    %c0_278 = arith.constant 0 : index
    %c0_279 = arith.constant 0 : index
    %c0_280 = arith.constant 0 : index
    %701 = vector.load %arg4[%c0_278, %c0_279, %c0_280] : memref<3x128x384xf32, #tpu.memory_space<vmem>>, vector<1x128x384xf32>
    %702 = vector.shape_cast %701 : vector<1x128x384xf32> to vector<128x384xf32>
    %cst_281 = arith.constant dense<0.000000e+00> : vector<8x384xf32>
    %703 = tpu.matmul %618, %702, %cst_281 {dimension_numbers = #tpu.dot_dimension_numbers<[1], [0], [0], [1], [0, 0, 1, 1], [], []>} : vector<8x128xf32>, vector<128x384xf32>, vector<8x384xf32> -> vector<8x384xf32>
    %704 = vector.extract_strided_slice %700 {offsets = [0, 0], sizes = [8, 128], strides = [1, 1]} : vector<8x384xf32> to vector<8x128xf32>
    %705 = vector.extract_strided_slice %703 {offsets = [0, 0], sizes = [8, 128], strides = [1, 1]} : vector<8x384xf32> to vector<8x128xf32>
    %706 = arith.addf %704, %705 : vector<8x128xf32>
    %707 = arith.negf %706 : vector<8x128xf32>
    %708 = math.exp %707 : vector<8x128xf32>
    %cst_282 = arith.constant 1.000000e+00 : f32
    %709 = vector.broadcast %cst_282 : f32 to vector<8x128xf32>
    %710 = arith.addf %709, %708 : vector<8x128xf32>
    %711 = arith.divf %709, %710 : vector<8x128xf32>
    %712 = vector.extract_strided_slice %700 {offsets = [0, 128], sizes = [8, 128], strides = [1, 1]} : vector<8x384xf32> to vector<8x128xf32>
    %713 = vector.extract_strided_slice %703 {offsets = [0, 128], sizes = [8, 128], strides = [1, 1]} : vector<8x384xf32> to vector<8x128xf32>
    %714 = arith.addf %712, %713 : vector<8x128xf32>
    %715 = arith.negf %714 : vector<8x128xf32>
    %716 = math.exp %715 : vector<8x128xf32>
    %cst_283 = arith.constant 1.000000e+00 : f32
    %717 = vector.broadcast %cst_283 : f32 to vector<8x128xf32>
    %718 = arith.addf %717, %716 : vector<8x128xf32>
    %719 = arith.divf %717, %718 : vector<8x128xf32>
    %720 = vector.extract_strided_slice %700 {offsets = [0, 256], sizes = [8, 128], strides = [1, 1]} : vector<8x384xf32> to vector<8x128xf32>
    %721 = vector.extract_strided_slice %703 {offsets = [0, 256], sizes = [8, 128], strides = [1, 1]} : vector<8x384xf32> to vector<8x128xf32>
    %c0_284 = arith.constant 0 : index
    %c0_285 = arith.constant 0 : index
    %c0_286 = arith.constant 0 : index
    %722 = vector.load %arg6[%c0_284, %c0_285, %c0_286] : memref<3x1x128xf32, #tpu.memory_space<vmem>>, vector<1x1x128xf32>
    %723 = vector.shape_cast %722 : vector<1x1x128xf32> to vector<1x128xf32>
    %724 = vector.broadcast %723 : vector<1x128xf32> to vector<8x128xf32>
    %725 = arith.addf %721, %724 : vector<8x128xf32>
    %726 = arith.mulf %711, %725 : vector<8x128xf32>
    %727 = arith.addf %720, %726 : vector<8x128xf32>
    %728 = math.tanh %727 : vector<8x128xf32>
    %cst_287 = arith.constant 1.000000e+00 : f32
    %729 = vector.broadcast %cst_287 : f32 to vector<8x128xf32>
    %730 = arith.subf %729, %719 : vector<8x128xf32>
    %731 = arith.mulf %730, %728 : vector<8x128xf32>
    %732 = arith.mulf %719, %618 : vector<8x128xf32>
    %733 = arith.addf %731, %732 : vector<8x128xf32>
    %c0_288 = arith.constant 0 : index
    %c0_289 = arith.constant 0 : index
    %c0_290 = arith.constant 0 : index
    %734 = vector.load %arg3[%c0_288, %c0_289, %c0_290] : memref<2x128x384xf32, #tpu.memory_space<vmem>>, vector<1x128x384xf32>
    %735 = vector.shape_cast %734 : vector<1x128x384xf32> to vector<128x384xf32>
    %cst_291 = arith.constant dense<0.000000e+00> : vector<8x384xf32>
    %736 = tpu.matmul %733, %735, %cst_291 {dimension_numbers = #tpu.dot_dimension_numbers<[1], [0], [0], [1], [0, 0, 1, 1], [], []>} : vector<8x128xf32>, vector<128x384xf32>, vector<8x384xf32> -> vector<8x384xf32>
    %c1_292 = arith.constant 1 : index
    %c0_293 = arith.constant 0 : index
    %c0_294 = arith.constant 0 : index
    %737 = vector.load %arg5[%c1_292, %c0_293, %c0_294] : memref<3x1x384xf32, #tpu.memory_space<vmem>>, vector<1x1x384xf32>
    %738 = vector.shape_cast %737 : vector<1x1x384xf32> to vector<1x384xf32>
    %739 = vector.broadcast %738 : vector<1x384xf32> to vector<8x384xf32>
    %740 = arith.addf %736, %739 : vector<8x384xf32>
    %c1_295 = arith.constant 1 : index
    %c0_296 = arith.constant 0 : index
    %c0_297 = arith.constant 0 : index
    %741 = vector.load %arg4[%c1_295, %c0_296, %c0_297] : memref<3x128x384xf32, #tpu.memory_space<vmem>>, vector<1x128x384xf32>
    %742 = vector.shape_cast %741 : vector<1x128x384xf32> to vector<128x384xf32>
    %cst_298 = arith.constant dense<0.000000e+00> : vector<8x384xf32>
    %743 = tpu.matmul %658, %742, %cst_298 {dimension_numbers = #tpu.dot_dimension_numbers<[1], [0], [0], [1], [0, 0, 1, 1], [], []>} : vector<8x128xf32>, vector<128x384xf32>, vector<8x384xf32> -> vector<8x384xf32>
    %744 = vector.extract_strided_slice %740 {offsets = [0, 0], sizes = [8, 128], strides = [1, 1]} : vector<8x384xf32> to vector<8x128xf32>
    %745 = vector.extract_strided_slice %743 {offsets = [0, 0], sizes = [8, 128], strides = [1, 1]} : vector<8x384xf32> to vector<8x128xf32>
    %746 = arith.addf %744, %745 : vector<8x128xf32>
    %747 = arith.negf %746 : vector<8x128xf32>
    %748 = math.exp %747 : vector<8x128xf32>
    %cst_299 = arith.constant 1.000000e+00 : f32
    %749 = vector.broadcast %cst_299 : f32 to vector<8x128xf32>
    %750 = arith.addf %749, %748 : vector<8x128xf32>
    %751 = arith.divf %749, %750 : vector<8x128xf32>
    %752 = vector.extract_strided_slice %740 {offsets = [0, 128], sizes = [8, 128], strides = [1, 1]} : vector<8x384xf32> to vector<8x128xf32>
    %753 = vector.extract_strided_slice %743 {offsets = [0, 128], sizes = [8, 128], strides = [1, 1]} : vector<8x384xf32> to vector<8x128xf32>
    %754 = arith.addf %752, %753 : vector<8x128xf32>
    %755 = arith.negf %754 : vector<8x128xf32>
    %756 = math.exp %755 : vector<8x128xf32>
    %cst_300 = arith.constant 1.000000e+00 : f32
    %757 = vector.broadcast %cst_300 : f32 to vector<8x128xf32>
    %758 = arith.addf %757, %756 : vector<8x128xf32>
    %759 = arith.divf %757, %758 : vector<8x128xf32>
    %760 = vector.extract_strided_slice %740 {offsets = [0, 256], sizes = [8, 128], strides = [1, 1]} : vector<8x384xf32> to vector<8x128xf32>
    %761 = vector.extract_strided_slice %743 {offsets = [0, 256], sizes = [8, 128], strides = [1, 1]} : vector<8x384xf32> to vector<8x128xf32>
    %c1_301 = arith.constant 1 : index
    %c0_302 = arith.constant 0 : index
    %c0_303 = arith.constant 0 : index
    %762 = vector.load %arg6[%c1_301, %c0_302, %c0_303] : memref<3x1x128xf32, #tpu.memory_space<vmem>>, vector<1x1x128xf32>
    %763 = vector.shape_cast %762 : vector<1x1x128xf32> to vector<1x128xf32>
    %764 = vector.broadcast %763 : vector<1x128xf32> to vector<8x128xf32>
    %765 = arith.addf %761, %764 : vector<8x128xf32>
    %766 = arith.mulf %751, %765 : vector<8x128xf32>
    %767 = arith.addf %760, %766 : vector<8x128xf32>
    %768 = math.tanh %767 : vector<8x128xf32>
    %cst_304 = arith.constant 1.000000e+00 : f32
    %769 = vector.broadcast %cst_304 : f32 to vector<8x128xf32>
    %770 = arith.subf %769, %759 : vector<8x128xf32>
    %771 = arith.mulf %770, %768 : vector<8x128xf32>
    %772 = arith.mulf %759, %658 : vector<8x128xf32>
    %773 = arith.addf %771, %772 : vector<8x128xf32>
    %c1_305 = arith.constant 1 : index
    %c0_306 = arith.constant 0 : index
    %c0_307 = arith.constant 0 : index
    %774 = vector.load %arg3[%c1_305, %c0_306, %c0_307] : memref<2x128x384xf32, #tpu.memory_space<vmem>>, vector<1x128x384xf32>
    %775 = vector.shape_cast %774 : vector<1x128x384xf32> to vector<128x384xf32>
    %cst_308 = arith.constant dense<0.000000e+00> : vector<8x384xf32>
    %776 = tpu.matmul %773, %775, %cst_308 {dimension_numbers = #tpu.dot_dimension_numbers<[1], [0], [0], [1], [0, 0, 1, 1], [], []>} : vector<8x128xf32>, vector<128x384xf32>, vector<8x384xf32> -> vector<8x384xf32>
    %c2_309 = arith.constant 2 : index
    %c0_310 = arith.constant 0 : index
    %c0_311 = arith.constant 0 : index
    %777 = vector.load %arg5[%c2_309, %c0_310, %c0_311] : memref<3x1x384xf32, #tpu.memory_space<vmem>>, vector<1x1x384xf32>
    %778 = vector.shape_cast %777 : vector<1x1x384xf32> to vector<1x384xf32>
    %779 = vector.broadcast %778 : vector<1x384xf32> to vector<8x384xf32>
    %780 = arith.addf %776, %779 : vector<8x384xf32>
    %c2_312 = arith.constant 2 : index
    %c0_313 = arith.constant 0 : index
    %c0_314 = arith.constant 0 : index
    %781 = vector.load %arg4[%c2_312, %c0_313, %c0_314] : memref<3x128x384xf32, #tpu.memory_space<vmem>>, vector<1x128x384xf32>
    %782 = vector.shape_cast %781 : vector<1x128x384xf32> to vector<128x384xf32>
    %cst_315 = arith.constant dense<0.000000e+00> : vector<8x384xf32>
    %783 = tpu.matmul %698, %782, %cst_315 {dimension_numbers = #tpu.dot_dimension_numbers<[1], [0], [0], [1], [0, 0, 1, 1], [], []>} : vector<8x128xf32>, vector<128x384xf32>, vector<8x384xf32> -> vector<8x384xf32>
    %784 = vector.extract_strided_slice %780 {offsets = [0, 0], sizes = [8, 128], strides = [1, 1]} : vector<8x384xf32> to vector<8x128xf32>
    %785 = vector.extract_strided_slice %783 {offsets = [0, 0], sizes = [8, 128], strides = [1, 1]} : vector<8x384xf32> to vector<8x128xf32>
    %786 = arith.addf %784, %785 : vector<8x128xf32>
    %787 = arith.negf %786 : vector<8x128xf32>
    %788 = math.exp %787 : vector<8x128xf32>
    %cst_316 = arith.constant 1.000000e+00 : f32
    %789 = vector.broadcast %cst_316 : f32 to vector<8x128xf32>
    %790 = arith.addf %789, %788 : vector<8x128xf32>
    %791 = arith.divf %789, %790 : vector<8x128xf32>
    %792 = vector.extract_strided_slice %780 {offsets = [0, 128], sizes = [8, 128], strides = [1, 1]} : vector<8x384xf32> to vector<8x128xf32>
    %793 = vector.extract_strided_slice %783 {offsets = [0, 128], sizes = [8, 128], strides = [1, 1]} : vector<8x384xf32> to vector<8x128xf32>
    %794 = arith.addf %792, %793 : vector<8x128xf32>
    %795 = arith.negf %794 : vector<8x128xf32>
    %796 = math.exp %795 : vector<8x128xf32>
    %cst_317 = arith.constant 1.000000e+00 : f32
    %797 = vector.broadcast %cst_317 : f32 to vector<8x128xf32>
    %798 = arith.addf %797, %796 : vector<8x128xf32>
    %799 = arith.divf %797, %798 : vector<8x128xf32>
    %800 = vector.extract_strided_slice %780 {offsets = [0, 256], sizes = [8, 128], strides = [1, 1]} : vector<8x384xf32> to vector<8x128xf32>
    %801 = vector.extract_strided_slice %783 {offsets = [0, 256], sizes = [8, 128], strides = [1, 1]} : vector<8x384xf32> to vector<8x128xf32>
    %c2_318 = arith.constant 2 : index
    %c0_319 = arith.constant 0 : index
    %c0_320 = arith.constant 0 : index
    %802 = vector.load %arg6[%c2_318, %c0_319, %c0_320] : memref<3x1x128xf32, #tpu.memory_space<vmem>>, vector<1x1x128xf32>
    %803 = vector.shape_cast %802 : vector<1x1x128xf32> to vector<1x128xf32>
    %804 = vector.broadcast %803 : vector<1x128xf32> to vector<8x128xf32>
    %805 = arith.addf %801, %804 : vector<8x128xf32>
    %806 = arith.mulf %791, %805 : vector<8x128xf32>
    %807 = arith.addf %800, %806 : vector<8x128xf32>
    %808 = math.tanh %807 : vector<8x128xf32>
    %cst_321 = arith.constant 1.000000e+00 : f32
    %809 = vector.broadcast %cst_321 : f32 to vector<8x128xf32>
    %810 = arith.subf %809, %799 : vector<8x128xf32>
    %811 = arith.mulf %810, %808 : vector<8x128xf32>
    %812 = arith.mulf %799, %698 : vector<8x128xf32>
    %813 = arith.addf %811, %812 : vector<8x128xf32>
    %c48 = arith.constant 48 : index
    %c0_322 = arith.constant 0 : index
    %814 = vector.load %arg18[%c48, %c0_322] : memref<64x128xf32, #tpu.memory_space<vmem>>, vector<8x128xf32>
    tpu.vector_store %arg18[%c48, %c0_322], %813 {strides = array<i32>} : memref<64x128xf32, #tpu.memory_space<vmem>>, vector<8x128xf32>,
    %815 = vector.extract_strided_slice %6 {offsets = [56, 0], sizes = [8, 384], strides = [1, 1]} : vector<64x384xf32> to vector<8x384xf32>
    %c0_323 = arith.constant 0 : index
    %c0_324 = arith.constant 0 : index
    %c0_325 = arith.constant 0 : index
    %816 = vector.load %arg4[%c0_323, %c0_324, %c0_325] : memref<3x128x384xf32, #tpu.memory_space<vmem>>, vector<1x128x384xf32>
    %817 = vector.shape_cast %816 : vector<1x128x384xf32> to vector<128x384xf32>
    %cst_326 = arith.constant dense<0.000000e+00> : vector<8x384xf32>
    %818 = tpu.matmul %733, %817, %cst_326 {dimension_numbers = #tpu.dot_dimension_numbers<[1], [0], [0], [1], [0, 0, 1, 1], [], []>} : vector<8x128xf32>, vector<128x384xf32>, vector<8x384xf32> -> vector<8x384xf32>
    %819 = vector.extract_strided_slice %815 {offsets = [0, 0], sizes = [8, 128], strides = [1, 1]} : vector<8x384xf32> to vector<8x128xf32>
    %820 = vector.extract_strided_slice %818 {offsets = [0, 0], sizes = [8, 128], strides = [1, 1]} : vector<8x384xf32> to vector<8x128xf32>
    %821 = arith.addf %819, %820 : vector<8x128xf32>
    %822 = arith.negf %821 : vector<8x128xf32>
    %823 = math.exp %822 : vector<8x128xf32>
    %cst_327 = arith.constant 1.000000e+00 : f32
    %824 = vector.broadcast %cst_327 : f32 to vector<8x128xf32>
    %825 = arith.addf %824, %823 : vector<8x128xf32>
    %826 = arith.divf %824, %825 : vector<8x128xf32>
    %827 = vector.extract_strided_slice %815 {offsets = [0, 128], sizes = [8, 128], strides = [1, 1]} : vector<8x384xf32> to vector<8x128xf32>
    %828 = vector.extract_strided_slice %818 {offsets = [0, 128], sizes = [8, 128], strides = [1, 1]} : vector<8x384xf32> to vector<8x128xf32>
    %829 = arith.addf %827, %828 : vector<8x128xf32>
    %830 = arith.negf %829 : vector<8x128xf32>
    %831 = math.exp %830 : vector<8x128xf32>
    %cst_328 = arith.constant 1.000000e+00 : f32
    %832 = vector.broadcast %cst_328 : f32 to vector<8x128xf32>
    %833 = arith.addf %832, %831 : vector<8x128xf32>
    %834 = arith.divf %832, %833 : vector<8x128xf32>
    %835 = vector.extract_strided_slice %815 {offsets = [0, 256], sizes = [8, 128], strides = [1, 1]} : vector<8x384xf32> to vector<8x128xf32>
    %836 = vector.extract_strided_slice %818 {offsets = [0, 256], sizes = [8, 128], strides = [1, 1]} : vector<8x384xf32> to vector<8x128xf32>
    %c0_329 = arith.constant 0 : index
    %c0_330 = arith.constant 0 : index
    %c0_331 = arith.constant 0 : index
    %837 = vector.load %arg6[%c0_329, %c0_330, %c0_331] : memref<3x1x128xf32, #tpu.memory_space<vmem>>, vector<1x1x128xf32>
    %838 = vector.shape_cast %837 : vector<1x1x128xf32> to vector<1x128xf32>
    %839 = vector.broadcast %838 : vector<1x128xf32> to vector<8x128xf32>
    %840 = arith.addf %836, %839 : vector<8x128xf32>
    %841 = arith.mulf %826, %840 : vector<8x128xf32>
    %842 = arith.addf %835, %841 : vector<8x128xf32>
    %843 = math.tanh %842 : vector<8x128xf32>
    %cst_332 = arith.constant 1.000000e+00 : f32
    %844 = vector.broadcast %cst_332 : f32 to vector<8x128xf32>
    %845 = arith.subf %844, %834 : vector<8x128xf32>
    %846 = arith.mulf %845, %843 : vector<8x128xf32>
    %847 = arith.mulf %834, %733 : vector<8x128xf32>
    %848 = arith.addf %846, %847 : vector<8x128xf32>
    %c0_333 = arith.constant 0 : index
    %c0_334 = arith.constant 0 : index
    %c0_335 = arith.constant 0 : index
    %849 = vector.load %arg3[%c0_333, %c0_334, %c0_335] : memref<2x128x384xf32, #tpu.memory_space<vmem>>, vector<1x128x384xf32>
    %850 = vector.shape_cast %849 : vector<1x128x384xf32> to vector<128x384xf32>
    %cst_336 = arith.constant dense<0.000000e+00> : vector<8x384xf32>
    %851 = tpu.matmul %848, %850, %cst_336 {dimension_numbers = #tpu.dot_dimension_numbers<[1], [0], [0], [1], [0, 0, 1, 1], [], []>} : vector<8x128xf32>, vector<128x384xf32>, vector<8x384xf32> -> vector<8x384xf32>
    %c1_337 = arith.constant 1 : index
    %c0_338 = arith.constant 0 : index
    %c0_339 = arith.constant 0 : index
    %852 = vector.load %arg5[%c1_337, %c0_338, %c0_339] : memref<3x1x384xf32, #tpu.memory_space<vmem>>, vector<1x1x384xf32>
    %853 = vector.shape_cast %852 : vector<1x1x384xf32> to vector<1x384xf32>
    %854 = vector.broadcast %853 : vector<1x384xf32> to vector<8x384xf32>
    %855 = arith.addf %851, %854 : vector<8x384xf32>
    %c1_340 = arith.constant 1 : index
    %c0_341 = arith.constant 0 : index
    %c0_342 = arith.constant 0 : index
    %856 = vector.load %arg4[%c1_340, %c0_341, %c0_342] : memref<3x128x384xf32, #tpu.memory_space<vmem>>, vector<1x128x384xf32>
    %857 = vector.shape_cast %856 : vector<1x128x384xf32> to vector<128x384xf32>
    %cst_343 = arith.constant dense<0.000000e+00> : vector<8x384xf32>
    %858 = tpu.matmul %773, %857, %cst_343 {dimension_numbers = #tpu.dot_dimension_numbers<[1], [0], [0], [1], [0, 0, 1, 1], [], []>} : vector<8x128xf32>, vector<128x384xf32>, vector<8x384xf32> -> vector<8x384xf32>
    %859 = vector.extract_strided_slice %855 {offsets = [0, 0], sizes = [8, 128], strides = [1, 1]} : vector<8x384xf32> to vector<8x128xf32>
    %860 = vector.extract_strided_slice %858 {offsets = [0, 0], sizes = [8, 128], strides = [1, 1]} : vector<8x384xf32> to vector<8x128xf32>
    %861 = arith.addf %859, %860 : vector<8x128xf32>
    %862 = arith.negf %861 : vector<8x128xf32>
    %863 = math.exp %862 : vector<8x128xf32>
    %cst_344 = arith.constant 1.000000e+00 : f32
    %864 = vector.broadcast %cst_344 : f32 to vector<8x128xf32>
    %865 = arith.addf %864, %863 : vector<8x128xf32>
    %866 = arith.divf %864, %865 : vector<8x128xf32>
    %867 = vector.extract_strided_slice %855 {offsets = [0, 128], sizes = [8, 128], strides = [1, 1]} : vector<8x384xf32> to vector<8x128xf32>
    %868 = vector.extract_strided_slice %858 {offsets = [0, 128], sizes = [8, 128], strides = [1, 1]} : vector<8x384xf32> to vector<8x128xf32>
    %869 = arith.addf %867, %868 : vector<8x128xf32>
    %870 = arith.negf %869 : vector<8x128xf32>
    %871 = math.exp %870 : vector<8x128xf32>
    %cst_345 = arith.constant 1.000000e+00 : f32
    %872 = vector.broadcast %cst_345 : f32 to vector<8x128xf32>
    %873 = arith.addf %872, %871 : vector<8x128xf32>
    %874 = arith.divf %872, %873 : vector<8x128xf32>
    %875 = vector.extract_strided_slice %855 {offsets = [0, 256], sizes = [8, 128], strides = [1, 1]} : vector<8x384xf32> to vector<8x128xf32>
    %876 = vector.extract_strided_slice %858 {offsets = [0, 256], sizes = [8, 128], strides = [1, 1]} : vector<8x384xf32> to vector<8x128xf32>
    %c1_346 = arith.constant 1 : index
    %c0_347 = arith.constant 0 : index
    %c0_348 = arith.constant 0 : index
    %877 = vector.load %arg6[%c1_346, %c0_347, %c0_348] : memref<3x1x128xf32, #tpu.memory_space<vmem>>, vector<1x1x128xf32>
    %878 = vector.shape_cast %877 : vector<1x1x128xf32> to vector<1x128xf32>
    %879 = vector.broadcast %878 : vector<1x128xf32> to vector<8x128xf32>
    %880 = arith.addf %876, %879 : vector<8x128xf32>
    %881 = arith.mulf %866, %880 : vector<8x128xf32>
    %882 = arith.addf %875, %881 : vector<8x128xf32>
    %883 = math.tanh %882 : vector<8x128xf32>
    %cst_349 = arith.constant 1.000000e+00 : f32
    %884 = vector.broadcast %cst_349 : f32 to vector<8x128xf32>
    %885 = arith.subf %884, %874 : vector<8x128xf32>
    %886 = arith.mulf %885, %883 : vector<8x128xf32>
    %887 = arith.mulf %874, %773 : vector<8x128xf32>
    %888 = arith.addf %886, %887 : vector<8x128xf32>
    %c1_350 = arith.constant 1 : index
    %c0_351 = arith.constant 0 : index
    %c0_352 = arith.constant 0 : index
    %889 = vector.load %arg3[%c1_350, %c0_351, %c0_352] : memref<2x128x384xf32, #tpu.memory_space<vmem>>, vector<1x128x384xf32>
    %890 = vector.shape_cast %889 : vector<1x128x384xf32> to vector<128x384xf32>
    %cst_353 = arith.constant dense<0.000000e+00> : vector<8x384xf32>
    %891 = tpu.matmul %888, %890, %cst_353 {dimension_numbers = #tpu.dot_dimension_numbers<[1], [0], [0], [1], [0, 0, 1, 1], [], []>} : vector<8x128xf32>, vector<128x384xf32>, vector<8x384xf32> -> vector<8x384xf32>
    %c2_354 = arith.constant 2 : index
    %c0_355 = arith.constant 0 : index
    %c0_356 = arith.constant 0 : index
    %892 = vector.load %arg5[%c2_354, %c0_355, %c0_356] : memref<3x1x384xf32, #tpu.memory_space<vmem>>, vector<1x1x384xf32>
    %893 = vector.shape_cast %892 : vector<1x1x384xf32> to vector<1x384xf32>
    %894 = vector.broadcast %893 : vector<1x384xf32> to vector<8x384xf32>
    %895 = arith.addf %891, %894 : vector<8x384xf32>
    %c2_357 = arith.constant 2 : index
    %c0_358 = arith.constant 0 : index
    %c0_359 = arith.constant 0 : index
    %896 = vector.load %arg4[%c2_357, %c0_358, %c0_359] : memref<3x128x384xf32, #tpu.memory_space<vmem>>, vector<1x128x384xf32>
    %897 = vector.shape_cast %896 : vector<1x128x384xf32> to vector<128x384xf32>
    %cst_360 = arith.constant dense<0.000000e+00> : vector<8x384xf32>
    %898 = tpu.matmul %813, %897, %cst_360 {dimension_numbers = #tpu.dot_dimension_numbers<[1], [0], [0], [1], [0, 0, 1, 1], [], []>} : vector<8x128xf32>, vector<128x384xf32>, vector<8x384xf32> -> vector<8x384xf32>
    %899 = vector.extract_strided_slice %895 {offsets = [0, 0], sizes = [8, 128], strides = [1, 1]} : vector<8x384xf32> to vector<8x128xf32>
    %900 = vector.extract_strided_slice %898 {offsets = [0, 0], sizes = [8, 128], strides = [1, 1]} : vector<8x384xf32> to vector<8x128xf32>
    %901 = arith.addf %899, %900 : vector<8x128xf32>
    %902 = arith.negf %901 : vector<8x128xf32>
    %903 = math.exp %902 : vector<8x128xf32>
    %cst_361 = arith.constant 1.000000e+00 : f32
    %904 = vector.broadcast %cst_361 : f32 to vector<8x128xf32>
    %905 = arith.addf %904, %903 : vector<8x128xf32>
    %906 = arith.divf %904, %905 : vector<8x128xf32>
    %907 = vector.extract_strided_slice %895 {offsets = [0, 128], sizes = [8, 128], strides = [1, 1]} : vector<8x384xf32> to vector<8x128xf32>
    %908 = vector.extract_strided_slice %898 {offsets = [0, 128], sizes = [8, 128], strides = [1, 1]} : vector<8x384xf32> to vector<8x128xf32>
    %909 = arith.addf %907, %908 : vector<8x128xf32>
    %910 = arith.negf %909 : vector<8x128xf32>
    %911 = math.exp %910 : vector<8x128xf32>
    %cst_362 = arith.constant 1.000000e+00 : f32
    %912 = vector.broadcast %cst_362 : f32 to vector<8x128xf32>
    %913 = arith.addf %912, %911 : vector<8x128xf32>
    %914 = arith.divf %912, %913 : vector<8x128xf32>
    %915 = vector.extract_strided_slice %895 {offsets = [0, 256], sizes = [8, 128], strides = [1, 1]} : vector<8x384xf32> to vector<8x128xf32>
    %916 = vector.extract_strided_slice %898 {offsets = [0, 256], sizes = [8, 128], strides = [1, 1]} : vector<8x384xf32> to vector<8x128xf32>
    %c2_363 = arith.constant 2 : index
    %c0_364 = arith.constant 0 : index
    %c0_365 = arith.constant 0 : index
    %917 = vector.load %arg6[%c2_363, %c0_364, %c0_365] : memref<3x1x128xf32, #tpu.memory_space<vmem>>, vector<1x1x128xf32>
    %918 = vector.shape_cast %917 : vector<1x1x128xf32> to vector<1x128xf32>
    %919 = vector.broadcast %918 : vector<1x128xf32> to vector<8x128xf32>
    %920 = arith.addf %916, %919 : vector<8x128xf32>
    %921 = arith.mulf %906, %920 : vector<8x128xf32>
    %922 = arith.addf %915, %921 : vector<8x128xf32>
    %923 = math.tanh %922 : vector<8x128xf32>
    %cst_366 = arith.constant 1.000000e+00 : f32
    %924 = vector.broadcast %cst_366 : f32 to vector<8x128xf32>
    %925 = arith.subf %924, %914 : vector<8x128xf32>
    %926 = arith.mulf %925, %923 : vector<8x128xf32>
    %927 = arith.mulf %914, %813 : vector<8x128xf32>
    %928 = arith.addf %926, %927 : vector<8x128xf32>
    %c56 = arith.constant 56 : index
    %c0_367 = arith.constant 0 : index
    %929 = vector.load %arg18[%c56, %c0_367] : memref<64x128xf32, #tpu.memory_space<vmem>>, vector<8x128xf32>
    tpu.vector_store %arg18[%c56, %c0_367], %928 {strides = array<i32>} : memref<64x128xf32, #tpu.memory_space<vmem>>, vector<8x128xf32>,
    %c0_368 = arith.constant 0 : index
    %c0_369 = arith.constant 0 : index
    %930 = vector.load %arg18[%c0_368, %c0_369] : memref<64x128xf32, #tpu.memory_space<vmem>>, vector<64x128xf32>
    %c0_370 = arith.constant 0 : index
    %c0_371 = arith.constant 0 : index
    %931 = vector.load %arg7[%c0_370, %c0_371] : memref<128x32xf32, #tpu.memory_space<vmem>>, vector<128x32xf32>
    %cst_372 = arith.constant dense<0.000000e+00> : vector<64x32xf32>
    %932 = tpu.matmul %930, %931, %cst_372 {dimension_numbers = #tpu.dot_dimension_numbers<[1], [0], [0], [1], [0, 0, 1, 1], [], []>} : vector<64x128xf32>, vector<128x32xf32>, vector<64x32xf32> -> vector<64x32xf32>
    %c0_373 = arith.constant 0 : index
    %c0_374 = arith.constant 0 : index
    %933 = vector.load %arg8[%c0_373, %c0_374] : memref<1x32xf32, #tpu.memory_space<vmem>>, vector<1x32xf32>
    %934 = vector.broadcast %933 : vector<1x32xf32> to vector<64x32xf32>
    %935 = arith.addf %932, %934 : vector<64x32xf32>
    %936 = math.tanh %935 : vector<64x32xf32>
    %c0_375 = arith.constant 0 : index
    %c0_376 = arith.constant 0 : index
    %937 = vector.load %arg9[%c0_375, %c0_376] : memref<1x32xf32, #tpu.memory_space<vmem>>, vector<1x32xf32>
    %938 = vector.broadcast %937 : vector<1x32xf32> to vector<64x32xf32>
    %939 = arith.mulf %936, %938 : vector<64x32xf32>
    %cst_377 = arith.constant dense<0.000000e+00> : vector<64xf32>
    %940 = vector.multi_reduction <add>, %939, %cst_377 [1] : vector<64x32xf32> to vector<64xf32>
    %941 = vector.shape_cast %940 : vector<64xf32> to vector<64x1xf32>
    %c0_378 = arith.constant 0 : index
    %c0_379 = arith.constant 0 : index
    %942 = vector.load %arg10[%c0_378, %c0_379] : memref<1x1xf32, #tpu.memory_space<vmem>>, vector<1x1xf32>
    %943 = vector.broadcast %942 : vector<1x1xf32> to vector<64x1xf32>
    %944 = arith.addf %941, %943 : vector<64x1xf32>
    %945 = vector.extract_strided_slice %944 {offsets = [0, 0], sizes = [8, 1], strides = [1, 1]} : vector<64x1xf32> to vector<8x1xf32>
    %946 = vector.extract_strided_slice %944 {offsets = [8, 0], sizes = [8, 1], strides = [1, 1]} : vector<64x1xf32> to vector<8x1xf32>
    %947 = vector.extract_strided_slice %944 {offsets = [16, 0], sizes = [8, 1], strides = [1, 1]} : vector<64x1xf32> to vector<8x1xf32>
    %948 = vector.extract_strided_slice %944 {offsets = [24, 0], sizes = [8, 1], strides = [1, 1]} : vector<64x1xf32> to vector<8x1xf32>
    %949 = vector.extract_strided_slice %944 {offsets = [32, 0], sizes = [8, 1], strides = [1, 1]} : vector<64x1xf32> to vector<8x1xf32>
    %950 = vector.extract_strided_slice %944 {offsets = [40, 0], sizes = [8, 1], strides = [1, 1]} : vector<64x1xf32> to vector<8x1xf32>
    %951 = vector.extract_strided_slice %944 {offsets = [48, 0], sizes = [8, 1], strides = [1, 1]} : vector<64x1xf32> to vector<8x1xf32>
    %952 = vector.extract_strided_slice %944 {offsets = [56, 0], sizes = [8, 1], strides = [1, 1]} : vector<64x1xf32> to vector<8x1xf32>
    %953 = arith.maximumf %945, %946 : vector<8x1xf32>
    %954 = arith.maximumf %953, %947 : vector<8x1xf32>
    %955 = arith.maximumf %954, %948 : vector<8x1xf32>
    %956 = arith.maximumf %955, %949 : vector<8x1xf32>
    %957 = arith.maximumf %956, %950 : vector<8x1xf32>
    %958 = arith.maximumf %957, %951 : vector<8x1xf32>
    %959 = arith.maximumf %958, %952 : vector<8x1xf32>
    %cst_380 = arith.constant 0.000000e+00 : f32
    %960 = vector.broadcast %cst_380 : f32 to vector<8x1xf32>
    %cst_381 = arith.constant 0.000000e+00 : f32
    %961 = vector.broadcast %cst_381 : f32 to vector<8x128xf32>
    %962 = arith.subf %945, %959 : vector<8x1xf32>
    %963 = math.exp %962 : vector<8x1xf32>
    %964 = arith.addf %960, %963 : vector<8x1xf32>
    %965 = vector.extract_strided_slice %930 {offsets = [0, 0], sizes = [8, 128], strides = [1, 1]} : vector<64x128xf32> to vector<8x128xf32>
    %966 = vector.broadcast %963 : vector<8x1xf32> to vector<8x128xf32>
    %967 = arith.mulf %966, %965 : vector<8x128xf32>
    %968 = arith.addf %961, %967 : vector<8x128xf32>
    %969 = arith.subf %946, %959 : vector<8x1xf32>
    %970 = math.exp %969 : vector<8x1xf32>
    %971 = arith.addf %964, %970 : vector<8x1xf32>
    %972 = vector.extract_strided_slice %930 {offsets = [8, 0], sizes = [8, 128], strides = [1, 1]} : vector<64x128xf32> to vector<8x128xf32>
    %973 = vector.broadcast %970 : vector<8x1xf32> to vector<8x128xf32>
    %974 = arith.mulf %973, %972 : vector<8x128xf32>
    %975 = arith.addf %968, %974 : vector<8x128xf32>
    %976 = arith.subf %947, %959 : vector<8x1xf32>
    %977 = math.exp %976 : vector<8x1xf32>
    %978 = arith.addf %971, %977 : vector<8x1xf32>
    %979 = vector.extract_strided_slice %930 {offsets = [16, 0], sizes = [8, 128], strides = [1, 1]} : vector<64x128xf32> to vector<8x128xf32>
    %980 = vector.broadcast %977 : vector<8x1xf32> to vector<8x128xf32>
    %981 = arith.mulf %980, %979 : vector<8x128xf32>
    %982 = arith.addf %975, %981 : vector<8x128xf32>
    %983 = arith.subf %948, %959 : vector<8x1xf32>
    %984 = math.exp %983 : vector<8x1xf32>
    %985 = arith.addf %978, %984 : vector<8x1xf32>
    %986 = vector.extract_strided_slice %930 {offsets = [24, 0], sizes = [8, 128], strides = [1, 1]} : vector<64x128xf32> to vector<8x128xf32>
    %987 = vector.broadcast %984 : vector<8x1xf32> to vector<8x128xf32>
    %988 = arith.mulf %987, %986 : vector<8x128xf32>
    %989 = arith.addf %982, %988 : vector<8x128xf32>
    %990 = arith.subf %949, %959 : vector<8x1xf32>
    %991 = math.exp %990 : vector<8x1xf32>
    %992 = arith.addf %985, %991 : vector<8x1xf32>
    %993 = vector.extract_strided_slice %930 {offsets = [32, 0], sizes = [8, 128], strides = [1, 1]} : vector<64x128xf32> to vector<8x128xf32>
    %994 = vector.broadcast %991 : vector<8x1xf32> to vector<8x128xf32>
    %995 = arith.mulf %994, %993 : vector<8x128xf32>
    %996 = arith.addf %989, %995 : vector<8x128xf32>
    %997 = arith.subf %950, %959 : vector<8x1xf32>
    %998 = math.exp %997 : vector<8x1xf32>
    %999 = arith.addf %992, %998 : vector<8x1xf32>
    %1000 = vector.extract_strided_slice %930 {offsets = [40, 0], sizes = [8, 128], strides = [1, 1]} : vector<64x128xf32> to vector<8x128xf32>
    %1001 = vector.broadcast %998 : vector<8x1xf32> to vector<8x128xf32>
    %1002 = arith.mulf %1001, %1000 : vector<8x128xf32>
    %1003 = arith.addf %996, %1002 : vector<8x128xf32>
    %1004 = arith.subf %951, %959 : vector<8x1xf32>
    %1005 = math.exp %1004 : vector<8x1xf32>
    %1006 = arith.addf %999, %1005 : vector<8x1xf32>
    %1007 = vector.extract_strided_slice %930 {offsets = [48, 0], sizes = [8, 128], strides = [1, 1]} : vector<64x128xf32> to vector<8x128xf32>
    %1008 = vector.broadcast %1005 : vector<8x1xf32> to vector<8x128xf32>
    %1009 = arith.mulf %1008, %1007 : vector<8x128xf32>
    %1010 = arith.addf %1003, %1009 : vector<8x128xf32>
    %1011 = arith.subf %952, %959 : vector<8x1xf32>
    %1012 = math.exp %1011 : vector<8x1xf32>
    %1013 = arith.addf %1006, %1012 : vector<8x1xf32>
    %1014 = vector.extract_strided_slice %930 {offsets = [56, 0], sizes = [8, 128], strides = [1, 1]} : vector<64x128xf32> to vector<8x128xf32>
    %1015 = vector.broadcast %1012 : vector<8x1xf32> to vector<8x128xf32>
    %1016 = arith.mulf %1015, %1014 : vector<8x128xf32>
    %1017 = arith.addf %1010, %1016 : vector<8x128xf32>
    %1018 = tpu.reciprocal %1013 {approx = true} : vector<8x1xf32> -> vector<8x1xf32>
    %1019 = vector.broadcast %1018 : vector<8x1xf32> to vector<8x128xf32>
    %1020 = arith.mulf %1017, %1019 : vector<8x128xf32>
    %c0_382 = arith.constant 0 : index
    %c0_383 = arith.constant 0 : index
    %1021 = vector.load %arg11[%c0_382, %c0_383] : memref<128x64xf32, #tpu.memory_space<vmem>>, vector<128x64xf32>
    %cst_384 = arith.constant dense<0.000000e+00> : vector<8x64xf32>
    %1022 = tpu.matmul %1020, %1021, %cst_384 {dimension_numbers = #tpu.dot_dimension_numbers<[1], [0], [0], [1], [0, 0, 1, 1], [], []>} : vector<8x128xf32>, vector<128x64xf32>, vector<8x64xf32> -> vector<8x64xf32>
    %c0_385 = arith.constant 0 : index
    %c0_386 = arith.constant 0 : index
    %1023 = vector.load %arg12[%c0_385, %c0_386] : memref<1x64xf32, #tpu.memory_space<vmem>>, vector<1x64xf32>
    %1024 = vector.broadcast %1023 : vector<1x64xf32> to vector<8x64xf32>
    %1025 = arith.addf %1022, %1024 : vector<8x64xf32>
    %cst_387 = arith.constant 0.000000e+00 : f32
    %1026 = vector.broadcast %cst_387 : f32 to vector<8x64xf32>
    %1027 = arith.maximumf %1025, %1026 : vector<8x64xf32>
    %c0_388 = arith.constant 0 : index
    %c0_389 = arith.constant 0 : index
    %1028 = vector.load %arg13[%c0_388, %c0_389] : memref<64x32xf32, #tpu.memory_space<vmem>>, vector<64x32xf32>
    %cst_390 = arith.constant dense<0.000000e+00> : vector<8x32xf32>
    %1029 = tpu.matmul %1027, %1028, %cst_390 {dimension_numbers = #tpu.dot_dimension_numbers<[1], [0], [0], [1], [0, 0, 1, 1], [], []>} : vector<8x64xf32>, vector<64x32xf32>, vector<8x32xf32> -> vector<8x32xf32>
    %c0_391 = arith.constant 0 : index
    %c0_392 = arith.constant 0 : index
    %1030 = vector.load %arg14[%c0_391, %c0_392] : memref<1x32xf32, #tpu.memory_space<vmem>>, vector<1x32xf32>
    %1031 = vector.broadcast %1030 : vector<1x32xf32> to vector<8x32xf32>
    %1032 = arith.addf %1029, %1031 : vector<8x32xf32>
    %cst_393 = arith.constant 0.000000e+00 : f32
    %1033 = vector.broadcast %cst_393 : f32 to vector<8x32xf32>
    %1034 = arith.maximumf %1032, %1033 : vector<8x32xf32>
    %c0_394 = arith.constant 0 : index
    %c0_395 = arith.constant 0 : index
    %1035 = vector.load %arg15[%c0_394, %c0_395] : memref<32x4xf32, #tpu.memory_space<vmem>>, vector<32x4xf32>
    %cst_396 = arith.constant dense<0.000000e+00> : vector<8x4xf32>
    %1036 = tpu.matmul %1034, %1035, %cst_396 {dimension_numbers = #tpu.dot_dimension_numbers<[1], [0], [0], [1], [0, 0, 1, 1], [], []>} : vector<8x32xf32>, vector<32x4xf32>, vector<8x4xf32> -> vector<8x4xf32>
    %c0_397 = arith.constant 0 : index
    %c0_398 = arith.constant 0 : index
    %1037 = vector.load %arg16[%c0_397, %c0_398] : memref<1x4xf32, #tpu.memory_space<vmem>>, vector<1x4xf32>
    %1038 = vector.broadcast %1037 : vector<1x4xf32> to vector<8x4xf32>
    %1039 = arith.addf %1036, %1038 : vector<8x4xf32>
    %c0_399 = arith.constant 0 : index
    %c0_400 = arith.constant 0 : index
    %1040 = vector.load %arg17[%c0_399, %c0_400] : memref<8x4xf32, #tpu.memory_space<vmem>>, vector<8x4xf32>
    tpu.vector_store %arg17[%c0_399, %c0_400], %1039 {strides = array<i32>} : memref<8x4xf32, #tpu.memory_space<vmem>>, vector<8x4xf32>,
    return
  }
  func.func @transform_0(%arg0: i32) -> (i32, i32) {
    %c0_i32 = arith.constant 0 : i32
    %c0_i32_0 = arith.constant 0 : i32
    %c0_i32_1 = arith.constant 0 : i32
    return %c0_i32, %c0_i32_0 : i32, i32
  }
  func.func @transform_1(%arg0: i32) -> (i32, i32) {
    %c0_i32 = arith.constant 0 : i32
    %c0_i32_0 = arith.constant 0 : i32
    %c0_i32_1 = arith.constant 0 : i32
    return %c0_i32, %c0_i32_0 : i32, i32
  }
  func.func @transform_2(%arg0: i32) -> (i32, i32, i32) {
    %c0_i32 = arith.constant 0 : i32
    %c0_i32_0 = arith.constant 0 : i32
    %c0_i32_1 = arith.constant 0 : i32
    %c0_i32_2 = arith.constant 0 : i32
    return %c0_i32, %c0_i32_0, %c0_i32_1 : i32, i32, i32
  }
  func.func @transform_3(%arg0: i32) -> (i32, i32, i32) {
    %c0_i32 = arith.constant 0 : i32
    %c0_i32_0 = arith.constant 0 : i32
    %c0_i32_1 = arith.constant 0 : i32
    %c0_i32_2 = arith.constant 0 : i32
    return %c0_i32, %c0_i32_0, %c0_i32_1 : i32, i32, i32
  }
  func.func @transform_4(%arg0: i32) -> (i32, i32, i32) {
    %c0_i32 = arith.constant 0 : i32
    %c0_i32_0 = arith.constant 0 : i32
    %c0_i32_1 = arith.constant 0 : i32
    %c0_i32_2 = arith.constant 0 : i32
    return %c0_i32, %c0_i32_0, %c0_i32_1 : i32, i32, i32
  }
  func.func @transform_5(%arg0: i32) -> (i32, i32, i32) {
    %c0_i32 = arith.constant 0 : i32
    %c0_i32_0 = arith.constant 0 : i32
    %c0_i32_1 = arith.constant 0 : i32
    %c0_i32_2 = arith.constant 0 : i32
    return %c0_i32, %c0_i32_0, %c0_i32_1 : i32, i32, i32
  }
  func.func @transform_6(%arg0: i32) -> (i32, i32) {
    %c0_i32 = arith.constant 0 : i32
    %c0_i32_0 = arith.constant 0 : i32
    %c0_i32_1 = arith.constant 0 : i32
    return %c0_i32, %c0_i32_0 : i32, i32
  }
  func.func @transform_7(%arg0: i32) -> (i32, i32) {
    %c0_i32 = arith.constant 0 : i32
    %c0_i32_0 = arith.constant 0 : i32
    %c0_i32_1 = arith.constant 0 : i32
    return %c0_i32, %c0_i32_0 : i32, i32
  }
  func.func @transform_8(%arg0: i32) -> (i32, i32) {
    %c0_i32 = arith.constant 0 : i32
    %c0_i32_0 = arith.constant 0 : i32
    %c0_i32_1 = arith.constant 0 : i32
    return %c0_i32, %c0_i32_0 : i32, i32
  }
  func.func @transform_9(%arg0: i32) -> (i32, i32) {
    %c0_i32 = arith.constant 0 : i32
    %c0_i32_0 = arith.constant 0 : i32
    %c0_i32_1 = arith.constant 0 : i32
    return %c0_i32, %c0_i32_0 : i32, i32
  }
  func.func @transform_10(%arg0: i32) -> (i32, i32) {
    %c0_i32 = arith.constant 0 : i32
    %c0_i32_0 = arith.constant 0 : i32
    %c0_i32_1 = arith.constant 0 : i32
    return %c0_i32, %c0_i32_0 : i32, i32
  }
  func.func @transform_11(%arg0: i32) -> (i32, i32) {
    %c0_i32 = arith.constant 0 : i32
    %c0_i32_0 = arith.constant 0 : i32
    %c0_i32_1 = arith.constant 0 : i32
    return %c0_i32, %c0_i32_0 : i32, i32
  }
  func.func @transform_12(%arg0: i32) -> (i32, i32) {
    %c0_i32 = arith.constant 0 : i32
    %c0_i32_0 = arith.constant 0 : i32
    %c0_i32_1 = arith.constant 0 : i32
    return %c0_i32, %c0_i32_0 : i32, i32
  }
  func.func @transform_13(%arg0: i32) -> (i32, i32) {
    %c0_i32 = arith.constant 0 : i32
    %c0_i32_0 = arith.constant 0 : i32
    %c0_i32_1 = arith.constant 0 : i32
    return %c0_i32, %c0_i32_0 : i32, i32
  }
  func.func @transform_14(%arg0: i32) -> (i32, i32) {
    %c0_i32 = arith.constant 0 : i32
    %c0_i32_0 = arith.constant 0 : i32
    %c0_i32_1 = arith.constant 0 : i32
    return %c0_i32, %c0_i32_0 : i32, i32
  }
  func.func @transform_15(%arg0: i32) -> (i32, i32) {
    %c0_i32 = arith.constant 0 : i32
    %c0_i32_0 = arith.constant 0 : i32
    %c0_i32_1 = arith.constant 0 : i32
    return %c0_i32, %c0_i32_0 : i32, i32
  }
  func.func @transform_16(%arg0: i32) -> (i32, i32) {
    %c0_i32 = arith.constant 0 : i32
    %c0_i32_0 = arith.constant 0 : i32
    %c0_i32_1 = arith.constant 0 : i32
    return %c0_i32, %c0_i32_0 : i32, i32
  }
}

</mosaic_0001>

<bundles_post_ra>
// kernel: gru_attention_forward.1
= control target key start
LH: loop header
LB: loop body
LE: loop exit
PB: predicated region body
PF: predicated region fallthrough
CT: control target
= control target key end

     0   :  { %vm77_vm0 = vcmask 130048   ;;  %v14707_v40 = vmov 0.0   ;;  %s14689_s1 = inlined_call_operand.vmem [shape: f32[16,384], index: 1, kind: input, shape index: {}]   ;;  %s14690_s3 = inlined_call_operand.vmem [shape: f32[3,128,384], index: 3, kind: input, shape index: {}]   ;;  %s14691_s0 = inlined_call_operand.vmem [shape: f32[64,16], index: 0, kind: input, shape index: {}]   ;;  %s14692_s5 = inlined_call_operand.vmem [shape: f32[3,1,128], index: 5, kind: input, shape index: {}]   ;;  %s14693_s2 = inlined_call_operand.vmem [shape: f32[2,128,384], index: 2, kind: input, shape index: {}]   ;;  %s14694_s4 = inlined_call_operand.vmem [shape: f32[3,1,384], index: 4, kind: input, shape index: {}]   ;;  %s14695_s6 = inlined_call_operand.vmem [shape: f32[128,32], index: 6, kind: input, shape index: {}]   ;;  %s14696_s7 = inlined_call_operand.vmem [shape: f32[1,32], index: 7, kind: input, shape index: {}]   ;;  %s14697_s8 = inlined_call_operand.vmem [shape: f32[1,32], index: 8, kind: input, shape index: {}]   ;;  %s14698_s9 = inlined_call_operand.<no memory space> [shape: f32[1,1], index: 9, kind: input, shape index: {}]   ;;  %s14699_s11 = inlined_call_operand.vmem [shape: f32[1,64], index: 11, kind: input, shape index: {}]   ;;  %s14700_s10 = inlined_call_operand.vmem [shape: f32[128,64], index: 10, kind: input, shape index: {}]   ;;  %s14701_s12 = inlined_call_operand.vmem [shape: f32[64,32], index: 12, kind: input, shape index: {}]   ;;  %s14702_s13 = inlined_call_operand.vmem [shape: f32[1,32], index: 13, kind: input, shape index: {}]   ;;  %s14703_s14 = inlined_call_operand.vmem [shape: f32[32,4], index: 14, kind: input, shape index: {}]   ;;  %s14704_s15 = inlined_call_operand.vmem [shape: f32[1,4], index: 15, kind: input, shape index: {}]   ;;  %s14705_s16 = inlined_call_operand.vmem [shape: f32[8,4], index: 16, kind: output, shape index: {}]  }
   0x1   :  { %14709 = sst [smem:[#allocation4_spill]] %s14689_s1  ;;  %v270_v1 = vld [vmem:[%s14690_s3 + $0x168] sm:$0xff]  ;;  %v267_v4 = vld [vmem:[%s14690_s3 + $0x150] sm:$0xff]  ;;  %v7956_v5 = vld [vmem:[%s14691_s0] sm:$0xff] }
   0x2   :  { %s14710_s23 = sld [smem:[#allocation4_spill]]  ;;  %273 = vmatpush.msra.mxu3 %v270_v1  ;;  %v264_v7 = vld [vmem:[%s14690_s3 + $0x138] sm:$0xff]  ;;  %v261_v8 = vld [vmem:[%s14690_s3 + $0x120] sm:$0xff]  ;;  %v258_v9 = vld [vmem:[%s14690_s3 + $0x108] sm:$0xff] }
   0x3   :  { %v272_v10 = vld [vmem:[%s14690_s3 + $0x178] sm:$0xff]  ;;  %v255_v12 = vld [vmem:[%s14690_s3 + $0xf0] sm:$0xff]  ;;  %v269_v13 = vld [vmem:[%s14690_s3 + $0x160] sm:$0xff] }
   0x4   :  { %274 = vmatpush.msra.mxu3 %v267_v4  ;;  %v7989_v14 = vld [vmem:[%s14691_s0 + $0x8] sm:$0xff]  ;;  %v252_v16 = vld [vmem:[%s14690_s3 + $0xd8] sm:$0xff]  ;;  %v263_v17 = vld [vmem:[%s14690_s3 + $0x130] sm:$0xff] }
   0x5   :  { %v266_v15 = vld [vmem:[%s14690_s3 + $0x148] sm:$0xff]  ;;  %v249_v18 = vld [vmem:[%s14690_s3 + $0xc0] sm:$0xff]  ;;  %v260_v19 = vld [vmem:[%s14690_s3 + $0x118] sm:$0xff] }
   0x6   :  { %275 = vmatpush.msra.mxu3 %v264_v7  ;;  %v246_v20 = vld [vmem:[%s14690_s3 + $0xa8] sm:$0xff]  ;;  %v257_v21 = vld [vmem:[%s14690_s3 + $0x100] sm:$0xff]  ;;  %v243_v22 = vld [vmem:[%s14690_s3 + $0x90] sm:$0xff] }
   0x7   :  { %v8022_v23 = vld [vmem:[%s14691_s0 + $0x10] sm:$0xff]  ;;  %v240_v24 = vld [vmem:[%s14690_s3 + $0x78] sm:$0xff]  ;;  %v254_v25 = vld [vmem:[%s14690_s3 + $0xe8] sm:$0xff] }
   0x8   :  { %v66_v0 = vld [vmem:[%s14710_s23 + $0x18] sm:$0xff]  ;;  %v63_v2 = vld [vmem:[%s14710_s23] sm:$0xff]  ;;  %v64_v6 = vld [vmem:[%s14710_s23 + $0x8] sm:$0xff]  ;;  %276 = vmatpush.msra.mxu3 %v261_v8 }
   0x9   :  { %116 = vmatpush.msra.mxu0 %v66_v0  ;;  %v67_v3 = vld [vmem:[%s14710_s23 + $0x20] sm:$0xff]  ;;  %v68_v11 = vld [vmem:[%s14710_s23 + $0x28] sm:$0xff]  ;;  %v251_v27 = vld [vmem:[%s14690_s3 + $0xd0] sm:$0xff] }
   0xa   :  { %157 = vmatpush.msra.mxu1 %v67_v3  ;;  %7537 = vmatpush.msra.mxu2 %v68_v11  ;;  %v237_v26 = vld [vmem:[%s14690_s3 + $0x60] sm:$0xff]  ;;  %v234_v28 = vld [vmem:[%s14690_s3 + $0x48] sm:$0xff]  ;;  %v248_v29 = vld [vmem:[%s14690_s3 + $0xb8] sm:$0xff] }
   0xb   :  { %117 = vmatpush.msra.mxu0 %v63_v2  ;;  %277 = vmatpush.msra.mxu3 %v258_v9  ;;  %v231_v30 = vld [vmem:[%s14690_s3 + $0x30] sm:$0xff]  ;;  %v8052_v31 = vld [vmem:[%s14691_s0 + $0x18] sm:$0xff]  ;;  %v59_v34 = vld [vmem:[%s14691_s0 + $0x20] sm:$0xff] }
   0xc   :  { %6279 = vmatmul.msk.f32.vlgmr.msra.gmra.mxu0 %vm77_vm0, %v7956_v5  ;;  %158 = vmatpush.msra.mxu1 %v64_v6  ;;  %v65_v32 = vld [vmem:[%s14710_s23 + $0x10] sm:$0xff]  ;;  %v228_v33 = vld [vmem:[%s14690_s3 + $0x18] sm:$0xff]  ;;  %v245_v35 = vld [vmem:[%s14690_s3 + $0xa0] sm:$0xff] }
   0xd   :  { %6287 = vmatmul.msk.f32.vlgmr.msra.gmra.mxu1 %vm77_vm0, %v7956_v5  ;;  %313 = vmatpush.msrb.mxu0 %v272_v10  ;;  %v225_v36 = vld [vmem:[%s14690_s3] sm:$0xff]  ;;  %v242_v37 = vld [vmem:[%s14690_s3 + $0x88] sm:$0xff]  ;;  %v8080_v38 = vld [vmem:[%s14690_s3 + $0x170] sm:$0xff] }
   0xe   :  { %198 = vmatpush.msrb.mxu1 %v68_v11  ;;  %278 = vmatpush.msra.mxu3 %v255_v12  ;;  %v239_v39 = vld [vmem:[%s14690_s3 + $0x70] sm:$0xff]  ;;  %v8089_v41 = vld [vmem:[%s14690_s3 + $0x158] sm:$0xff]  ;;  %v8095_v42 = vld [vmem:[%s14690_s3 + $0x140] sm:$0xff] }
   0xf   :  { %314 = vmatpush.msrb.mxu0 %v269_v13  ;;  %7538 = vmatpush.msra.mxu2 %v65_v32  ;;  %v60_v43 = vld [vmem:[%s14691_s0 + $0x28] sm:$0xff]  ;;  %v236_v44 = vld [vmem:[%s14690_s3 + $0x58] sm:$0xff]  ;;  %v233_v46 = vld [vmem:[%s14690_s3 + $0x40] sm:$0xff] }
  0x10   :  { %279 = vmatpush.msra.mxu3 %v252_v16  ;;  %199 = vmatpush.msrb.mxu1 %v65_v32  ;;  %v8108_v45 = vld [vmem:[%s14690_s3 + $0x128] sm:$0xff]  ;;  %v8119_v47 = vld [vmem:[%s14690_s3 + $0x110] sm:$0xff]  ;;  %v8128_v49 = vld [vmem:[%s14690_s3 + $0xf8] sm:$0xff] }
  0x11   :  { %315 = vmatpush.msrb.mxu0 %v266_v15  ;;  %6299 = vmatmul.msk.f32.vlgmr.msra.gmra.mxu2 %vm77_vm0, %v59_v34  ;;  %v230_v48 = vld [vmem:[%s14690_s3 + $0x28] sm:$0xff]  ;;  %v8134_v50 = vld [vmem:[%s14690_s3 + $0xe0] sm:$0xff]  ;;  %v61_v51 = vld [vmem:[%s14691_s0 + $0x30] sm:$0xff] }
  0x12   :  { %280 = vmatpush.msra.mxu3 %v249_v18  ;;  %v227_v52 = vld [vmem:[%s14690_s3 + $0x10] sm:$0xff]  ;;  %v8147_v53 = vld [vmem:[%s14690_s3 + $0xc8] sm:$0xff]  ;;  %v8161_v55 = vld [vmem:[%s14690_s3 + $0x98] sm:$0xff] }
  0x13   :  { %316 = vmatpush.msrb.mxu0 %v263_v17  ;;  %v8155_v54 = vld [vmem:[%s14690_s3 + $0xb0] sm:$0xff]  ;;  %v8167_v56 = vld [vmem:[%s14690_s3 + $0x80] sm:$0xff]  ;;  %v62_v57 = vld [vmem:[%s14691_s0 + $0x38] sm:$0xff] }
  0x14   :  { %6280 = vmatmul.msk.f32.gmra.mxu0 %vm77_vm0, %v7989_v14  ;;  %281 = vmatpush.msra.mxu3 %v246_v20  ;;  %v8177_v58 = vld [vmem:[%s14690_s3 + $0x68] sm:$0xff]  ;;  %v8185_v59 = vld [vmem:[%s14690_s3 + $0x50] sm:$0xff]  ;;  %v8191_v60 = vld [vmem:[%s14690_s3 + $0x38] sm:$0xff] }
  0x15   :  { %6288 = vmatmul.msk.f32.gmra.mxu1 %vm77_vm0, %v7989_v14  ;;  %317 = vmatpush.msrb.mxu0 %v260_v19  ;;  %v8197_v61 = vld [vmem:[%s14690_s3 + $0x20] sm:$0xff]  ;;  %v8203_v62 = vld [vmem:[%s14690_s3 + $0x8] sm:$0xff]  ;;  %v431_v2 = vld [vmem:[%s14693_s2 + $0x170] sm:$0xff] }
  0x16   :  { %282 = vmatpush.msra.mxu3 %v243_v22  ;;  %462 = vmatpush.msrb.mxu2 %v431_v2  ;;  %v428_v3 = vld [vmem:[%s14693_s2 + $0x158] sm:$0xff]  ;;  %v422_v6 = vld [vmem:[%s14693_s2 + $0x128] sm:$0xff]  ;;  %v419_v8 = vld [vmem:[%s14693_s2 + $0x110] sm:$0xff] }
  0x17   :  { %318 = vmatpush.msrb.mxu0 %v257_v21  ;;  %v430_v7 = vld [vmem:[%s14693_s2 + $0x168] sm:$0xff]  ;;  %v427_v10 = vld [vmem:[%s14693_s2 + $0x150] sm:$0xff]  ;;  %v416_v11 = vld [vmem:[%s14693_s2 + $0xf8] sm:$0xff] }
  0x18   :  { %283 = vmatpush.msra.mxu3 %v240_v24  ;;  %463 = vmatpush.msrb.mxu2 %v428_v3  ;;  %v424_v12 = vld [vmem:[%s14693_s2 + $0x138] sm:$0xff]  ;;  %v413_v13 = vld [vmem:[%s14693_s2 + $0xe0] sm:$0xff]  ;;  %v410_v15 = vld [vmem:[%s14693_s2 + $0xc8] sm:$0xff] }
  0x19   :  { %319 = vmatpush.msrb.mxu0 %v254_v25  ;;  %6300 = vmatmul.msk.f32.gmra.mxu2 %vm77_vm0, %v60_v43  ;;  %v418_v17 = vld [vmem:[%s14693_s2 + $0x108] sm:$0xff]  ;;  %v407_v18 = vld [vmem:[%s14693_s2 + $0xb0] sm:$0xff]  ;;  %v8274_v19 = vld [vmem:[%s14694_s4] sm:$0x7] }
  0x1a   :  { %284 = vmatpush.msra.mxu3 %v237_v26  ;;  %442 = vmatpush.msra.mxu1 %v430_v7  ;;  %v415_v20 = vld [vmem:[%s14693_s2 + $0xf0] sm:$0xff]  ;;  %v404_v21 = vld [vmem:[%s14693_s2 + $0x98] sm:$0xff]  ;;  %v401_v24 = vld [vmem:[%s14693_s2 + $0x80] sm:$0xff] }
  0x1b   :  { %320 = vmatpush.msrb.mxu0 %v251_v27  ;;  %v412_v22 = vld [vmem:[%s14693_s2 + $0xd8] sm:$0xff]  ;;  %v409_v25 = vld [vmem:[%s14693_s2 + $0xc0] sm:$0xff]  ;;  %v398_v26 = vld [vmem:[%s14693_s2 + $0x68] sm:$0xff]  ;;  %v8297_v27 = vperm.slane %v8274_v19, 0 }
  0x1c   :  { %6281 = vmatmul.msk.f32.gmra.mxu0 %vm77_vm0, %v8022_v23  ;;  %285 = vmatpush.msra.mxu3 %v234_v28  ;;  %v6351_v2 = vld [vmem:[%s14690_s3 + $0x2e8] sm:$0xff]  ;;  %v6350_v3 = vld [vmem:[%s14690_s3 + $0x2e0] sm:$0xff]  ;;  %v6348_v7 = vld [vmem:[%s14690_s3 + $0x2d0] sm:$0xff] }
  0x1d   :  { %6289 = vmatmul.msk.f32.gmra.mxu1 %vm77_vm0, %v8022_v23  ;;  %321 = vmatpush.msrb.mxu0 %v248_v29  ;;  %v406_v29 = vld [vmem:[%s14693_s2 + $0xa8] sm:$0xff] }
  0x1e   :  { %286 = vmatpush.msra.mxu3 %v231_v30  ;;  %443 = vmatpush.msra.mxu1 %v427_v10  ;;  %v395_v30 = vld [vmem:[%s14693_s2 + $0x50] sm:$0xff]  ;;  %v388_v10 = vld [vmem:[%s14693_s2 + $0x18] sm:$0xff] }
  0x1f   :  { %322 = vmatpush.msrb.mxu0 %v245_v35 }
  0x20   :  { %287 = vmatpush.msra.mxu3 %v228_v33  ;;  %444 = vmatpush.msra.mxu1 %v424_v12  ;;  %v403_v33 = vld [vmem:[%s14693_s2 + $0x90] sm:$0xff]  ;;  %v6345_v12 = vld [vmem:[%s14690_s3 + $0x2b8] sm:$0xff] }
  0x21   :  { %323 = vmatpush.msrb.mxu0 %v242_v37  ;;  %6301 = vmatmul.msk.f32.gmra.mxu2 %vm77_vm0, %v61_v51  ;;  %v389_v37 = vld [vmem:[%s14693_s2 + $0x20] sm:$0xff] }
  0x22   :  { %288 = vmatpush.msra.mxu3 %v225_v36  ;;  %v400_v36 = vld [vmem:[%s14693_s2 + $0x78] sm:$0xff] }
  0x23   :  { %289 = vmatmul.f32.vlgmr.msra.gmra.mxu3 %v14707_v40  ;;  %324 = vmatpush.msrb.mxu0 %v239_v39 }
  0x24   :  { %6282 = vmatmul.msk.f32.gmra.mxu0 %vm77_vm0, %v8052_v31  ;;  %293 = vmatpush.msrb.mxu3 %v8080_v38 }
  0x25   :  { %6290 = vmatmul.msk.f32.gmra.mxu1 %vm77_vm0, %v8052_v31  ;;  %325 = vmatpush.msrb.mxu0 %v236_v44  ;;  %v397_v44 = vld [vmem:[%s14693_s2 + $0x60] sm:$0xff] }
  0x26   :  { %294 = vmatpush.msrb.mxu3 %v8089_v41 }
  0x27   :  { %326 = vmatpush.msrb.mxu0 %v233_v46  ;;  %v386_v46 = vld [vmem:[%s14693_s2 + $0x8] sm:$0xff] }
  0x28   :  { %295 = vmatpush.msrb.mxu3 %v8095_v42 }
  0x29   :  { %327 = vmatpush.msrb.mxu0 %v230_v48  ;;  %6302 = vmatmul.msk.f32.gmra.mxu2 %vm77_vm0, %v62_v57  ;;  %v432_v48 = vld [vmem:[%s14693_s2 + $0x178] sm:$0xff] }
  0x2a   :  { %296 = vmatpush.msrb.mxu3 %v8108_v45 }
  0x2b   :  { %328 = vmatpush.msrb.mxu0 %v227_v52  ;;  %v394_v52 = vld [vmem:[%s14693_s2 + $0x48] sm:$0xff] }
  0x2c   :  { %6283 = vmatmul.msk.f32.gmra.mxu0 %vm77_vm0, %v59_v34  ;;  %297 = vmatpush.msrb.mxu3 %v8119_v47 }
  0x2d   :  { %6291 = vmatmul.msk.f32.gmra.mxu1 %vm77_vm0, %v59_v34  ;;  %v392_v34 = vld [vmem:[%s14693_s2 + $0x38] sm:$0xff]  ;;  %551 = vmatpush.msra.mxu0 %v6351_v2  ;;  %v405_v2 = vld [vmem:[%s14693_s2 + $0xa0] sm:$0xff] }
  0x2e   :  { %298 = vmatpush.msrb.mxu3 %v8128_v49 }
  0x2f   :  { %552 = vmatpush.msra.mxu0 %v6348_v7  ;;  %v402_v7 = vld [vmem:[%s14693_s2 + $0x88] sm:$0xff] }
  0x30   :  { %299 = vmatpush.msrb.mxu3 %v8134_v50 }
  0x31   :  { %553 = vmatpush.msra.mxu0 %v6345_v12 }
  0x32   :  { %300 = vmatpush.msrb.mxu3 %v8147_v53 }
  0x34   :  { %6284 = vmatmul.msk.f32.gmra.mxu0 %vm77_vm0, %v60_v43  ;;  %301 = vmatpush.msrb.mxu3 %v8155_v54 }
  0x35   :  { %6292 = vmatmul.msk.f32.gmra.mxu1 %vm77_vm0, %v60_v43 }
  0x36   :  { %302 = vmatpush.msrb.mxu3 %v8161_v55 }
  0x38   :  { %303 = vmatpush.msrb.mxu3 %v8167_v56 }
  0x3a   :  { %304 = vmatpush.msrb.mxu3 %v8177_v58 }
  0x3c   :  { %6285 = vmatmul.msk.f32.gmra.mxu0 %vm77_vm0, %v61_v51  ;;  %305 = vmatpush.msrb.mxu3 %v8185_v59 }
  0x3d   :  { %6293 = vmatmul.msk.f32.gmra.mxu1 %vm77_vm0, %v61_v51  ;;  %v6353_v51 = vld [vmem:[%s14690_s3 + $0x2f8] sm:$0xff] }
  0x3e   :  { %306 = vmatpush.msrb.mxu3 %v8191_v60 }
  0x40   :  { %307 = vmatpush.msrb.mxu3 %v8197_v61 }
  0x42   :  { %308 = vmatpush.msrb.mxu3 %v8203_v62 }
  0x43   :  { %309 = vmatmul.f32.vlgmr.msrb.gmra.mxu3 %v14707_v40 }
  0x44   :  { %6286 = vmatmul.msk.f32.gmra.mxu0 %vm77_vm0, %v62_v57  ;;  %482 = vmatpush.msra.mxu3 %v432_v48  ;;  %v8439_v48 = vld [vmem:[%s14690_s3 + $0x240] sm:$0xff] }
  0x45   :  { %6294 = vmatmul.msk.f32.gmra.mxu1 %vm77_vm0, %v62_v57 }
  0x4c   :  { %329 = vmatmul.f32.vlgmr.msrb.gmra.mxu0 %v14707_v40 }
  0x4d   :  { %6295 = vmatmul.msk.f32.vlgmr.msrb.gmra.mxu1 %vm77_vm0, %v7956_v5  ;;  %v425_v5 = vld [vmem:[%s14693_s2 + $0x140] sm:$0xff] }
  0x4e   :  { %464 = vmatpush.msrb.mxu2 %v425_v5  ;;  %v391_v5 = vld [vmem:[%s14693_s2 + $0x30] sm:$0xff] }
  0x50   :  { %465 = vmatpush.msrb.mxu2 %v422_v6  ;;  %v426_v6 = vld [vmem:[%s14693_s2 + $0x148] sm:$0xff] }
  0x52   :  { %466 = vmatpush.msrb.mxu2 %v419_v8  ;;  %v6347_v8 = vld [vmem:[%s14690_s3 + $0x2c8] sm:$0xff] }
  0x54   :  { %467 = vmatpush.msrb.mxu2 %v416_v11  ;;  %v423_v11 = vld [vmem:[%s14693_s2 + $0x130] sm:$0xff] }
  0x55   :  { %6296 = vmatmul.msk.f32.gmra.mxu1 %vm77_vm0, %v7989_v14  ;;  %v421_v14 = vld [vmem:[%s14693_s2 + $0x120] sm:$0xff] }
  0x56   :  { %468 = vmatpush.msrb.mxu2 %v413_v13  ;;  %445 = vmatpush.msra.mxu1 %v421_v14  ;;  %v6344_v13 = vld [vmem:[%s14690_s3 + $0x2b0] sm:$0xff]  ;;  %v385_v14 = vld [vmem:[%s14693_s2] sm:$0xff] }
  0x58   :  { %469 = vmatpush.msrb.mxu2 %v410_v15  ;;  %446 = vmatpush.msra.mxu1 %v418_v17  ;;  %v420_v17 = vld [vmem:[%s14693_s2 + $0x118] sm:$0xff] }
  0x5a   :  { %470 = vmatpush.msrb.mxu2 %v407_v18  ;;  %447 = vmatpush.msra.mxu1 %v415_v20  ;;  %v6342_v18 = vld [vmem:[%s14690_s3 + $0x2a0] sm:$0xff]  ;;  %v6352_v20 = vld [vmem:[%s14690_s3 + $0x2f0] sm:$0xff] }
  0x5b   :  { %554 = vmatpush.msra.mxu0 %v6342_v18  ;;  %v8493_v18 = vld [vmem:[%s14690_s3 + $0x1f8] sm:$0xff] }
  0x5c   :  { %471 = vmatpush.msrb.mxu2 %v404_v21  ;;  %448 = vmatpush.msra.mxu1 %v412_v22  ;;  %v6341_v22 = vld [vmem:[%s14690_s3 + $0x298] sm:$0xff] }
  0x5d   :  { %6297 = vmatmul.msk.f32.gmra.mxu1 %vm77_vm0, %v8022_v23 }
  0x5e   :  { %472 = vmatpush.msrb.mxu2 %v401_v24  ;;  %449 = vmatpush.msra.mxu1 %v409_v25  ;;  %v417_v24 = vld [vmem:[%s14693_s2 + $0x100] sm:$0xff]  ;;  %v6339_v25 = vld [vmem:[%s14690_s3 + $0x288] sm:$0xff] }
  0x5f   :  { %555 = vmatpush.msra.mxu0 %v6339_v25  ;;  %v6328_v25 = vld [vmem:[%s14690_s3 + $0x230] sm:$0xff] }
  0x60   :  { %473 = vmatpush.msrb.mxu2 %v398_v26  ;;  %450 = vmatpush.msra.mxu1 %v406_v29  ;;  %v6349_v26 = vld [vmem:[%s14690_s3 + $0x2d8] sm:$0xff]  ;;  %v6338_v29 = vld [vmem:[%s14690_s3 + $0x280] sm:$0xff] }
  0x62   :  { %474 = vmatpush.msrb.mxu2 %v395_v30  ;;  %451 = vmatpush.msra.mxu1 %v403_v33  ;;  %v6336_v33 = vld [vmem:[%s14690_s3 + $0x270] sm:$0xff] }
  0x63   :  { %556 = vmatpush.msra.mxu0 %v6336_v33  ;;  %v393_v33 = vld [vmem:[%s14693_s2 + $0x40] sm:$0xff] }
  0x64   :  { %475 = vmatpush.msrb.mxu2 %v392_v34  ;;  %452 = vmatpush.msra.mxu1 %v400_v36  ;;  %v6346_v34 = vld [vmem:[%s14690_s3 + $0x2c0] sm:$0xff]  ;;  %v411_v36 = vld [vmem:[%s14693_s2 + $0xd0] sm:$0xff] }
  0x65   :  { %6298 = vmatmul.msk.f32.gmra.mxu1 %vm77_vm0, %v8052_v31 }
  0x66   :  { %476 = vmatpush.msrb.mxu2 %v389_v37  ;;  %453 = vmatpush.msra.mxu1 %v397_v44  ;;  %v8423_v37 = vld [vmem:[%s14690_s3 + $0x258] sm:$0xff]  ;;  %v6332_v44 = vld [vmem:[%s14690_s3 + $0x250] sm:$0xff] }
  0x67   :  { %557 = vmatpush.msra.mxu0 %v8423_v37 }
  0x68   :  { %477 = vmatpush.msrb.mxu2 %v386_v46  ;;  %454 = vmatpush.msra.mxu1 %v394_v52  ;;  %v408_v46 = vld [vmem:[%s14693_s2 + $0xb8] sm:$0xff] }
  0x69   :  { %558 = vmatpush.msra.mxu0 %v8439_v48  ;;  %v6329_v52 = vld [vmem:[%s14690_s3 + $0x238] sm:$0xff] }
  0x6a   :  { %591 = vmatpush.msra.mxu2 %v6353_v51  ;;  %455 = vmatpush.msra.mxu1 %v391_v5  ;;  %v6340_v51 = vld [vmem:[%s14690_s3 + $0x290] sm:$0xff]  ;;  %v6337_v5 = vld [vmem:[%s14690_s3 + $0x278] sm:$0xff] }
  0x6c   :  { %592 = vmatpush.msra.mxu2 %v6350_v3  ;;  %456 = vmatpush.msra.mxu1 %v388_v10  ;;  %v8456_v3 = vld [vmem:[%s14690_s3 + $0x228] sm:$0xff]  ;;  %v6334_v10 = vld [vmem:[%s14690_s3 + $0x260] sm:$0xff] }
  0x6d   :  { %559 = vmatpush.msra.mxu0 %v8456_v3 }
  0x6e   :  { %593 = vmatpush.msra.mxu2 %v6347_v8  ;;  %457 = vmatpush.msra.mxu1 %v385_v14  ;;  %v8471_v8 = vld [vmem:[%s14690_s3 + $0x210] sm:$0xff] }
  0x6f   :  { %560 = vmatpush.msra.mxu0 %v8471_v8 }
  0x70   :  { %594 = vmatpush.msra.mxu2 %v6344_v13  ;;  %571 = vmatpush.msrb.mxu1 %v6352_v20  ;;  %v8483_v13 = vperm.slane %v8274_v19, 1  ;;  %v6331_v20 = vld [vmem:[%s14690_s3 + $0x248] sm:$0xff] }
  0x71   :  { %561 = vmatpush.msra.mxu0 %v8493_v18 }
  0x72   :  { %595 = vmatpush.msra.mxu2 %v6341_v22  ;;  %572 = vmatpush.msrb.mxu1 %v6349_v26  ;;  %v396_v22 = vld [vmem:[%s14693_s2 + $0x58] sm:$0xff] }
  0x74   :  { %596 = vmatpush.msra.mxu2 %v6338_v29  ;;  %573 = vmatpush.msrb.mxu1 %v6346_v34  ;;  %v6317_v29 = vld [vmem:[%s14690_s3 + $0x1d8] sm:$0xff]  ;;  %v8527_v34 = vld [vmem:[%s14690_s3 + $0x1c8] sm:$0xff] }
  0x89   :  { %v119_v63 = vpop.f32.mrf.mxu0 }
  0x8a   :  { %v8219_v0 = vpop.f32.mrf.mxu1  ;;  %v120_v31 = vadd.f32 %v119_v63, %v8297_v27  ;;  %v429_v63 = vld [vmem:[%s14693_s2 + $0x160] sm:$0xff] }
  0x8b   :  { %483 = vmatpush.msra.mxu3 %v429_v63 }
  0x8d   :  { %484 = vmatpush.msra.mxu3 %v426_v6  ;;  %v6326_v6 = vld [vmem:[%s14690_s3 + $0x220] sm:$0xff] }
  0x8f   :  { %485 = vmatpush.msra.mxu3 %v423_v11  ;;  %v6323_v11 = vld [vmem:[%s14690_s3 + $0x208] sm:$0xff] }
  0x91   :  { %v8221_v1 = vpop.f32.mrf.mxu0  ;;  %486 = vmatpush.msra.mxu3 %v420_v17  ;;  %v399_v17 = vld [vmem:[%s14693_s2 + $0x70] sm:$0xff] }
  0x92   :  { %v8229_v4 = vpop.f32.mrf.mxu1 }
  0x93   :  { %487 = vmatpush.msra.mxu3 %v417_v24  ;;  %v8508_v24 = vld [vmem:[%s14690_s3 + $0x1e0] sm:$0xff] }
  0x94   :  { %562 = vmatpush.msra.mxu0 %v8508_v24 }
  0x96   :  { %563 = vmatpush.msra.mxu0 %v8527_v34 }
  0x99   :  { %v8243_v9 = vpop.f32.mrf.mxu0 }
  0x9a   :  { %v8263_v16 = vpop.f32.mrf.mxu1 }
  0xa1   :  { %v8285_v23 = vpop.f32.mrf.mxu0 }
  0xa2   :  { %v8299_v28 = vpop.f32.mrf.mxu1 }
  0xa6   :  { %v290_v32 = vpop.f32.mrf.mxu3 }
  0xa7   :  { %v333_v35 = vadd.f32 %v290_v32, %v120_v31  ;;  %v414_v32 = vld [vmem:[%s14693_s2 + $0xe8] sm:$0xff] }
  0xa8   :  { %488 = vmatpush.msra.mxu3 %v414_v32  ;;  %v161_v32 = vadd.f32 %v8219_v0, %v8483_v13  ;;  %v6314_v0 = vld [vmem:[%s14690_s3 + $0x1c0] sm:$0xff] }
  0xa9   :  { %v8320_v39 = vpop.f32.mrf.mxu0  ;;  %v6303_v43 = vmul.f32 -1.442695, %v333_v35  ;;  %v6335_v35 = vld [vmem:[%s14690_s3 + $0x268] sm:$0xff] }
  0xaa   :  { %v8337_v57 = vpop.f32.mrf.mxu1  ;;  %597 = vmatpush.msra.mxu2 %v6335_v35  ;;  %489 = vmatpush.msra.mxu3 %v411_v36  ;;  %v6325_v35 = vld [vmem:[%s14690_s3 + $0x218] sm:$0xff] }
  0xab   :  { %7574 = vpow2.f32 %v6303_v43  ;;  %v6343_v43 = vld [vmem:[%s14690_s3 + $0x2a8] sm:$0xff] }
  0xac   :  { %574 = vmatpush.msrb.mxu1 %v6343_v43  ;;  %598 = vmatpush.msra.mxu2 %v6332_v44 }
  0xad   :  { %490 = vmatpush.msra.mxu3 %v408_v46  ;;  %v390_v46 = vld [vmem:[%s14693_s2 + $0x28] sm:$0xff] }
  0xae   :  { %575 = vmatpush.msrb.mxu1 %v6340_v51  ;;  %599 = vmatpush.msra.mxu2 %v6329_v52  ;;  %v8544_v51 = vld [vmem:[%s14690_s3 + $0x1b0] sm:$0xff]  ;;  %v6322_v52 = vld [vmem:[%s14690_s3 + $0x200] sm:$0xff] }
  0xaf   :  { %491 = vmatpush.msra.mxu3 %v405_v2  ;;  %564 = vmatpush.msra.mxu0 %v8544_v51 }
  0xb0   :  { %576 = vmatpush.msrb.mxu1 %v6337_v5  ;;  %600 = vmatpush.msra.mxu2 %v6326_v6  ;;  %v6311_v5 = vld [vmem:[%s14690_s3 + $0x1a8] sm:$0xff] }
  0xb1   :  { %v8375_v15 = vpop.f32.mrf.mxu0  ;;  %v7575_v21 = vpop.eup %7574  ;;  %492 = vmatpush.msra.mxu3 %v402_v7  ;;  %v387_v7 = vld [vmem:[%s14693_s2 + $0x10] sm:$0xff] }
  0xb2   :  { %v8401_v30 = vadd.f32 1.0, %v7575_v21  ;;  %v8403_v31 = vpop.f32.mrf.mxu1  ;;  %577 = vmatpush.msrb.mxu1 %v6334_v10  ;;  %601 = vmatpush.msra.mxu2 %v6323_v11  ;;  %v6320_v21 = vld [vmem:[%s14690_s3 + $0x1f0] sm:$0xff]  ;;  %v8559_v10 = vld [vmem:[%s14690_s3 + $0x198] sm:$0xff]  ;;  %v6319_v11 = vld [vmem:[%s14690_s3 + $0x1e8] sm:$0xff] }
  0xb3   :  { %493 = vmatpush.msra.mxu3 %v399_v17  ;;  %565 = vmatpush.msra.mxu0 %v8559_v10  ;;  %v6308_v17 = vld [vmem:[%s14690_s3 + $0x190] sm:$0xff] }
  0xb4   :  { %7576 = vrcp.f32 %v8401_v30  ;;  %578 = vmatpush.msrb.mxu1 %v6331_v20  ;;  %602 = vmatpush.msra.mxu2 %v6320_v21  ;;  %vm343_vm2 = vweird.f32 %v8401_v30 }
  0xb5   :  { %494 = vmatpush.msra.mxu3 %v396_v22  ;;  %v8574_v22 = vld [vmem:[%s14690_s3 + $0x180] sm:$0xff] }
  0xb6   :  { %579 = vmatpush.msrb.mxu1 %v6328_v25  ;;  %603 = vmatpush.msra.mxu2 %v6317_v29  ;;  %v6316_v25 = vld [vmem:[%s14690_s3 + $0x1d0] sm:$0xff] }
  0xb7   :  { %495 = vmatpush.msra.mxu3 %v393_v33  ;;  %566 = vmatpush.msra.mxu0 %v8574_v22  ;;  %v6310_v33 = vld [vmem:[%s14690_s3 + $0x1a0] sm:$0xff] }
  0xb8   :  { %580 = vmatpush.msrb.mxu1 %v6325_v35  ;;  %604 = vmatpush.msra.mxu2 %v6314_v0  ;;  %v349_v0 = vand.u32 2147483648, %v8401_v30 }
  0xb9   :  { %v8448_v63 = vpop.f32.mrf.mxu0  ;;  %496 = vmatpush.msra.mxu3 %v390_v46  ;;  %567 = vmatmul.f32.vlgmr.msra.gmra.mxu0 %v14707_v40 }
  0xba   :  { %v8480_v12 = vpop.eup %7576  ;;  %v8485_v14 = vpop.f32.mrf.mxu1  ;;  %581 = vmatpush.msrb.mxu1 %v6322_v52  ;;  %605 = vmatpush.msra.mxu2 %v6311_v5  ;;  %v6307_v52 = vld [vmem:[%s14690_s3 + $0x188] sm:$0xff] }
  0xbb   :  { %v339_v26 = vmul.f32 %v8480_v12, %v8401_v30  ;;  %497 = vmatpush.msra.mxu3 %v387_v7  ;;  %vm344_vm1 = vweird.f32 %v8480_v12  ;;  %v350_v7 = vor.u32 1.1754944e-38, %v349_v0 }
  0xbc   :  { %582 = vmatpush.msrb.mxu1 %v6319_v11  ;;  %606 = vmatpush.msra.mxu2 %v6308_v17  ;;  %vm345_vm3 = vmor %vm343_vm2, %vm344_vm1 }
  0xbd   :  { %v340_v2 = vsub.f32 1.0, %v339_v26  ;;  %v6313_v26 = vld [vmem:[%s14690_s3 + $0x1b8] sm:$0xff] }
  0xbe   :  { %583 = vmatpush.msrb.mxu1 %v6316_v25 }
  0xbf   :  { %v341_v21 = vmul.f32 %v8480_v12, %v340_v2 }
  0xc0   :  { %584 = vmatpush.msrb.mxu1 %v6313_v26 }
  0xc1   :  { %v8536_v43 = vpop.f32.mrf.mxu0  ;;  %v342_v29 = vadd.f32 %v8480_v12, %v341_v21 }
  0xc2   :  { %v8568_v20 = vpop.f32.mrf.mxu1  ;;  %585 = vmatpush.msrb.mxu1 %v6310_v33 }
  0xc3   :  { %v346_v2 = vsel %vm345_vm3, %v8480_v12, %v342_v29 }
  0xc4   :  { %586 = vmatpush.msrb.mxu1 %v6307_v52 }
  0xc6   :  { %v310_v36 = vpop.f32.mrf.mxu3 }
  0xc7   :  { %v353_v44 = vadd.f32 %v310_v36, %v161_v32  ;;  %v7544_v32 = vld [vmem:[%s14692_s5] ss:$0 sm:$0xff] }
  0xc9   :  { %v6304_v6 = vmul.f32 -1.442695, %v353_v44  ;;  %v330_v36 = vpop.f32.mrf.mxu0  ;;  %v347_v44 = vand.u32 2147483647, %v8401_v30 }
  0xca   :  { %v377_v5 = vadd.f32 %v7544_v32, %v330_v36  ;;  %v201_v11 = vpop.f32.mrf.mxu1 }
  0xcb   :  { %7578 = vpow2.f32 %v6304_v6  ;;  %v8600_v6 = vperm.slane %v8274_v19, 2  ;;  %vm348_vm4 = vcmp.eq.f32.partialorder %v347_v44, 8.507059e+37 }
  0xcc   :  { %v351_v17 = vsel %vm348_vm4, %v350_v7, %v346_v2 }
  0xcd   :  { %v378_v21 = vmul.f32 %v377_v5, %v351_v17  ;;  %v202_v30 = vadd.f32 %v201_v11, %v8600_v6  ;;  %v6451_v11 = vld [vmem:[%s14690_s3 + $0x468] sm:$0xff]  ;;  %v6442_v17 = vld [vmem:[%s14690_s3 + $0x420] sm:$0xff] }
  0xcf   :  { %v379_v33 = vadd.f32 %v378_v21, %v202_v30  ;;  %v6439_v21 = vld [vmem:[%s14690_s3 + $0x408] sm:$0xff]  ;;  %v14711_v30 = vmov 0.0  }
  0xd1   :  { %v7579_v35 = vpop.eup %7578 }
  0xd2   :  { %v357_v46 = vadd.f32 1.0, %v7579_v35 }
  0xd4   :  { %7580 = vrcp.f32 %v357_v46  ;;  %v369_v40 = vand.u32 2147483648, %v357_v46  ;;  %v367_v12 = vand.u32 2147483647, %v357_v46  ;;  %vm363_vm6 = vweird.f32 %v357_v46 }
  0xd5   :  { %7582 = vtanh.f32 %v379_v33  ;;  %v6430_v33 = vld [vmem:[%s14690_s3 + $0x3c0] sm:$0xff] }
  0xd6   :  { %v370_v19 = vor.u32 1.1754944e-38, %v369_v40  ;;  %vm368_vm8 = vcmp.eq.f32.partialorder %v367_v12, 8.507059e+37  ;;  %v6448_v40 = vld [vmem:[%s14690_s3 + $0x450] sm:$0xff]  ;;  %v6421_v12 = vld [vmem:[%s14690_s3 + $0x378] sm:$0xff] }
  0xda   :  { %v7581_v25 = vpop.eup %7580 }
  0xdb   :  { %v359_v26 = vmul.f32 %v7581_v25, %v357_v46  ;;  %vm364_vm5 = vweird.f32 %v7581_v25  ;;  %v7583_v44 = vpop.eup %7582  ;;  %v6445_v46 = vld [vmem:[%s14690_s3 + $0x438] sm:$0xff] }
  0xdc   :  { %vm365_vm7 = vmor %vm363_vm6, %vm364_vm5 }
  0xdd   :  { %v360_v35 = vsub.f32 1.0, %v359_v26  ;;  %v6433_v26 = vld [vmem:[%s14690_s3 + $0x3d8] sm:$0xff] }
  0xdf   :  { %v361_v52 = vmul.f32 %v7581_v25, %v360_v35  ;;  %v6427_v35 = vld [vmem:[%s14690_s3 + $0x3a8] sm:$0xff] }
  0xe1   :  { %v362_v29 = vadd.f32 %v7581_v25, %v361_v52  ;;  %v6424_v52 = vld [vmem:[%s14690_s3 + $0x390] sm:$0xff] }
  0xe3   :  { %v366_v32 = vsel %vm365_vm7, %v7581_v25, %v362_v29  ;;  %v6436_v25 = vld [vmem:[%s14690_s3 + $0x3f0] sm:$0xff]  ;;  %v6418_v29 = vld [vmem:[%s14690_s3 + $0x360] sm:$0xff] }
  0xe4   :  { %v371_v36 = vsel %vm368_vm8, %v370_v19, %v366_v32  ;;  %v6415_v19 = vld [vmem:[%s14690_s3 + $0x348] sm:$0xff]  ;;  %v6412_v32 = vld [vmem:[%s14690_s3 + $0x330] sm:$0xff] }
  0xe5   :  { %v381_v0 = vsub.f32 1.0, %v371_v36  ;;  %v383_v5 = vmul.f32 0.0, %v371_v36  ;;  %v6409_v36 = vld [vmem:[%s14690_s3 + $0x318] sm:$0xff] }
  0xe7   :  { %v382_v2 = vmul.f32 %v7583_v44, %v381_v0  ;;  %v6406_v0 = vld [vmem:[%s14690_s3 + $0x300] sm:$0xff]  ;;  %v6402_v44 = vld [vmem:[%s14693_s2 + $0x2e8] sm:$0xff] }
  0xe8   :  { %722 = vmatpush.msrb.mxu3 %v6402_v44  ;;  %v6368_v44 = vld [vmem:[%s14693_s2 + $0x1d8] sm:$0xff] }
  0xe9   :  { %v8603_v7 = vadd.f32 %v383_v5, %v382_v2  ;;  %v6399_v2 = vld [vmem:[%s14693_s2 + $0x2d0] sm:$0xff]  ;;  %v6404_v5 = vld [vmem:[%s14693_s2 + $0x2f8] sm:$0xff] }
  0xea   :  { %723 = vmatpush.msrb.mxu3 %v6399_v2  ;;  %v6400_v2 = vld [vmem:[%s14693_s2 + $0x2d8] sm:$0xff] }
  0xeb   :  { %458 = vmatmul.f32.vlgmr.msra.gmra.mxu1 %v8603_v7  ;;  %478 = vmatmul.f32.vlgmr.msrb.gmra.mxu2 %v8603_v7 }
  0xec   :  { %498 = vmatmul.f32.vlgmr.msra.gmra.mxu3 %v8603_v7  ;;  %831 = vmatpush.msrb.mxu2 %v6451_v11  ;;  %v6396_v11 = vld [vmem:[%s14693_s2 + $0x2b8] sm:$0xff] }
  0xed   :  { %762 = vmatpush.msra.mxu1 %v6404_v5  ;;  %724 = vmatpush.msrb.mxu3 %v6396_v11  ;;  %v6449_v5 = vld [vmem:[%s14690_s3 + $0x458] sm:$0xff]  ;;  %v6365_v11 = vld [vmem:[%s14693_s2 + $0x1c0] sm:$0xff] }
  0xee   :  { %832 = vmatpush.msrb.mxu2 %v6448_v40  ;;  %v6401_v40 = vld [vmem:[%s14693_s2 + $0x2e0] sm:$0xff] }
  0xef   :  { %763 = vmatpush.msra.mxu1 %v6401_v40  ;;  %v6397_v40 = vld [vmem:[%s14693_s2 + $0x2c0] sm:$0xff] }
  0xf0   :  { %833 = vmatpush.msrb.mxu2 %v6445_v46  ;;  %v6393_v46 = vld [vmem:[%s14693_s2 + $0x2a0] sm:$0xff] }
  0xf1   :  { %725 = vmatpush.msrb.mxu3 %v6393_v46 }
  0xf2   :  { %834 = vmatpush.msrb.mxu2 %v6442_v17  ;;  %v6390_v17 = vld [vmem:[%s14693_s2 + $0x288] sm:$0xff] }
  0xf3   :  { %587 = vmatmul.f32.vlgmr.msrb.gmra.mxu1 %v14711_v30  ;;  %607 = vmatmul.f32.vlgmr.msra.gmra.mxu2 %v14711_v30 }
  0xf4   :  { %835 = vmatpush.msrb.mxu2 %v6439_v21  ;;  %726 = vmatpush.msrb.mxu3 %v6390_v17  ;;  %v6366_v21 = vld [vmem:[%s14693_s2 + $0x1c8] sm:$0xff] }
  0xf5   :  { %v6362_v17 = vld [vmem:[%s14693_s2 + $0x1a8] sm:$0xff] }
  0xf6   :  { %836 = vmatpush.msrb.mxu2 %v6436_v25  ;;  %v6380_v25 = vld [vmem:[%s14693_s2 + $0x238] sm:$0xff] }
  0xf8   :  { %837 = vmatpush.msrb.mxu2 %v6433_v26 }
  0xfa   :  { %838 = vmatpush.msrb.mxu2 %v6430_v33  ;;  %v6363_v33 = vld [vmem:[%s14693_s2 + $0x1b0] sm:$0xff] }
  0xfc   :  { %839 = vmatpush.msrb.mxu2 %v6427_v35  ;;  %v6377_v35 = vld [vmem:[%s14693_s2 + $0x220] sm:$0xff] }
  0xfe   :  { %840 = vmatpush.msrb.mxu2 %v6424_v52  ;;  %v6360_v52 = vld [vmem:[%s14693_s2 + $0x198] sm:$0xff] }
 0x100   :  { %841 = vmatpush.msrb.mxu2 %v6421_v12  ;;  %v6374_v12 = vld [vmem:[%s14693_s2 + $0x208] sm:$0xff] }
 0x102   :  { %842 = vmatpush.msrb.mxu2 %v6418_v29  ;;  %v6357_v29 = vld [vmem:[%s14693_s2 + $0x180] sm:$0xff] }
 0x104   :  { %843 = vmatpush.msrb.mxu2 %v6415_v19  ;;  %v6371_v19 = vld [vmem:[%s14693_s2 + $0x1f0] sm:$0xff] }
 0x106   :  { %844 = vmatpush.msrb.mxu2 %v6412_v32  ;;  %v6403_v32 = vld [vmem:[%s14693_s2 + $0x2f0] sm:$0xff] }
 0x107   :  { %742 = vmatpush.msrb.mxu0 %v6403_v32 }
 0x108   :  { %845 = vmatpush.msrb.mxu2 %v6409_v36  ;;  %v6452_v36 = vld [vmem:[%s14690_s3 + $0x470] sm:$0xff] }
 0x109   :  { %743 = vmatpush.msrb.mxu0 %v6400_v2  ;;  %v978_v2 = vld [vmem:[%s14690_s3 + $0x108] sm:$0xff] }
 0x10a   :  { %846 = vmatpush.msrb.mxu2 %v6406_v0 }
 0x10b   :  { %847 = vmatmul.f32.vlgmr.msrb.gmra.mxu2 %v14711_v30  ;;  %744 = vmatpush.msrb.mxu0 %v6397_v40  ;;  %v6376_v40 = vld [vmem:[%s14693_s2 + $0x218] sm:$0xff] }
 0x10c   :  { %1013 = vmatpush.msra.mxu2 %v8080_v38  ;;  %v6398_v38 = vld [vmem:[%s14693_s2 + $0x2c8] sm:$0xff] }
 0x10d   :  { %764 = vmatpush.msra.mxu1 %v6398_v38  ;;  %v6446_v38 = vld [vmem:[%s14690_s3 + $0x440] sm:$0xff] }
 0x10e   :  { %1014 = vmatpush.msra.mxu2 %v8089_v41  ;;  %v6387_v41 = vld [vmem:[%s14693_s2 + $0x270] sm:$0xff] }
 0x10f   :  { %727 = vmatpush.msrb.mxu3 %v6387_v41  ;;  %v6394_v41 = vld [vmem:[%s14693_s2 + $0x2a8] sm:$0xff] }
 0x110   :  { %1015 = vmatpush.msra.mxu2 %v8095_v42  ;;  %v6384_v42 = vld [vmem:[%s14693_s2 + $0x258] sm:$0xff]  ;;  %745 = vmatpush.msrb.mxu0 %v6394_v41 }
 0x111   :  { %728 = vmatpush.msrb.mxu3 %v6384_v42  ;;  %v6443_v42 = vld [vmem:[%s14690_s3 + $0x428] sm:$0xff] }
 0x112   :  { %1016 = vmatpush.msra.mxu2 %v8108_v45  ;;  %v8706_v45 = vpop.f32.mrf.mxu2 }
 0x114   :  { %1017 = vmatpush.msra.mxu2 %v8119_v47  ;;  %v6381_v47 = vld [vmem:[%s14693_s2 + $0x240] sm:$0xff] }
 0x115   :  { %729 = vmatpush.msrb.mxu3 %v6381_v47  ;;  %v6359_v47 = vld [vmem:[%s14693_s2 + $0x190] sm:$0xff] }
 0x116   :  { %1018 = vmatpush.msra.mxu2 %v8128_v49  ;;  %v6395_v49 = vld [vmem:[%s14693_s2 + $0x2b0] sm:$0xff] }
 0x117   :  { %765 = vmatpush.msra.mxu1 %v6395_v49  ;;  %v6391_v49 = vld [vmem:[%s14693_s2 + $0x290] sm:$0xff] }
 0x118   :  { %1019 = vmatpush.msra.mxu2 %v8134_v50  ;;  %v8714_v50 = vpop.f32.mrf.mxu1  ;;  %746 = vmatpush.msrb.mxu0 %v6391_v49  ;;  %v972_v49 = vld [vmem:[%s14690_s3 + $0xd8] sm:$0xff] }
 0x11a   :  { %1020 = vmatpush.msra.mxu2 %v8147_v53  ;;  %v6378_v53 = vld [vmem:[%s14693_s2 + $0x228] sm:$0xff] }
 0x11b   :  { %730 = vmatpush.msrb.mxu3 %v6378_v53  ;;  %v6440_v53 = vld [vmem:[%s14690_s3 + $0x410] sm:$0xff] }
 0x11c   :  { %1021 = vmatpush.msra.mxu2 %v8155_v54  ;;  %v6392_v54 = vld [vmem:[%s14693_s2 + $0x298] sm:$0xff] }
 0x11d   :  { %766 = vmatpush.msra.mxu1 %v6392_v54  ;;  %v990_v54 = vld [vmem:[%s14690_s3 + $0x168] sm:$0xff] }
 0x11e   :  { %1022 = vmatpush.msra.mxu2 %v8161_v55  ;;  %v6375_v55 = vld [vmem:[%s14693_s2 + $0x210] sm:$0xff] }
 0x11f   :  { %731 = vmatpush.msrb.mxu3 %v6375_v55  ;;  %v8820_v55 = vld [vmem:[%s14694_s4 + $0x3] sm:$0x7] }
 0x120   :  { %1023 = vmatpush.msra.mxu2 %v8167_v56  ;;  %v6389_v56 = vld [vmem:[%s14693_s2 + $0x280] sm:$0xff]  ;;  %v8748_v26 = vpop.f32.mrf.mxu1 }
 0x121   :  { %767 = vmatpush.msra.mxu1 %v6389_v56  ;;  %v6388_v56 = vld [vmem:[%s14693_s2 + $0x278] sm:$0xff] }
 0x122   :  { %1024 = vmatpush.msra.mxu2 %v8177_v58  ;;  %v6372_v58 = vld [vmem:[%s14693_s2 + $0x1f8] sm:$0xff]  ;;  %747 = vmatpush.msrb.mxu0 %v6388_v56  ;;  %v6370_v56 = vld [vmem:[%s14693_s2 + $0x1e8] sm:$0xff] }
 0x123   :  { %732 = vmatpush.msrb.mxu3 %v6372_v58  ;;  %v6437_v58 = vld [vmem:[%s14690_s3 + $0x3f8] sm:$0xff] }
 0x124   :  { %1025 = vmatpush.msra.mxu2 %v8185_v59  ;;  %v6386_v59 = vld [vmem:[%s14693_s2 + $0x268] sm:$0xff] }
 0x125   :  { %768 = vmatpush.msra.mxu1 %v6386_v59  ;;  %v987_v59 = vld [vmem:[%s14690_s3 + $0x150] sm:$0xff] }
 0x126   :  { %1026 = vmatpush.msra.mxu2 %v8191_v60  ;;  %v8734_v60 = vpop.f32.mrf.mxu2 }
 0x128   :  { %1027 = vmatpush.msra.mxu2 %v8197_v61  ;;  %v6369_v61 = vld [vmem:[%s14693_s2 + $0x1e0] sm:$0xff]  ;;  %v8794_v46 = vpop.f32.mrf.mxu1 }
 0x129   :  { %733 = vmatpush.msrb.mxu3 %v6369_v61 }
 0x12a   :  { %1028 = vmatpush.msra.mxu2 %v8203_v62  ;;  %v6383_v62 = vld [vmem:[%s14693_s2 + $0x250] sm:$0xff] }
 0x12b   :  { %1029 = vmatmul.f32.vlgmr.msra.gmra.mxu2 %v8603_v7  ;;  %769 = vmatpush.msra.mxu1 %v6383_v62  ;;  %v436_v62 = vperm.slane %v8820_v55, 0 }
 0x12c   :  { %734 = vmatpush.msrb.mxu3 %v6366_v21  ;;  %v6385_v21 = vld [vmem:[%s14693_s2 + $0x260] sm:$0xff] }
 0x12d   :  { %770 = vmatpush.msra.mxu1 %v6380_v25  ;;  %v6434_v25 = vld [vmem:[%s14690_s3 + $0x3e0] sm:$0xff]  ;;  %748 = vmatpush.msrb.mxu0 %v6385_v21 }
 0x12e   :  { %735 = vmatpush.msrb.mxu3 %v6363_v33  ;;  %v8774_v0 = vpop.f32.mrf.mxu2  ;;  %v984_v33 = vld [vmem:[%s14690_s3 + $0x138] sm:$0xff] }
 0x12f   :  { %771 = vmatpush.msra.mxu1 %v6377_v35  ;;  %v6382_v35 = vld [vmem:[%s14693_s2 + $0x248] sm:$0xff] }
 0x130   :  { %736 = vmatpush.msrb.mxu3 %v6360_v52  ;;  %v6431_v52 = vld [vmem:[%s14690_s3 + $0x3c8] sm:$0xff]  ;;  %749 = vmatpush.msrb.mxu0 %v6382_v35 }
 0x131   :  { %772 = vmatpush.msra.mxu1 %v6374_v12  ;;  %v981_v12 = vld [vmem:[%s14690_s3 + $0x120] sm:$0xff]  ;;  %v966_v35 = vld [vmem:[%s14690_s3 + $0xa8] sm:$0xff] }
 0x132   :  { %737 = vmatpush.msrb.mxu3 %v6357_v29 }
 0x133   :  { %773 = vmatpush.msra.mxu1 %v6371_v19 }
 0x134   :  { %851 = vmatpush.msra.mxu3 %v6452_v36  ;;  %v6379_v36 = vld [vmem:[%s14693_s2 + $0x230] sm:$0xff] }
 0x135   :  { %774 = vmatpush.msra.mxu1 %v6368_v44  ;;  %v6428_v44 = vld [vmem:[%s14690_s3 + $0x3b0] sm:$0xff]  ;;  %750 = vmatpush.msrb.mxu0 %v6379_v36  ;;  %v6361_v36 = vld [vmem:[%s14693_s2 + $0x1a0] sm:$0xff] }
 0x136   :  { %852 = vmatpush.msra.mxu3 %v6449_v5  ;;  %v8831_v61 = vpop.f32.mrf.mxu2  ;;  %v568_v19 = vpop.f32.mrf.mxu0 }
 0x137   :  { %775 = vmatpush.msra.mxu1 %v6365_v11  ;;  %v437_v11 = vperm.slane %v8820_v55, 1  ;;  %751 = vmatpush.msrb.mxu0 %v6376_v40  ;;  %v6407_v40 = vld [vmem:[%s14690_s3 + $0x308] sm:$0xff] }
 0x138   :  { %853 = vmatpush.msra.mxu3 %v6446_v38  ;;  %v6425_v38 = vld [vmem:[%s14690_s3 + $0x398] sm:$0xff] }
 0x139   :  { %776 = vmatpush.msra.mxu1 %v6362_v17  ;;  %v975_v17 = vld [vmem:[%s14690_s3 + $0xf0] sm:$0xff] }
 0x13a   :  { %854 = vmatpush.msra.mxu3 %v6443_v42  ;;  %v6373_v42 = vld [vmem:[%s14693_s2 + $0x200] sm:$0xff] }
 0x13b   :  { %777 = vmatpush.msra.mxu1 %v6359_v47  ;;  %v6422_v47 = vld [vmem:[%s14690_s3 + $0x380] sm:$0xff]  ;;  %752 = vmatpush.msrb.mxu0 %v6373_v42  ;;  %v951_v42 = vld [vmem:[%s14690_s3 + $0x30] sm:$0xff] }
 0x13c   :  { %855 = vmatpush.msra.mxu3 %v6440_v53 }
 0x13d   :  { %993 = vmatpush.msrb.mxu1 %v990_v54  ;;  %753 = vmatpush.msrb.mxu0 %v6370_v56 }
 0x13e   :  { %856 = vmatpush.msra.mxu3 %v6437_v58  ;;  %v6419_v58 = vld [vmem:[%s14690_s3 + $0x368] sm:$0xff] }
 0x13f   :  { %994 = vmatpush.msrb.mxu1 %v987_v59  ;;  %v969_v59 = vld [vmem:[%s14690_s3 + $0xc0] sm:$0xff] }
 0x140   :  { %857 = vmatpush.msra.mxu3 %v6434_v25  ;;  %v6367_v25 = vld [vmem:[%s14693_s2 + $0x1d0] sm:$0xff] }
 0x141   :  { %995 = vmatpush.msrb.mxu1 %v984_v33  ;;  %v6416_v33 = vld [vmem:[%s14690_s3 + $0x350] sm:$0xff]  ;;  %754 = vmatpush.msrb.mxu0 %v6367_v25  ;;  %v6447_v25 = vld [vmem:[%s14690_s3 + $0x448] sm:$0xff] }
 0x142   :  { %858 = vmatpush.msra.mxu3 %v6431_v52 }
 0x143   :  { %996 = vmatpush.msrb.mxu1 %v981_v12  ;;  %v6364_v12 = vld [vmem:[%s14693_s2 + $0x1b8] sm:$0xff] }
 0x144   :  { %859 = vmatpush.msra.mxu3 %v6428_v44  ;;  %755 = vmatpush.msrb.mxu0 %v6364_v12  ;;  %v6410_v44 = vld [vmem:[%s14690_s3 + $0x320] sm:$0xff] }
 0x145   :  { %997 = vmatpush.msrb.mxu1 %v978_v2  ;;  %v960_v2 = vld [vmem:[%s14690_s3 + $0x78] sm:$0xff] }
 0x146   :  { %860 = vmatpush.msra.mxu3 %v6425_v38  ;;  %756 = vmatpush.msrb.mxu0 %v6361_v36  ;;  %v957_v38 = vld [vmem:[%s14690_s3 + $0x60] sm:$0xff] }
 0x147   :  { %998 = vmatpush.msrb.mxu1 %v975_v17  ;;  %v954_v17 = vld [vmem:[%s14690_s3 + $0x48] sm:$0xff] }
 0x148   :  { %861 = vmatpush.msra.mxu3 %v6422_v47 }
 0x149   :  { %999 = vmatpush.msrb.mxu1 %v972_v49  ;;  %v6453_v49 = vld [vmem:[%s14690_s3 + $0x478] sm:$0xff] }
 0x14a   :  { %862 = vmatpush.msra.mxu3 %v6419_v58  ;;  %v6450_v58 = vld [vmem:[%s14690_s3 + $0x460] sm:$0xff] }
 0x14b   :  { %1000 = vmatpush.msrb.mxu1 %v969_v59  ;;  %v945_v59 = vld [vmem:[%s14690_s3] sm:$0xff] }
 0x14c   :  { %863 = vmatpush.msra.mxu3 %v6416_v33 }
 0x14d   :  { %1001 = vmatpush.msrb.mxu1 %v966_v35 }
 0x168   :  { %v459_v29 = vpop.f32.mrf.mxu1 }
 0x169   :  { %v460_v32 = vadd.f32 %v459_v29, %v436_v62  ;;  %v6413_v29 = vld [vmem:[%s14690_s3 + $0x338] sm:$0xff] }
 0x16a   :  { %864 = vmatpush.msra.mxu3 %v6413_v29  ;;  %v6444_v29 = vld [vmem:[%s14690_s3 + $0x430] sm:$0xff] }
 0x16b   :  { %v611_v5 = vadd.f32 %v568_v19, %v460_v32  ;;  %v963_v19 = vld [vmem:[%s14690_s3 + $0x90] sm:$0xff] }
 0x16c   :  { %1002 = vmatpush.msrb.mxu1 %v963_v19  ;;  %865 = vmatpush.msra.mxu3 %v6410_v44 }
 0x16d   :  { %v6354_v41 = vmul.f32 -1.442695, %v611_v5 }
 0x16e   :  { %v479_v53 = vpop.f32.mrf.mxu2  ;;  %1003 = vmatpush.msrb.mxu1 %v960_v2  ;;  %866 = vmatpush.msra.mxu3 %v6407_v40  ;;  %v6441_v40 = vld [vmem:[%s14690_s3 + $0x418] sm:$0xff] }
 0x16f   :  { %7584 = vpow2.f32 %v6354_v41  ;;  %v480_v54 = vadd.f32 %v479_v53, %v437_v11  ;;  %v6358_v11 = vld [vmem:[%s14693_s2 + $0x188] sm:$0xff]  ;;  %v948_v53 = vld [vmem:[%s14690_s3 + $0x18] sm:$0xff]  ;;  %v499_v36 = vpop.f32.mrf.mxu3 }
 0x170   :  { %v588_v62 = vpop.f32.mrf.mxu1  ;;  %757 = vmatpush.msrb.mxu0 %v6358_v11  ;;  %1004 = vmatpush.msrb.mxu1 %v957_v38 }
 0x171   :  { %v631_v21 = vadd.f32 %v588_v62, %v480_v54 }
 0x172   :  { %1005 = vmatpush.msrb.mxu1 %v954_v17  ;;  %871 = vmatpush.msra.mxu0 %v6453_v49 }
 0x173   :  { %v6355_v52 = vmul.f32 -1.442695, %v631_v21  ;;  %v7545_v21 = vld [vmem:[%s14692_s5 + $0x1] ss:$0 sm:$0xff] }
 0x174   :  { %1006 = vmatpush.msrb.mxu1 %v951_v42  ;;  %872 = vmatpush.msra.mxu0 %v6450_v58  ;;  %v6435_v58 = vld [vmem:[%s14690_s3 + $0x3e8] sm:$0xff] }
 0x175   :  { %v7585_v32 = vpop.eup %7584  ;;  %7586 = vpow2.f32 %v6355_v52 }
 0x176   :  { %v615_v5 = vadd.f32 1.0, %v7585_v32  ;;  %1007 = vmatpush.msrb.mxu1 %v948_v53  ;;  %v608_v33 = vpop.f32.mrf.mxu2  ;;  %873 = vmatpush.msra.mxu0 %v6447_v25  ;;  %v438_v32 = vperm.slane %v8820_v55, 2  ;;  %v6438_v55 = vld [vmem:[%s14690_s3 + $0x400] sm:$0xff] }
 0x177   :  { %v656_v11 = vadd.f32 %v7545_v21, %v608_v33  ;;  %v6432_v21 = vld [vmem:[%s14690_s3 + $0x3d0] sm:$0xff] }
 0x178   :  { %7588 = vrcp.f32 %v615_v5  ;;  %1008 = vmatpush.msrb.mxu1 %v945_v59  ;;  %v627_v35 = vand.u32 2147483648, %v615_v5  ;;  %v625_v12 = vand.u32 2147483647, %v615_v5  ;;  %874 = vmatpush.msra.mxu0 %v6444_v29  ;;  %vm621_vm10 = vweird.f32 %v615_v5 }
 0x179   :  { %v500_v42 = vadd.f32 %v499_v36, %v438_v32  ;;  %v6420_v32 = vld [vmem:[%s14690_s3 + $0x370] sm:$0xff] }
 0x17a   :  { %v628_v38 = vor.u32 1.1754944e-38, %v627_v35  ;;  %875 = vmatpush.msra.mxu0 %v6441_v40  ;;  %vm626_vm12 = vcmp.eq.f32.partialorder %v625_v12, 8.507059e+37  ;;  %v6429_v35 = vld [vmem:[%s14690_s3 + $0x3b8] sm:$0xff]  ;;  %v6423_v12 = vld [vmem:[%s14690_s3 + $0x388] sm:$0xff] }
 0x17b   :  { %v7587_v41 = vpop.eup %7586  ;;  %v992_v40 = vld [vmem:[%s14690_s3 + $0x178] sm:$0xff] }
 0x17c   :  { %v635_v47 = vadd.f32 1.0, %v7587_v41  ;;  %876 = vmatpush.msra.mxu0 %v6438_v55  ;;  %v6411_v55 = vld [vmem:[%s14690_s3 + $0x328] sm:$0xff] }
 0x17e   :  { %v7589_v54 = vpop.eup %7588  ;;  %7590 = vrcp.f32 %v635_v47  ;;  %v645_v59 = vand.u32 2147483647, %v635_v47  ;;  %877 = vmatpush.msra.mxu0 %v6435_v58  ;;  %vm641_vm14 = vweird.f32 %v635_v47  ;;  %v971_v58 = vld [vmem:[%s14690_s3 + $0xd0] sm:$0xff] }
 0x17f   :  { %v617_v56 = vmul.f32 %v7589_v54, %v615_v5  ;;  %vm622_vm9 = vweird.f32 %v7589_v54  ;;  %v647_v5 = vand.u32 2147483648, %v635_v47 }
 0x180   :  { %vm623_vm11 = vmor %vm621_vm10, %vm622_vm9  ;;  %878 = vmatpush.msra.mxu0 %v6432_v21  ;;  %vm646_vm0 = vcmp.eq.f32.partialorder %v645_v59, 8.507059e+37  ;;  %v968_v59 = vld [vmem:[%s14690_s3 + $0xb8] sm:$0xff] }
 0x181   :  { %v618_v62 = vsub.f32 1.0, %v617_v56  ;;  %v648_v25 = vor.u32 1.1754944e-38, %v647_v5  ;;  %v977_v5 = vld [vmem:[%s14690_s3 + $0x100] sm:$0xff]  ;;  %v956_v21 = vld [vmem:[%s14690_s3 + $0x58] sm:$0xff] }
 0x182   :  { %879 = vmatpush.msra.mxu0 %v6429_v35  ;;  %v947_v35 = vld [vmem:[%s14690_s3 + $0x10] sm:$0xff] }
 0x183   :  { %v619_v52 = vmul.f32 %v7589_v54, %v618_v62 }
 0x184   :  { %v7591_v19 = vpop.eup %7590 }
 0x185   :  { %v637_v44 = vmul.f32 %v7591_v19, %v635_v47  ;;  %v620_v2 = vadd.f32 %v7589_v54, %v619_v52  ;;  %vm642_vm13 = vweird.f32 %v7591_v19  ;;  %v6426_v47 = vld [vmem:[%s14690_s3 + $0x3a0] sm:$0xff] }
 0x186   :  { %vm643_vm15 = vmor %vm641_vm14, %vm642_vm13  ;;  %880 = vmatpush.msra.mxu0 %v6426_v47  ;;  %v6502_v47 = vld [vmem:[%s14690_s3 + $0x2d0] sm:$0xff] }
 0x187   :  { %v638_v17 = vsub.f32 1.0, %v637_v44  ;;  %v624_v41 = vsel %vm623_vm11, %v7589_v54, %v620_v2  ;;  %v6417_v2 = vld [vmem:[%s14690_s3 + $0x358] sm:$0xff] }
 0x188   :  { %v629_v49 = vsel %vm626_vm12, %v628_v38, %v624_v41  ;;  %881 = vmatpush.msra.mxu0 %v6423_v12  ;;  %v6414_v38 = vld [vmem:[%s14690_s3 + $0x340] sm:$0xff]  ;;  %v986_v41 = vld [vmem:[%s14690_s3 + $0x148] sm:$0xff]  ;;  %v1151_v12 = vld [vmem:[%s14693_s2 + $0x170] sm:$0xff] }
 0x189   :  { %v639_v53 = vmul.f32 %v7591_v19, %v638_v17  ;;  %v657_v56 = vmul.f32 %v656_v11, %v629_v49  ;;  %v989_v17 = vld [vmem:[%s14690_s3 + $0x160] sm:$0xff]  ;;  %v6408_v49 = vld [vmem:[%s14690_s3 + $0x310] sm:$0xff] }
 0x18a   :  { %882 = vmatpush.msra.mxu0 %v6420_v32  ;;  %v1145_v32 = vld [vmem:[%s14693_s2 + $0x140] sm:$0xff] }
 0x18b   :  { %v640_v62 = vadd.f32 %v7591_v19, %v639_v53  ;;  %v658_v54 = vadd.f32 %v657_v56, %v500_v42  ;;  %v983_v42 = vld [vmem:[%s14690_s3 + $0x130] sm:$0xff]  ;;  %v980_v53 = vld [vmem:[%s14690_s3 + $0x118] sm:$0xff]  ;;  %v974_v56 = vld [vmem:[%s14690_s3 + $0xe8] sm:$0xff] }
 0x18c   :  { %883 = vmatpush.msra.mxu0 %v6417_v2  ;;  %v7849_v2 = vld [vmem:[%s14690_s3 + $0x288] sm:$0xff] }
 0x18d   :  { %v644_v33 = vsel %vm643_vm15, %v7591_v19, %v640_v62  ;;  %7592 = vtanh.f32 %v658_v54  ;;  %v962_v62 = vld [vmem:[%s14690_s3 + $0x88] sm:$0xff]  ;;  %v959_v54 = vld [vmem:[%s14690_s3 + $0x70] sm:$0xff] }
 0x18e   :  { %v649_v52 = vsel %vm646_vm0, %v648_v25, %v644_v33  ;;  %884 = vmatpush.msra.mxu0 %v6414_v38  ;;  %v953_v25 = vld [vmem:[%s14690_s3 + $0x40] sm:$0xff]  ;;  %v950_v33 = vld [vmem:[%s14690_s3 + $0x28] sm:$0xff]  ;;  %v1135_v38 = vld [vmem:[%s14693_s2 + $0xf0] sm:$0xff] }
 0x18f   :  { %v660_v29 = vsub.f32 1.0, %v649_v52  ;;  %v662_v44 = vmul.f32 0.0, %v649_v52  ;;  %v6505_v52 = vld [vmem:[%s14690_s3 + $0x2e8] sm:$0xff] }
 0x190   :  { %885 = vmatpush.msra.mxu0 %v6411_v55  ;;  %v1121_v55 = vld [vmem:[%s14693_s2 + $0x80] sm:$0xff] }
 0x192   :  { %886 = vmatpush.msra.mxu0 %v6408_v49  ;;  %v1118_v49 = vld [vmem:[%s14693_s2 + $0x68] sm:$0xff] }
 0x193   :  { %v7593_v19 = vpop.eup %7592 }
 0x194   :  { %v661_v36 = vmul.f32 %v7593_v19, %v660_v29  ;;  %v1148_v29 = vld [vmem:[%s14693_s2 + $0x158] sm:$0xff] }
 0x195   :  { %v6499_v19 = vld [vmem:[%s14690_s3 + $0x2b8] sm:$0xff] }
 0x196   :  { %v8980_v11 = vadd.f32 %v662_v44, %v661_v36  ;;  %v1142_v36 = vld [vmem:[%s14693_s2 + $0x128] sm:$0xff]  ;;  %v7848_v44 = vld [vmem:[%s14690_s3 + $0x2a0] sm:$0xff] }
 0x198   :  { %738 = vmatmul.f32.vlgmr.msrb.gmra.mxu3 %v8980_v11  ;;  %758 = vmatmul.f32.vlgmr.msrb.gmra.mxu0 %v8980_v11 }
 0x199   :  { %778 = vmatmul.f32.vlgmr.msra.gmra.mxu1 %v8980_v11  ;;  %1033 = vmatpush.msrb.mxu3 %v992_v40  ;;  %v7850_v40 = vld [vmem:[%s14690_s3 + $0x270] sm:$0xff] }
 0x19a   :  { %1181 = vmatpush.msra.mxu1 %v1151_v12  ;;  %v6504_v12 = vld [vmem:[%s14690_s3 + $0x2e0] sm:$0xff] }
 0x19b   :  { %1034 = vmatpush.msrb.mxu3 %v989_v17  ;;  %v1124_v17 = vld [vmem:[%s14693_s2 + $0x98] sm:$0xff] }
 0x19c   :  { %1182 = vmatpush.msra.mxu1 %v1148_v29  ;;  %v164_v29 = vadd.f32 %v8229_v4, %v8483_v13  ;;  %v1108_v4 = vld [vmem:[%s14693_s2 + $0x18] sm:$0xff] }
 0x19d   :  { %1035 = vmatpush.msrb.mxu3 %v986_v41  ;;  %v1132_v41 = vld [vmem:[%s14693_s2 + $0xd8] sm:$0xff] }
 0x19e   :  { %1183 = vmatpush.msra.mxu1 %v1145_v32  ;;  %v1146_v32 = vld [vmem:[%s14693_s2 + $0x148] sm:$0xff] }
 0x19f   :  { %1036 = vmatpush.msrb.mxu3 %v983_v42  ;;  %v1129_v42 = vld [vmem:[%s14693_s2 + $0xc0] sm:$0xff] }
 0x1a0   :  { %867 = vmatmul.f32.vlgmr.msra.gmra.mxu3 %v14711_v30  ;;  %887 = vmatmul.f32.vlgmr.msra.gmra.mxu0 %v14711_v30  ;;  %v965_v30 = vld [vmem:[%s14690_s3 + $0xa0] sm:$0xff] }
 0x1a1   :  { %1009 = vmatmul.f32.vlgmr.msrb.gmra.mxu1 %v8603_v7  ;;  %1037 = vmatpush.msrb.mxu3 %v980_v53  ;;  %v9135_v53 = vpop.f32.mrf.mxu2 }
 0x1a2   :  { %1184 = vmatpush.msra.mxu1 %v1142_v36  ;;  %v6501_v36 = vld [vmem:[%s14690_s3 + $0x2c8] sm:$0xff] }
 0x1a3   :  { %1038 = vmatpush.msrb.mxu3 %v977_v5  ;;  %v1126_v5 = vld [vmem:[%s14693_s2 + $0xa8] sm:$0xff] }
 0x1a5   :  { %1039 = vmatpush.msrb.mxu3 %v974_v56  ;;  %v1115_v56 = vld [vmem:[%s14693_s2 + $0x50] sm:$0xff] }
 0x1a7   :  { %1040 = vmatpush.msrb.mxu3 %v971_v58  ;;  %v1123_v58 = vld [vmem:[%s14693_s2 + $0x90] sm:$0xff] }
 0x1a9   :  { %1041 = vmatpush.msrb.mxu3 %v968_v59  ;;  %v1112_v59 = vld [vmem:[%s14693_s2 + $0x38] sm:$0xff] }
 0x1ab   :  { %1042 = vmatpush.msrb.mxu3 %v965_v30  ;;  %v1120_v30 = vld [vmem:[%s14693_s2 + $0x78] sm:$0xff] }
 0x1ad   :  { %1043 = vmatpush.msrb.mxu3 %v962_v62  ;;  %v1109_v62 = vld [vmem:[%s14693_s2 + $0x20] sm:$0xff] }
 0x1af   :  { %1044 = vmatpush.msrb.mxu3 %v959_v54  ;;  %v1117_v54 = vld [vmem:[%s14693_s2 + $0x60] sm:$0xff] }
 0x1b1   :  { %1045 = vmatpush.msrb.mxu3 %v956_v21  ;;  %v1106_v21 = vld [vmem:[%s14693_s2 + $0x8] sm:$0xff] }
 0x1b3   :  { %1046 = vmatpush.msrb.mxu3 %v953_v25  ;;  %v1152_v25 = vld [vmem:[%s14693_s2 + $0x178] sm:$0xff] }
 0x1b4   :  { %1201 = vmatpush.msrb.mxu2 %v1152_v25 }
 0x1b5   :  { %1047 = vmatpush.msrb.mxu3 %v950_v33  ;;  %v6507_v33 = vld [vmem:[%s14690_s3 + $0x2f8] sm:$0xff] }
 0x1b7   :  { %1048 = vmatpush.msrb.mxu3 %v947_v35  ;;  %v1114_v35 = vld [vmem:[%s14693_s2 + $0x48] sm:$0xff] }
 0x1b8   :  { %1049 = vmatmul.f32.vlgmr.msrb.gmra.mxu3 %v8603_v7 }
 0x1b9   :  { %1269 = vmatpush.msra.mxu3 %v6505_v52  ;;  %v1030_v52 = vpop.f32.mrf.mxu2 }
 0x1bb   :  { %1270 = vmatpush.msra.mxu3 %v6502_v47  ;;  %v1149_v47 = vld [vmem:[%s14693_s2 + $0x160] sm:$0xff] }
 0x1bc   :  { %1202 = vmatpush.msrb.mxu2 %v1149_v47 }
 0x1bd   :  { %1271 = vmatpush.msra.mxu3 %v6499_v19  ;;  %v1111_v19 = vld [vmem:[%s14693_s2 + $0x30] sm:$0xff] }
 0x1be   :  { %1203 = vmatpush.msrb.mxu2 %v1146_v32  ;;  %v6477_v32 = vld [vmem:[%s14690_s3 + $0x208] sm:$0xff] }
 0x1bf   :  { %1272 = vmatpush.msra.mxu3 %v7848_v44  ;;  %v1073_v44 = vadd.f32 %v1030_v52, %v164_v29  ;;  %v1122_v29 = vld [vmem:[%s14693_s2 + $0x88] sm:$0xff] }
 0x1c1   :  { %1273 = vmatpush.msra.mxu3 %v7849_v2  ;;  %v1143_v2 = vld [vmem:[%s14693_s2 + $0x130] sm:$0xff] }
 0x1c2   :  { %1204 = vmatpush.msrb.mxu2 %v1143_v2 }
 0x1c3   :  { %1274 = vmatpush.msra.mxu3 %v7850_v40  ;;  %v6498_v40 = vld [vmem:[%s14690_s3 + $0x2b0] sm:$0xff] }
 0x1c5   :  { %1275 = vmatpush.msra.mxu3 %v8423_v37  ;;  %v1150_v37 = vld [vmem:[%s14693_s2 + $0x168] sm:$0xff] }
 0x1c6   :  { %1161 = vmatpush.msrb.mxu0 %v1150_v37  ;;  %v1105_v37 = vld [vmem:[%s14693_s2] sm:$0xff] }
 0x1c7   :  { %1276 = vmatpush.msra.mxu3 %v8439_v48  ;;  %v1139_v48 = vld [vmem:[%s14693_s2 + $0x110] sm:$0xff] }
 0x1c8   :  { %1185 = vmatpush.msra.mxu1 %v1139_v48 }
 0x1c9   :  { %1277 = vmatpush.msra.mxu3 %v8456_v3  ;;  %v1147_v3 = vld [vmem:[%s14693_s2 + $0x150] sm:$0xff] }
 0x1ca   :  { %1162 = vmatpush.msrb.mxu0 %v1147_v3  ;;  %v1140_v3 = vld [vmem:[%s14693_s2 + $0x118] sm:$0xff] }
 0x1cb   :  { %1278 = vmatpush.msra.mxu3 %v8471_v8  ;;  %v1136_v8 = vld [vmem:[%s14693_s2 + $0xf8] sm:$0xff]  ;;  %1205 = vmatpush.msrb.mxu2 %v1140_v3 }
 0x1cc   :  { %1186 = vmatpush.msra.mxu1 %v1136_v8  ;;  %v6506_v8 = vld [vmem:[%s14690_s3 + $0x2f0] sm:$0xff]  ;;  %v6471_v3 = vld [vmem:[%s14690_s3 + $0x1d8] sm:$0xff] }
 0x1cd   :  { %1279 = vmatpush.msra.mxu3 %v8493_v18  ;;  %v1144_v18 = vld [vmem:[%s14693_s2 + $0x138] sm:$0xff] }
 0x1ce   :  { %1163 = vmatpush.msrb.mxu0 %v1144_v18  ;;  %v6495_v18 = vld [vmem:[%s14690_s3 + $0x298] sm:$0xff] }
 0x1cf   :  { %1280 = vmatpush.msra.mxu3 %v8508_v24  ;;  %v1133_v24 = vld [vmem:[%s14693_s2 + $0xe0] sm:$0xff] }
 0x1d0   :  { %1187 = vmatpush.msra.mxu1 %v1133_v24  ;;  %v6458_v24 = vmul.f32 -1.442695, %v1073_v44  ;;  %v6485_v44 = vld [vmem:[%s14690_s3 + $0x248] sm:$0xff] }
 0x1d1   :  { %1281 = vmatpush.msra.mxu3 %v8527_v34  ;;  %v1141_v34 = vld [vmem:[%s14693_s2 + $0x120] sm:$0xff] }
 0x1d2   :  { %1164 = vmatpush.msrb.mxu0 %v1141_v34  ;;  %v1137_v34 = vld [vmem:[%s14693_s2 + $0x100] sm:$0xff]  ;;  %7594 = vpow2.f32 %v6458_v24 }
 0x1d3   :  { %1282 = vmatpush.msra.mxu3 %v8544_v51  ;;  %v1130_v51 = vld [vmem:[%s14693_s2 + $0xc8] sm:$0xff]  ;;  %1206 = vmatpush.msrb.mxu2 %v1137_v34  ;;  %v6468_v24 = vld [vmem:[%s14690_s3 + $0x1c0] sm:$0xff] }
 0x1d4   :  { %1188 = vmatpush.msra.mxu1 %v1130_v51  ;;  %v6503_v51 = vld [vmem:[%s14690_s3 + $0x2d8] sm:$0xff] }
 0x1d5   :  { %1283 = vmatpush.msra.mxu3 %v8559_v10  ;;  %v1138_v10 = vld [vmem:[%s14693_s2 + $0x108] sm:$0xff] }
 0x1d6   :  { %1165 = vmatpush.msrb.mxu0 %v1138_v10  ;;  %v6492_v10 = vld [vmem:[%s14690_s3 + $0x280] sm:$0xff] }
 0x1d7   :  { %1284 = vmatpush.msra.mxu3 %v8574_v22  ;;  %v1127_v22 = vld [vmem:[%s14693_s2 + $0xb0] sm:$0xff] }
 0x1d8   :  { %1285 = vmatmul.f32.vlgmr.msra.gmra.mxu3 %v8980_v11  ;;  %1189 = vmatpush.msra.mxu1 %v1127_v22  ;;  %v9222_v22 = vld [vmem:[%s14694_s4 + $0x6] sm:$0x7]  ;;  %v7595_v52 = vpop.eup %7594 }
 0x1d9   :  { %1166 = vmatpush.msrb.mxu0 %v1135_v38  ;;  %v716_v38 = vperm.slane %v9222_v22, 0 }
 0x1da   :  { %1190 = vmatpush.msra.mxu1 %v1124_v17  ;;  %v1134_v17 = vld [vmem:[%s14693_s2 + $0xe8] sm:$0xff] }
 0x1db   :  { %1167 = vmatpush.msrb.mxu0 %v1132_v41  ;;  %v6500_v41 = vld [vmem:[%s14690_s3 + $0x2c0] sm:$0xff]  ;;  %1207 = vmatpush.msrb.mxu2 %v1134_v17  ;;  %v6465_v17 = vld [vmem:[%s14690_s3 + $0x1a8] sm:$0xff] }
 0x1dc   :  { %1191 = vmatpush.msra.mxu1 %v1121_v55 }
 0x1dd   :  { %1168 = vmatpush.msrb.mxu0 %v1129_v42  ;;  %v6489_v42 = vld [vmem:[%s14690_s3 + $0x268] sm:$0xff] }
 0x1de   :  { %1192 = vmatpush.msra.mxu1 %v1118_v49  ;;  %v1131_v49 = vld [vmem:[%s14693_s2 + $0xd0] sm:$0xff] }
 0x1df   :  { %1169 = vmatpush.msrb.mxu0 %v1126_v5  ;;  %v6497_v5 = vld [vmem:[%s14690_s3 + $0x2a8] sm:$0xff]  ;;  %1208 = vmatpush.msrb.mxu2 %v1131_v49  ;;  %v6462_v49 = vld [vmem:[%s14690_s3 + $0x190] sm:$0xff] }
 0x1e0   :  { %1193 = vmatpush.msra.mxu1 %v1115_v56  ;;  %v6486_v56 = vld [vmem:[%s14690_s3 + $0x250] sm:$0xff] }
 0x1e1   :  { %1170 = vmatpush.msrb.mxu0 %v1123_v58  ;;  %v123_v58 = vadd.f32 %v8221_v1, %v8297_v27  ;;  %v1125_v1 = vld [vmem:[%s14693_s2 + $0xa0] sm:$0xff] }
 0x1e2   :  { %1194 = vmatpush.msra.mxu1 %v1112_v59 }
 0x1e3   :  { %1171 = vmatpush.msrb.mxu0 %v1120_v30 }
 0x1e4   :  { %1195 = vmatpush.msra.mxu1 %v1109_v62  ;;  %v1128_v62 = vld [vmem:[%s14693_s2 + $0xb8] sm:$0xff] }
 0x1e5   :  { %1172 = vmatpush.msrb.mxu0 %v1117_v54  ;;  %v6494_v54 = vld [vmem:[%s14690_s3 + $0x290] sm:$0xff]  ;;  %1209 = vmatpush.msrb.mxu2 %v1128_v62 }
 0x1e6   :  { %1196 = vmatpush.msra.mxu1 %v1106_v21  ;;  %v6483_v21 = vld [vmem:[%s14690_s3 + $0x238] sm:$0xff] }
 0x1e7   :  { %1173 = vmatpush.msrb.mxu0 %v1114_v35  ;;  %v6480_v35 = vld [vmem:[%s14690_s3 + $0x220] sm:$0xff]  ;;  %1210 = vmatpush.msrb.mxu2 %v1125_v1 }
 0x1e8   :  { %1309 = vmatpush.msrb.mxu1 %v6507_v33  ;;  %v6491_v33 = vld [vmem:[%s14690_s3 + $0x278] sm:$0xff] }
 0x1e9   :  { %1174 = vmatpush.msrb.mxu0 %v1111_v19  ;;  %v6488_v19 = vld [vmem:[%s14690_s3 + $0x260] sm:$0xff]  ;;  %1211 = vmatpush.msrb.mxu2 %v1122_v29 }
 0x1ea   :  { %1310 = vmatpush.msrb.mxu1 %v6504_v12 }
 0x1eb   :  { %1175 = vmatpush.msrb.mxu0 %v1108_v4  ;;  %v6474_v4 = vld [vmem:[%s14690_s3 + $0x1f0] sm:$0xff] }
 0x1ec   :  { %1311 = vmatpush.msrb.mxu1 %v6501_v36  ;;  %v9273_v36 = vadd.f32 1.0, %v7595_v52 }
 0x1ed   :  { %1176 = vmatpush.msrb.mxu0 %v1105_v37  ;;  %v6482_v37 = vld [vmem:[%s14690_s3 + $0x230] sm:$0xff] }
 0x1ee   :  { %1312 = vmatpush.msrb.mxu1 %v6498_v40  ;;  %v1116_v40 = vld [vmem:[%s14693_s2 + $0x58] sm:$0xff]  ;;  %vm1083_vm6 = vweird.f32 %v9273_v36 }
 0x1ef   :  { %1289 = vmatpush.msra.mxu0 %v6506_v8  ;;  %v1113_v8 = vld [vmem:[%s14693_s2 + $0x40] sm:$0xff] }
 0x1f0   :  { %1313 = vmatpush.msrb.mxu1 %v6495_v18  ;;  %v6479_v18 = vld [vmem:[%s14690_s3 + $0x218] sm:$0xff] }
 0x1f1   :  { %1290 = vmatpush.msra.mxu0 %v6503_v51 }
 0x1f2   :  { %1314 = vmatpush.msrb.mxu1 %v6492_v10  ;;  %v1110_v10 = vld [vmem:[%s14693_s2 + $0x28] sm:$0xff] }
 0x1f3   :  { %1291 = vmatpush.msra.mxu0 %v6500_v41  ;;  %v717_v41 = vperm.slane %v9222_v22, 1 }
 0x1f4   :  { %1315 = vmatpush.msrb.mxu1 %v6489_v42  ;;  %v6473_v42 = vld [vmem:[%s14690_s3 + $0x1e8] sm:$0xff] }
 0x1f5   :  { %1292 = vmatpush.msra.mxu0 %v6497_v5 }
 0x1f6   :  { %1316 = vmatpush.msrb.mxu1 %v6486_v56 }
 0x1f7   :  { %1293 = vmatpush.msra.mxu0 %v6494_v54  ;;  %v6467_v54 = vld [vmem:[%s14690_s3 + $0x1b8] sm:$0xff] }
 0x1f8   :  { %1317 = vmatpush.msrb.mxu1 %v6483_v21 }
 0x1f9   :  { %1294 = vmatpush.msra.mxu0 %v6491_v33  ;;  %v6464_v33 = vld [vmem:[%s14690_s3 + $0x1a0] sm:$0xff] }
 0x1fa   :  { %1318 = vmatpush.msrb.mxu1 %v6480_v35 }
 0x1fb   :  { %1295 = vmatpush.msra.mxu0 %v6488_v19 }
 0x1fc   :  { %1319 = vmatpush.msrb.mxu1 %v6477_v32 }
 0x1fd   :  { %1296 = vmatpush.msra.mxu0 %v6485_v44 }
 0x1fe   :  { %1320 = vmatpush.msrb.mxu1 %v6474_v4  ;;  %v7547_v4 = vld [vmem:[%s14692_s5] ss:$0 sm:$0xff] }
 0x1ff   :  { %1297 = vmatpush.msra.mxu0 %v6482_v37 }
 0x200   :  { %1321 = vmatpush.msrb.mxu1 %v6471_v3 }
 0x201   :  { %1298 = vmatpush.msra.mxu0 %v6479_v18 }
 0x202   :  { %1322 = vmatpush.msrb.mxu1 %v6468_v24 }
 0x204   :  { %1323 = vmatpush.msrb.mxu1 %v6465_v17  ;;  %v1089_v17 = vand.u32 2147483648, %v9273_v36 }
 0x206   :  { %1324 = vmatpush.msrb.mxu1 %v6462_v49 }
 0x215   :  { %v759_v5 = vpop.f32.mrf.mxu0 }
 0x216   :  { %v9199_v48 = vpop.f32.mrf.mxu1 }
 0x21b   :  { %v739_v55 = vpop.f32.mrf.mxu3 }
 0x21c   :  { %v740_v59 = vadd.f32 %v739_v55, %v716_v38  ;;  %v6476_v38 = vld [vmem:[%s14690_s3 + $0x200] sm:$0xff]  ;;  %v1107_v55 = vld [vmem:[%s14693_s2 + $0x10] sm:$0xff] }
 0x21d   :  { %1299 = vmatpush.msra.mxu0 %v6476_v38  ;;  %v205_v38 = vadd.f32 %v8714_v50, %v8600_v6 }
 0x21e   :  { %v1010_v30 = vpop.f32.mrf.mxu1  ;;  %v891_v12 = vadd.f32 %v9135_v53, %v740_v59  ;;  %v1119_v53 = vld [vmem:[%s14693_s2 + $0x70] sm:$0xff] }
 0x21f   :  { %v1053_v25 = vadd.f32 %v1010_v30, %v123_v58  ;;  %1212 = vmatpush.msrb.mxu2 %v1119_v53  ;;  %1300 = vmatpush.msra.mxu0 %v6473_v42  ;;  %v6470_v59 = vld [vmem:[%s14690_s3 + $0x1d0] sm:$0xff]  ;;  %v760_v30 = vadd.f32 %v759_v5, %v717_v41 }
 0x220   :  { %v6454_v2 = vmul.f32 -1.442695, %v891_v12 }
 0x221   :  { %v6457_v47 = vmul.f32 -1.442695, %v1053_v25  ;;  %1213 = vmatpush.msrb.mxu2 %v1116_v40  ;;  %1301 = vmatpush.msra.mxu0 %v6470_v59 }
 0x223   :  { %7596 = vpow2.f32 %v6457_v47  ;;  %1214 = vmatpush.msrb.mxu2 %v1113_v8  ;;  %v868_v58 = vpop.f32.mrf.mxu3  ;;  %1302 = vmatpush.msra.mxu0 %v6467_v54  ;;  %v6461_v47 = vld [vmem:[%s14690_s3 + $0x188] sm:$0xff] }
 0x224   :  { %7598 = vrcp.f32 %v9273_v36  ;;  %v911_v25 = vadd.f32 %v868_v58, %v760_v30  ;;  %v1090_v58 = vor.u32 1.1754944e-38, %v1089_v17 }
 0x225   :  { %7600 = vpow2.f32 %v6454_v2  ;;  %1215 = vmatpush.msrb.mxu2 %v1110_v10  ;;  %1303 = vmatpush.msra.mxu0 %v6464_v33 }
 0x226   :  { %v6455_v29 = vmul.f32 -1.442695, %v911_v25 }
 0x227   :  { %1216 = vmatpush.msrb.mxu2 %v1107_v55  ;;  %1304 = vmatpush.msra.mxu0 %v6461_v47 }
 0x229   :  { %v7597_v34 = vpop.eup %7596 }
 0x22a   :  { %v1057_v51 = vadd.f32 1.0, %v7597_v34  ;;  %v7599_v56 = vpop.eup %7598 }
 0x22b   :  { %v7601_v62 = vpop.eup %7600  ;;  %v1079_v21 = vmul.f32 %v7599_v56, %v9273_v36  ;;  %vm1084_vm5 = vweird.f32 %v7599_v56 }
 0x22c   :  { %7602 = vrcp.f32 %v1057_v51  ;;  %v9332_v35 = vadd.f32 1.0, %v7601_v62  ;;  %v1069_v32 = vand.u32 2147483648, %v1057_v51  ;;  %v1067_v44 = vand.u32 2147483647, %v1057_v51  ;;  %vm1085_vm7 = vmor %vm1083_vm6, %vm1084_vm5 }
 0x22d   :  { %v1080_v12 = vsub.f32 1.0, %v1079_v21  ;;  %vm1063_vm2 = vweird.f32 %v1057_v51 }
 0x22e   :  { %7604 = vrcp.f32 %v9332_v35  ;;  %v1070_v37 = vor.u32 1.1754944e-38, %v1069_v32  ;;  %vm1068_vm4 = vcmp.eq.f32.partialorder %v1067_v44, 8.507059e+37  ;;  %v907_v47 = vand.u32 2147483648, %v9332_v35  ;;  %v888_v32 = vpop.f32.mrf.mxu0 }
 0x22f   :  { %v1081_v2 = vmul.f32 %v7599_v56, %v1080_v12  ;;  %7606 = vpow2.f32 %v6455_v29  ;;  %v6602_v12 = vld [vmem:[%s14690_s3 + $0x450] sm:$0xff]  ;;  %vm901_vm10 = vweird.f32 %v9332_v35  ;;  %v7546_v29 = vld [vmem:[%s14692_s5 + $0x2] ss:$0 sm:$0xff] }
 0x231   :  { %v1082_v10 = vadd.f32 %v7599_v56, %v1081_v2  ;;  %v936_v2 = vadd.f32 %v7546_v29, %v888_v32  ;;  %v6553_v29 = vld [vmem:[%s14693_s2 + $0x2d0] sm:$0xff] }
 0x232   :  { %v7603_v1 = vpop.eup %7602  ;;  %v6557_v32 = vld [vmem:[%s14693_s2 + $0x2f0] sm:$0xff] }
 0x233   :  { %v1059_v52 = vmul.f32 %v7603_v1, %v1057_v51  ;;  %vm1064_vm1 = vweird.f32 %v7603_v1  ;;  %v1087_v51 = vand.u32 2147483647, %v9273_v36  ;;  %v1086_v5 = vsel %vm1085_vm7, %v7599_v56, %v1082_v10  ;;  %v6605_v56 = vld [vmem:[%s14690_s3 + $0x468] sm:$0xff]  ;;  %v6587_v10 = vld [vmem:[%s14690_s3 + $0x3d8] sm:$0xff]  ;;  %1457 = vmatpush.msrb.mxu3 %v6557_v32  ;;  %v6533_v32 = vld [vmem:[%s14693_s2 + $0x230] sm:$0xff] }
 0x234   :  { %vm1065_vm3 = vmor %vm1063_vm2, %vm1064_vm1  ;;  %v7605_v34 = vpop.eup %7604 }
 0x235   :  { %v1060_v19 = vsub.f32 1.0, %v1059_v52  ;;  %v7607_v55 = vpop.eup %7606  ;;  %v897_v42 = vmul.f32 %v7605_v34, %v9332_v35  ;;  %vm1088_vm8 = vcmp.eq.f32.partialorder %v1087_v51, 8.507059e+37  ;;  %vm902_vm9 = vweird.f32 %v7605_v34 }
 0x236   :  { %v9347_v59 = vadd.f32 1.0, %v7607_v55  ;;  %v1091_v50 = vsel %vm1088_vm8, %v1090_v58, %v1086_v5  ;;  %vm903_vm11 = vmor %vm901_vm10, %vm902_vm9  ;;  %v6581_v55 = vld [vmem:[%s14690_s3 + $0x3a8] sm:$0xff]  ;;  %v6575_v5 = vld [vmem:[%s14690_s3 + $0x378] sm:$0xff] }
 0x237   :  { %v1061_v53 = vmul.f32 %v7603_v1, %v1060_v19  ;;  %v898_v30 = vsub.f32 1.0, %v897_v42  ;;  %v1101_v62 = vsub.f32 1.0, %v1091_v50  ;;  %v1103_v36 = vmul.f32 %v1091_v50, %v8603_v7  ;;  %v6578_v42 = vld [vmem:[%s14690_s3 + $0x390] sm:$0xff]  ;;  %v6569_v50 = vld [vmem:[%s14690_s3 + $0x348] sm:$0xff] }
 0x238   :  { %v905_v7 = vand.u32 2147483647, %v9332_v35  ;;  %v6596_v35 = vld [vmem:[%s14690_s3 + $0x420] sm:$0xff]  ;;  %v927_v51 = vand.u32 2147483648, %v9347_v59  ;;  %vm921_vm14 = vweird.f32 %v9347_v59 }
 0x239   :  { %v1062_v40 = vadd.f32 %v7603_v1, %v1061_v53  ;;  %v899_v21 = vmul.f32 %v7605_v34, %v898_v30  ;;  %v6599_v53 = vld [vmem:[%s14690_s3 + $0x438] sm:$0xff]  ;;  %v6572_v30 = vld [vmem:[%s14690_s3 + $0x360] sm:$0xff] }
 0x23a   :  { %vm906_vm12 = vcmp.eq.f32.partialorder %v905_v7, 8.507059e+37  ;;  %v928_v58 = vor.u32 1.1754944e-38, %v927_v51  ;;  %v6556_v7 = vld [vmem:[%s14693_s2 + $0x2e8] sm:$0xff] }
 0x23b   :  { %v1050_v3 = vpop.f32.mrf.mxu3  ;;  %v1066_v8 = vsel %vm1065_vm3, %v7603_v1, %v1062_v40  ;;  %v900_v52 = vadd.f32 %v7605_v34, %v899_v21  ;;  %v6566_v21 = vld [vmem:[%s14690_s3 + $0x330] sm:$0xff]  ;;  %1437 = vmatpush.msra.mxu2 %v6556_v7  ;;  %v1671_v51 = vld [vmem:[%s14690_s3 + $0x68] sm:$0xff] }
 0x23c   :  { %v1071_v18 = vsel %vm1068_vm4, %v1070_v37, %v1066_v8  ;;  %v1097_v24 = vadd.f32 %v7547_v4, %v1050_v3  ;;  %v908_v4 = vor.u32 1.1754944e-38, %v907_v47  ;;  %v6593_v3 = vld [vmem:[%s14690_s3 + $0x408] sm:$0xff]  ;;  %v718_v8 = vperm.slane %v9222_v22, 2  ;;  %v6584_v22 = vld [vmem:[%s14690_s3 + $0x3c0] sm:$0xff]  ;;  %v1704_v47 = vld [vmem:[%s14690_s3 + $0x170] sm:$0xff] }
 0x23d   :  { %v904_v44 = vsel %vm903_vm11, %v7605_v34, %v900_v52  ;;  %1438 = vmatpush.msra.mxu2 %v6553_v29  ;;  %v6536_v7 = vld [vmem:[%s14693_s2 + $0x248] sm:$0xff]  ;;  %v6537_v29 = vld [vmem:[%s14693_s2 + $0x250] sm:$0xff] }
 0x23e   :  { %v1098_v41 = vmul.f32 %v1097_v24, %v1071_v18  ;;  %v909_v37 = vsel %vm906_vm12, %v908_v4, %v904_v44  ;;  %v6590_v18 = vld [vmem:[%s14690_s3 + $0x3f0] sm:$0xff]  ;;  %v6558_v44 = vld [vmem:[%s14693_s2 + $0x2f8] sm:$0xff] }
 0x23f   :  { %v937_v24 = vmul.f32 %v936_v2, %v909_v37  ;;  %v6554_v4 = vld [vmem:[%s14693_s2 + $0x2d8] sm:$0xff]  ;;  %v6551_v2 = vld [vmem:[%s14693_s2 + $0x2c0] sm:$0xff] }
 0x240   :  { %v1099_v49 = vadd.f32 %v1098_v41, %v205_v38  ;;  %v780_v38 = vadd.f32 %v9199_v48, %v718_v8  ;;  %v925_v48 = vand.u32 2147483647, %v9347_v59  ;;  %v6547_v37 = vld [vmem:[%s14693_s2 + $0x2a0] sm:$0xff]  ;;  %1458 = vmatpush.msrb.mxu3 %v6554_v4  ;;  %v1692_v8 = vld [vmem:[%s14690_s3 + $0x110] sm:$0xff]  ;;  %v6530_v4 = vld [vmem:[%s14693_s2 + $0x218] sm:$0xff] }
 0x242   :  { %7608 = vtanh.f32 %v1099_v49  ;;  %v938_v17 = vadd.f32 %v937_v24, %v780_v38  ;;  %vm926_vm0 = vcmp.eq.f32.partialorder %v925_v48, 8.507059e+37  ;;  %1459 = vmatpush.msrb.mxu3 %v6551_v2  ;;  %v1689_v24 = vld [vmem:[%s14690_s3 + $0xf8] sm:$0xff]  ;;  %v1668_v48 = vld [vmem:[%s14690_s3 + $0x50] sm:$0xff] }
 0x243   :  { %7610 = vrcp.f32 %v9347_v59  ;;  %v6538_v38 = vld [vmem:[%s14693_s2 + $0x258] sm:$0xff] }
 0x244   :  { %7612 = vtanh.f32 %v938_v17  ;;  %v1680_v17 = vld [vmem:[%s14690_s3 + $0xb0] sm:$0xff]  ;;  %v6514_v2 = vld [vmem:[%s14693_s2 + $0x198] sm:$0xff] }
 0x248   :  { %v7609_v54 = vpop.eup %7608 }
 0x249   :  { %v1102_v25 = vmul.f32 %v7609_v54, %v1101_v62  ;;  %v7611_v33 = vpop.eup %7610 }
 0x24a   :  { %v917_v19 = vmul.f32 %v7611_v33, %v9347_v59  ;;  %vm922_vm13 = vweird.f32 %v7611_v33  ;;  %v7613_v62 = vpop.eup %7612 }
 0x24b   :  { %v9351_v1 = vadd.f32 %v1103_v36, %v1102_v25  ;;  %vm923_vm15 = vmor %vm921_vm14, %vm922_vm13  ;;  %v6563_v36 = vld [vmem:[%s14690_s3 + $0x318] sm:$0xff] }
 0x24c   :  { %v918_v40 = vsub.f32 1.0, %v917_v19  ;;  %v1698_v19 = vld [vmem:[%s14690_s3 + $0x140] sm:$0xff] }
 0x24d   :  { %1177 = vmatmul.f32.vlgmr.msrb.gmra.mxu0 %v9351_v1  ;;  %1197 = vmatmul.f32.vlgmr.msra.gmra.mxu1 %v9351_v1 }
 0x24e   :  { %1217 = vmatmul.f32.vlgmr.msrb.gmra.mxu2 %v9351_v1  ;;  %1545 = vmatpush.msra.mxu1 %v6605_v56  ;;  %v919_v34 = vmul.f32 %v7611_v33, %v918_v40  ;;  %v1695_v40 = vld [vmem:[%s14690_s3 + $0x128] sm:$0xff] }
 0x24f   :  { %1477 = vmatpush.msrb.mxu0 %v6558_v44  ;;  %v6517_v44 = vld [vmem:[%s14693_s2 + $0x1b0] sm:$0xff] }
 0x250   :  { %1546 = vmatpush.msra.mxu1 %v6602_v12  ;;  %v920_v41 = vadd.f32 %v7611_v33, %v919_v34  ;;  %v1701_v12 = vld [vmem:[%s14690_s3 + $0x158] sm:$0xff]  ;;  %v6541_v34 = vld [vmem:[%s14693_s2 + $0x270] sm:$0xff] }
 0x252   :  { %1547 = vmatpush.msra.mxu1 %v6599_v53  ;;  %v924_v49 = vsel %vm923_vm15, %v7611_v33, %v920_v41  ;;  %v6560_v33 = vld [vmem:[%s14690_s3 + $0x300] sm:$0xff]  ;;  %v6550_v53 = vld [vmem:[%s14693_s2 + $0x2b8] sm:$0xff] }
 0x253   :  { %v929_v59 = vsel %vm926_vm0, %v928_v58, %v924_v49  ;;  %1439 = vmatpush.msra.mxu2 %v6550_v53  ;;  %v1677_v41 = vld [vmem:[%s14690_s3 + $0x98] sm:$0xff]  ;;  %v1662_v49 = vld [vmem:[%s14690_s3 + $0x20] sm:$0xff] }
 0x254   :  { %1548 = vmatpush.msra.mxu1 %v6596_v35  ;;  %v940_v54 = vsub.f32 1.0, %v929_v59  ;;  %v942_v56 = vmul.f32 0.0, %v929_v59  ;;  %v6555_v35 = vld [vmem:[%s14693_s2 + $0x2e0] sm:$0xff]  ;;  %v6549_v59 = vld [vmem:[%s14693_s2 + $0x2b0] sm:$0xff]  ;;  %v6534_v53 = vld [vmem:[%s14693_s2 + $0x238] sm:$0xff] }
 0x255   :  { %1305 = vmatmul.f32.vlgmr.msra.gmra.mxu0 %v8980_v11  ;;  %1325 = vmatmul.f32.vlgmr.msrb.gmra.mxu1 %v8980_v11  ;;  %v6535_v58 = vld [vmem:[%s14693_s2 + $0x240] sm:$0xff] }
 0x256   :  { %1549 = vmatpush.msra.mxu1 %v6593_v3  ;;  %v941_v25 = vmul.f32 %v7613_v62, %v940_v54  ;;  %v6552_v3 = vld [vmem:[%s14693_s2 + $0x2c8] sm:$0xff]  ;;  %1478 = vmatpush.msrb.mxu0 %v6555_v35  ;;  %v6545_v62 = vld [vmem:[%s14693_s2 + $0x290] sm:$0xff]  ;;  %v6546_v54 = vld [vmem:[%s14693_s2 + $0x298] sm:$0xff] }
 0x257   :  { %1440 = vmatpush.msra.mxu2 %v6547_v37  ;;  %v6531_v35 = vld [vmem:[%s14693_s2 + $0x220] sm:$0xff]  ;;  %v6528_v37 = vld [vmem:[%s14693_s2 + $0x208] sm:$0xff] }
 0x258   :  { %1550 = vmatpush.msra.mxu1 %v6590_v18  ;;  %v9418_v52 = vadd.f32 %v942_v56, %v941_v25  ;;  %v6544_v18 = vld [vmem:[%s14693_s2 + $0x288] sm:$0xff]  ;;  %1479 = vmatpush.msrb.mxu0 %v6552_v3  ;;  %v6542_v25 = vld [vmem:[%s14693_s2 + $0x278] sm:$0xff]  ;;  %v6511_v3 = vld [vmem:[%s14693_s2 + $0x180] sm:$0xff] }
 0x259   :  { %1441 = vmatpush.msra.mxu2 %v6544_v18  ;;  %v6526_v56 = vld [vmem:[%s14693_s2 + $0x1f8] sm:$0xff]  ;;  %v6525_v18 = vld [vmem:[%s14693_s2 + $0x1f0] sm:$0xff] }
 0x25a   :  { %1551 = vmatpush.msra.mxu1 %v6587_v10  ;;  %v1686_v10 = vld [vmem:[%s14690_s3 + $0xe0] sm:$0xff]  ;;  %1480 = vmatpush.msrb.mxu0 %v6549_v59  ;;  %v1703_v59 = vld [vmem:[%s14690_s3 + $0x168] sm:$0xff] }
 0x25b   :  { %1442 = vmatpush.msra.mxu2 %v6541_v34  ;;  %v6521_v34 = vld [vmem:[%s14693_s2 + $0x1d0] sm:$0xff] }
 0x25c   :  { %1552 = vmatpush.msra.mxu1 %v6584_v22  ;;  %v1683_v22 = vld [vmem:[%s14690_s3 + $0xc8] sm:$0xff]  ;;  %1481 = vmatpush.msrb.mxu0 %v6546_v54  ;;  %v1700_v54 = vld [vmem:[%s14690_s3 + $0x150] sm:$0xff] }
 0x25d   :  { %1443 = vmatpush.msra.mxu2 %v6538_v38  ;;  %v6603_v38 = vld [vmem:[%s14690_s3 + $0x458] sm:$0xff] }
 0x25e   :  { %1553 = vmatpush.msra.mxu1 %v6581_v55  ;;  %v1674_v55 = vld [vmem:[%s14690_s3 + $0x80] sm:$0xff] }
 0x25f   :  { %1444 = vmatpush.msra.mxu2 %v6535_v58  ;;  %v6594_v58 = vld [vmem:[%s14690_s3 + $0x410] sm:$0xff] }
 0x260   :  { %1554 = vmatpush.msra.mxu1 %v6578_v42  ;;  %v1665_v42 = vld [vmem:[%s14690_s3 + $0x38] sm:$0xff] }
 0x262   :  { %1555 = vmatpush.msra.mxu1 %v6575_v5  ;;  %v1659_v5 = vld [vmem:[%s14690_s3 + $0x8] sm:$0xff] }
 0x264   :  { %1556 = vmatpush.msra.mxu1 %v6572_v30  ;;  %v6548_v30 = vld [vmem:[%s14693_s2 + $0x2a8] sm:$0xff] }
 0x265   :  { %1460 = vmatpush.msrb.mxu3 %v6548_v30  ;;  %v6607_v30 = vld [vmem:[%s14690_s3 + $0x478] sm:$0xff] }
 0x266   :  { %1557 = vmatpush.msra.mxu1 %v6569_v50  ;;  %v6532_v50 = vld [vmem:[%s14693_s2 + $0x228] sm:$0xff] }
 0x267   :  { %1445 = vmatpush.msra.mxu2 %v6532_v50  ;;  %1461 = vmatpush.msrb.mxu3 %v6545_v62  ;;  %v6591_v50 = vld [vmem:[%s14690_s3 + $0x3f8] sm:$0xff]  ;;  %v6604_v62 = vld [vmem:[%s14690_s3 + $0x460] sm:$0xff] }
 0x268   :  { %1558 = vmatpush.msra.mxu1 %v6566_v21  ;;  %v6529_v21 = vld [vmem:[%s14693_s2 + $0x210] sm:$0xff] }
 0x269   :  { %1446 = vmatpush.msra.mxu2 %v6529_v21  ;;  %1462 = vmatpush.msrb.mxu3 %v6542_v25  ;;  %v6588_v25 = vld [vmem:[%s14690_s3 + $0x3e0] sm:$0xff] }
 0x26a   :  { %1559 = vmatpush.msra.mxu1 %v6563_v36  ;;  %v6543_v36 = vld [vmem:[%s14693_s2 + $0x280] sm:$0xff] }
 0x26b   :  { %1482 = vmatpush.msrb.mxu0 %v6543_v36  ;;  %1447 = vmatpush.msra.mxu2 %v6526_v56  ;;  %v6601_v36 = vld [vmem:[%s14690_s3 + $0x448] sm:$0xff]  ;;  %v1697_v56 = vld [vmem:[%s14690_s3 + $0x138] sm:$0xff] }
 0x26c   :  { %1560 = vmatpush.msra.mxu1 %v6560_v33  ;;  %v6539_v33 = vld [vmem:[%s14693_s2 + $0x260] sm:$0xff] }
 0x26d   :  { %1561 = vmatmul.f32.vlgmr.msra.gmra.mxu1 %v9418_v52  ;;  %1463 = vmatpush.msrb.mxu3 %v6539_v33 }
 0x26e   :  { %1726 = vmatpush.msrb.mxu1 %v1704_v47  ;;  %v6540_v47 = vld [vmem:[%s14693_s2 + $0x268] sm:$0xff] }
 0x26f   :  { %1483 = vmatpush.msrb.mxu0 %v6540_v47  ;;  %1464 = vmatpush.msrb.mxu3 %v6536_v7  ;;  %v6585_v47 = vld [vmem:[%s14690_s3 + $0x3c8] sm:$0xff]  ;;  %v1694_v7 = vld [vmem:[%s14690_s3 + $0x120] sm:$0xff] }
 0x270   :  { %1727 = vmatpush.msrb.mxu1 %v1701_v12  ;;  %v6523_v12 = vld [vmem:[%s14693_s2 + $0x1e0] sm:$0xff] }
 0x271   :  { %1448 = vmatpush.msra.mxu2 %v6523_v12  ;;  %1484 = vmatpush.msrb.mxu0 %v6537_v29  ;;  %v6598_v12 = vld [vmem:[%s14690_s3 + $0x430] sm:$0xff] }
 0x272   :  { %1728 = vmatpush.msrb.mxu1 %v1698_v19  ;;  %v6520_v19 = vld [vmem:[%s14693_s2 + $0x1c8] sm:$0xff]  ;;  %1465 = vmatpush.msrb.mxu3 %v6533_v32  ;;  %v6582_v32 = vld [vmem:[%s14690_s3 + $0x3b0] sm:$0xff] }
 0x273   :  { %1449 = vmatpush.msra.mxu2 %v6520_v19  ;;  %1485 = vmatpush.msrb.mxu0 %v6534_v53  ;;  %v1286_v19 = vpop.f32.mrf.mxu3  ;;  %v6595_v53 = vld [vmem:[%s14690_s3 + $0x418] sm:$0xff] }
 0x274   :  { %1729 = vmatpush.msrb.mxu1 %v1695_v40  ;;  %1466 = vmatpush.msrb.mxu3 %v6530_v4  ;;  %v6527_v40 = vld [vmem:[%s14693_s2 + $0x200] sm:$0xff] }
 0x275   :  { %1450 = vmatpush.msra.mxu2 %v6517_v44  ;;  %1486 = vmatpush.msrb.mxu0 %v6531_v35  ;;  %v1691_v44 = vld [vmem:[%s14690_s3 + $0x108] sm:$0xff] }
 0x276   :  { %1730 = vmatpush.msrb.mxu1 %v1692_v8  ;;  %1467 = vmatpush.msrb.mxu3 %v6527_v40  ;;  %v6524_v8 = vld [vmem:[%s14693_s2 + $0x1e8] sm:$0xff]  ;;  %v6579_v40 = vld [vmem:[%s14690_s3 + $0x398] sm:$0xff] }
 0x277   :  { %1451 = vmatpush.msra.mxu2 %v6514_v2  ;;  %1487 = vmatpush.msrb.mxu0 %v6528_v37  ;;  %v6592_v37 = vld [vmem:[%s14690_s3 + $0x400] sm:$0xff] }
 0x278   :  { %1731 = vmatpush.msrb.mxu1 %v1689_v24  ;;  %1468 = vmatpush.msrb.mxu3 %v6524_v8  ;;  %v6606_v24 = vld [vmem:[%s14690_s3 + $0x470] sm:$0xff] }
 0x279   :  { %1452 = vmatpush.msra.mxu2 %v6511_v3  ;;  %1488 = vmatpush.msrb.mxu0 %v6525_v18  ;;  %v1688_v3 = vld [vmem:[%s14690_s3 + $0xf0] sm:$0xff]  ;;  %v6576_v18 = vld [vmem:[%s14690_s3 + $0x380] sm:$0xff] }
 0x27a   :  { %1732 = vmatpush.msrb.mxu1 %v1686_v10  ;;  %v6522_v10 = vld [vmem:[%s14693_s2 + $0x1d8] sm:$0xff]  ;;  %1469 = vmatpush.msrb.mxu3 %v6521_v34 }
 0x27b   :  { %1565 = vmatpush.msrb.mxu2 %v6606_v24  ;;  %1489 = vmatpush.msrb.mxu0 %v6522_v10  ;;  %v6589_v24 = vld [vmem:[%s14690_s3 + $0x3e8] sm:$0xff]  ;;  %v1685_v34 = vld [vmem:[%s14690_s3 + $0xd8] sm:$0xff] }
 0x27c   :  { %1733 = vmatpush.msrb.mxu1 %v1683_v22  ;;  %v6518_v22 = vld [vmem:[%s14693_s2 + $0x1b8] sm:$0xff] }
 0x27d   :  { %1566 = vmatpush.msrb.mxu2 %v6603_v38  ;;  %1470 = vmatpush.msrb.mxu3 %v6518_v22  ;;  %v6573_v22 = vld [vmem:[%s14690_s3 + $0x368] sm:$0xff] }
 0x27e   :  { %1734 = vmatpush.msrb.mxu1 %v1680_v17  ;;  %v6519_v17 = vld [vmem:[%s14693_s2 + $0x1c0] sm:$0xff] }
 0x27f   :  { %1490 = vmatpush.msrb.mxu0 %v6519_v17  ;;  %v6586_v17 = vld [vmem:[%s14690_s3 + $0x3d0] sm:$0xff] }
 0x280   :  { %1735 = vmatpush.msrb.mxu1 %v1677_v41  ;;  %v6600_v41 = vld [vmem:[%s14690_s3 + $0x440] sm:$0xff] }
 0x281   :  { %1567 = vmatpush.msrb.mxu2 %v6600_v41  ;;  %v1682_v41 = vld [vmem:[%s14690_s3 + $0xc0] sm:$0xff] }
 0x282   :  { %1736 = vmatpush.msrb.mxu1 %v1674_v55  ;;  %v6515_v55 = vld [vmem:[%s14693_s2 + $0x1a0] sm:$0xff] }
 0x283   :  { %1471 = vmatpush.msrb.mxu3 %v6515_v55 }
 0x284   :  { %1737 = vmatpush.msrb.mxu1 %v1671_v51  ;;  %v6516_v51 = vld [vmem:[%s14693_s2 + $0x1a8] sm:$0xff] }
 0x285   :  { %1491 = vmatpush.msrb.mxu0 %v6516_v51  ;;  %v6570_v51 = vld [vmem:[%s14690_s3 + $0x350] sm:$0xff] }
 0x286   :  { %1738 = vmatpush.msrb.mxu1 %v1668_v48  ;;  %v6597_v48 = vld [vmem:[%s14690_s3 + $0x428] sm:$0xff] }
 0x287   :  { %1568 = vmatpush.msrb.mxu2 %v6597_v48  ;;  %v6583_v48 = vld [vmem:[%s14690_s3 + $0x3b8] sm:$0xff] }
 0x288   :  { %1739 = vmatpush.msrb.mxu1 %v1665_v42  ;;  %v9623_v42 = vld [vmem:[%s14694_s4 + $0x3] sm:$0x7] }
 0x289   :  { %1569 = vmatpush.msrb.mxu2 %v6594_v58  ;;  %v1155_v21 = vperm.slane %v9623_v42, 0  ;;  %v1156_v35 = vperm.slane %v9623_v42, 1  ;;  %v6567_v58 = vld [vmem:[%s14690_s3 + $0x338] sm:$0xff] }
 0x28a   :  { %1740 = vmatpush.msrb.mxu1 %v1662_v49  ;;  %v6512_v49 = vld [vmem:[%s14693_s2 + $0x188] sm:$0xff] }
 0x28b   :  { %1472 = vmatpush.msrb.mxu3 %v6512_v49  ;;  %1570 = vmatpush.msrb.mxu2 %v6591_v50  ;;  %v1679_v49 = vld [vmem:[%s14690_s3 + $0xa8] sm:$0xff] }
 0x28c   :  { %1741 = vmatpush.msrb.mxu1 %v1659_v5  ;;  %v6513_v5 = vld [vmem:[%s14693_s2 + $0x190] sm:$0xff] }
 0x28d   :  { %1742 = vmatmul.f32.vlgmr.msrb.gmra.mxu1 %v9351_v1  ;;  %1492 = vmatpush.msrb.mxu0 %v6513_v5 }
 0x28e   :  { %1585 = vmatpush.msra.mxu3 %v6607_v30  ;;  %1571 = vmatpush.msrb.mxu2 %v6588_v25  ;;  %v6580_v30 = vld [vmem:[%s14690_s3 + $0x3a0] sm:$0xff]  ;;  %v1673_v25 = vld [vmem:[%s14690_s3 + $0x78] sm:$0xff] }
 0x28f   :  { %1706 = vmatpush.msra.mxu0 %v1703_v59  ;;  %v1676_v59 = vld [vmem:[%s14690_s3 + $0x90] sm:$0xff] }
 0x290   :  { %1586 = vmatpush.msra.mxu3 %v6604_v62  ;;  %1572 = vmatpush.msrb.mxu2 %v6585_v47  ;;  %v6571_v47 = vld [vmem:[%s14690_s3 + $0x358] sm:$0xff] }
 0x291   :  { %1707 = vmatpush.msra.mxu0 %v1700_v54  ;;  %v6564_v54 = vld [vmem:[%s14690_s3 + $0x320] sm:$0xff] }
 0x292   :  { %1587 = vmatpush.msra.mxu3 %v6601_v36  ;;  %1573 = vmatpush.msrb.mxu2 %v6582_v32  ;;  %v6561_v36 = vld [vmem:[%s14690_s3 + $0x308] sm:$0xff] }
 0x293   :  { %1708 = vmatpush.msra.mxu0 %v1697_v56  ;;  %v6574_v56 = vld [vmem:[%s14690_s3 + $0x370] sm:$0xff] }
 0x294   :  { %1588 = vmatpush.msra.mxu3 %v6598_v12  ;;  %1574 = vmatpush.msrb.mxu2 %v6579_v40  ;;  %v1667_v12 = vld [vmem:[%s14690_s3 + $0x48] sm:$0xff]  ;;  %v1658_v40 = vld [vmem:[%s14690_s3] sm:$0xff] }
 0x295   :  { %1709 = vmatpush.msra.mxu0 %v1694_v7 }
 0x296   :  { %1589 = vmatpush.msra.mxu3 %v6595_v53  ;;  %1575 = vmatpush.msrb.mxu2 %v6576_v18  ;;  %v6565_v53 = vld [vmem:[%s14690_s3 + $0x328] sm:$0xff] }
 0x297   :  { %1710 = vmatpush.msra.mxu0 %v1691_v44  ;;  %v1661_v44 = vld [vmem:[%s14690_s3 + $0x18] sm:$0xff] }
 0x298   :  { %1590 = vmatpush.msra.mxu3 %v6592_v37  ;;  %1576 = vmatpush.msrb.mxu2 %v6573_v22 }
 0x299   :  { %1711 = vmatpush.msra.mxu0 %v1688_v3 }
 0x29a   :  { %1591 = vmatpush.msra.mxu3 %v6589_v24  ;;  %1577 = vmatpush.msrb.mxu2 %v6570_v51  ;;  %v7548_v24 = vld [vmem:[%s14692_s5 + $0x1] ss:$0 sm:$0xff] }
 0x29b   :  { %1712 = vmatpush.msra.mxu0 %v1685_v34 }
 0x29c   :  { %1592 = vmatpush.msra.mxu3 %v6586_v17  ;;  %1578 = vmatpush.msrb.mxu2 %v6567_v58 }
 0x29d   :  { %1713 = vmatpush.msra.mxu0 %v1682_v41 }
 0x29e   :  { %1593 = vmatpush.msra.mxu3 %v6583_v48  ;;  %1579 = vmatpush.msrb.mxu2 %v6564_v54 }
 0x29f   :  { %1714 = vmatpush.msra.mxu0 %v1679_v49 }
 0x2a0   :  { %1594 = vmatpush.msra.mxu3 %v6580_v30  ;;  %1580 = vmatpush.msrb.mxu2 %v6561_v36 }
 0x2a1   :  { %1715 = vmatpush.msra.mxu0 %v1676_v59 }
 0x2a3   :  { %1716 = vmatpush.msra.mxu0 %v1673_v25 }
 0x2ca   :  { %v1178_v33 = vpop.f32.mrf.mxu0  ;;  %v1198_v2 = vpop.f32.mrf.mxu1 }
 0x2cb   :  { %v1179_v29 = vadd.f32 %v1178_v33, %v1155_v21  ;;  %v1199_v10 = vadd.f32 %v1198_v2, %v1156_v35  ;;  %v6577_v21 = vld [vmem:[%s14690_s3 + $0x388] sm:$0xff]  ;;  %v1670_v33 = vld [vmem:[%s14690_s3 + $0x60] sm:$0xff]  ;;  %v6562_v2 = vld [vmem:[%s14690_s3 + $0x310] sm:$0xff] }
 0x2cc   :  { %1595 = vmatpush.msra.mxu3 %v6577_v21  ;;  %1717 = vmatpush.msra.mxu0 %v1670_v33 }
 0x2cd   :  { %v1329_v4 = vadd.f32 %v1286_v19, %v1179_v29  ;;  %v6568_v29 = vld [vmem:[%s14690_s3 + $0x340] sm:$0xff]  ;;  %v1664_v19 = vld [vmem:[%s14690_s3 + $0x30] sm:$0xff] }
 0x2ce   :  { %1596 = vmatpush.msra.mxu3 %v6574_v56  ;;  %1718 = vmatpush.msra.mxu0 %v1667_v12 }
 0x2cf   :  { %v6508_v8 = vmul.f32 -1.442695, %v1329_v4 }
 0x2d0   :  { %1597 = vmatpush.msra.mxu3 %v6571_v47  ;;  %1719 = vmatpush.msra.mxu0 %v1664_v19  ;;  %v1702_v19 = vld [vmem:[%s14690_s3 + $0x160] sm:$0xff] }
 0x2d1   :  { %7614 = vpow2.f32 %v6508_v8  ;;  %v1218_v22 = vpop.f32.mrf.mxu2 }
 0x2d2   :  { %v1306_v38 = vpop.f32.mrf.mxu0  ;;  %1598 = vmatpush.msra.mxu3 %v6568_v29  ;;  %1720 = vmatpush.msra.mxu0 %v1661_v44  ;;  %v1705_v29 = vld [vmem:[%s14690_s3 + $0x178] sm:$0xff]  ;;  %v1690_v44 = vld [vmem:[%s14690_s3 + $0x100] sm:$0xff] }
 0x2d3   :  { %v1349_v55 = vadd.f32 %v1306_v38, %v1199_v10  ;;  %v1157_v10 = vperm.slane %v9623_v42, 2  ;;  %v1326_v38 = vpop.f32.mrf.mxu1 }
 0x2d4   :  { %1599 = vmatpush.msra.mxu3 %v6565_v53  ;;  %1721 = vmatpush.msra.mxu0 %v1658_v40  ;;  %v1373_v49 = vadd.f32 %v7548_v24, %v1326_v38  ;;  %v1693_v53 = vld [vmem:[%s14690_s3 + $0x118] sm:$0xff]  ;;  %v1678_v40 = vld [vmem:[%s14690_s3 + $0xa0] sm:$0xff]  ;;  %v1663_v24 = vld [vmem:[%s14690_s3 + $0x28] sm:$0xff] }
 0x2d5   :  { %v6509_v5 = vmul.f32 -1.442695, %v1349_v55  ;;  %v6656_v38 = vld [vmem:[%s14690_s3 + $0x2d0] sm:$0xff] }
 0x2d6   :  { %1600 = vmatpush.msra.mxu3 %v6562_v2  ;;  %v1681_v2 = vld [vmem:[%s14690_s3 + $0xb8] sm:$0xff] }
 0x2d7   :  { %v7615_v50 = vpop.eup %7614  ;;  %7616 = vpow2.f32 %v6509_v5  ;;  %v1219_v5 = vadd.f32 %v1218_v22, %v1157_v10  ;;  %v6659_v10 = vld [vmem:[%s14690_s3 + $0x2e8] sm:$0xff]  ;;  %v1864_v22 = vld [vmem:[%s14693_s2 + $0x170] sm:$0xff] }
 0x2d8   :  { %v1333_v62 = vadd.f32 1.0, %v7615_v50 }
 0x2da   :  { %7618 = vrcp.f32 %v1333_v62  ;;  %v1345_v3 = vand.u32 2147483648, %v1333_v62  ;;  %v1343_v18 = vand.u32 2147483647, %v1333_v62  ;;  %vm1339_vm2 = vweird.f32 %v1333_v62 }
 0x2dc   :  { %v1346_v55 = vor.u32 1.1754944e-38, %v1345_v3  ;;  %vm1344_vm4 = vcmp.eq.f32.partialorder %v1343_v18, 8.507059e+37  ;;  %v1672_v3 = vld [vmem:[%s14690_s3 + $0x70] sm:$0xff]  ;;  %v1666_v18 = vld [vmem:[%s14690_s3 + $0x40] sm:$0xff] }
 0x2dd   :  { %v7617_v7 = vpop.eup %7616 }
 0x2de   :  { %v1353_v32 = vadd.f32 1.0, %v7617_v7 }
 0x2e0   :  { %v7619_v4 = vpop.eup %7618  ;;  %7620 = vrcp.f32 %v1353_v32  ;;  %v1365_v59 = vand.u32 2147483648, %v1353_v32  ;;  %v1363_v54 = vand.u32 2147483647, %v1353_v32  ;;  %vm1359_vm6 = vweird.f32 %v1353_v32 }
 0x2e1   :  { %v1335_v35 = vmul.f32 %v7619_v4, %v1333_v62  ;;  %vm1340_vm1 = vweird.f32 %v7619_v4 }
 0x2e2   :  { %vm1341_vm3 = vmor %vm1339_vm2, %vm1340_vm1  ;;  %v1366_v25 = vor.u32 1.1754944e-38, %v1365_v59  ;;  %vm1364_vm8 = vcmp.eq.f32.partialorder %v1363_v54, 8.507059e+37  ;;  %v6635_v59 = vld [vmem:[%s14690_s3 + $0x228] sm:$0xff]  ;;  %v6629_v54 = vld [vmem:[%s14690_s3 + $0x1f8] sm:$0xff] }
 0x2e3   :  { %v1336_v37 = vsub.f32 1.0, %v1335_v35  ;;  %v1684_v35 = vld [vmem:[%s14690_s3 + $0xd0] sm:$0xff] }
 0x2e5   :  { %v1337_v8 = vmul.f32 %v7619_v4, %v1336_v37  ;;  %v1675_v37 = vld [vmem:[%s14690_s3 + $0x88] sm:$0xff] }
 0x2e6   :  { %v7621_v34 = vpop.eup %7620 }
 0x2e7   :  { %v1355_v17 = vmul.f32 %v7621_v34, %v1353_v32  ;;  %v1338_v41 = vadd.f32 %v7619_v4, %v1337_v8  ;;  %vm1360_vm5 = vweird.f32 %v7621_v34  ;;  %v1696_v32 = vld [vmem:[%s14690_s3 + $0x130] sm:$0xff]  ;;  %v1669_v8 = vld [vmem:[%s14690_s3 + $0x58] sm:$0xff] }
 0x2e8   :  { %vm1361_vm7 = vmor %vm1359_vm6, %vm1360_vm5 }
 0x2e9   :  { %v1356_v51 = vsub.f32 1.0, %v1355_v17  ;;  %v1342_v48 = vsel %vm1341_vm3, %v7619_v4, %v1338_v41  ;;  %v1687_v4 = vld [vmem:[%s14690_s3 + $0xe8] sm:$0xff]  ;;  %v1861_v17 = vld [vmem:[%s14693_s2 + $0x158] sm:$0xff] }
 0x2ea   :  { %v1347_v58 = vsel %vm1344_vm4, %v1346_v55, %v1342_v48  ;;  %v6653_v41 = vld [vmem:[%s14690_s3 + $0x2b8] sm:$0xff]  ;;  %v1858_v55 = vld [vmem:[%s14693_s2 + $0x140] sm:$0xff]  ;;  %v1855_v48 = vld [vmem:[%s14693_s2 + $0x128] sm:$0xff] }
 0x2eb   :  { %v1357_v30 = vmul.f32 %v7621_v34, %v1356_v51  ;;  %v1374_v50 = vmul.f32 %v1373_v49, %v1347_v58  ;;  %v6650_v51 = vld [vmem:[%s14690_s3 + $0x2a0] sm:$0xff]  ;;  %v6647_v49 = vld [vmem:[%s14690_s3 + $0x288] sm:$0xff]  ;;  %v6641_v58 = vld [vmem:[%s14690_s3 + $0x258] sm:$0xff] }
 0x2ed   :  { %v1358_v21 = vadd.f32 %v7621_v34, %v1357_v30  ;;  %v1375_v42 = vadd.f32 %v1374_v50, %v1219_v5  ;;  %v6644_v5 = vld [vmem:[%s14690_s3 + $0x270] sm:$0xff]  ;;  %v6638_v30 = vld [vmem:[%s14690_s3 + $0x240] sm:$0xff] }
 0x2ee   :  { %v6632_v50 = vld [vmem:[%s14690_s3 + $0x210] sm:$0xff] }
 0x2ef   :  { %v1362_v36 = vsel %vm1361_vm7, %v7621_v34, %v1358_v21  ;;  %7622 = vtanh.f32 %v1375_v42  ;;  %v1660_v34 = vld [vmem:[%s14690_s3 + $0x10] sm:$0xff]  ;;  %v6626_v21 = vld [vmem:[%s14690_s3 + $0x1e0] sm:$0xff]  ;;  %v6623_v42 = vld [vmem:[%s14690_s3 + $0x1c8] sm:$0xff] }
 0x2f0   :  { %v1367_v62 = vsel %vm1364_vm8, %v1366_v25, %v1362_v36  ;;  %v6620_v25 = vld [vmem:[%s14690_s3 + $0x1b0] sm:$0xff]  ;;  %v6617_v36 = vld [vmem:[%s14690_s3 + $0x198] sm:$0xff] }
 0x2f1   :  { %v1377_v56 = vsub.f32 1.0, %v1367_v62  ;;  %v1379_v12 = vmul.f32 %v1367_v62, %v8980_v11  ;;  %v1699_v11 = vld [vmem:[%s14690_s3 + $0x148] sm:$0xff]  ;;  %v6614_v62 = vld [vmem:[%s14690_s3 + $0x180] sm:$0xff] }
 0x2f5   :  { %v7623_v33 = vpop.eup %7622 }
 0x2f6   :  { %v1378_v47 = vmul.f32 %v7623_v33, %v1377_v56  ;;  %v1863_v56 = vld [vmem:[%s14693_s2 + $0x168] sm:$0xff]  ;;  %v1852_v33 = vld [vmem:[%s14693_s2 + $0x110] sm:$0xff] }
 0x2f8   :  { %v9770_v7 = vadd.f32 %v1379_v12, %v1378_v47  ;;  %v1860_v47 = vld [vmem:[%s14693_s2 + $0x150] sm:$0xff]  ;;  %v1849_v12 = vld [vmem:[%s14693_s2 + $0xf8] sm:$0xff] }
 0x2fa   :  { %1453 = vmatmul.f32.vlgmr.msra.gmra.mxu2 %v9770_v7  ;;  %1473 = vmatmul.f32.vlgmr.msrb.gmra.mxu3 %v9770_v7 }
 0x2fb   :  { %1493 = vmatmul.f32.vlgmr.msrb.gmra.mxu0 %v9770_v7  ;;  %1746 = vmatpush.msra.mxu2 %v1705_v29  ;;  %v1857_v29 = vld [vmem:[%s14693_s2 + $0x138] sm:$0xff] }
 0x2fc   :  { %1894 = vmatpush.msrb.mxu0 %v1864_v22  ;;  %1874 = vmatpush.msrb.mxu3 %v1863_v56  ;;  %v1822_v22 = vld [vmem:[%s14693_s2 + $0x20] sm:$0xff]  ;;  %v1853_v56 = vld [vmem:[%s14693_s2 + $0x118] sm:$0xff] }
 0x2fd   :  { %1747 = vmatpush.msra.mxu2 %v1702_v19  ;;  %v1846_v19 = vld [vmem:[%s14693_s2 + $0xe0] sm:$0xff] }
 0x2fe   :  { %1895 = vmatpush.msrb.mxu0 %v1861_v17  ;;  %1875 = vmatpush.msrb.mxu3 %v1860_v47  ;;  %v1830_v17 = vld [vmem:[%s14693_s2 + $0x60] sm:$0xff]  ;;  %v6649_v47 = vld [vmem:[%s14690_s3 + $0x298] sm:$0xff] }
 0x2ff   :  { %1748 = vmatpush.msra.mxu2 %v1699_v11  ;;  %v1854_v11 = vld [vmem:[%s14693_s2 + $0x120] sm:$0xff] }
 0x300   :  { %1896 = vmatpush.msrb.mxu0 %v1858_v55  ;;  %1876 = vmatpush.msrb.mxu3 %v1857_v29  ;;  %v1865_v55 = vld [vmem:[%s14693_s2 + $0x178] sm:$0xff]  ;;  %v1850_v29 = vld [vmem:[%s14693_s2 + $0x100] sm:$0xff] }
 0x301   :  { %1749 = vmatpush.msra.mxu2 %v1696_v32  ;;  %v1843_v32 = vld [vmem:[%s14693_s2 + $0xc8] sm:$0xff]  ;;  %1914 = vmatpush.msra.mxu1 %v1865_v55  ;;  %v6634_v55 = vld [vmem:[%s14690_s3 + $0x220] sm:$0xff] }
 0x302   :  { %1581 = vmatmul.f32.vlgmr.msrb.gmra.mxu2 %v9418_v52  ;;  %1601 = vmatmul.f32.vlgmr.msra.gmra.mxu3 %v9418_v52 }
 0x303   :  { %1722 = vmatmul.f32.vlgmr.msra.gmra.mxu0 %v9351_v1  ;;  %1750 = vmatpush.msra.mxu2 %v1693_v53  ;;  %v1851_v53 = vld [vmem:[%s14693_s2 + $0x108] sm:$0xff] }
 0x304   :  { %1897 = vmatpush.msrb.mxu0 %v1855_v48  ;;  %1877 = vmatpush.msrb.mxu3 %v1854_v11  ;;  %v1827_v48 = vld [vmem:[%s14693_s2 + $0x48] sm:$0xff]  ;;  %v6646_v11 = vld [vmem:[%s14690_s3 + $0x280] sm:$0xff] }
 0x305   :  { %1751 = vmatpush.msra.mxu2 %v1690_v44  ;;  %v1840_v44 = vld [vmem:[%s14693_s2 + $0xb0] sm:$0xff] }
 0x306   :  { %1898 = vmatpush.msrb.mxu0 %v1852_v33  ;;  %1878 = vmatpush.msrb.mxu3 %v1851_v53  ;;  %v6660_v33 = vld [vmem:[%s14690_s3 + $0x2f0] sm:$0xff] }
 0x307   :  { %1752 = vmatpush.msra.mxu2 %v1687_v4  ;;  %v1848_v4 = vld [vmem:[%s14693_s2 + $0xf0] sm:$0xff] }
 0x308   :  { %1899 = vmatpush.msrb.mxu0 %v1849_v12  ;;  %1879 = vmatpush.msrb.mxu3 %v1848_v4  ;;  %v6654_v4 = vld [vmem:[%s14690_s3 + $0x2c0] sm:$0xff] }
 0x309   :  { %1753 = vmatpush.msra.mxu2 %v1684_v35  ;;  %v1837_v35 = vld [vmem:[%s14693_s2 + $0x98] sm:$0xff] }
 0x30a   :  { %1900 = vmatpush.msrb.mxu0 %v1846_v19  ;;  %v6657_v19 = vld [vmem:[%s14690_s3 + $0x2d8] sm:$0xff] }
 0x30b   :  { %1754 = vmatpush.msra.mxu2 %v1681_v2  ;;  %v1845_v2 = vld [vmem:[%s14693_s2 + $0xd8] sm:$0xff] }
 0x30c   :  { %1901 = vmatpush.msrb.mxu0 %v1843_v32  ;;  %1880 = vmatpush.msrb.mxu3 %v1845_v2  ;;  %v10023_v32 = vld [vmem:[%s14694_s4 + $0x6] sm:$0x7] }
 0x30d   :  { %1755 = vmatpush.msra.mxu2 %v1678_v40  ;;  %v1834_v40 = vld [vmem:[%s14693_s2 + $0x80] sm:$0xff]  ;;  %v1431_v53 = vperm.slane %v10023_v32, 0 }
 0x30e   :  { %1902 = vmatpush.msrb.mxu0 %v1840_v44  ;;  %v1847_v44 = vld [vmem:[%s14693_s2 + $0xe8] sm:$0xff] }
 0x30f   :  { %1756 = vmatpush.msra.mxu2 %v1675_v37  ;;  %v1842_v37 = vld [vmem:[%s14693_s2 + $0xc0] sm:$0xff] }
 0x310   :  { %1903 = vmatpush.msrb.mxu0 %v1837_v35  ;;  %1881 = vmatpush.msrb.mxu3 %v1842_v37  ;;  %v6643_v35 = vld [vmem:[%s14690_s3 + $0x268] sm:$0xff] }
 0x311   :  { %1757 = vmatpush.msra.mxu2 %v1672_v3  ;;  %v1831_v3 = vld [vmem:[%s14693_s2 + $0x68] sm:$0xff] }
 0x312   :  { %1904 = vmatpush.msrb.mxu0 %v1834_v40  ;;  %v1844_v40 = vld [vmem:[%s14693_s2 + $0xd0] sm:$0xff]  ;;  %v6651_v37 = vld [vmem:[%s14690_s3 + $0x2a8] sm:$0xff] }
 0x313   :  { %1758 = vmatpush.msra.mxu2 %v1669_v8  ;;  %v1839_v8 = vld [vmem:[%s14693_s2 + $0xa8] sm:$0xff] }
 0x314   :  { %1905 = vmatpush.msrb.mxu0 %v1831_v3  ;;  %1882 = vmatpush.msrb.mxu3 %v1839_v8  ;;  %v6640_v3 = vld [vmem:[%s14690_s3 + $0x250] sm:$0xff]  ;;  %v126_v8 = vadd.f32 %v8243_v9, %v8297_v27  ;;  %v1838_v9 = vld [vmem:[%s14693_s2 + $0xa0] sm:$0xff] }
 0x315   :  { %1759 = vmatpush.msra.mxu2 %v1666_v18  ;;  %v1828_v18 = vld [vmem:[%s14693_s2 + $0x50] sm:$0xff] }
 0x316   :  { %1906 = vmatpush.msrb.mxu0 %v1828_v18 }
 0x317   :  { %1760 = vmatpush.msra.mxu2 %v1663_v24  ;;  %v9942_v24 = vpop.f32.mrf.mxu1 }
 0x319   :  { %1761 = vmatpush.msra.mxu2 %v1660_v34  ;;  %v1836_v34 = vld [vmem:[%s14693_s2 + $0x90] sm:$0xff] }
 0x31a   :  { %1762 = vmatmul.f32.vlgmr.msra.gmra.mxu2 %v9351_v1  ;;  %1883 = vmatpush.msrb.mxu3 %v1836_v34 }
 0x31b   :  { %1982 = vmatpush.msrb.mxu2 %v6659_v10  ;;  %v1825_v10 = vld [vmem:[%s14693_s2 + $0x38] sm:$0xff] }
 0x31c   :  { %1907 = vmatpush.msrb.mxu0 %v1825_v10  ;;  %v1841_v10 = vld [vmem:[%s14693_s2 + $0xb8] sm:$0xff] }
 0x31d   :  { %1983 = vmatpush.msrb.mxu2 %v6656_v38  ;;  %v1833_v38 = vld [vmem:[%s14693_s2 + $0x78] sm:$0xff] }
 0x31e   :  { %1884 = vmatpush.msrb.mxu3 %v1833_v38  ;;  %1908 = vmatpush.msrb.mxu0 %v1822_v22  ;;  %v6648_v38 = vld [vmem:[%s14690_s3 + $0x290] sm:$0xff]  ;;  %v6637_v22 = vld [vmem:[%s14690_s3 + $0x238] sm:$0xff] }
 0x31f   :  { %1984 = vmatpush.msrb.mxu2 %v6653_v41  ;;  %v1819_v41 = vld [vmem:[%s14693_s2 + $0x8] sm:$0xff] }
 0x320   :  { %1885 = vmatpush.msrb.mxu3 %v1830_v17  ;;  %1909 = vmatpush.msrb.mxu0 %v1819_v41  ;;  %v6645_v41 = vld [vmem:[%s14690_s3 + $0x278] sm:$0xff] }
 0x321   :  { %1985 = vmatpush.msrb.mxu2 %v6650_v51  ;;  %v6661_v51 = vld [vmem:[%s14690_s3 + $0x2f8] sm:$0xff] }
 0x322   :  { %2022 = vmatpush.msra.mxu0 %v6661_v51  ;;  %1886 = vmatpush.msrb.mxu3 %v1827_v48 }
 0x323   :  { %1986 = vmatpush.msrb.mxu2 %v6647_v49  ;;  %v1743_v49 = vpop.f32.mrf.mxu1 }
 0x325   :  { %1987 = vmatpush.msrb.mxu2 %v6644_v5  ;;  %v1862_v5 = vld [vmem:[%s14693_s2 + $0x160] sm:$0xff] }
 0x326   :  { %1915 = vmatpush.msra.mxu1 %v1862_v5  ;;  %v1835_v5 = vld [vmem:[%s14693_s2 + $0x88] sm:$0xff] }
 0x327   :  { %1988 = vmatpush.msrb.mxu2 %v6641_v58  ;;  %v6658_v58 = vld [vmem:[%s14690_s3 + $0x2e0] sm:$0xff] }
 0x328   :  { %2023 = vmatpush.msra.mxu0 %v6658_v58  ;;  %v6642_v58 = vld [vmem:[%s14690_s3 + $0x260] sm:$0xff] }
 0x329   :  { %1989 = vmatpush.msrb.mxu2 %v6638_v30  ;;  %v167_v30 = vadd.f32 %v8263_v16, %v8483_v13  ;;  %v1821_v16 = vld [vmem:[%s14693_s2 + $0x18] sm:$0xff] }
 0x32b   :  { %1990 = vmatpush.msrb.mxu2 %v6635_v59  ;;  %v1824_v59 = vld [vmem:[%s14693_s2 + $0x30] sm:$0xff] }
 0x32c   :  { %1887 = vmatpush.msrb.mxu3 %v1824_v59 }
 0x32d   :  { %1991 = vmatpush.msrb.mxu2 %v6632_v50  ;;  %v1859_v50 = vld [vmem:[%s14693_s2 + $0x148] sm:$0xff] }
 0x32e   :  { %1916 = vmatpush.msra.mxu1 %v1859_v50  ;;  %1888 = vmatpush.msrb.mxu3 %v1821_v16  ;;  %v6639_v50 = vld [vmem:[%s14690_s3 + $0x248] sm:$0xff]  ;;  %v1829_v16 = vld [vmem:[%s14693_s2 + $0x58] sm:$0xff] }
 0x32f   :  { %1992 = vmatpush.msrb.mxu2 %v6629_v54  ;;  %v6655_v54 = vld [vmem:[%s14690_s3 + $0x2c8] sm:$0xff] }
 0x330   :  { %2024 = vmatpush.msra.mxu0 %v6655_v54  ;;  %v6628_v54 = vld [vmem:[%s14690_s3 + $0x1f0] sm:$0xff] }
 0x331   :  { %1993 = vmatpush.msrb.mxu2 %v6626_v21  ;;  %v1786_v21 = vadd.f32 %v1743_v49, %v167_v30  ;;  %v6631_v30 = vld [vmem:[%s14690_s3 + $0x208] sm:$0xff] }
 0x333   :  { %1994 = vmatpush.msrb.mxu2 %v6623_v42  ;;  %v1856_v42 = vld [vmem:[%s14693_s2 + $0x130] sm:$0xff]  ;;  %v6612_v12 = vmul.f32 -1.442695, %v1786_v21 }
 0x334   :  { %1917 = vmatpush.msra.mxu1 %v1856_v42  ;;  %v6636_v42 = vld [vmem:[%s14690_s3 + $0x230] sm:$0xff] }
 0x335   :  { %1995 = vmatpush.msrb.mxu2 %v6620_v25  ;;  %v6652_v25 = vld [vmem:[%s14690_s3 + $0x2b0] sm:$0xff]  ;;  %7624 = vpow2.f32 %v6612_v12 }
 0x336   :  { %2025 = vmatpush.msra.mxu0 %v6652_v25  ;;  %1918 = vmatpush.msra.mxu1 %v1853_v56  ;;  %v6625_v25 = vld [vmem:[%s14690_s3 + $0x1d8] sm:$0xff] }
 0x337   :  { %1996 = vmatpush.msrb.mxu2 %v6617_v36  ;;  %v1818_v36 = vld [vmem:[%s14693_s2] sm:$0xff]  ;;  %v6633_v56 = vld [vmem:[%s14690_s3 + $0x218] sm:$0xff] }
 0x338   :  { %1889 = vmatpush.msrb.mxu3 %v1818_v36  ;;  %2026 = vmatpush.msra.mxu0 %v6649_v47  ;;  %v1826_v36 = vld [vmem:[%s14693_s2 + $0x40] sm:$0xff] }
 0x339   :  { %1997 = vmatpush.msrb.mxu2 %v6614_v62  ;;  %1919 = vmatpush.msra.mxu1 %v1850_v29  ;;  %v1823_v29 = vld [vmem:[%s14693_s2 + $0x28] sm:$0xff] }
 0x33a   :  { %1998 = vmatmul.f32.vlgmr.msrb.gmra.mxu2 %v9770_v7  ;;  %2002 = vmatpush.msra.mxu3 %v6660_v33  ;;  %v6622_v33 = vld [vmem:[%s14690_s3 + $0x1c0] sm:$0xff] }
 0x33b   :  { %2027 = vmatpush.msra.mxu0 %v6646_v11  ;;  %1920 = vmatpush.msra.mxu1 %v1847_v44  ;;  %v7625_v51 = vpop.eup %7624  ;;  %v6619_v11 = vld [vmem:[%s14690_s3 + $0x1a8] sm:$0xff]  ;;  %v1820_v44 = vld [vmem:[%s14693_s2 + $0x10] sm:$0xff] }
 0x33c   :  { %2003 = vmatpush.msra.mxu3 %v6657_v19  ;;  %v10074_v59 = vadd.f32 1.0, %v7625_v51  ;;  %v6630_v19 = vld [vmem:[%s14690_s3 + $0x200] sm:$0xff] }
 0x33d   :  { %2028 = vmatpush.msra.mxu0 %v6643_v35  ;;  %1921 = vmatpush.msra.mxu1 %v1844_v40  ;;  %v6616_v35 = vld [vmem:[%s14690_s3 + $0x190] sm:$0xff] }
 0x33e   :  { %2004 = vmatpush.msra.mxu3 %v6654_v4  ;;  %v6627_v4 = vld [vmem:[%s14690_s3 + $0x1e8] sm:$0xff]  ;;  %vm1796_vm14 = vweird.f32 %v10074_v59 }
 0x33f   :  { %2029 = vmatpush.msra.mxu0 %v6640_v3  ;;  %1922 = vmatpush.msra.mxu1 %v1841_v10  ;;  %v6624_v3 = vld [vmem:[%s14690_s3 + $0x1d0] sm:$0xff] }
 0x340   :  { %2005 = vmatpush.msra.mxu3 %v6651_v37 }
 0x341   :  { %2030 = vmatpush.msra.mxu0 %v6637_v22  ;;  %1923 = vmatpush.msra.mxu1 %v1838_v9 }
 0x342   :  { %2006 = vmatpush.msra.mxu3 %v6648_v38 }
 0x343   :  { %2031 = vmatpush.msra.mxu0 %v6634_v55  ;;  %1924 = vmatpush.msra.mxu1 %v1835_v5  ;;  %v6615_v55 = vld [vmem:[%s14690_s3 + $0x188] sm:$0xff] }
 0x344   :  { %2007 = vmatpush.msra.mxu3 %v6645_v41 }
 0x345   :  { %2032 = vmatpush.msra.mxu0 %v6631_v30 }
 0x346   :  { %2008 = vmatpush.msra.mxu3 %v6642_v58 }
 0x347   :  { %2033 = vmatpush.msra.mxu0 %v6628_v54 }
 0x348   :  { %2009 = vmatpush.msra.mxu3 %v6639_v50 }
 0x349   :  { %2034 = vmatpush.msra.mxu0 %v6625_v25 }
 0x34a   :  { %2010 = vmatpush.msra.mxu3 %v6636_v42 }
 0x34b   :  { %2035 = vmatpush.msra.mxu0 %v6622_v33 }
 0x34c   :  { %2011 = vmatpush.msra.mxu3 %v6633_v56 }
 0x34d   :  { %2036 = vmatpush.msra.mxu0 %v6619_v11 }
 0x34e   :  { %2012 = vmatpush.msra.mxu3 %v6630_v19 }
 0x34f   :  { %2037 = vmatpush.msra.mxu0 %v6616_v35 }
 0x350   :  { %2013 = vmatpush.msra.mxu3 %v6627_v4 }
 0x352   :  { %2014 = vmatpush.msra.mxu3 %v6624_v3 }
 0x378   :  { %v10000_v62 = vpop.f32.mrf.mxu0 }
 0x37d   :  { %v1454_v2 = vpop.f32.mrf.mxu2 }
 0x37e   :  { %v1455_v18 = vadd.f32 %v1454_v2, %v1431_v53  ;;  %v1432_v53 = vperm.slane %v10023_v32, 1  ;;  %v1474_v2 = vpop.f32.mrf.mxu3 }
 0x380   :  { %v1723_v34 = vpop.f32.mrf.mxu0  ;;  %v1605_v49 = vadd.f32 %v9942_v24, %v1455_v18  ;;  %v1832_v24 = vld [vmem:[%s14693_s2 + $0x70] sm:$0xff] }
 0x381   :  { %v1766_v17 = vadd.f32 %v1723_v34, %v126_v8  ;;  %1925 = vmatpush.msra.mxu1 %v1832_v24  ;;  %v1475_v8 = vadd.f32 %v1474_v2, %v1432_v53  ;;  %v6621_v34 = vld [vmem:[%s14690_s3 + $0x1b8] sm:$0xff]  ;;  %v7550_v24 = vld [vmem:[%s14692_s5] ss:$0 sm:$0xff] }
 0x382   :  { %v6608_v21 = vmul.f32 -1.442695, %v1605_v49  ;;  %2015 = vmatpush.msra.mxu3 %v6621_v34 }
 0x383   :  { %v6611_v48 = vmul.f32 -1.442695, %v1766_v17  ;;  %1926 = vmatpush.msra.mxu1 %v1829_v16  ;;  %v6618_v17 = vld [vmem:[%s14690_s3 + $0x1a0] sm:$0xff] }
 0x384   :  { %2016 = vmatpush.msra.mxu3 %v6618_v17 }
 0x385   :  { %7626 = vpow2.f32 %v6611_v48  ;;  %1927 = vmatpush.msra.mxu1 %v1826_v36  ;;  %v1582_v37 = vpop.f32.mrf.mxu2 }
 0x386   :  { %7628 = vrcp.f32 %v10074_v59  ;;  %v1625_v38 = vadd.f32 %v1582_v37, %v1475_v8  ;;  %2017 = vmatpush.msra.mxu3 %v6615_v55 }
 0x387   :  { %7630 = vpow2.f32 %v6608_v21  ;;  %1928 = vmatpush.msra.mxu1 %v1823_v29  ;;  %v1802_v29 = vand.u32 2147483648, %v10074_v59 }
 0x388   :  { %v6609_v48 = vmul.f32 -1.442695, %v1625_v38 }
 0x389   :  { %1929 = vmatpush.msra.mxu1 %v1820_v44  ;;  %v1803_v35 = vor.u32 1.1754944e-38, %v1802_v29  ;;  %v6735_v29 = vld [vmem:[%s14690_s3 + $0x3a8] sm:$0xff] }
 0x38b   :  { %v7627_v47 = vpop.eup %7626 }
 0x38c   :  { %v1770_v12 = vadd.f32 1.0, %v7627_v47  ;;  %v7629_v40 = vpop.eup %7628  ;;  %v208_v47 = vadd.f32 %v8748_v26, %v8600_v6 }
 0x38d   :  { %v7631_v18 = vpop.eup %7630  ;;  %v1792_v10 = vmul.f32 %v7629_v40, %v10074_v59  ;;  %vm1797_vm13 = vweird.f32 %v7629_v40 }
 0x38e   :  { %7632 = vrcp.f32 %v1770_v12  ;;  %v10133_v9 = vadd.f32 1.0, %v7631_v18  ;;  %v1782_v5 = vand.u32 2147483648, %v1770_v12  ;;  %v1780_v30 = vand.u32 2147483647, %v1770_v12  ;;  %vm1798_vm15 = vmor %vm1796_vm14, %vm1797_vm13 }
 0x38f   :  { %v1793_v51 = vsub.f32 1.0, %v1792_v10  ;;  %vm1776_vm10 = vweird.f32 %v1770_v12 }
 0x390   :  { %7634 = vrcp.f32 %v10133_v9  ;;  %v1783_v21 = vor.u32 1.1754944e-38, %v1782_v5  ;;  %vm1781_vm12 = vcmp.eq.f32.partialorder %v1780_v30, 8.507059e+37  ;;  %v1621_v17 = vand.u32 2147483648, %v10133_v9  ;;  %v1602_v5 = vpop.f32.mrf.mxu3 }
 0x391   :  { %v1794_v50 = vmul.f32 %v7629_v40, %v1793_v51  ;;  %7636 = vpow2.f32 %v6609_v48  ;;  %vm1615_vm2 = vweird.f32 %v10133_v9  ;;  %v6753_v51 = vld [vmem:[%s14690_s3 + $0x438] sm:$0xff] }
 0x393   :  { %v1795_v33 = vadd.f32 %v7629_v40, %v1794_v50  ;;  %v6747_v50 = vld [vmem:[%s14690_s3 + $0x408] sm:$0xff] }
 0x394   :  { %v7633_v22 = vpop.eup %7632 }
 0x395   :  { %v1772_v41 = vmul.f32 %v7633_v22, %v1770_v12  ;;  %vm1777_vm9 = vweird.f32 %v7633_v22  ;;  %v1800_v12 = vand.u32 2147483647, %v10074_v59  ;;  %v1799_v4 = vsel %vm1798_vm15, %v7629_v40, %v1795_v33  ;;  %v6759_v40 = vld [vmem:[%s14690_s3 + $0x468] sm:$0xff] }
 0x396   :  { %vm1778_vm11 = vmor %vm1776_vm10, %vm1777_vm9  ;;  %v7635_v56 = vpop.eup %7634 }
 0x397   :  { %v1773_v49 = vsub.f32 1.0, %v1772_v41  ;;  %v7637_v11 = vpop.eup %7636  ;;  %v1611_v53 = vmul.f32 %v7635_v56, %v10133_v9  ;;  %vm1801_vm0 = vcmp.eq.f32.partialorder %v1800_v12, 8.507059e+37  ;;  %vm1616_vm1 = vweird.f32 %v7635_v56  ;;  %v6756_v41 = vld [vmem:[%s14690_s3 + $0x450] sm:$0xff] }
 0x398   :  { %v10148_v2 = vadd.f32 1.0, %v7637_v11  ;;  %v1804_v26 = vsel %vm1801_vm0, %v1803_v35, %v1799_v4  ;;  %vm1617_vm3 = vmor %vm1615_vm2, %vm1616_vm1  ;;  %v6732_v11 = vld [vmem:[%s14690_s3 + $0x390] sm:$0xff]  ;;  %v6726_v4 = vld [vmem:[%s14690_s3 + $0x360] sm:$0xff] }
 0x399   :  { %v1774_v58 = vmul.f32 %v7633_v22, %v1773_v49  ;;  %v1612_v37 = vsub.f32 1.0, %v1611_v53  ;;  %v1814_v3 = vsub.f32 1.0, %v1804_v26  ;;  %v1816_v59 = vmul.f32 %v1804_v26, %v9351_v1  ;;  %v7549_v49 = vld [vmem:[%s14692_s5 + $0x2] ss:$0 sm:$0xff]  ;;  %v6729_v53 = vld [vmem:[%s14690_s3 + $0x378] sm:$0xff] }
 0x39a   :  { %v1619_v1 = vand.u32 2147483647, %v10133_v9  ;;  %v6750_v9 = vld [vmem:[%s14690_s3 + $0x420] sm:$0xff]  ;;  %vm1635_vm6 = vweird.f32 %v10148_v2 }
 0x39b   :  { %v1775_v54 = vadd.f32 %v7633_v22, %v1774_v58  ;;  %v1613_v18 = vmul.f32 %v7635_v56, %v1612_v37  ;;  %v1622_v58 = vor.u32 1.1754944e-38, %v1621_v17  ;;  %v6710_v17 = vld [vmem:[%s14693_s2 + $0x2e8] sm:$0xff] }
 0x39c   :  { %vm1620_vm4 = vcmp.eq.f32.partialorder %v1619_v1, 8.507059e+37  ;;  %2150 = vmatpush.msrb.mxu1 %v6710_v17  ;;  %v2411_v1 = vld [vmem:[%s14690_s3 + $0x140] sm:$0xff]  ;;  %v6674_v17 = vld [vmem:[%s14693_s2 + $0x1c8] sm:$0xff] }
 0x39d   :  { %v1763_v16 = vpop.f32.mrf.mxu2  ;;  %v1779_v42 = vsel %vm1778_vm11, %v7633_v22, %v1775_v54  ;;  %v1614_v22 = vadd.f32 %v7635_v56, %v1613_v18  ;;  %v1433_v54 = vperm.slane %v10023_v32, 2  ;;  %v6738_v32 = vld [vmem:[%s14690_s3 + $0x3c0] sm:$0xff]  ;;  %v6717_v18 = vld [vmem:[%s14690_s3 + $0x318] sm:$0xff] }
 0x39e   :  { %v1784_v25 = vsel %vm1781_vm12, %v1783_v21, %v1779_v42  ;;  %v1810_v36 = vadd.f32 %v7550_v24, %v1763_v16  ;;  %v1649_v21 = vadd.f32 %v7549_v49, %v1602_v5  ;;  %v6744_v16 = vld [vmem:[%s14690_s3 + $0x3f0] sm:$0xff]  ;;  %v2402_v5 = vld [vmem:[%s14690_s3 + $0xf8] sm:$0xff] }
 0x39f   :  { %v1618_v48 = vsel %vm1617_vm3, %v7635_v56, %v1614_v22  ;;  %v1495_v56 = vadd.f32 %v10000_v62, %v1433_v54  ;;  %v1639_v62 = vand.u32 2147483647, %v10148_v2  ;;  %v2414_v22 = vld [vmem:[%s14690_s3 + $0x158] sm:$0xff]  ;;  %v2405_v49 = vld [vmem:[%s14690_s3 + $0x110] sm:$0xff]  ;;  %v2384_v54 = vld [vmem:[%s14690_s3 + $0x68] sm:$0xff] }
 0x3a0   :  { %v1811_v19 = vmul.f32 %v1810_v36, %v1784_v25  ;;  %v1623_v24 = vsel %vm1620_vm4, %v1622_v58, %v1618_v48  ;;  %v6741_v36 = vld [vmem:[%s14690_s3 + $0x3d8] sm:$0xff]  ;;  %v6701_v48 = vld [vmem:[%s14693_s2 + $0x2a0] sm:$0xff] }
 0x3a1   :  { %v1650_v42 = vmul.f32 %v1649_v21, %v1623_v24  ;;  %vm1640_vm8 = vcmp.eq.f32.partialorder %v1639_v62, 8.507059e+37  ;;  %v2399_v58 = vld [vmem:[%s14690_s3 + $0xe0] sm:$0xff]  ;;  %v2390_v24 = vld [vmem:[%s14690_s3 + $0x98] sm:$0xff]  ;;  %v2381_v21 = vld [vmem:[%s14690_s3 + $0x50] sm:$0xff] }
 0x3a2   :  { %v1812_v44 = vadd.f32 %v1811_v19, %v208_v47  ;;  %v1641_v19 = vand.u32 2147483648, %v10148_v2  ;;  %v6705_v62 = vld [vmem:[%s14693_s2 + $0x2c0] sm:$0xff] }
 0x3a3   :  { %v1651_v33 = vadd.f32 %v1650_v42, %v1495_v56  ;;  %v2375_v42 = vld [vmem:[%s14690_s3 + $0x20] sm:$0xff]  ;;  %v6711_v56 = vld [vmem:[%s14693_s2 + $0x2f0] sm:$0xff] }
 0x3a4   :  { %7638 = vtanh.f32 %v1812_v44  ;;  %v1642_v44 = vor.u32 1.1754944e-38, %v1641_v19  ;;  %2170 = vmatpush.msra.mxu2 %v6711_v56  ;;  %v6692_v19 = vld [vmem:[%s14693_s2 + $0x258] sm:$0xff]  ;;  %v6669_v56 = vld [vmem:[%s14693_s2 + $0x1a0] sm:$0xff] }
 0x3a5   :  { %7640 = vrcp.f32 %v10148_v2 }
 0x3a6   :  { %7642 = vtanh.f32 %v1651_v33  ;;  %v6695_v33 = vld [vmem:[%s14693_s2 + $0x270] sm:$0xff] }
 0x3aa   :  { %v7639_v8 = vpop.eup %7638 }
 0x3ab   :  { %v1815_v34 = vmul.f32 %v7639_v8, %v1814_v3  ;;  %v7641_v38 = vpop.eup %7640  ;;  %v6720_v3 = vld [vmem:[%s14690_s3 + $0x330] sm:$0xff] }
 0x3ac   :  { %v1631_v55 = vmul.f32 %v7641_v38, %v10148_v2  ;;  %vm1636_vm5 = vweird.f32 %v7641_v38  ;;  %v6723_v2 = vld [vmem:[%s14690_s3 + $0x348] sm:$0xff]  ;;  %v7643_v37 = vpop.eup %7642 }
 0x3ad   :  { %v10152_v10 = vadd.f32 %v1816_v59, %v1815_v34  ;;  %vm1637_vm7 = vmor %vm1635_vm6, %vm1636_vm5  ;;  %v6714_v59 = vld [vmem:[%s14690_s3 + $0x300] sm:$0xff] }
 0x3ae   :  { %v1632_v30 = vsub.f32 1.0, %v1631_v55  ;;  %v6704_v55 = vld [vmem:[%s14693_s2 + $0x2b8] sm:$0xff] }
 0x3af   :  { %1890 = vmatmul.f32.vlgmr.msrb.gmra.mxu3 %v10152_v10  ;;  %1910 = vmatmul.f32.vlgmr.msrb.gmra.mxu0 %v10152_v10 }
 0x3b0   :  { %1930 = vmatmul.f32.vlgmr.msra.gmra.mxu1 %v10152_v10  ;;  %2258 = vmatpush.msrb.mxu0 %v6759_v40  ;;  %v1633_v25 = vmul.f32 %v7641_v38, %v1632_v30  ;;  %v2393_v30 = vld [vmem:[%s14690_s3 + $0xb0] sm:$0xff] }
 0x3b2   :  { %2259 = vmatpush.msrb.mxu0 %v6756_v41  ;;  %v1634_v47 = vadd.f32 %v7641_v38, %v1633_v25  ;;  %v6707_v41 = vld [vmem:[%s14693_s2 + $0x2d0] sm:$0xff]  ;;  %v2372_v25 = vld [vmem:[%s14690_s3 + $0x8] sm:$0xff] }
 0x3b3   :  { %2151 = vmatpush.msrb.mxu1 %v6707_v41  ;;  %v6687_v41 = vld [vmem:[%s14693_s2 + $0x230] sm:$0xff] }
 0x3b4   :  { %2260 = vmatpush.msrb.mxu0 %v6753_v51  ;;  %v1638_v12 = vsel %vm1637_vm7, %v7641_v38, %v1634_v47  ;;  %v2417_v38 = vld [vmem:[%s14690_s3 + $0x170] sm:$0xff]  ;;  %v2408_v51 = vld [vmem:[%s14690_s3 + $0x128] sm:$0xff]  ;;  %v6708_v47 = vld [vmem:[%s14693_s2 + $0x2d8] sm:$0xff] }
 0x3b5   :  { %v1643_v35 = vsel %vm1640_vm8, %v1642_v44, %v1638_v12  ;;  %2152 = vmatpush.msrb.mxu1 %v6704_v55  ;;  %2171 = vmatpush.msra.mxu2 %v6708_v47  ;;  %v6689_v12 = vld [vmem:[%s14693_s2 + $0x240] sm:$0xff]  ;;  %v6703_v44 = vld [vmem:[%s14693_s2 + $0x2b0] sm:$0xff]  ;;  %v6666_v47 = vld [vmem:[%s14693_s2 + $0x188] sm:$0xff] }
 0x3b6   :  { %2261 = vmatpush.msrb.mxu0 %v6750_v9  ;;  %v1653_v26 = vsub.f32 1.0, %v1643_v35  ;;  %v1655_v34 = vmul.f32 %v1643_v35, %v9418_v52  ;;  %v2396_v9 = vld [vmem:[%s14690_s3 + $0xc8] sm:$0xff]  ;;  %v6699_v35 = vld [vmem:[%s14693_s2 + $0x290] sm:$0xff] }
 0x3b7   :  { %2018 = vmatmul.f32.vlgmr.msra.gmra.mxu3 %v9770_v7  ;;  %2038 = vmatmul.f32.vlgmr.msra.gmra.mxu0 %v9770_v7  ;;  %v6671_v55 = vld [vmem:[%s14693_s2 + $0x1b0] sm:$0xff] }
 0x3b8   :  { %2262 = vmatpush.msrb.mxu0 %v6747_v50  ;;  %v1654_v8 = vmul.f32 %v7643_v37, %v1653_v26  ;;  %2153 = vmatpush.msrb.mxu1 %v6701_v48  ;;  %v2387_v50 = vld [vmem:[%s14690_s3 + $0x80] sm:$0xff]  ;;  %v6683_v37 = vld [vmem:[%s14693_s2 + $0x210] sm:$0xff]  ;;  %v6696_v26 = vld [vmem:[%s14693_s2 + $0x278] sm:$0xff] }
 0x3b9   :  { %2172 = vmatpush.msra.mxu2 %v6705_v62  ;;  %v6685_v48 = vld [vmem:[%s14693_s2 + $0x220] sm:$0xff]  ;;  %v6761_v62 = vld [vmem:[%s14690_s3 + $0x478] sm:$0xff] }
 0x3ba   :  { %2263 = vmatpush.msrb.mxu0 %v6744_v16  ;;  %v10220_v40 = vadd.f32 %v1655_v34, %v1654_v8  ;;  %v2378_v16 = vld [vmem:[%s14690_s3 + $0x38] sm:$0xff]  ;;  %v6694_v34 = vld [vmem:[%s14693_s2 + $0x268] sm:$0xff] }
 0x3bb   :  { %v6680_v8 = vld [vmem:[%s14693_s2 + $0x1f8] sm:$0xff] }
 0x3bc   :  { %2264 = vmatpush.msrb.mxu0 %v6741_v36  ;;  %v6698_v36 = vld [vmem:[%s14693_s2 + $0x288] sm:$0xff] }
 0x3bd   :  { %2154 = vmatpush.msrb.mxu1 %v6698_v36  ;;  %v6754_v36 = vld [vmem:[%s14690_s3 + $0x440] sm:$0xff] }
 0x3be   :  { %2265 = vmatpush.msrb.mxu0 %v6738_v32  ;;  %v6712_v32 = vld [vmem:[%s14693_s2 + $0x2f8] sm:$0xff] }
 0x3bf   :  { %2190 = vmatpush.msrb.mxu3 %v6712_v32  ;;  %2155 = vmatpush.msrb.mxu1 %v6695_v33  ;;  %v6670_v32 = vld [vmem:[%s14693_s2 + $0x1a8] sm:$0xff] }
 0x3c0   :  { %2266 = vmatpush.msrb.mxu0 %v6735_v29  ;;  %v6709_v29 = vld [vmem:[%s14693_s2 + $0x2e0] sm:$0xff]  ;;  %v6751_v33 = vld [vmem:[%s14690_s3 + $0x428] sm:$0xff] }
 0x3c1   :  { %2191 = vmatpush.msrb.mxu3 %v6709_v29  ;;  %2156 = vmatpush.msrb.mxu1 %v6692_v19  ;;  %v6667_v29 = vld [vmem:[%s14693_s2 + $0x190] sm:$0xff] }
 0x3c2   :  { %2267 = vmatpush.msrb.mxu0 %v6732_v11  ;;  %v6706_v11 = vld [vmem:[%s14693_s2 + $0x2c8] sm:$0xff]  ;;  %v6748_v19 = vld [vmem:[%s14690_s3 + $0x410] sm:$0xff] }
 0x3c3   :  { %2192 = vmatpush.msrb.mxu3 %v6706_v11  ;;  %2157 = vmatpush.msrb.mxu1 %v6689_v12  ;;  %v2416_v11 = vld [vmem:[%s14690_s3 + $0x168] sm:$0xff]  ;;  %v10440_v12 = vld [vmem:[%s14694_s4 + $0x3] sm:$0x7] }
 0x3c4   :  { %2268 = vmatpush.msrb.mxu0 %v6729_v53  ;;  %v6702_v53 = vld [vmem:[%s14693_s2 + $0x2a8] sm:$0xff] }
 0x3c5   :  { %2173 = vmatpush.msra.mxu2 %v6702_v53  ;;  %2193 = vmatpush.msrb.mxu3 %v6703_v44  ;;  %v6745_v53 = vld [vmem:[%s14690_s3 + $0x3f8] sm:$0xff]  ;;  %v6758_v44 = vld [vmem:[%s14690_s3 + $0x460] sm:$0xff] }
 0x3c6   :  { %2269 = vmatpush.msrb.mxu0 %v6726_v4  ;;  %v6686_v4 = vld [vmem:[%s14693_s2 + $0x228] sm:$0xff] }
 0x3c7   :  { %2158 = vmatpush.msrb.mxu1 %v6686_v4  ;;  %2174 = vmatpush.msra.mxu2 %v6699_v35  ;;  %v2413_v4 = vld [vmem:[%s14690_s3 + $0x150] sm:$0xff]  ;;  %v1868_v35 = vperm.slane %v10440_v12, 0 }
 0x3c8   :  { %2270 = vmatpush.msrb.mxu0 %v6723_v2  ;;  %v6700_v2 = vld [vmem:[%s14693_s2 + $0x298] sm:$0xff] }
 0x3c9   :  { %2194 = vmatpush.msrb.mxu3 %v6700_v2  ;;  %2159 = vmatpush.msrb.mxu1 %v6683_v37  ;;  %v6742_v2 = vld [vmem:[%s14690_s3 + $0x3e0] sm:$0xff]  ;;  %v6755_v37 = vld [vmem:[%s14690_s3 + $0x448] sm:$0xff] }
 0x3ca   :  { %2271 = vmatpush.msrb.mxu0 %v6720_v3  ;;  %v6697_v3 = vld [vmem:[%s14693_s2 + $0x280] sm:$0xff]  ;;  %2175 = vmatpush.msra.mxu2 %v6696_v26  ;;  %v2410_v26 = vld [vmem:[%s14690_s3 + $0x138] sm:$0xff] }
 0x3cb   :  { %2195 = vmatpush.msrb.mxu3 %v6697_v3  ;;  %2160 = vmatpush.msrb.mxu1 %v6680_v8  ;;  %v6739_v8 = vld [vmem:[%s14690_s3 + $0x3c8] sm:$0xff] }
 0x3cc   :  { %2272 = vmatpush.msrb.mxu0 %v6717_v18  ;;  %v6693_v18 = vld [vmem:[%s14693_s2 + $0x260] sm:$0xff] }
 0x3cd   :  { %2176 = vmatpush.msra.mxu2 %v6693_v18  ;;  %2196 = vmatpush.msrb.mxu3 %v6694_v34  ;;  %v6752_v18 = vld [vmem:[%s14690_s3 + $0x430] sm:$0xff]  ;;  %v2407_v34 = vld [vmem:[%s14690_s3 + $0x120] sm:$0xff] }
 0x3ce   :  { %2273 = vmatpush.msrb.mxu0 %v6714_v59  ;;  %v6677_v59 = vld [vmem:[%s14693_s2 + $0x1e0] sm:$0xff] }
 0x3cf   :  { %2274 = vmatmul.f32.vlgmr.msrb.gmra.mxu0 %v10220_v40  ;;  %2161 = vmatpush.msrb.mxu1 %v6677_v59 }
 0x3d0   :  { %2439 = vmatpush.msra.mxu0 %v2417_v38  ;;  %v6690_v38 = vld [vmem:[%s14693_s2 + $0x248] sm:$0xff] }
 0x3d1   :  { %2177 = vmatpush.msra.mxu2 %v6690_v38  ;;  %2162 = vmatpush.msrb.mxu1 %v6674_v17  ;;  %v1999_v38 = vpop.f32.mrf.mxu2  ;;  %v6749_v17 = vld [vmem:[%s14690_s3 + $0x418] sm:$0xff] }
 0x3d2   :  { %2440 = vmatpush.msra.mxu0 %v2414_v22  ;;  %v6691_v22 = vld [vmem:[%s14693_s2 + $0x250] sm:$0xff] }
 0x3d3   :  { %2197 = vmatpush.msrb.mxu3 %v6691_v22  ;;  %2178 = vmatpush.msra.mxu2 %v6687_v41  ;;  %v6736_v22 = vld [vmem:[%s14690_s3 + $0x3b0] sm:$0xff]  ;;  %v2404_v41 = vld [vmem:[%s14690_s3 + $0x108] sm:$0xff] }
 0x3d4   :  { %2441 = vmatpush.msra.mxu0 %v2411_v1  ;;  %v6688_v1 = vld [vmem:[%s14693_s2 + $0x238] sm:$0xff]  ;;  %2163 = vmatpush.msrb.mxu1 %v6671_v55 }
 0x3d5   :  { %2198 = vmatpush.msrb.mxu3 %v6688_v1  ;;  %v1869_v1 = vperm.slane %v10440_v12, 1 }
 0x3d6   :  { %2442 = vmatpush.msra.mxu0 %v2408_v51  ;;  %v6684_v51 = vld [vmem:[%s14693_s2 + $0x218] sm:$0xff] }
 0x3d7   :  { %2179 = vmatpush.msra.mxu2 %v6684_v51  ;;  %2199 = vmatpush.msrb.mxu3 %v6685_v48  ;;  %v6733_v48 = vld [vmem:[%s14690_s3 + $0x398] sm:$0xff] }
 0x3d8   :  { %2443 = vmatpush.msra.mxu0 %v2405_v49  ;;  %v6668_v49 = vld [vmem:[%s14693_s2 + $0x198] sm:$0xff] }
 0x3d9   :  { %2164 = vmatpush.msrb.mxu1 %v6668_v49  ;;  %v6746_v49 = vld [vmem:[%s14690_s3 + $0x400] sm:$0xff] }
 0x3da   :  { %2444 = vmatpush.msra.mxu0 %v2402_v5  ;;  %v6681_v5 = vld [vmem:[%s14693_s2 + $0x200] sm:$0xff] }
 0x3db   :  { %2180 = vmatpush.msra.mxu2 %v6681_v5  ;;  %v2401_v5 = vld [vmem:[%s14690_s3 + $0xf0] sm:$0xff] }
 0x3dc   :  { %2445 = vmatpush.msra.mxu0 %v2399_v58  ;;  %v6682_v58 = vld [vmem:[%s14693_s2 + $0x208] sm:$0xff] }
 0x3dd   :  { %2200 = vmatpush.msrb.mxu3 %v6682_v58 }
 0x3de   :  { %2446 = vmatpush.msra.mxu0 %v2396_v9  ;;  %v6665_v9 = vld [vmem:[%s14693_s2 + $0x180] sm:$0xff] }
 0x3df   :  { %2165 = vmatpush.msrb.mxu1 %v6665_v9  ;;  %v6730_v9 = vld [vmem:[%s14690_s3 + $0x380] sm:$0xff] }
 0x3e0   :  { %2447 = vmatpush.msra.mxu0 %v2393_v30  ;;  %v6678_v30 = vld [vmem:[%s14693_s2 + $0x1e8] sm:$0xff] }
 0x3e1   :  { %2181 = vmatpush.msra.mxu2 %v6678_v30  ;;  %v6743_v30 = vld [vmem:[%s14690_s3 + $0x3e8] sm:$0xff] }
 0x3e2   :  { %2448 = vmatpush.msra.mxu0 %v2390_v24  ;;  %v6679_v24 = vld [vmem:[%s14693_s2 + $0x1f0] sm:$0xff] }
 0x3e3   :  { %2201 = vmatpush.msrb.mxu3 %v6679_v24  ;;  %v2398_v24 = vld [vmem:[%s14690_s3 + $0xd8] sm:$0xff] }
 0x3e4   :  { %2449 = vmatpush.msra.mxu0 %v2387_v50  ;;  %v6760_v50 = vld [vmem:[%s14690_s3 + $0x470] sm:$0xff] }
 0x3e5   :  { %2278 = vmatpush.msra.mxu1 %v6760_v50 }
 0x3e6   :  { %2450 = vmatpush.msra.mxu0 %v2384_v54  ;;  %v6675_v54 = vld [vmem:[%s14693_s2 + $0x1d0] sm:$0xff] }
 0x3e7   :  { %2182 = vmatpush.msra.mxu2 %v6675_v54 }
 0x3e8   :  { %2451 = vmatpush.msra.mxu0 %v2381_v21  ;;  %v6676_v21 = vld [vmem:[%s14693_s2 + $0x1d8] sm:$0xff] }
 0x3e9   :  { %2202 = vmatpush.msrb.mxu3 %v6676_v21  ;;  %v6727_v21 = vld [vmem:[%s14690_s3 + $0x368] sm:$0xff] }
 0x3ea   :  { %2452 = vmatpush.msra.mxu0 %v2378_v16  ;;  %v6757_v16 = vld [vmem:[%s14690_s3 + $0x458] sm:$0xff] }
 0x3eb   :  { %2279 = vmatpush.msra.mxu1 %v6757_v16  ;;  %v6740_v16 = vld [vmem:[%s14690_s3 + $0x3d0] sm:$0xff] }
 0x3ec   :  { %2453 = vmatpush.msra.mxu0 %v2375_v42  ;;  %v6672_v42 = vld [vmem:[%s14693_s2 + $0x1b8] sm:$0xff] }
 0x3ed   :  { %2183 = vmatpush.msra.mxu2 %v6672_v42  ;;  %2280 = vmatpush.msra.mxu1 %v6754_v36  ;;  %v2395_v42 = vld [vmem:[%s14690_s3 + $0xc0] sm:$0xff]  ;;  %v6724_v36 = vld [vmem:[%s14690_s3 + $0x350] sm:$0xff] }
 0x3ee   :  { %2454 = vmatpush.msra.mxu0 %v2372_v25  ;;  %v6673_v25 = vld [vmem:[%s14693_s2 + $0x1c0] sm:$0xff] }
 0x3ef   :  { %2455 = vmatmul.f32.vlgmr.msra.gmra.mxu0 %v10152_v10  ;;  %2203 = vmatpush.msrb.mxu3 %v6673_v25 }
 0x3f0   :  { %2184 = vmatpush.msra.mxu2 %v6669_v56  ;;  %2281 = vmatpush.msra.mxu1 %v6751_v33  ;;  %v6737_v56 = vld [vmem:[%s14690_s3 + $0x3b8] sm:$0xff] }
 0x3f1   :  { %2204 = vmatpush.msrb.mxu3 %v6670_v32  ;;  %v2392_v32 = vld [vmem:[%s14690_s3 + $0xa8] sm:$0xff] }
 0x3f2   :  { %2185 = vmatpush.msra.mxu2 %v6666_v47  ;;  %2282 = vmatpush.msra.mxu1 %v6748_v19  ;;  %v6721_v47 = vld [vmem:[%s14690_s3 + $0x338] sm:$0xff]  ;;  %v2389_v19 = vld [vmem:[%s14690_s3 + $0x90] sm:$0xff] }
 0x3f3   :  { %2205 = vmatpush.msrb.mxu3 %v6667_v29  ;;  %v6734_v29 = vld [vmem:[%s14690_s3 + $0x3a0] sm:$0xff] }
 0x3f4   :  { %2298 = vmatpush.msrb.mxu2 %v6761_v62  ;;  %2283 = vmatpush.msra.mxu1 %v6745_v53  ;;  %v6718_v53 = vld [vmem:[%s14690_s3 + $0x320] sm:$0xff] }
 0x3f5   :  { %2419 = vmatpush.msra.mxu3 %v2416_v11 }
 0x3f6   :  { %2299 = vmatpush.msrb.mxu2 %v6758_v44  ;;  %2284 = vmatpush.msra.mxu1 %v6742_v2  ;;  %v6731_v44 = vld [vmem:[%s14690_s3 + $0x388] sm:$0xff]  ;;  %v6728_v2 = vld [vmem:[%s14690_s3 + $0x370] sm:$0xff] }
 0x3f7   :  { %2420 = vmatpush.msra.mxu3 %v2413_v4  ;;  %v2386_v4 = vld [vmem:[%s14690_s3 + $0x78] sm:$0xff] }
 0x3f8   :  { %2300 = vmatpush.msrb.mxu2 %v6755_v37  ;;  %2285 = vmatpush.msra.mxu1 %v6739_v8  ;;  %v2383_v37 = vld [vmem:[%s14690_s3 + $0x60] sm:$0xff] }
 0x3f9   :  { %2421 = vmatpush.msra.mxu3 %v2410_v26  ;;  %v6725_v26 = vld [vmem:[%s14690_s3 + $0x358] sm:$0xff] }
 0x3fa   :  { %2301 = vmatpush.msrb.mxu2 %v6752_v18  ;;  %2286 = vmatpush.msra.mxu1 %v6736_v22  ;;  %v6722_v18 = vld [vmem:[%s14690_s3 + $0x340] sm:$0xff]  ;;  %v2374_v22 = vld [vmem:[%s14690_s3 + $0x18] sm:$0xff] }
 0x3fb   :  { %2422 = vmatpush.msra.mxu3 %v2407_v34  ;;  %v2377_v34 = vld [vmem:[%s14690_s3 + $0x30] sm:$0xff] }
 0x3fc   :  { %2302 = vmatpush.msrb.mxu2 %v6749_v17  ;;  %2287 = vmatpush.msra.mxu1 %v6733_v48 }
 0x3fd   :  { %2423 = vmatpush.msra.mxu3 %v2404_v41 }
 0x3fe   :  { %2303 = vmatpush.msrb.mxu2 %v6746_v49  ;;  %2288 = vmatpush.msra.mxu1 %v6730_v9 }
 0x3ff   :  { %2424 = vmatpush.msra.mxu3 %v2401_v5 }
 0x400   :  { %2304 = vmatpush.msrb.mxu2 %v6743_v30  ;;  %2289 = vmatpush.msra.mxu1 %v6727_v21  ;;  %v1870_v30 = vperm.slane %v10440_v12, 2 }
 0x401   :  { %2425 = vmatpush.msra.mxu3 %v2398_v24 }
 0x402   :  { %2305 = vmatpush.msrb.mxu2 %v6740_v16  ;;  %2290 = vmatpush.msra.mxu1 %v6724_v36 }
 0x403   :  { %2426 = vmatpush.msra.mxu3 %v2395_v42 }
 0x404   :  { %2306 = vmatpush.msrb.mxu2 %v6737_v56  ;;  %2291 = vmatpush.msra.mxu1 %v6721_v47 }
 0x405   :  { %2427 = vmatpush.msra.mxu3 %v2392_v32 }
 0x406   :  { %2307 = vmatpush.msrb.mxu2 %v6734_v29  ;;  %2292 = vmatpush.msra.mxu1 %v6718_v53 }
 0x407   :  { %2428 = vmatpush.msra.mxu3 %v2389_v19 }
 0x408   :  { %2308 = vmatpush.msrb.mxu2 %v6731_v44 }
 0x409   :  { %2429 = vmatpush.msra.mxu3 %v2386_v4 }
 0x40a   :  { %2309 = vmatpush.msrb.mxu2 %v6728_v2 }
 0x40b   :  { %2430 = vmatpush.msra.mxu3 %v2383_v37 }
 0x40c   :  { %2310 = vmatpush.msrb.mxu2 %v6725_v26 }
 0x40e   :  { %2311 = vmatpush.msrb.mxu2 %v6722_v18  ;;  %v2409_v18 = vld [vmem:[%s14690_s3 + $0x130] sm:$0xff] }
 0x42c   :  { %v1911_v51 = vpop.f32.mrf.mxu0 }
 0x42d   :  { %v1912_v50 = vadd.f32 %v1911_v51, %v1869_v1  ;;  %v6716_v1 = vld [vmem:[%s14690_s3 + $0x310] sm:$0xff] }
 0x432   :  { %v1891_v3 = vpop.f32.mrf.mxu3 }
 0x433   :  { %v1892_v59 = vadd.f32 %v1891_v3, %v1868_v35  ;;  %v6715_v35 = vld [vmem:[%s14690_s3 + $0x308] sm:$0xff] }
 0x434   :  { %2293 = vmatpush.msra.mxu1 %v6715_v35  ;;  %v2380_v3 = vld [vmem:[%s14690_s3 + $0x48] sm:$0xff]  ;;  %v2039_v24 = vpop.f32.mrf.mxu0 }
 0x435   :  { %v2042_v55 = vadd.f32 %v1999_v38, %v1892_v59  ;;  %2431 = vmatpush.msra.mxu3 %v2380_v3  ;;  %v6719_v38 = vld [vmem:[%s14690_s3 + $0x328] sm:$0xff]  ;;  %v2418_v3 = vld [vmem:[%s14690_s3 + $0x178] sm:$0xff] }
 0x436   :  { %2312 = vmatpush.msrb.mxu2 %v6719_v38  ;;  %v2400_v38 = vld [vmem:[%s14690_s3 + $0xe8] sm:$0xff] }
 0x437   :  { %v6662_v58 = vmul.f32 -1.442695, %v2042_v55  ;;  %2432 = vmatpush.msra.mxu3 %v2377_v34  ;;  %v2371_v55 = vld [vmem:[%s14690_s3] sm:$0xff]  ;;  %v2406_v34 = vld [vmem:[%s14690_s3 + $0x118] sm:$0xff] }
 0x438   :  { %2313 = vmatpush.msrb.mxu2 %v6716_v1  ;;  %v2388_v1 = vld [vmem:[%s14690_s3 + $0x88] sm:$0xff] }
 0x439   :  { %7644 = vpow2.f32 %v6662_v58  ;;  %2433 = vmatpush.msra.mxu3 %v2374_v22  ;;  %v7551_v58 = vld [vmem:[%s14692_s5 + $0x1] ss:$0 sm:$0xff]  ;;  %v2397_v22 = vld [vmem:[%s14690_s3 + $0xd0] sm:$0xff] }
 0x43a   :  { %v2019_v54 = vpop.f32.mrf.mxu3 }
 0x43b   :  { %v2062_v25 = vadd.f32 %v2019_v54, %v1912_v50  ;;  %2434 = vmatpush.msra.mxu3 %v2371_v55  ;;  %v1931_v50 = vpop.f32.mrf.mxu1  ;;  %v2385_v55 = vld [vmem:[%s14690_s3 + $0x70] sm:$0xff] }
 0x43c   :  { %v1932_v56 = vadd.f32 %v1931_v50, %v1870_v30  ;;  %v2577_v30 = vld [vmem:[%s14693_s2 + $0x170] sm:$0xff]  ;;  %v6804_v50 = vld [vmem:[%s14690_s3 + $0x2a0] sm:$0xff] }
 0x43d   :  { %v6663_v33 = vmul.f32 -1.442695, %v2062_v25  ;;  %v2086_v25 = vadd.f32 %v7551_v58, %v2039_v24  ;;  %v6813_v58 = vld [vmem:[%s14690_s3 + $0x2e8] sm:$0xff]  ;;  %v6807_v24 = vld [vmem:[%s14690_s3 + $0x2b8] sm:$0xff] }
 0x43f   :  { %v7645_v62 = vpop.eup %7644  ;;  %7646 = vpow2.f32 %v6663_v33 }
 0x440   :  { %v2046_v11 = vadd.f32 1.0, %v7645_v62 }
 0x442   :  { %7648 = vrcp.f32 %v2046_v11  ;;  %v2058_v48 = vand.u32 2147483648, %v2046_v11  ;;  %v2056_v5 = vand.u32 2147483647, %v2046_v11  ;;  %vm2052_vm10 = vweird.f32 %v2046_v11 }
 0x444   :  { %v2059_v16 = vor.u32 1.1754944e-38, %v2058_v48  ;;  %vm2057_vm12 = vcmp.eq.f32.partialorder %v2056_v5, 8.507059e+37  ;;  %v2379_v48 = vld [vmem:[%s14690_s3 + $0x40] sm:$0xff]  ;;  %v2373_v5 = vld [vmem:[%s14690_s3 + $0x10] sm:$0xff] }
 0x445   :  { %v7647_v8 = vpop.eup %7646 }
 0x446   :  { %v2066_v59 = vadd.f32 1.0, %v7647_v8  ;;  %v2415_v8 = vld [vmem:[%s14690_s3 + $0x160] sm:$0xff] }
 0x448   :  { %v7649_v17 = vpop.eup %7648  ;;  %7650 = vrcp.f32 %v2066_v59  ;;  %v2078_v29 = vand.u32 2147483648, %v2066_v59  ;;  %v2076_v19 = vand.u32 2147483647, %v2066_v59  ;;  %vm2072_vm14 = vweird.f32 %v2066_v59 }
 0x449   :  { %v2048_v41 = vmul.f32 %v7649_v17, %v2046_v11  ;;  %vm2053_vm9 = vweird.f32 %v7649_v17 }
 0x44a   :  { %vm2054_vm11 = vmor %vm2052_vm10, %vm2053_vm9  ;;  %v2079_v53 = vor.u32 1.1754944e-38, %v2078_v29  ;;  %vm2077_vm0 = vcmp.eq.f32.partialorder %v2076_v19, 8.507059e+37  ;;  %v6771_v29 = vld [vmem:[%s14690_s3 + $0x198] sm:$0xff]  ;;  %v6768_v19 = vld [vmem:[%s14690_s3 + $0x180] sm:$0xff] }
 0x44b   :  { %v2049_v51 = vsub.f32 1.0, %v2048_v41  ;;  %v2391_v41 = vld [vmem:[%s14690_s3 + $0xa0] sm:$0xff] }
 0x44d   :  { %v2050_v49 = vmul.f32 %v7649_v17, %v2049_v51  ;;  %v2382_v51 = vld [vmem:[%s14690_s3 + $0x58] sm:$0xff] }
 0x44e   :  { %v7651_v9 = vpop.eup %7650 }
 0x44f   :  { %v2051_v54 = vadd.f32 %v7649_v17, %v2050_v49  ;;  %v2068_v21 = vmul.f32 %v7651_v9, %v2066_v59  ;;  %vm2073_vm13 = vweird.f32 %v7651_v9  ;;  %v2403_v59 = vld [vmem:[%s14690_s3 + $0x100] sm:$0xff]  ;;  %v2376_v49 = vld [vmem:[%s14690_s3 + $0x28] sm:$0xff] }
 0x450   :  { %vm2074_vm15 = vmor %vm2072_vm14, %vm2073_vm13 }
 0x451   :  { %v2055_v42 = vsel %vm2054_vm11, %v7649_v17, %v2051_v54  ;;  %v2069_v36 = vsub.f32 1.0, %v2068_v21  ;;  %v2394_v17 = vld [vmem:[%s14690_s3 + $0xb8] sm:$0xff]  ;;  %v6801_v54 = vld [vmem:[%s14690_s3 + $0x288] sm:$0xff]  ;;  %v6798_v21 = vld [vmem:[%s14690_s3 + $0x270] sm:$0xff] }
 0x452   :  { %v2060_v32 = vsel %vm2057_vm12, %v2059_v16, %v2055_v42  ;;  %v6795_v16 = vld [vmem:[%s14690_s3 + $0x258] sm:$0xff]  ;;  %v6792_v42 = vld [vmem:[%s14690_s3 + $0x240] sm:$0xff] }
 0x453   :  { %v2087_v33 = vmul.f32 %v2086_v25, %v2060_v32  ;;  %v2070_v47 = vmul.f32 %v7651_v9, %v2069_v36  ;;  %v6789_v25 = vld [vmem:[%s14690_s3 + $0x228] sm:$0xff]  ;;  %v6786_v36 = vld [vmem:[%s14690_s3 + $0x210] sm:$0xff]  ;;  %v6780_v32 = vld [vmem:[%s14690_s3 + $0x1e0] sm:$0xff] }
 0x455   :  { %v2088_v62 = vadd.f32 %v2087_v33, %v1932_v56  ;;  %v2071_v12 = vadd.f32 %v7651_v9, %v2070_v47  ;;  %v6783_v56 = vld [vmem:[%s14690_s3 + $0x1f8] sm:$0xff]  ;;  %v6777_v33 = vld [vmem:[%s14690_s3 + $0x1c8] sm:$0xff]  ;;  %v6774_v47 = vld [vmem:[%s14690_s3 + $0x1b0] sm:$0xff] }
 0x457   :  { %7652 = vtanh.f32 %v2088_v62  ;;  %v2075_v11 = vsel %vm2074_vm15, %v7651_v9, %v2071_v12  ;;  %v6810_v9 = vld [vmem:[%s14690_s3 + $0x2d0] sm:$0xff]  ;;  %v2574_v62 = vld [vmem:[%s14693_s2 + $0x158] sm:$0xff]  ;;  %v2571_v12 = vld [vmem:[%s14693_s2 + $0x140] sm:$0xff] }
 0x458   :  { %v2080_v44 = vsel %vm2077_vm0, %v2079_v53, %v2075_v11  ;;  %v2568_v11 = vld [vmem:[%s14693_s2 + $0x128] sm:$0xff] }
 0x459   :  { %v2090_v4 = vsub.f32 1.0, %v2080_v44  ;;  %v2092_v37 = vmul.f32 %v2080_v44, %v9770_v7  ;;  %v2412_v7 = vld [vmem:[%s14690_s3 + $0x148] sm:$0xff]  ;;  %v2565_v44 = vld [vmem:[%s14693_s2 + $0x110] sm:$0xff] }
 0x45a   :  { %v2576_v53 = vld [vmem:[%s14693_s2 + $0x168] sm:$0xff] }
 0x45d   :  { %v7653_v35 = vpop.eup %7652 }
 0x45e   :  { %v2091_v2 = vmul.f32 %v7653_v35, %v2090_v4  ;;  %v2573_v4 = vld [vmem:[%s14693_s2 + $0x150] sm:$0xff]  ;;  %v2562_v35 = vld [vmem:[%s14693_s2 + $0xf8] sm:$0xff] }
 0x460   :  { %v10572_v26 = vadd.f32 %v2092_v37, %v2091_v2  ;;  %v2570_v2 = vld [vmem:[%s14693_s2 + $0x138] sm:$0xff]  ;;  %v2559_v37 = vld [vmem:[%s14693_s2 + $0xe0] sm:$0xff] }
 0x462   :  { %2166 = vmatmul.f32.vlgmr.msrb.gmra.mxu1 %v10572_v26  ;;  %2186 = vmatmul.f32.vlgmr.msra.gmra.mxu2 %v10572_v26 }
 0x463   :  { %2206 = vmatmul.f32.vlgmr.msrb.gmra.mxu3 %v10572_v26  ;;  %2459 = vmatpush.msrb.mxu1 %v2418_v3  ;;  %v2567_v3 = vld [vmem:[%s14693_s2 + $0x120] sm:$0xff] }
 0x464   :  { %2607 = vmatpush.msrb.mxu3 %v2577_v30  ;;  %2587 = vmatpush.msra.mxu2 %v2576_v53  ;;  %v2532_v30 = vld [vmem:[%s14693_s2 + $0x8] sm:$0xff] }
 0x465   :  { %2460 = vmatpush.msrb.mxu1 %v2415_v8  ;;  %v2556_v8 = vld [vmem:[%s14693_s2 + $0xc8] sm:$0xff] }
 0x466   :  { %2608 = vmatpush.msrb.mxu3 %v2574_v62  ;;  %2588 = vmatpush.msra.mxu2 %v2573_v4  ;;  %v2566_v62 = vld [vmem:[%s14693_s2 + $0x118] sm:$0xff]  ;;  %v10814_v53 = vld [vmem:[%s14694_s4 + $0x6] sm:$0x7] }
 0x467   :  { %2461 = vmatpush.msrb.mxu1 %v2412_v7  ;;  %v2564_v7 = vld [vmem:[%s14693_s2 + $0x108] sm:$0xff] }
 0x468   :  { %2609 = vmatpush.msrb.mxu3 %v2571_v12  ;;  %2589 = vmatpush.msra.mxu2 %v2570_v2  ;;  %v6814_v12 = vld [vmem:[%s14690_s3 + $0x2f0] sm:$0xff]  ;;  %v6811_v2 = vld [vmem:[%s14690_s3 + $0x2d8] sm:$0xff] }
 0x469   :  { %2462 = vmatpush.msrb.mxu1 %v2409_v18  ;;  %v2553_v18 = vld [vmem:[%s14693_s2 + $0xb0] sm:$0xff] }
 0x46a   :  { %2294 = vmatmul.f32.vlgmr.msra.gmra.mxu1 %v10220_v40  ;;  %2314 = vmatmul.f32.vlgmr.msrb.gmra.mxu2 %v10220_v40 }
 0x46b   :  { %2435 = vmatmul.f32.vlgmr.msra.gmra.mxu3 %v10152_v10  ;;  %2463 = vmatpush.msrb.mxu1 %v2406_v34  ;;  %v2561_v34 = vld [vmem:[%s14693_s2 + $0xf0] sm:$0xff] }
 0x46c   :  { %2610 = vmatpush.msrb.mxu3 %v2568_v11  ;;  %2590 = vmatpush.msra.mxu2 %v2567_v3  ;;  %v6803_v11 = vld [vmem:[%s14690_s3 + $0x298] sm:$0xff]  ;;  %v2560_v3 = vld [vmem:[%s14693_s2 + $0xe8] sm:$0xff] }
 0x46d   :  { %2464 = vmatpush.msrb.mxu1 %v2403_v59  ;;  %v2550_v59 = vld [vmem:[%s14693_s2 + $0x98] sm:$0xff] }
 0x46e   :  { %2611 = vmatpush.msrb.mxu3 %v2565_v44  ;;  %2591 = vmatpush.msra.mxu2 %v2564_v7  ;;  %v6797_v7 = vld [vmem:[%s14690_s3 + $0x268] sm:$0xff] }
 0x46f   :  { %2465 = vmatpush.msrb.mxu1 %v2400_v38  ;;  %v2558_v38 = vld [vmem:[%s14693_s2 + $0xd8] sm:$0xff] }
 0x470   :  { %2612 = vmatpush.msrb.mxu3 %v2562_v35  ;;  %2592 = vmatpush.msra.mxu2 %v2561_v34  ;;  %v2563_v35 = vld [vmem:[%s14693_s2 + $0x100] sm:$0xff] }
 0x471   :  { %2466 = vmatpush.msrb.mxu1 %v2397_v22  ;;  %v2547_v22 = vld [vmem:[%s14693_s2 + $0x80] sm:$0xff] }
 0x472   :  { %2613 = vmatpush.msrb.mxu3 %v2559_v37  ;;  %2593 = vmatpush.msra.mxu2 %v2558_v38  ;;  %v6800_v37 = vld [vmem:[%s14690_s3 + $0x280] sm:$0xff]  ;;  %v6805_v38 = vld [vmem:[%s14690_s3 + $0x2a8] sm:$0xff] }
 0x473   :  { %2467 = vmatpush.msrb.mxu1 %v2394_v17  ;;  %v2555_v17 = vld [vmem:[%s14693_s2 + $0xc0] sm:$0xff] }
 0x474   :  { %2614 = vmatpush.msrb.mxu3 %v2556_v8  ;;  %2594 = vmatpush.msra.mxu2 %v2555_v17  ;;  %v6808_v8 = vld [vmem:[%s14690_s3 + $0x2c0] sm:$0xff]  ;;  %v2554_v17 = vld [vmem:[%s14693_s2 + $0xb8] sm:$0xff] }
 0x475   :  { %2468 = vmatpush.msrb.mxu1 %v2391_v41  ;;  %v2544_v41 = vld [vmem:[%s14693_s2 + $0x68] sm:$0xff] }
 0x476   :  { %2615 = vmatpush.msrb.mxu3 %v2553_v18  ;;  %v2144_v18 = vperm.slane %v10814_v53, 0 }
 0x477   :  { %2469 = vmatpush.msrb.mxu1 %v2388_v1  ;;  %v2552_v1 = vld [vmem:[%s14693_s2 + $0xa8] sm:$0xff] }
 0x478   :  { %2616 = vmatpush.msrb.mxu3 %v2550_v59  ;;  %2595 = vmatpush.msra.mxu2 %v2552_v1  ;;  %v2557_v59 = vld [vmem:[%s14693_s2 + $0xd0] sm:$0xff]  ;;  %v6791_v1 = vld [vmem:[%s14690_s3 + $0x238] sm:$0xff] }
 0x479   :  { %2470 = vmatpush.msrb.mxu1 %v2385_v55  ;;  %v2541_v55 = vld [vmem:[%s14693_s2 + $0x50] sm:$0xff] }
 0x47a   :  { %2617 = vmatpush.msrb.mxu3 %v2547_v22  ;;  %v6794_v22 = vld [vmem:[%s14690_s3 + $0x250] sm:$0xff] }
 0x47b   :  { %2471 = vmatpush.msrb.mxu1 %v2382_v51  ;;  %v10744_v51 = vpop.f32.mrf.mxu0 }
 0x47c   :  { %2618 = vmatpush.msrb.mxu3 %v2544_v41  ;;  %v6802_v41 = vld [vmem:[%s14690_s3 + $0x290] sm:$0xff] }
 0x47d   :  { %2472 = vmatpush.msrb.mxu1 %v2379_v48  ;;  %v2549_v48 = vld [vmem:[%s14693_s2 + $0x90] sm:$0xff] }
 0x47e   :  { %2619 = vmatpush.msrb.mxu3 %v2541_v55  ;;  %2596 = vmatpush.msra.mxu2 %v2549_v48  ;;  %v129_v55 = vadd.f32 %v8285_v23, %v8297_v27 }
 0x47f   :  { %2473 = vmatpush.msrb.mxu1 %v2376_v49  ;;  %v2538_v49 = vld [vmem:[%s14693_s2 + $0x38] sm:$0xff] }
 0x480   :  { %2620 = vmatpush.msrb.mxu3 %v2538_v49 }
 0x481   :  { %2474 = vmatpush.msrb.mxu1 %v2373_v5  ;;  %v2546_v5 = vld [vmem:[%s14693_s2 + $0x78] sm:$0xff] }
 0x482   :  { %2475 = vmatmul.f32.vlgmr.msrb.gmra.mxu1 %v10152_v10  ;;  %2597 = vmatpush.msra.mxu2 %v2546_v5  ;;  %v2551_v5 = vld [vmem:[%s14693_s2 + $0xa0] sm:$0xff] }
 0x483   :  { %2695 = vmatpush.msra.mxu1 %v6813_v58  ;;  %v2535_v58 = vld [vmem:[%s14693_s2 + $0x20] sm:$0xff] }
 0x484   :  { %2621 = vmatpush.msrb.mxu3 %v2535_v58  ;;  %v6799_v58 = vld [vmem:[%s14690_s3 + $0x278] sm:$0xff] }
 0x485   :  { %2696 = vmatpush.msra.mxu1 %v6810_v9  ;;  %v2543_v9 = vld [vmem:[%s14693_s2 + $0x60] sm:$0xff] }
 0x486   :  { %2598 = vmatpush.msra.mxu2 %v2543_v9  ;;  %2622 = vmatpush.msrb.mxu3 %v2532_v30  ;;  %v6788_v9 = vld [vmem:[%s14690_s3 + $0x220] sm:$0xff] }
 0x487   :  { %2697 = vmatpush.msra.mxu1 %v6807_v24  ;;  %v2578_v24 = vld [vmem:[%s14693_s2 + $0x178] sm:$0xff] }
 0x488   :  { %2627 = vmatpush.msrb.mxu0 %v2578_v24  ;;  %v2548_v24 = vld [vmem:[%s14693_s2 + $0x88] sm:$0xff] }
 0x489   :  { %2698 = vmatpush.msra.mxu1 %v6804_v50  ;;  %v6815_v50 = vld [vmem:[%s14690_s3 + $0x2f8] sm:$0xff] }
 0x48a   :  { %2735 = vmatpush.msra.mxu3 %v6815_v50  ;;  %v6796_v50 = vld [vmem:[%s14690_s3 + $0x260] sm:$0xff] }
 0x48b   :  { %2699 = vmatpush.msra.mxu1 %v6801_v54  ;;  %v2540_v54 = vld [vmem:[%s14693_s2 + $0x48] sm:$0xff] }
 0x48c   :  { %2599 = vmatpush.msra.mxu2 %v2540_v54  ;;  %v6785_v54 = vld [vmem:[%s14690_s3 + $0x208] sm:$0xff] }
 0x48d   :  { %2700 = vmatpush.msra.mxu1 %v6798_v21  ;;  %v2575_v21 = vld [vmem:[%s14693_s2 + $0x160] sm:$0xff] }
 0x48e   :  { %2628 = vmatpush.msrb.mxu0 %v2575_v21 }
 0x48f   :  { %2701 = vmatpush.msra.mxu1 %v6795_v16  ;;  %v6812_v16 = vld [vmem:[%s14690_s3 + $0x2e0] sm:$0xff] }
 0x490   :  { %2736 = vmatpush.msra.mxu3 %v6812_v16 }
 0x491   :  { %2702 = vmatpush.msra.mxu1 %v6792_v42  ;;  %v2456_v42 = vpop.f32.mrf.mxu0 }
 0x493   :  { %2703 = vmatpush.msra.mxu1 %v6789_v25  ;;  %v2537_v25 = vld [vmem:[%s14693_s2 + $0x30] sm:$0xff] }
 0x494   :  { %2600 = vmatpush.msra.mxu2 %v2537_v25  ;;  %v6793_v25 = vld [vmem:[%s14690_s3 + $0x248] sm:$0xff] }
 0x495   :  { %2704 = vmatpush.msra.mxu1 %v6786_v36  ;;  %v170_v36 = vadd.f32 %v8299_v28, %v8483_v13  ;;  %v2569_v28 = vld [vmem:[%s14693_s2 + $0x130] sm:$0xff] }
 0x497   :  { %2705 = vmatpush.msra.mxu1 %v6783_v56  ;;  %v2572_v56 = vld [vmem:[%s14693_s2 + $0x148] sm:$0xff] }
 0x498   :  { %2629 = vmatpush.msrb.mxu0 %v2572_v56 }
 0x499   :  { %2706 = vmatpush.msra.mxu1 %v6780_v32  ;;  %v6809_v32 = vld [vmem:[%s14690_s3 + $0x2c8] sm:$0xff] }
 0x49a   :  { %2737 = vmatpush.msra.mxu3 %v6809_v32  ;;  %2630 = vmatpush.msrb.mxu0 %v2569_v28  ;;  %v6790_v32 = vld [vmem:[%s14690_s3 + $0x230] sm:$0xff]  ;;  %v2539_v28 = vld [vmem:[%s14693_s2 + $0x40] sm:$0xff] }
 0x49b   :  { %2707 = vmatpush.msra.mxu1 %v6777_v33  ;;  %v2534_v33 = vld [vmem:[%s14693_s2 + $0x18] sm:$0xff] }
 0x49c   :  { %2601 = vmatpush.msra.mxu2 %v2534_v33  ;;  %2631 = vmatpush.msrb.mxu0 %v2566_v62  ;;  %v6779_v33 = vld [vmem:[%s14690_s3 + $0x1d8] sm:$0xff]  ;;  %v2145_v62 = vperm.slane %v10814_v53, 1 }
 0x49d   :  { %2708 = vmatpush.msra.mxu1 %v6774_v47  ;;  %v2499_v47 = vadd.f32 %v2456_v42, %v170_v36  ;;  %v2545_v42 = vld [vmem:[%s14693_s2 + $0x70] sm:$0xff] }
 0x49e   :  { %2632 = vmatpush.msrb.mxu0 %v2563_v35  ;;  %v6782_v36 = vld [vmem:[%s14690_s3 + $0x1f0] sm:$0xff] }
 0x49f   :  { %2709 = vmatpush.msra.mxu1 %v6771_v29  ;;  %v6806_v29 = vld [vmem:[%s14690_s3 + $0x2b0] sm:$0xff]  ;;  %v6766_v4 = vmul.f32 -1.442695, %v2499_v47 }
 0x4a0   :  { %2738 = vmatpush.msra.mxu3 %v6806_v29  ;;  %2633 = vmatpush.msrb.mxu0 %v2560_v3  ;;  %v6787_v29 = vld [vmem:[%s14690_s3 + $0x218] sm:$0xff]  ;;  %v2533_v3 = vld [vmem:[%s14693_s2 + $0x10] sm:$0xff] }
 0x4a1   :  { %2710 = vmatpush.msra.mxu1 %v6768_v19  ;;  %v2531_v19 = vld [vmem:[%s14693_s2] sm:$0xff]  ;;  %7654 = vpow2.f32 %v6766_v4  ;;  %v6773_v4 = vld [vmem:[%s14690_s3 + $0x1a8] sm:$0xff] }
 0x4a2   :  { %2711 = vmatmul.f32.vlgmr.msra.gmra.mxu1 %v10572_v26  ;;  %2602 = vmatpush.msra.mxu2 %v2531_v19  ;;  %v6776_v19 = vld [vmem:[%s14690_s3 + $0x1c0] sm:$0xff] }
 0x4a3   :  { %2739 = vmatpush.msra.mxu3 %v6803_v11  ;;  %2634 = vmatpush.msrb.mxu0 %v2557_v59  ;;  %v6784_v11 = vld [vmem:[%s14690_s3 + $0x200] sm:$0xff] }
 0x4a4   :  { %2715 = vmatpush.msrb.mxu2 %v6814_v12  ;;  %v2536_v12 = vld [vmem:[%s14693_s2 + $0x28] sm:$0xff] }
 0x4a5   :  { %2740 = vmatpush.msra.mxu3 %v6800_v37  ;;  %2635 = vmatpush.msrb.mxu0 %v2554_v17  ;;  %v6775_v17 = vld [vmem:[%s14690_s3 + $0x1b8] sm:$0xff] }
 0x4a6   :  { %2716 = vmatpush.msrb.mxu2 %v6811_v2 }
 0x4a7   :  { %2741 = vmatpush.msra.mxu3 %v6797_v7  ;;  %2636 = vmatpush.msrb.mxu0 %v2551_v5  ;;  %v7655_v23 = vpop.eup %7654  ;;  %v6770_v7 = vld [vmem:[%s14690_s3 + $0x190] sm:$0xff] }
 0x4a8   :  { %2717 = vmatpush.msrb.mxu2 %v6808_v8  ;;  %v10885_v56 = vadd.f32 1.0, %v7655_v23  ;;  %v6781_v8 = vld [vmem:[%s14690_s3 + $0x1e8] sm:$0xff] }
 0x4a9   :  { %2742 = vmatpush.msra.mxu3 %v6794_v22  ;;  %2637 = vmatpush.msrb.mxu0 %v2548_v24 }
 0x4aa   :  { %2718 = vmatpush.msrb.mxu2 %v6805_v38  ;;  %v6778_v38 = vld [vmem:[%s14690_s3 + $0x1d0] sm:$0xff]  ;;  %vm2509_vm6 = vweird.f32 %v10885_v56 }
 0x4ab   :  { %2743 = vmatpush.msra.mxu3 %v6791_v1  ;;  %2638 = vmatpush.msrb.mxu0 %v2545_v42 }
 0x4ac   :  { %2719 = vmatpush.msrb.mxu2 %v6802_v41 }
 0x4ad   :  { %2744 = vmatpush.msra.mxu3 %v6788_v9 }
 0x4ae   :  { %2720 = vmatpush.msrb.mxu2 %v6799_v58  ;;  %v6769_v58 = vld [vmem:[%s14690_s3 + $0x188] sm:$0xff] }
 0x4af   :  { %2745 = vmatpush.msra.mxu3 %v6785_v54 }
 0x4b0   :  { %2721 = vmatpush.msrb.mxu2 %v6796_v50 }
 0x4b1   :  { %2746 = vmatpush.msra.mxu3 %v6782_v36 }
 0x4b2   :  { %2722 = vmatpush.msrb.mxu2 %v6793_v25 }
 0x4b3   :  { %2747 = vmatpush.msra.mxu3 %v6779_v33 }
 0x4b4   :  { %2723 = vmatpush.msrb.mxu2 %v6790_v32 }
 0x4b5   :  { %2748 = vmatpush.msra.mxu3 %v6776_v19  ;;  %v2515_v19 = vand.u32 2147483648, %v10885_v56 }
 0x4b6   :  { %2724 = vmatpush.msrb.mxu2 %v6787_v29  ;;  %v211_v29 = vadd.f32 %v8794_v46, %v8600_v6 }
 0x4b7   :  { %2749 = vmatpush.msra.mxu3 %v6773_v4 }
 0x4b8   :  { %2725 = vmatpush.msrb.mxu2 %v6784_v11  ;;  %v2513_v11 = vand.u32 2147483647, %v10885_v56 }
 0x4b9   :  { %2750 = vmatpush.msra.mxu3 %v6770_v7 }
 0x4ba   :  { %2726 = vmatpush.msrb.mxu2 %v6781_v8  ;;  %vm2514_vm8 = vcmp.eq.f32.partialorder %v2513_v11, 8.507059e+37 }
 0x4bc   :  { %2727 = vmatpush.msrb.mxu2 %v6778_v38 }
 0x4be   :  { %2728 = vmatpush.msrb.mxu2 %v6775_v17 }
 0x4df   :  { %v2167_v34 = vpop.f32.mrf.mxu1 }
 0x4e0   :  { %v2168_v48 = vadd.f32 %v2167_v34, %v2144_v18 }
 0x4e2   :  { %v2318_v21 = vadd.f32 %v10744_v51, %v2168_v48  ;;  %v2542_v51 = vld [vmem:[%s14693_s2 + $0x58] sm:$0xff] }
 0x4e3   :  { %2639 = vmatpush.msrb.mxu0 %v2542_v51 }
 0x4e4   :  { %v6762_v47 = vmul.f32 -1.442695, %v2318_v21  ;;  %v7553_v21 = vld [vmem:[%s14692_s5] ss:$0 sm:$0xff] }
 0x4e5   :  { %2640 = vmatpush.msrb.mxu0 %v2539_v28  ;;  %v2187_v2 = vpop.f32.mrf.mxu2 }
 0x4e6   :  { %v10816_v44 = vpop.f32.mrf.mxu3  ;;  %v2188_v18 = vadd.f32 %v2187_v2, %v2145_v62 }
 0x4e7   :  { %2641 = vmatpush.msrb.mxu0 %v2536_v12  ;;  %v2295_v59 = vpop.f32.mrf.mxu1 }
 0x4e8   :  { %v2338_v1 = vadd.f32 %v2295_v59, %v2188_v18 }
 0x4e9   :  { %2642 = vmatpush.msrb.mxu0 %v2533_v3 }
 0x4ee   :  { %v2436_v49 = vpop.f32.mrf.mxu3 }
 0x4ef   :  { %v2479_v30 = vadd.f32 %v2436_v49, %v129_v55  ;;  %v6772_v55 = vld [vmem:[%s14690_s3 + $0x1a0] sm:$0xff] }
 0x4f0   :  { %2729 = vmatpush.msrb.mxu2 %v6772_v55  ;;  %v6910_v55 = vld [vmem:[%s14690_s3 + $0x450] sm:$0xff] }
 0x4f1   :  { %v6765_v16 = vmul.f32 -1.442695, %v2479_v30  ;;  %v6763_v30 = vmul.f32 -1.442695, %v2338_v1 }
 0x4f2   :  { %2730 = vmatpush.msrb.mxu2 %v6769_v58 }
 0x4f3   :  { %7656 = vpow2.f32 %v6765_v16 }
 0x4f4   :  { %7658 = vrcp.f32 %v10885_v56 }
 0x4f5   :  { %7660 = vpow2.f32 %v6762_v47 }
 0x4f9   :  { %v7657_v35 = vpop.eup %7656 }
 0x4fa   :  { %v2483_v37 = vadd.f32 1.0, %v7657_v35  ;;  %v7659_v34 = vpop.eup %7658 }
 0x4fb   :  { %v7661_v22 = vpop.eup %7660  ;;  %v2505_v41 = vmul.f32 %v7659_v34, %v10885_v56  ;;  %vm2510_vm5 = vweird.f32 %v7659_v34 }
 0x4fc   :  { %7662 = vrcp.f32 %v2483_v37  ;;  %v10935_v49 = vadd.f32 1.0, %v7661_v22  ;;  %v2495_v24 = vand.u32 2147483648, %v2483_v37  ;;  %v2493_v54 = vand.u32 2147483647, %v2483_v37  ;;  %vm2511_vm7 = vmor %vm2509_vm6, %vm2510_vm5 }
 0x4fd   :  { %v2506_v9 = vsub.f32 1.0, %v2505_v41  ;;  %vm2489_vm2 = vweird.f32 %v2483_v37 }
 0x4fe   :  { %7664 = vrcp.f32 %v10935_v49  ;;  %v2496_v36 = vor.u32 1.1754944e-38, %v2495_v24  ;;  %vm2494_vm4 = vcmp.eq.f32.partialorder %v2493_v54, 8.507059e+37  ;;  %v2334_v1 = vand.u32 2147483648, %v10935_v49  ;;  %v6901_v54 = vld [vmem:[%s14690_s3 + $0x408] sm:$0xff] }
 0x4ff   :  { %v2507_v16 = vmul.f32 %v7659_v34, %v2506_v9  ;;  %7666 = vpow2.f32 %v6763_v30  ;;  %v2476_v42 = vpop.f32.mrf.mxu1  ;;  %vm2328_vm10 = vweird.f32 %v10935_v49  ;;  %v7552_v9 = vld [vmem:[%s14692_s5 + $0x2] ss:$0 sm:$0xff]  ;;  %v2315_v30 = vpop.f32.mrf.mxu2 }
 0x500   :  { %v2523_v32 = vadd.f32 %v7553_v21, %v2476_v42  ;;  %v2146_v21 = vperm.slane %v10814_v53, 2  ;;  %v6898_v42 = vld [vmem:[%s14690_s3 + $0x3f0] sm:$0xff]  ;;  %v6892_v53 = vld [vmem:[%s14690_s3 + $0x3c0] sm:$0xff] }
 0x501   :  { %v2508_v47 = vadd.f32 %v7659_v34, %v2507_v16  ;;  %v2362_v16 = vadd.f32 %v7552_v9, %v2315_v30  ;;  %v3112_v9 = vld [vmem:[%s14690_s3 + $0xe0] sm:$0xff]  ;;  %v3109_v30 = vld [vmem:[%s14690_s3 + $0xc8] sm:$0xff] }
 0x502   :  { %v7663_v48 = vpop.eup %7662 }
 0x503   :  { %v2485_v5 = vmul.f32 %v7663_v48, %v2483_v37  ;;  %vm2490_vm1 = vweird.f32 %v7663_v48  ;;  %v2512_v2 = vsel %vm2511_vm7, %v7659_v34, %v2508_v47  ;;  %v2516_v37 = vor.u32 1.1754944e-38, %v2515_v19  ;;  %v6913_v34 = vld [vmem:[%s14690_s3 + $0x468] sm:$0xff]  ;;  %v6886_v19 = vld [vmem:[%s14690_s3 + $0x390] sm:$0xff] }
 0x504   :  { %vm2491_vm3 = vmor %vm2489_vm2, %vm2490_vm1  ;;  %v7665_v33 = vpop.eup %7664 }
 0x505   :  { %v2486_v23 = vsub.f32 1.0, %v2485_v5  ;;  %v7667_v12 = vpop.eup %7666  ;;  %v2324_v4 = vmul.f32 %v7665_v33, %v10935_v49  ;;  %v2517_v46 = vsel %vm2514_vm8, %v2516_v37, %v2512_v2  ;;  %vm2329_vm9 = vweird.f32 %v7665_v33  ;;  %v6907_v5 = vld [vmem:[%s14690_s3 + $0x438] sm:$0xff]  ;;  %v6877_v2 = vld [vmem:[%s14690_s3 + $0x348] sm:$0xff] }
 0x506   :  { %v10950_v3 = vadd.f32 1.0, %v7667_v12  ;;  %v2527_v7 = vsub.f32 1.0, %v2517_v46  ;;  %v2529_v56 = vmul.f32 %v2517_v46, %v10152_v10  ;;  %v2332_v10 = vand.u32 2147483647, %v10935_v49  ;;  %vm2330_vm11 = vmor %vm2328_vm10, %vm2329_vm9  ;;  %v6904_v49 = vld [vmem:[%s14690_s3 + $0x420] sm:$0xff]  ;;  %v6883_v12 = vld [vmem:[%s14690_s3 + $0x378] sm:$0xff] }
 0x507   :  { %v2487_v50 = vmul.f32 %v7663_v48, %v2486_v23  ;;  %v2325_v8 = vsub.f32 1.0, %v2324_v4  ;;  %v2335_v23 = vor.u32 1.1754944e-38, %v2334_v1  ;;  %v6880_v4 = vld [vmem:[%s14690_s3 + $0x360] sm:$0xff] }
 0x508   :  { %vm2333_vm12 = vcmp.eq.f32.partialorder %v2332_v10, 8.507059e+37  ;;  %vm2348_vm14 = vweird.f32 %v10950_v3  ;;  %v3124_v1 = vld [vmem:[%s14690_s3 + $0x140] sm:$0xff]  ;;  %v3121_v10 = vld [vmem:[%s14690_s3 + $0x128] sm:$0xff] }
 0x509   :  { %v2488_v25 = vadd.f32 %v7663_v48, %v2487_v50  ;;  %v2326_v59 = vmul.f32 %v7665_v33, %v2325_v8  ;;  %v6874_v8 = vld [vmem:[%s14690_s3 + $0x330] sm:$0xff] }
 0x50b   :  { %v2492_v51 = vsel %vm2491_vm3, %v7663_v48, %v2488_v25  ;;  %v2327_v41 = vadd.f32 %v7665_v33, %v2326_v59  ;;  %v6868_v59 = vld [vmem:[%s14690_s3 + $0x300] sm:$0xff] }
 0x50c   :  { %v2497_v28 = vsel %vm2494_vm4, %v2496_v36, %v2492_v51  ;;  %v6895_v51 = vld [vmem:[%s14690_s3 + $0x3d8] sm:$0xff] }
 0x50d   :  { %v2524_v62 = vmul.f32 %v2523_v32, %v2497_v28  ;;  %v2331_v58 = vsel %vm2330_vm11, %v7665_v33, %v2327_v41  ;;  %v2208_v32 = vadd.f32 %v10816_v44, %v2146_v21  ;;  %v6889_v28 = vld [vmem:[%s14690_s3 + $0x3a8] sm:$0xff]  ;;  %v2352_v44 = vand.u32 2147483647, %v10950_v3  ;;  %v6861_v41 = vld [vmem:[%s14693_s2 + $0x2d0] sm:$0xff]  ;;  %v3091_v21 = vld [vmem:[%s14690_s3 + $0x38] sm:$0xff] }
 0x50e   :  { %v2336_v50 = vsel %vm2333_vm12, %v2335_v23, %v2331_v58  ;;  %v3115_v58 = vld [vmem:[%s14690_s3 + $0xf8] sm:$0xff]  ;;  %v3106_v23 = vld [vmem:[%s14690_s3 + $0xb0] sm:$0xff] }
 0x50f   :  { %v2525_v35 = vadd.f32 %v2524_v62, %v211_v29  ;;  %v2363_v25 = vmul.f32 %v2362_v16, %v2336_v50  ;;  %v2354_v29 = vand.u32 2147483648, %v10950_v3  ;;  %vm2353_vm0 = vcmp.eq.f32.partialorder %v2352_v44, 8.507059e+37  ;;  %v3097_v50 = vld [vmem:[%s14690_s3 + $0x68] sm:$0xff]  ;;  %v3088_v16 = vld [vmem:[%s14690_s3 + $0x20] sm:$0xff] }
 0x510   :  { %v6843_v44 = vld [vmem:[%s14693_s2 + $0x240] sm:$0xff] }
 0x511   :  { %7668 = vtanh.f32 %v2525_v35  ;;  %v2364_v33 = vadd.f32 %v2363_v25, %v2208_v32  ;;  %v2355_v11 = vor.u32 1.1754944e-38, %v2354_v29  ;;  %v6852_v25 = vld [vmem:[%s14693_s2 + $0x288] sm:$0xff]  ;;  %v6849_v32 = vld [vmem:[%s14693_s2 + $0x270] sm:$0xff] }
 0x512   :  { %7670 = vrcp.f32 %v10950_v3  ;;  %v6860_v29 = vld [vmem:[%s14693_s2 + $0x2c8] sm:$0xff] }
 0x513   :  { %7672 = vtanh.f32 %v2364_v33  ;;  %v6863_v33 = vld [vmem:[%s14693_s2 + $0x2e0] sm:$0xff] }
 0x517   :  { %v7669_v18 = vpop.eup %7668 }
 0x518   :  { %v2528_v38 = vmul.f32 %v7669_v18, %v2527_v7  ;;  %v7671_v17 = vpop.eup %7670  ;;  %v6871_v7 = vld [vmem:[%s14690_s3 + $0x318] sm:$0xff] }
 0x519   :  { %v2344_v48 = vmul.f32 %v7671_v17, %v10950_v3  ;;  %vm2349_vm13 = vweird.f32 %v7671_v17  ;;  %v7673_v37 = vpop.eup %7672 }
 0x51a   :  { %v10954_v22 = vadd.f32 %v2529_v56, %v2528_v38  ;;  %vm2350_vm15 = vmor %vm2348_vm14, %vm2349_vm13  ;;  %v3130_v56 = vld [vmem:[%s14690_s3 + $0x170] sm:$0xff] }
 0x51b   :  { %v2345_v24 = vsub.f32 1.0, %v2344_v48  ;;  %v6855_v48 = vld [vmem:[%s14693_s2 + $0x2a0] sm:$0xff] }
 0x51c   :  { %2603 = vmatmul.f32.vlgmr.msra.gmra.mxu2 %v10954_v22  ;;  %2623 = vmatmul.f32.vlgmr.msrb.gmra.mxu3 %v10954_v22 }
 0x51d   :  { %2643 = vmatmul.f32.vlgmr.msrb.gmra.mxu0 %v10954_v22  ;;  %2971 = vmatpush.msrb.mxu3 %v6913_v34  ;;  %v2346_v36 = vmul.f32 %v7671_v17, %v2345_v24  ;;  %v3127_v34 = vld [vmem:[%s14690_s3 + $0x158] sm:$0xff]  ;;  %v3100_v24 = vld [vmem:[%s14690_s3 + $0x80] sm:$0xff] }
 0x51f   :  { %2972 = vmatpush.msrb.mxu3 %v6910_v55  ;;  %v2347_v47 = vadd.f32 %v7671_v17, %v2346_v36  ;;  %v6858_v55 = vld [vmem:[%s14693_s2 + $0x2b8] sm:$0xff]  ;;  %v6865_v36 = vld [vmem:[%s14693_s2 + $0x2f0] sm:$0xff] }
 0x520   :  { %2883 = vmatpush.msrb.mxu1 %v6865_v36  ;;  %v6905_v36 = vld [vmem:[%s14690_s3 + $0x428] sm:$0xff] }
 0x521   :  { %2973 = vmatpush.msrb.mxu3 %v6907_v5  ;;  %v2351_v62 = vsel %vm2350_vm15, %v7671_v17, %v2347_v47  ;;  %v6864_v17 = vld [vmem:[%s14693_s2 + $0x2e8] sm:$0xff]  ;;  %v3118_v5 = vld [vmem:[%s14690_s3 + $0x110] sm:$0xff]  ;;  %v6846_v47 = vld [vmem:[%s14693_s2 + $0x258] sm:$0xff] }
 0x522   :  { %v2356_v35 = vsel %vm2353_vm0, %v2355_v11, %v2351_v62  ;;  %2863 = vmatpush.msra.mxu0 %v6864_v17  ;;  %v6857_v62 = vld [vmem:[%s14693_s2 + $0x2b0] sm:$0xff]  ;;  %v6842_v17 = vld [vmem:[%s14693_s2 + $0x238] sm:$0xff] }
 0x523   :  { %2974 = vmatpush.msrb.mxu3 %v6904_v49  ;;  %v2366_v3 = vsub.f32 1.0, %v2356_v35  ;;  %v2368_v18 = vmul.f32 %v2356_v35, %v10220_v40  ;;  %v3103_v49 = vld [vmem:[%s14690_s3 + $0x98] sm:$0xff]  ;;  %v6853_v11 = vld [vmem:[%s14693_s2 + $0x290] sm:$0xff] }
 0x524   :  { %2731 = vmatmul.f32.vlgmr.msrb.gmra.mxu2 %v10572_v26  ;;  %2751 = vmatmul.f32.vlgmr.msra.gmra.mxu3 %v10572_v26  ;;  %v6837_v35 = vld [vmem:[%s14693_s2 + $0x210] sm:$0xff] }
 0x525   :  { %2975 = vmatpush.msrb.mxu3 %v6901_v54  ;;  %v2367_v46 = vmul.f32 %v7673_v37, %v2366_v3  ;;  %2864 = vmatpush.msra.mxu0 %v6861_v41  ;;  %v3094_v54 = vld [vmem:[%s14690_s3 + $0x50] sm:$0xff]  ;;  %v6851_v37 = vld [vmem:[%s14693_s2 + $0x280] sm:$0xff]  ;;  %v6834_v3 = vld [vmem:[%s14693_s2 + $0x1f8] sm:$0xff] }
 0x526   :  { %v6825_v41 = vld [vmem:[%s14693_s2 + $0x1b0] sm:$0xff] }
 0x527   :  { %2976 = vmatpush.msrb.mxu3 %v6898_v42  ;;  %v11022_v38 = vadd.f32 %v2368_v18, %v2367_v46  ;;  %2865 = vmatpush.msra.mxu0 %v6858_v55  ;;  %v3085_v42 = vld [vmem:[%s14690_s3 + $0x8] sm:$0xff]  ;;  %v6839_v55 = vld [vmem:[%s14693_s2 + $0x220] sm:$0xff] }
 0x528   :  { %v6848_v46 = vld [vmem:[%s14693_s2 + $0x268] sm:$0xff] }
 0x529   :  { %2977 = vmatpush.msrb.mxu3 %v6895_v51  ;;  %2866 = vmatpush.msra.mxu0 %v6855_v48  ;;  %v6866_v51 = vld [vmem:[%s14693_s2 + $0x2f8] sm:$0xff]  ;;  %v6844_v18 = vld [vmem:[%s14693_s2 + $0x248] sm:$0xff]  ;;  %v6835_v48 = vld [vmem:[%s14693_s2 + $0x200] sm:$0xff] }
 0x52a   :  { %2903 = vmatpush.msra.mxu2 %v6866_v51  ;;  %v6820_v51 = vld [vmem:[%s14693_s2 + $0x188] sm:$0xff] }
 0x52b   :  { %2978 = vmatpush.msrb.mxu3 %v6892_v53  ;;  %2867 = vmatpush.msra.mxu0 %v6852_v25  ;;  %v6862_v53 = vld [vmem:[%s14693_s2 + $0x2d8] sm:$0xff]  ;;  %v6824_v25 = vld [vmem:[%s14693_s2 + $0x1a8] sm:$0xff] }
 0x52c   :  { %2884 = vmatpush.msrb.mxu1 %v6862_v53  ;;  %2904 = vmatpush.msra.mxu2 %v6863_v33  ;;  %v6902_v53 = vld [vmem:[%s14690_s3 + $0x410] sm:$0xff]  ;;  %v6915_v33 = vld [vmem:[%s14690_s3 + $0x478] sm:$0xff] }
 0x52d   :  { %2979 = vmatpush.msrb.mxu3 %v6889_v28  ;;  %v6859_v28 = vld [vmem:[%s14693_s2 + $0x2c0] sm:$0xff]  ;;  %2868 = vmatpush.msra.mxu0 %v6849_v32  ;;  %v6821_v32 = vld [vmem:[%s14693_s2 + $0x190] sm:$0xff] }
 0x52e   :  { %2885 = vmatpush.msrb.mxu1 %v6859_v28  ;;  %2905 = vmatpush.msra.mxu2 %v6860_v29  ;;  %v11242_v28 = vld [vmem:[%s14694_s4 + $0x3] sm:$0x7]  ;;  %v6899_v29 = vld [vmem:[%s14690_s3 + $0x3f8] sm:$0xff] }
 0x52f   :  { %2980 = vmatpush.msrb.mxu3 %v6886_v19  ;;  %2869 = vmatpush.msra.mxu0 %v6846_v47  ;;  %v6856_v19 = vld [vmem:[%s14693_s2 + $0x2a8] sm:$0xff] }
 0x530   :  { %2886 = vmatpush.msrb.mxu1 %v6856_v19  ;;  %2906 = vmatpush.msra.mxu2 %v6857_v62  ;;  %v3129_v47 = vld [vmem:[%s14690_s3 + $0x168] sm:$0xff]  ;;  %v3126_v19 = vld [vmem:[%s14690_s3 + $0x150] sm:$0xff]  ;;  %v2581_v62 = vperm.slane %v11242_v28, 0 }
 0x531   :  { %2981 = vmatpush.msrb.mxu3 %v6883_v12  ;;  %2870 = vmatpush.msra.mxu0 %v6843_v44  ;;  %v6840_v12 = vld [vmem:[%s14693_s2 + $0x228] sm:$0xff]  ;;  %v6912_v44 = vld [vmem:[%s14690_s3 + $0x460] sm:$0xff] }
 0x532   :  { %2887 = vmatpush.msrb.mxu1 %v6853_v11  ;;  %v6909_v11 = vld [vmem:[%s14690_s3 + $0x448] sm:$0xff] }
 0x533   :  { %2982 = vmatpush.msrb.mxu3 %v6880_v4  ;;  %v6854_v4 = vld [vmem:[%s14693_s2 + $0x298] sm:$0xff]  ;;  %2871 = vmatpush.msra.mxu0 %v6840_v12  ;;  %v6896_v12 = vld [vmem:[%s14690_s3 + $0x3e0] sm:$0xff] }
 0x534   :  { %2907 = vmatpush.msra.mxu2 %v6854_v4  ;;  %v3123_v4 = vld [vmem:[%s14690_s3 + $0x138] sm:$0xff] }
 0x535   :  { %2983 = vmatpush.msrb.mxu3 %v6877_v2  ;;  %v6850_v2 = vld [vmem:[%s14693_s2 + $0x278] sm:$0xff]  ;;  %2872 = vmatpush.msra.mxu0 %v6837_v35 }
 0x536   :  { %2888 = vmatpush.msrb.mxu1 %v6850_v2  ;;  %2908 = vmatpush.msra.mxu2 %v6851_v37  ;;  %v6893_v2 = vld [vmem:[%s14690_s3 + $0x3c8] sm:$0xff]  ;;  %v6906_v37 = vld [vmem:[%s14690_s3 + $0x430] sm:$0xff] }
 0x537   :  { %2984 = vmatpush.msrb.mxu3 %v6874_v8  ;;  %v6847_v8 = vld [vmem:[%s14693_s2 + $0x260] sm:$0xff]  ;;  %2873 = vmatpush.msra.mxu0 %v6834_v3 }
 0x538   :  { %2889 = vmatpush.msrb.mxu1 %v6847_v8  ;;  %2909 = vmatpush.msra.mxu2 %v6848_v46  ;;  %v3120_v3 = vld [vmem:[%s14690_s3 + $0x120] sm:$0xff]  ;;  %v2712_v46 = vpop.f32.mrf.mxu1 }
 0x539   :  { %2985 = vmatpush.msrb.mxu3 %v6871_v7  ;;  %v6831_v7 = vld [vmem:[%s14693_s2 + $0x1e0] sm:$0xff] }
 0x53a   :  { %2874 = vmatpush.msra.mxu0 %v6831_v7  ;;  %2890 = vmatpush.msrb.mxu1 %v6844_v18  ;;  %v6890_v7 = vld [vmem:[%s14690_s3 + $0x3b0] sm:$0xff]  ;;  %v6903_v18 = vld [vmem:[%s14690_s3 + $0x418] sm:$0xff] }
 0x53b   :  { %2986 = vmatpush.msrb.mxu3 %v6868_v59  ;;  %v6845_v59 = vld [vmem:[%s14693_s2 + $0x250] sm:$0xff] }
 0x53c   :  { %2987 = vmatmul.f32.vlgmr.msrb.gmra.mxu3 %v11022_v38  ;;  %2910 = vmatpush.msra.mxu2 %v6845_v59  ;;  %v3117_v59 = vld [vmem:[%s14690_s3 + $0x108] sm:$0xff] }
 0x53d   :  { %3152 = vmatpush.msra.mxu3 %v3130_v56  ;;  %v6828_v56 = vld [vmem:[%s14693_s2 + $0x1c8] sm:$0xff] }
 0x53e   :  { %2875 = vmatpush.msra.mxu0 %v6828_v56  ;;  %2911 = vmatpush.msra.mxu2 %v6842_v17 }
 0x53f   :  { %3153 = vmatpush.msra.mxu3 %v3127_v34  ;;  %v6841_v34 = vld [vmem:[%s14693_s2 + $0x230] sm:$0xff] }
 0x540   :  { %2891 = vmatpush.msrb.mxu1 %v6841_v34  ;;  %2876 = vmatpush.msra.mxu0 %v6825_v41  ;;  %v2582_v34 = vperm.slane %v11242_v28, 1  ;;  %v6887_v41 = vld [vmem:[%s14690_s3 + $0x398] sm:$0xff] }
 0x541   :  { %3154 = vmatpush.msra.mxu3 %v3124_v1  ;;  %v6838_v1 = vld [vmem:[%s14693_s2 + $0x218] sm:$0xff]  ;;  %2912 = vmatpush.msra.mxu2 %v6839_v55  ;;  %v3114_v55 = vld [vmem:[%s14690_s3 + $0xf0] sm:$0xff] }
 0x542   :  { %2892 = vmatpush.msrb.mxu1 %v6838_v1  ;;  %v6900_v1 = vld [vmem:[%s14690_s3 + $0x400] sm:$0xff] }
 0x543   :  { %3155 = vmatpush.msra.mxu3 %v3121_v10  ;;  %v6822_v10 = vld [vmem:[%s14693_s2 + $0x198] sm:$0xff] }
 0x544   :  { %2877 = vmatpush.msra.mxu0 %v6822_v10  ;;  %2893 = vmatpush.msrb.mxu1 %v6835_v48  ;;  %v6884_v48 = vld [vmem:[%s14690_s3 + $0x380] sm:$0xff] }
 0x545   :  { %3156 = vmatpush.msra.mxu3 %v3118_v5  ;;  %v6836_v5 = vld [vmem:[%s14693_s2 + $0x208] sm:$0xff] }
 0x546   :  { %2913 = vmatpush.msra.mxu2 %v6836_v5  ;;  %v6897_v5 = vld [vmem:[%s14690_s3 + $0x3e8] sm:$0xff] }
 0x547   :  { %3157 = vmatpush.msra.mxu3 %v3115_v58  ;;  %v6819_v58 = vld [vmem:[%s14693_s2 + $0x180] sm:$0xff] }
 0x548   :  { %2878 = vmatpush.msra.mxu0 %v6819_v58  ;;  %v3111_v58 = vld [vmem:[%s14690_s3 + $0xd8] sm:$0xff] }
 0x549   :  { %3158 = vmatpush.msra.mxu3 %v3112_v9  ;;  %v6832_v9 = vld [vmem:[%s14693_s2 + $0x1e8] sm:$0xff] }
 0x54a   :  { %2894 = vmatpush.msrb.mxu1 %v6832_v9 }
 0x54b   :  { %3159 = vmatpush.msra.mxu3 %v3109_v30  ;;  %v6833_v30 = vld [vmem:[%s14693_s2 + $0x1f0] sm:$0xff] }
 0x54c   :  { %2914 = vmatpush.msra.mxu2 %v6833_v30 }
 0x54d   :  { %3160 = vmatpush.msra.mxu3 %v3106_v23  ;;  %v6914_v23 = vld [vmem:[%s14690_s3 + $0x470] sm:$0xff] }
 0x54e   :  { %2991 = vmatpush.msrb.mxu0 %v6914_v23  ;;  %v6881_v23 = vld [vmem:[%s14690_s3 + $0x368] sm:$0xff] }
 0x54f   :  { %3161 = vmatpush.msra.mxu3 %v3103_v49  ;;  %v6829_v49 = vld [vmem:[%s14693_s2 + $0x1d0] sm:$0xff] }
 0x550   :  { %2895 = vmatpush.msrb.mxu1 %v6829_v49  ;;  %v6894_v49 = vld [vmem:[%s14690_s3 + $0x3d0] sm:$0xff] }
 0x551   :  { %3162 = vmatpush.msra.mxu3 %v3100_v24  ;;  %v6830_v24 = vld [vmem:[%s14693_s2 + $0x1d8] sm:$0xff] }
 0x552   :  { %2915 = vmatpush.msra.mxu2 %v6830_v24  ;;  %v3108_v24 = vld [vmem:[%s14690_s3 + $0xc0] sm:$0xff] }
 0x553   :  { %3163 = vmatpush.msra.mxu3 %v3097_v50  ;;  %v6911_v50 = vld [vmem:[%s14690_s3 + $0x458] sm:$0xff] }
 0x554   :  { %2992 = vmatpush.msrb.mxu0 %v6911_v50 }
 0x555   :  { %3164 = vmatpush.msra.mxu3 %v3094_v54  ;;  %v6826_v54 = vld [vmem:[%s14693_s2 + $0x1b8] sm:$0xff] }
 0x556   :  { %2896 = vmatpush.msrb.mxu1 %v6826_v54  ;;  %v6878_v54 = vld [vmem:[%s14690_s3 + $0x350] sm:$0xff] }
 0x557   :  { %3165 = vmatpush.msra.mxu3 %v3091_v21  ;;  %v6827_v21 = vld [vmem:[%s14693_s2 + $0x1c0] sm:$0xff] }
 0x558   :  { %2916 = vmatpush.msra.mxu2 %v6827_v21  ;;  %v6891_v21 = vld [vmem:[%s14690_s3 + $0x3b8] sm:$0xff] }
 0x559   :  { %3166 = vmatpush.msra.mxu3 %v3088_v16  ;;  %v6908_v16 = vld [vmem:[%s14690_s3 + $0x440] sm:$0xff] }
 0x55a   :  { %2993 = vmatpush.msrb.mxu0 %v6908_v16  ;;  %2917 = vmatpush.msra.mxu2 %v6824_v25  ;;  %v3105_v16 = vld [vmem:[%s14690_s3 + $0xa8] sm:$0xff]  ;;  %v6875_v25 = vld [vmem:[%s14690_s3 + $0x338] sm:$0xff] }
 0x55b   :  { %3167 = vmatpush.msra.mxu3 %v3085_v42  ;;  %v6823_v42 = vld [vmem:[%s14693_s2 + $0x1a0] sm:$0xff] }
 0x55c   :  { %3168 = vmatmul.f32.vlgmr.msra.gmra.mxu3 %v10954_v22  ;;  %2897 = vmatpush.msrb.mxu1 %v6823_v42 }
 0x55d   :  { %2994 = vmatpush.msrb.mxu0 %v6905_v36  ;;  %2918 = vmatpush.msra.mxu2 %v6821_v32  ;;  %v6888_v36 = vld [vmem:[%s14690_s3 + $0x3a0] sm:$0xff] }
 0x55e   :  { %2898 = vmatpush.msrb.mxu1 %v6820_v51  ;;  %v3102_v51 = vld [vmem:[%s14690_s3 + $0x90] sm:$0xff] }
 0x55f   :  { %2995 = vmatpush.msrb.mxu0 %v6902_v53  ;;  %3132 = vmatpush.msrb.mxu2 %v3129_v47  ;;  %v6885_v47 = vld [vmem:[%s14690_s3 + $0x388] sm:$0xff] }
 0x560   :  { %3011 = vmatpush.msra.mxu1 %v6915_v33  ;;  %v6872_v33 = vld [vmem:[%s14690_s3 + $0x320] sm:$0xff] }
 0x561   :  { %2996 = vmatpush.msrb.mxu0 %v6899_v29  ;;  %3133 = vmatpush.msrb.mxu2 %v3126_v19  ;;  %v3099_v29 = vld [vmem:[%s14690_s3 + $0x78] sm:$0xff]  ;;  %v6882_v19 = vld [vmem:[%s14690_s3 + $0x370] sm:$0xff] }
 0x562   :  { %3012 = vmatpush.msra.mxu1 %v6912_v44  ;;  %v6869_v44 = vld [vmem:[%s14690_s3 + $0x308] sm:$0xff] }
 0x563   :  { %2997 = vmatpush.msrb.mxu0 %v6896_v12  ;;  %3134 = vmatpush.msrb.mxu2 %v3123_v4  ;;  %v6879_v12 = vld [vmem:[%s14690_s3 + $0x358] sm:$0xff] }
 0x564   :  { %3013 = vmatpush.msra.mxu1 %v6909_v11  ;;  %v3093_v11 = vld [vmem:[%s14690_s3 + $0x48] sm:$0xff] }
 0x565   :  { %2998 = vmatpush.msrb.mxu0 %v6893_v2  ;;  %3135 = vmatpush.msrb.mxu2 %v3120_v3  ;;  %v3090_v2 = vld [vmem:[%s14690_s3 + $0x30] sm:$0xff]  ;;  %v6873_v3 = vld [vmem:[%s14690_s3 + $0x328] sm:$0xff] }
 0x566   :  { %3014 = vmatpush.msra.mxu1 %v6906_v37 }
 0x567   :  { %2999 = vmatpush.msrb.mxu0 %v6890_v7  ;;  %3136 = vmatpush.msrb.mxu2 %v3117_v59  ;;  %v3084_v59 = vld [vmem:[%s14690_s3] sm:$0xff] }
 0x568   :  { %3015 = vmatpush.msra.mxu1 %v6903_v18  ;;  %v6870_v18 = vld [vmem:[%s14690_s3 + $0x310] sm:$0xff] }
 0x569   :  { %3000 = vmatpush.msrb.mxu0 %v6887_v41  ;;  %3137 = vmatpush.msrb.mxu2 %v3114_v55 }
 0x56a   :  { %3016 = vmatpush.msra.mxu1 %v6900_v1  ;;  %v7554_v1 = vld [vmem:[%s14692_s5 + $0x1] ss:$0 sm:$0xff] }
 0x56b   :  { %3001 = vmatpush.msrb.mxu0 %v6884_v48  ;;  %3138 = vmatpush.msrb.mxu2 %v3111_v58 }
 0x56c   :  { %3017 = vmatpush.msra.mxu1 %v6897_v5 }
 0x56d   :  { %3002 = vmatpush.msrb.mxu0 %v6881_v23  ;;  %3139 = vmatpush.msrb.mxu2 %v3108_v24 }
 0x56e   :  { %3018 = vmatpush.msra.mxu1 %v6894_v49 }
 0x56f   :  { %3003 = vmatpush.msrb.mxu0 %v6878_v54  ;;  %3140 = vmatpush.msrb.mxu2 %v3105_v16 }
 0x570   :  { %3019 = vmatpush.msra.mxu1 %v6891_v21 }
 0x571   :  { %3004 = vmatpush.msrb.mxu0 %v6875_v25  ;;  %3141 = vmatpush.msrb.mxu2 %v3102_v51 }
 0x572   :  { %3020 = vmatpush.msra.mxu1 %v6888_v36 }
 0x573   :  { %3005 = vmatpush.msrb.mxu0 %v6872_v33  ;;  %3142 = vmatpush.msrb.mxu2 %v3099_v29 }
 0x574   :  { %3021 = vmatpush.msra.mxu1 %v6885_v47 }
 0x575   :  { %3006 = vmatpush.msrb.mxu0 %v6869_v44 }
 0x576   :  { %3022 = vmatpush.msra.mxu1 %v6882_v19 }
 0x578   :  { %3023 = vmatpush.msra.mxu1 %v6879_v12  ;;  %v3128_v12 = vld [vmem:[%s14690_s3 + $0x160] sm:$0xff] }
 0x59a   :  { %v2644_v5 = vpop.f32.mrf.mxu0 }
 0x59f   :  { %v2604_v35 = vpop.f32.mrf.mxu2  ;;  %v2624_v17 = vpop.f32.mrf.mxu3 }
 0x5a0   :  { %v2605_v8 = vadd.f32 %v2604_v35, %v2581_v62  ;;  %v2625_v9 = vadd.f32 %v2624_v17, %v2582_v34  ;;  %v3096_v62 = vld [vmem:[%s14690_s3 + $0x60] sm:$0xff] }
 0x5a1   :  { %3143 = vmatpush.msrb.mxu2 %v3096_v62  ;;  %v6876_v35 = vld [vmem:[%s14690_s3 + $0x340] sm:$0xff]  ;;  %v3131_v62 = vld [vmem:[%s14690_s3 + $0x178] sm:$0xff] }
 0x5a2   :  { %v2755_v56 = vadd.f32 %v2712_v46, %v2605_v8  ;;  %v3087_v8 = vld [vmem:[%s14690_s3 + $0x18] sm:$0xff]  ;;  %3024 = vmatpush.msra.mxu1 %v6876_v35  ;;  %v3116_v35 = vld [vmem:[%s14690_s3 + $0x100] sm:$0xff] }
 0x5a3   :  { %3144 = vmatpush.msrb.mxu2 %v3093_v11  ;;  %v3122_v11 = vld [vmem:[%s14690_s3 + $0x130] sm:$0xff] }
 0x5a4   :  { %v6816_v10 = vmul.f32 -1.442695, %v2755_v56  ;;  %3025 = vmatpush.msra.mxu1 %v6873_v3  ;;  %v3107_v3 = vld [vmem:[%s14690_s3 + $0xb8] sm:$0xff] }
 0x5a5   :  { %3145 = vmatpush.msrb.mxu2 %v3090_v2  ;;  %v3113_v2 = vld [vmem:[%s14690_s3 + $0xe8] sm:$0xff] }
 0x5a6   :  { %7674 = vpow2.f32 %v6816_v10  ;;  %3026 = vmatpush.msra.mxu1 %v6870_v18  ;;  %v2583_v10 = vperm.slane %v11242_v28, 2  ;;  %v3095_v18 = vld [vmem:[%s14690_s3 + $0x58] sm:$0xff] }
 0x5a7   :  { %v2732_v30 = vpop.f32.mrf.mxu2  ;;  %3146 = vmatpush.msrb.mxu2 %v3087_v8  ;;  %v2752_v48 = vpop.f32.mrf.mxu3  ;;  %v3104_v8 = vld [vmem:[%s14690_s3 + $0xa0] sm:$0xff] }
 0x5a8   :  { %v2775_v50 = vadd.f32 %v2732_v30, %v2625_v9  ;;  %v2799_v24 = vadd.f32 %v7554_v1, %v2752_v48  ;;  %v3290_v1 = vld [vmem:[%s14693_s2 + $0x170] sm:$0xff]  ;;  %v6955_v48 = vld [vmem:[%s14690_s3 + $0x288] sm:$0xff] }
 0x5a9   :  { %3147 = vmatpush.msrb.mxu2 %v3084_v59  ;;  %v3092_v59 = vld [vmem:[%s14690_s3 + $0x40] sm:$0xff] }
 0x5aa   :  { %v6817_v42 = vmul.f32 -1.442695, %v2775_v50  ;;  %v2645_v50 = vadd.f32 %v2644_v5, %v2583_v10  ;;  %v6958_v10 = vld [vmem:[%s14690_s3 + $0x2a0] sm:$0xff]  ;;  %v6952_v5 = vld [vmem:[%s14690_s3 + $0x270] sm:$0xff] }
 0x5ac   :  { %v7675_v32 = vpop.eup %7674  ;;  %7676 = vpow2.f32 %v6817_v42 }
 0x5ad   :  { %v2759_v53 = vadd.f32 1.0, %v7675_v32 }
 0x5af   :  { %7678 = vrcp.f32 %v2759_v53  ;;  %v2771_v34 = vand.u32 2147483648, %v2759_v53  ;;  %v2769_v41 = vand.u32 2147483647, %v2759_v53  ;;  %vm2765_vm2 = vweird.f32 %v2759_v53 }
 0x5b1   :  { %v2772_v30 = vor.u32 1.1754944e-38, %v2771_v34  ;;  %vm2770_vm4 = vcmp.eq.f32.partialorder %v2769_v41, 8.507059e+37  ;;  %v3086_v34 = vld [vmem:[%s14690_s3 + $0x10] sm:$0xff] }
 0x5b2   :  { %v7677_v4 = vpop.eup %7676  ;;  %v6964_v41 = vld [vmem:[%s14690_s3 + $0x2d0] sm:$0xff] }
 0x5b3   :  { %v2779_v37 = vadd.f32 1.0, %v7677_v4  ;;  %v3119_v4 = vld [vmem:[%s14690_s3 + $0x118] sm:$0xff] }
 0x5b5   :  { %v7679_v46 = vpop.eup %7678  ;;  %7680 = vrcp.f32 %v2779_v37  ;;  %v2791_v16 = vand.u32 2147483648, %v2779_v37  ;;  %v2789_v25 = vand.u32 2147483647, %v2779_v37  ;;  %vm2785_vm6 = vweird.f32 %v2779_v37 }
 0x5b6   :  { %v2761_v7 = vmul.f32 %v7679_v46, %v2759_v53  ;;  %vm2766_vm1 = vweird.f32 %v7679_v46 }
 0x5b7   :  { %vm2767_vm3 = vmor %vm2765_vm2, %vm2766_vm1  ;;  %v2792_v51 = vor.u32 1.1754944e-38, %v2791_v16  ;;  %vm2790_vm8 = vcmp.eq.f32.partialorder %v2789_v25, 8.507059e+37  ;;  %v6922_v16 = vld [vmem:[%s14690_s3 + $0x180] sm:$0xff] }
 0x5b8   :  { %v2762_v56 = vsub.f32 1.0, %v2761_v7  ;;  %v3098_v7 = vld [vmem:[%s14690_s3 + $0x70] sm:$0xff]  ;;  %v3284_v25 = vld [vmem:[%s14693_s2 + $0x140] sm:$0xff] }
 0x5ba   :  { %v2763_v17 = vmul.f32 %v7679_v46, %v2762_v56  ;;  %v3089_v56 = vld [vmem:[%s14690_s3 + $0x28] sm:$0xff] }
 0x5bb   :  { %v7681_v55 = vpop.eup %7680 }
 0x5bc   :  { %v2781_v58 = vmul.f32 %v7681_v55, %v2779_v37  ;;  %v2764_v9 = vadd.f32 %v7679_v46, %v2763_v17  ;;  %vm2786_vm5 = vweird.f32 %v7681_v55  ;;  %v3110_v37 = vld [vmem:[%s14690_s3 + $0xd0] sm:$0xff]  ;;  %v6967_v17 = vld [vmem:[%s14690_s3 + $0x2e8] sm:$0xff] }
 0x5bd   :  { %vm2787_vm7 = vmor %vm2785_vm6, %vm2786_vm5 }
 0x5be   :  { %v2782_v23 = vsub.f32 1.0, %v2781_v58  ;;  %v2768_v49 = vsel %vm2767_vm3, %v7679_v46, %v2764_v9  ;;  %v3101_v46 = vld [vmem:[%s14690_s3 + $0x88] sm:$0xff]  ;;  %v6949_v58 = vld [vmem:[%s14690_s3 + $0x258] sm:$0xff]  ;;  %v6946_v9 = vld [vmem:[%s14690_s3 + $0x240] sm:$0xff] }
 0x5bf   :  { %v2773_v54 = vsel %vm2770_vm4, %v2772_v30, %v2768_v49  ;;  %v6943_v30 = vld [vmem:[%s14690_s3 + $0x228] sm:$0xff]  ;;  %v6937_v49 = vld [vmem:[%s14690_s3 + $0x1f8] sm:$0xff] }
 0x5c0   :  { %v2783_v21 = vmul.f32 %v7681_v55, %v2782_v23  ;;  %v2800_v42 = vmul.f32 %v2799_v24, %v2773_v54  ;;  %v6940_v23 = vld [vmem:[%s14690_s3 + $0x210] sm:$0xff]  ;;  %v6934_v24 = vld [vmem:[%s14690_s3 + $0x1e0] sm:$0xff] }
 0x5c1   :  { %v6928_v54 = vld [vmem:[%s14690_s3 + $0x1b0] sm:$0xff] }
 0x5c2   :  { %v2784_v36 = vadd.f32 %v7681_v55, %v2783_v21  ;;  %v2801_v28 = vadd.f32 %v2800_v42, %v2645_v50  ;;  %v6931_v50 = vld [vmem:[%s14690_s3 + $0x1c8] sm:$0xff]  ;;  %v6925_v21 = vld [vmem:[%s14690_s3 + $0x198] sm:$0xff] }
 0x5c3   :  { %v3287_v42 = vld [vmem:[%s14693_s2 + $0x158] sm:$0xff] }
 0x5c4   :  { %v2788_v32 = vsel %vm2787_vm7, %v7681_v55, %v2784_v36  ;;  %7682 = vtanh.f32 %v2801_v28  ;;  %v6961_v55 = vld [vmem:[%s14690_s3 + $0x2b8] sm:$0xff]  ;;  %v3281_v36 = vld [vmem:[%s14693_s2 + $0x128] sm:$0xff] }
 0x5c5   :  { %v2793_v53 = vsel %vm2790_vm8, %v2792_v51, %v2788_v32  ;;  %v3289_v28 = vld [vmem:[%s14693_s2 + $0x168] sm:$0xff]  ;;  %v3278_v51 = vld [vmem:[%s14693_s2 + $0x110] sm:$0xff] }
 0x5c6   :  { %v2803_v33 = vsub.f32 1.0, %v2793_v53  ;;  %v2805_v44 = vmul.f32 %v2793_v53, %v10572_v26  ;;  %v3125_v26 = vld [vmem:[%s14690_s3 + $0x148] sm:$0xff]  ;;  %v3286_v32 = vld [vmem:[%s14693_s2 + $0x150] sm:$0xff]  ;;  %v3275_v53 = vld [vmem:[%s14693_s2 + $0xf8] sm:$0xff] }
 0x5ca   :  { %v7683_v47 = vpop.eup %7682 }
 0x5cb   :  { %v2804_v29 = vmul.f32 %v7683_v47, %v2803_v33  ;;  %v3283_v33 = vld [vmem:[%s14693_s2 + $0x138] sm:$0xff]  ;;  %v3272_v47 = vld [vmem:[%s14693_s2 + $0xe0] sm:$0xff] }
 0x5cd   :  { %v11374_v19 = vadd.f32 %v2805_v44, %v2804_v29  ;;  %v3280_v29 = vld [vmem:[%s14693_s2 + $0x120] sm:$0xff]  ;;  %v3269_v44 = vld [vmem:[%s14693_s2 + $0xc8] sm:$0xff] }
 0x5cf   :  { %2879 = vmatmul.f32.vlgmr.msra.gmra.mxu0 %v11374_v19  ;;  %2899 = vmatmul.f32.vlgmr.msrb.gmra.mxu1 %v11374_v19 }
 0x5d0   :  { %2919 = vmatmul.f32.vlgmr.msra.gmra.mxu2 %v11374_v19  ;;  %3172 = vmatpush.msra.mxu0 %v3131_v62  ;;  %v3277_v62 = vld [vmem:[%s14693_s2 + $0x108] sm:$0xff] }
 0x5d1   :  { %3320 = vmatpush.msra.mxu2 %v3290_v1  ;;  %3300 = vmatpush.msrb.mxu1 %v3289_v28  ;;  %v6969_v1 = vld [vmem:[%s14690_s3 + $0x2f8] sm:$0xff] }
 0x5d2   :  { %3173 = vmatpush.msra.mxu0 %v3128_v12  ;;  %v3266_v12 = vld [vmem:[%s14693_s2 + $0xb0] sm:$0xff] }
 0x5d3   :  { %3321 = vmatpush.msra.mxu2 %v3287_v42  ;;  %3301 = vmatpush.msrb.mxu1 %v3286_v32  ;;  %v6957_v42 = vld [vmem:[%s14690_s3 + $0x298] sm:$0xff] }
 0x5d4   :  { %3174 = vmatpush.msra.mxu0 %v3125_v26  ;;  %v3274_v26 = vld [vmem:[%s14693_s2 + $0xf0] sm:$0xff]  ;;  %v6965_v32 = vld [vmem:[%s14690_s3 + $0x2d8] sm:$0xff] }
 0x5d5   :  { %3322 = vmatpush.msra.mxu2 %v3284_v25  ;;  %3302 = vmatpush.msrb.mxu1 %v3283_v33  ;;  %v11616_v25 = vld [vmem:[%s14694_s4 + $0x6] sm:$0x7] }
 0x5d6   :  { %3175 = vmatpush.msra.mxu0 %v3122_v11  ;;  %v3263_v11 = vld [vmem:[%s14693_s2 + $0x98] sm:$0xff]  ;;  %v3273_v33 = vld [vmem:[%s14693_s2 + $0xe8] sm:$0xff] }
 0x5d7   :  { %3007 = vmatmul.f32.vlgmr.msrb.gmra.mxu0 %v11022_v38  ;;  %3027 = vmatmul.f32.vlgmr.msra.gmra.mxu1 %v11022_v38 }
 0x5d8   :  { %3148 = vmatmul.f32.vlgmr.msrb.gmra.mxu2 %v10954_v22  ;;  %3176 = vmatpush.msra.mxu0 %v3119_v4  ;;  %v3271_v4 = vld [vmem:[%s14693_s2 + $0xd8] sm:$0xff] }
 0x5d9   :  { %3323 = vmatpush.msra.mxu2 %v3281_v36  ;;  %3303 = vmatpush.msrb.mxu1 %v3280_v29  ;;  %v6951_v29 = vld [vmem:[%s14690_s3 + $0x268] sm:$0xff] }
 0x5da   :  { %3177 = vmatpush.msra.mxu0 %v3116_v35  ;;  %v3260_v35 = vld [vmem:[%s14693_s2 + $0x80] sm:$0xff] }
 0x5db   :  { %3324 = vmatpush.msra.mxu2 %v3278_v51  ;;  %3304 = vmatpush.msrb.mxu1 %v3277_v62  ;;  %v3276_v51 = vld [vmem:[%s14693_s2 + $0x100] sm:$0xff] }
 0x5dc   :  { %3178 = vmatpush.msra.mxu0 %v3113_v2  ;;  %v3268_v2 = vld [vmem:[%s14693_s2 + $0xc0] sm:$0xff] }
 0x5dd   :  { %3325 = vmatpush.msra.mxu2 %v3275_v53  ;;  %3305 = vmatpush.msrb.mxu1 %v3274_v26  ;;  %v6954_v53 = vld [vmem:[%s14690_s3 + $0x280] sm:$0xff]  ;;  %v6959_v26 = vld [vmem:[%s14690_s3 + $0x2a8] sm:$0xff] }
 0x5de   :  { %3179 = vmatpush.msra.mxu0 %v3110_v37  ;;  %v3257_v37 = vld [vmem:[%s14693_s2 + $0x68] sm:$0xff] }
 0x5df   :  { %3326 = vmatpush.msra.mxu2 %v3272_v47  ;;  %3306 = vmatpush.msrb.mxu1 %v3271_v4  ;;  %v6962_v47 = vld [vmem:[%s14690_s3 + $0x2c0] sm:$0xff]  ;;  %v3267_v4 = vld [vmem:[%s14693_s2 + $0xb8] sm:$0xff] }
 0x5e0   :  { %3180 = vmatpush.msra.mxu0 %v3107_v3  ;;  %v3265_v3 = vld [vmem:[%s14693_s2 + $0xa8] sm:$0xff] }
 0x5e1   :  { %3327 = vmatpush.msra.mxu2 %v3269_v44  ;;  %3307 = vmatpush.msrb.mxu1 %v3268_v2  ;;  %v2857_v44 = vperm.slane %v11616_v25, 0  ;;  %v6945_v2 = vld [vmem:[%s14690_s3 + $0x238] sm:$0xff] }
 0x5e2   :  { %3181 = vmatpush.msra.mxu0 %v3104_v8  ;;  %v3254_v8 = vld [vmem:[%s14693_s2 + $0x50] sm:$0xff] }
 0x5e3   :  { %3328 = vmatpush.msra.mxu2 %v3266_v12  ;;  %3308 = vmatpush.msrb.mxu1 %v3265_v3  ;;  %v3270_v12 = vld [vmem:[%s14693_s2 + $0xd0] sm:$0xff] }
 0x5e4   :  { %3182 = vmatpush.msra.mxu0 %v3101_v46  ;;  %v11546_v46 = vpop.f32.mrf.mxu3 }
 0x5e5   :  { %3329 = vmatpush.msra.mxu2 %v3263_v11  ;;  %v6948_v11 = vld [vmem:[%s14690_s3 + $0x250] sm:$0xff] }
 0x5e6   :  { %3183 = vmatpush.msra.mxu0 %v3098_v7  ;;  %v3262_v7 = vld [vmem:[%s14693_s2 + $0x90] sm:$0xff] }
 0x5e7   :  { %3330 = vmatpush.msra.mxu2 %v3260_v35  ;;  %3309 = vmatpush.msrb.mxu1 %v3262_v7  ;;  %v6956_v35 = vld [vmem:[%s14690_s3 + $0x290] sm:$0xff]  ;;  %v3264_v7 = vld [vmem:[%s14693_s2 + $0xa0] sm:$0xff] }
 0x5e8   :  { %3184 = vmatpush.msra.mxu0 %v3095_v18  ;;  %v3251_v18 = vld [vmem:[%s14693_s2 + $0x38] sm:$0xff] }
 0x5e9   :  { %3331 = vmatpush.msra.mxu2 %v3257_v37  ;;  %v132_v37 = vadd.f32 %v8320_v39, %v8297_v27 }
 0x5ea   :  { %3185 = vmatpush.msra.mxu0 %v3092_v59  ;;  %v3259_v59 = vld [vmem:[%s14693_s2 + $0x78] sm:$0xff] }
 0x5eb   :  { %3332 = vmatpush.msra.mxu2 %v3254_v8  ;;  %3310 = vmatpush.msrb.mxu1 %v3259_v59  ;;  %v6942_v59 = vld [vmem:[%s14690_s3 + $0x220] sm:$0xff] }
 0x5ec   :  { %3186 = vmatpush.msra.mxu0 %v3089_v56  ;;  %v3248_v56 = vld [vmem:[%s14693_s2 + $0x20] sm:$0xff] }
 0x5ed   :  { %3333 = vmatpush.msra.mxu2 %v3251_v18  ;;  %v6953_v18 = vld [vmem:[%s14690_s3 + $0x278] sm:$0xff] }
 0x5ee   :  { %3187 = vmatpush.msra.mxu0 %v3086_v34  ;;  %v3256_v34 = vld [vmem:[%s14693_s2 + $0x60] sm:$0xff] }
 0x5ef   :  { %3188 = vmatmul.f32.vlgmr.msra.gmra.mxu0 %v10954_v22  ;;  %3334 = vmatpush.msra.mxu2 %v3248_v56 }
 0x5f0   :  { %3408 = vmatpush.msrb.mxu0 %v6967_v17  ;;  %v3245_v17 = vld [vmem:[%s14693_s2 + $0x8] sm:$0xff]  ;;  %3311 = vmatpush.msrb.mxu1 %v3256_v34 }
 0x5f1   :  { %3335 = vmatpush.msra.mxu2 %v3245_v17  ;;  %v3261_v34 = vld [vmem:[%s14693_s2 + $0x88] sm:$0xff]  ;;  %v6950_v17 = vld [vmem:[%s14690_s3 + $0x260] sm:$0xff] }
 0x5f2   :  { %3409 = vmatpush.msrb.mxu0 %v6964_v41  ;;  %v3291_v41 = vld [vmem:[%s14693_s2 + $0x178] sm:$0xff] }
 0x5f3   :  { %3340 = vmatpush.msrb.mxu3 %v3291_v41  ;;  %3448 = vmatpush.msrb.mxu2 %v6969_v1  ;;  %v6939_v41 = vld [vmem:[%s14690_s3 + $0x208] sm:$0xff] }
 0x5f4   :  { %3410 = vmatpush.msrb.mxu0 %v6961_v55  ;;  %v3253_v55 = vld [vmem:[%s14693_s2 + $0x48] sm:$0xff] }
 0x5f5   :  { %3312 = vmatpush.msrb.mxu1 %v3253_v55 }
 0x5f6   :  { %3411 = vmatpush.msrb.mxu0 %v6958_v10  ;;  %v3288_v10 = vld [vmem:[%s14693_s2 + $0x160] sm:$0xff] }
 0x5f7   :  { %3341 = vmatpush.msrb.mxu3 %v3288_v10  ;;  %v3258_v10 = vld [vmem:[%s14693_s2 + $0x70] sm:$0xff] }
 0x5f8   :  { %3412 = vmatpush.msrb.mxu0 %v6955_v48  ;;  %v6966_v48 = vld [vmem:[%s14690_s3 + $0x2e0] sm:$0xff] }
 0x5f9   :  { %3449 = vmatpush.msrb.mxu2 %v6966_v48  ;;  %v6947_v48 = vld [vmem:[%s14690_s3 + $0x248] sm:$0xff] }
 0x5fa   :  { %3413 = vmatpush.msrb.mxu0 %v6952_v5  ;;  %v3169_v5 = vpop.f32.mrf.mxu3 }
 0x5fc   :  { %3414 = vmatpush.msrb.mxu0 %v6949_v58  ;;  %v3250_v58 = vld [vmem:[%s14693_s2 + $0x30] sm:$0xff] }
 0x5fd   :  { %3313 = vmatpush.msrb.mxu1 %v3250_v58 }
 0x5fe   :  { %3415 = vmatpush.msrb.mxu0 %v6946_v9  ;;  %v173_v9 = vadd.f32 %v8337_v57, %v8483_v13  ;;  %v3282_v57 = vld [vmem:[%s14693_s2 + $0x130] sm:$0xff] }
 0x600   :  { %3416 = vmatpush.msrb.mxu0 %v6943_v30  ;;  %v3285_v30 = vld [vmem:[%s14693_s2 + $0x148] sm:$0xff] }
 0x601   :  { %3342 = vmatpush.msrb.mxu3 %v3285_v30  ;;  %v6933_v30 = vld [vmem:[%s14690_s3 + $0x1d8] sm:$0xff] }
 0x602   :  { %3417 = vmatpush.msrb.mxu0 %v6940_v23  ;;  %v6963_v23 = vld [vmem:[%s14690_s3 + $0x2c8] sm:$0xff] }
 0x603   :  { %3450 = vmatpush.msrb.mxu2 %v6963_v23  ;;  %3343 = vmatpush.msrb.mxu3 %v3282_v57  ;;  %v6930_v57 = vld [vmem:[%s14690_s3 + $0x1c0] sm:$0xff] }
 0x604   :  { %3418 = vmatpush.msrb.mxu0 %v6937_v49  ;;  %v3247_v49 = vld [vmem:[%s14693_s2 + $0x18] sm:$0xff] }
 0x605   :  { %3314 = vmatpush.msrb.mxu1 %v3247_v49  ;;  %v3252_v49 = vld [vmem:[%s14693_s2 + $0x40] sm:$0xff] }
 0x606   :  { %3419 = vmatpush.msrb.mxu0 %v6934_v24  ;;  %v3212_v24 = vadd.f32 %v3169_v5, %v173_v9  ;;  %v6936_v5 = vld [vmem:[%s14690_s3 + $0x1f0] sm:$0xff] }
 0x607   :  { %v6944_v9 = vld [vmem:[%s14690_s3 + $0x230] sm:$0xff] }
 0x608   :  { %3420 = vmatpush.msrb.mxu0 %v6931_v50  ;;  %v6960_v50 = vld [vmem:[%s14690_s3 + $0x2b0] sm:$0xff]  ;;  %v6920_v28 = vmul.f32 -1.442695, %v3212_v24  ;;  %v6941_v24 = vld [vmem:[%s14690_s3 + $0x218] sm:$0xff] }
 0x609   :  { %3451 = vmatpush.msrb.mxu2 %v6960_v50  ;;  %v3249_v50 = vld [vmem:[%s14693_s2 + $0x28] sm:$0xff] }
 0x60a   :  { %3421 = vmatpush.msrb.mxu0 %v6928_v54  ;;  %v3244_v54 = vld [vmem:[%s14693_s2] sm:$0xff]  ;;  %7684 = vpow2.f32 %v6920_v28 }
 0x60b   :  { %3315 = vmatpush.msrb.mxu1 %v3244_v54  ;;  %3452 = vmatpush.msrb.mxu2 %v6957_v42  ;;  %v6938_v54 = vld [vmem:[%s14690_s3 + $0x200] sm:$0xff]  ;;  %v2858_v42 = vperm.slane %v11616_v25, 1 }
 0x60c   :  { %3422 = vmatpush.msrb.mxu0 %v6925_v21  ;;  %v3279_v21 = vld [vmem:[%s14693_s2 + $0x118] sm:$0xff] }
 0x60d   :  { %3344 = vmatpush.msrb.mxu3 %v3279_v21  ;;  %3453 = vmatpush.msrb.mxu2 %v6954_v53  ;;  %v6927_v21 = vld [vmem:[%s14690_s3 + $0x1a8] sm:$0xff]  ;;  %v6924_v53 = vld [vmem:[%s14690_s3 + $0x190] sm:$0xff] }
 0x60e   :  { %3423 = vmatpush.msrb.mxu0 %v6922_v16  ;;  %v6968_v16 = vld [vmem:[%s14690_s3 + $0x2f0] sm:$0xff] }
 0x60f   :  { %3424 = vmatmul.f32.vlgmr.msrb.gmra.mxu0 %v11374_v19  ;;  %3428 = vmatpush.msra.mxu1 %v6968_v16 }
 0x610   :  { %3345 = vmatpush.msrb.mxu3 %v3276_v51  ;;  %3454 = vmatpush.msrb.mxu2 %v6951_v29  ;;  %v7685_v39 = vpop.eup %7684  ;;  %v3246_v51 = vld [vmem:[%s14693_s2 + $0x10] sm:$0xff] }
 0x611   :  { %3429 = vmatpush.msra.mxu1 %v6965_v32  ;;  %v11687_v58 = vadd.f32 1.0, %v7685_v39  ;;  %v6935_v32 = vld [vmem:[%s14690_s3 + $0x1e8] sm:$0xff] }
 0x612   :  { %3346 = vmatpush.msrb.mxu3 %v3273_v33  ;;  %3455 = vmatpush.msrb.mxu2 %v6948_v11 }
 0x613   :  { %3430 = vmatpush.msra.mxu1 %v6962_v47  ;;  %vm3222_vm14 = vweird.f32 %v11687_v58 }
 0x614   :  { %3347 = vmatpush.msrb.mxu3 %v3270_v12  ;;  %3456 = vmatpush.msrb.mxu2 %v6945_v2 }
 0x615   :  { %3431 = vmatpush.msra.mxu1 %v6959_v26  ;;  %v6929_v26 = vld [vmem:[%s14690_s3 + $0x1b8] sm:$0xff] }
 0x616   :  { %3348 = vmatpush.msrb.mxu3 %v3267_v4  ;;  %3457 = vmatpush.msrb.mxu2 %v6942_v59 }
 0x617   :  { %3432 = vmatpush.msra.mxu1 %v6956_v35  ;;  %v6926_v35 = vld [vmem:[%s14690_s3 + $0x1a0] sm:$0xff] }
 0x618   :  { %3349 = vmatpush.msrb.mxu3 %v3264_v7  ;;  %3458 = vmatpush.msrb.mxu2 %v6939_v41 }
 0x619   :  { %3433 = vmatpush.msra.mxu1 %v6953_v18 }
 0x61a   :  { %3350 = vmatpush.msrb.mxu3 %v3261_v34  ;;  %3459 = vmatpush.msrb.mxu2 %v6936_v5 }
 0x61b   :  { %3434 = vmatpush.msra.mxu1 %v6950_v17  ;;  %v7556_v17 = vld [vmem:[%s14692_s5] ss:$0 sm:$0xff] }
 0x61c   :  { %3351 = vmatpush.msrb.mxu3 %v3258_v10  ;;  %3460 = vmatpush.msrb.mxu2 %v6933_v30 }
 0x61d   :  { %3435 = vmatpush.msra.mxu1 %v6947_v48 }
 0x61e   :  { %3461 = vmatpush.msrb.mxu2 %v6930_v57 }
 0x61f   :  { %3436 = vmatpush.msra.mxu1 %v6944_v9 }
 0x620   :  { %3462 = vmatpush.msrb.mxu2 %v6927_v21 }
 0x621   :  { %3437 = vmatpush.msra.mxu1 %v6941_v24 }
 0x622   :  { %3463 = vmatpush.msrb.mxu2 %v6924_v53 }
 0x623   :  { %3438 = vmatpush.msra.mxu1 %v6938_v54 }
 0x625   :  { %3439 = vmatpush.msra.mxu1 %v6935_v32 }
 0x64c   :  { %v2880_v62 = vpop.f32.mrf.mxu0  ;;  %v2900_v33 = vpop.f32.mrf.mxu1 }
 0x64d   :  { %v2881_v3 = vadd.f32 %v2880_v62, %v2857_v44  ;;  %v6932_v44 = vld [vmem:[%s14690_s3 + $0x1d0] sm:$0xff]  ;;  %v2901_v62 = vadd.f32 %v2900_v33, %v2858_v42 }
 0x64e   :  { %3440 = vmatpush.msra.mxu1 %v6932_v44 }
 0x64f   :  { %v3031_v1 = vadd.f32 %v11546_v46, %v2881_v3  ;;  %v3255_v46 = vld [vmem:[%s14693_s2 + $0x58] sm:$0xff] }
 0x650   :  { %3352 = vmatpush.msrb.mxu3 %v3255_v46  ;;  %3441 = vmatpush.msra.mxu1 %v6929_v26 }
 0x651   :  { %v6916_v23 = vmul.f32 -1.442695, %v3031_v1 }
 0x652   :  { %3353 = vmatpush.msrb.mxu3 %v3252_v49  ;;  %3442 = vmatpush.msra.mxu1 %v6926_v35  ;;  %v3228_v49 = vand.u32 2147483648, %v11687_v58  ;;  %v7061_v35 = vld [vmem:[%s14690_s3 + $0x438] sm:$0xff] }
 0x653   :  { %v11618_v36 = vpop.f32.mrf.mxu2 }
 0x654   :  { %3354 = vmatpush.msrb.mxu3 %v3249_v50  ;;  %v3008_v29 = vpop.f32.mrf.mxu0  ;;  %v3226_v50 = vand.u32 2147483647, %v11687_v58  ;;  %v3229_v42 = vor.u32 1.1754944e-38, %v3228_v49  ;;  %v7037_v49 = vld [vmem:[%s14690_s3 + $0x378] sm:$0xff] }
 0x655   :  { %v3051_v4 = vadd.f32 %v3008_v29, %v2901_v62 }
 0x656   :  { %3355 = vmatpush.msrb.mxu3 %v3246_v51  ;;  %vm3227_vm0 = vcmp.eq.f32.partialorder %v3226_v50, 8.507059e+37 }
 0x657   :  { %v6917_v18 = vmul.f32 -1.442695, %v3051_v4 }
 0x65b   :  { %v3149_v8 = vpop.f32.mrf.mxu2 }
 0x65c   :  { %v3192_v56 = vadd.f32 %v3149_v8, %v132_v37  ;;  %v6923_v8 = vld [vmem:[%s14690_s3 + $0x188] sm:$0xff] }
 0x65d   :  { %3443 = vmatpush.msra.mxu1 %v6923_v8  ;;  %v3028_v8 = vpop.f32.mrf.mxu1 }
 0x65e   :  { %v6919_v55 = vmul.f32 -1.442695, %v3192_v56 }
 0x660   :  { %7686 = vpow2.f32 %v6919_v55 }
 0x661   :  { %7688 = vrcp.f32 %v11687_v58 }
 0x662   :  { %7690 = vpow2.f32 %v6916_v23  ;;  %v214_v23 = vadd.f32 %v8706_v45, %v8600_v6 }
 0x666   :  { %v7687_v16 = vpop.eup %7686 }
 0x667   :  { %v3196_v28 = vadd.f32 1.0, %v7687_v16  ;;  %v7689_v47 = vpop.eup %7688 }
 0x668   :  { %v7691_v12 = vpop.eup %7690  ;;  %v3218_v11 = vmul.f32 %v7689_v47, %v11687_v58  ;;  %vm3223_vm13 = vweird.f32 %v7689_v47 }
 0x669   :  { %7692 = vrcp.f32 %v3196_v28  ;;  %v11737_v37 = vadd.f32 1.0, %v7691_v12  ;;  %v3208_v56 = vand.u32 2147483648, %v3196_v28  ;;  %v3206_v34 = vand.u32 2147483647, %v3196_v28  ;;  %vm3224_vm15 = vmor %vm3222_vm14, %vm3223_vm13 }
 0x66a   :  { %v3219_v7 = vsub.f32 1.0, %v3218_v11  ;;  %vm3202_vm10 = vweird.f32 %v3196_v28  ;;  %v7064_v11 = vld [vmem:[%s14690_s3 + $0x450] sm:$0xff] }
 0x66b   :  { %7694 = vrcp.f32 %v11737_v37  ;;  %v3209_v10 = vor.u32 1.1754944e-38, %v3208_v56  ;;  %vm3207_vm12 = vcmp.eq.f32.partialorder %v3206_v34, 8.507059e+37  ;;  %v3047_v26 = vand.u32 2147483648, %v11737_v37  ;;  %v7055_v56 = vld [vmem:[%s14690_s3 + $0x408] sm:$0xff] }
 0x66c   :  { %v3220_v41 = vmul.f32 %v7689_v47, %v3219_v7  ;;  %7696 = vpow2.f32 %v6917_v18  ;;  %v3189_v1 = vpop.f32.mrf.mxu0  ;;  %vm3041_vm2 = vweird.f32 %v11737_v37 }
 0x66d   :  { %v3236_v5 = vadd.f32 %v7556_v17, %v3189_v1  ;;  %v3048_v7 = vor.u32 1.1754944e-38, %v3047_v26  ;;  %v7052_v17 = vld [vmem:[%s14690_s3 + $0x3f0] sm:$0xff]  ;;  %v7012_v26 = vld [vmem:[%s14693_s2 + $0x2b8] sm:$0xff] }
 0x66e   :  { %v3221_v9 = vadd.f32 %v7689_v47, %v3220_v41 }
 0x66f   :  { %v7693_v2 = vpop.eup %7692 }
 0x670   :  { %v3198_v3 = vmul.f32 %v7693_v2, %v3196_v28  ;;  %vm3203_vm9 = vweird.f32 %v7693_v2  ;;  %v3225_v16 = vsel %vm3224_vm15, %v7689_v47, %v3221_v9  ;;  %v7067_v47 = vld [vmem:[%s14690_s3 + $0x468] sm:$0xff] }
 0x671   :  { %vm3204_vm11 = vmor %vm3202_vm10, %vm3203_vm9  ;;  %v7695_v46 = vpop.eup %7694  ;;  %v3230_v45 = vsel %vm3227_vm0, %v3229_v42, %v3225_v16  ;;  %v7028_v42 = vld [vmem:[%s14690_s3 + $0x330] sm:$0xff] }
 0x672   :  { %v3199_v59 = vsub.f32 1.0, %v3198_v3  ;;  %v7697_v57 = vpop.eup %7696  ;;  %v3037_v54 = vmul.f32 %v7695_v46, %v11737_v37  ;;  %v3240_v32 = vsub.f32 1.0, %v3230_v45  ;;  %v3242_v58 = vmul.f32 %v3230_v45, %v10954_v22  ;;  %v7555_v3 = vld [vmem:[%s14692_s5 + $0x2] ss:$0 sm:$0xff] }
 0x673   :  { %v11752_v28 = vadd.f32 1.0, %v7697_v57  ;;  %vm3042_vm1 = vweird.f32 %v7695_v46  ;;  %v3045_v22 = vand.u32 2147483647, %v11737_v37  ;;  %v7058_v37 = vld [vmem:[%s14690_s3 + $0x420] sm:$0xff]  ;;  %v3075_v34 = vadd.f32 %v7555_v3, %v3028_v8  ;;  %v7014_v8 = vld [vmem:[%s14693_s2 + $0x2c8] sm:$0xff] }
 0x674   :  { %v3200_v39 = vmul.f32 %v7693_v2, %v3199_v59  ;;  %v3038_v51 = vsub.f32 1.0, %v3037_v54  ;;  %vm3043_vm3 = vmor %vm3041_vm2, %vm3042_vm1  ;;  %v7034_v57 = vld [vmem:[%s14690_s3 + $0x360] sm:$0xff]  ;;  %v7031_v54 = vld [vmem:[%s14690_s3 + $0x348] sm:$0xff] }
 0x675   :  { %vm3046_vm4 = vcmp.eq.f32.partialorder %v3045_v22, 8.507059e+37  ;;  %v3067_v9 = vand.u32 2147483648, %v11752_v28  ;;  %vm3061_vm6 = vweird.f32 %v11752_v28  ;;  %v7016_v22 = vld [vmem:[%s14693_s2 + $0x2d8] sm:$0xff]  ;;  %v7009_v3 = vld [vmem:[%s14693_s2 + $0x2a0] sm:$0xff] }
 0x676   :  { %v3201_v55 = vadd.f32 %v7693_v2, %v3200_v39  ;;  %v3039_v33 = vmul.f32 %v7695_v46, %v3038_v51  ;;  %v2859_v39 = vperm.slane %v11616_v25, 2  ;;  %v7046_v25 = vld [vmem:[%s14690_s3 + $0x3c0] sm:$0xff]  ;;  %v7025_v51 = vld [vmem:[%s14690_s3 + $0x318] sm:$0xff] }
 0x678   :  { %v3205_v48 = vsel %vm3204_vm11, %v7693_v2, %v3201_v55  ;;  %v3040_v12 = vadd.f32 %v7695_v46, %v3039_v33  ;;  %v7049_v55 = vld [vmem:[%s14690_s3 + $0x3d8] sm:$0xff]  ;;  %v3843_v33 = vld [vmem:[%s14690_s3 + $0x170] sm:$0xff] }
 0x679   :  { %v3210_v30 = vsel %vm3207_vm12, %v3209_v10, %v3205_v48  ;;  %v2921_v10 = vadd.f32 %v11618_v36, %v2859_v39  ;;  %v3065_v36 = vand.u32 2147483647, %v11752_v28  ;;  %v7000_v39 = vld [vmem:[%s14693_s2 + $0x258] sm:$0xff] }
 0x67a   :  { %v3237_v24 = vmul.f32 %v3236_v5, %v3210_v30  ;;  %v3044_v2 = vsel %vm3043_vm3, %v7695_v46, %v3040_v12  ;;  %v7043_v46 = vld [vmem:[%s14690_s3 + $0x3a8] sm:$0xff]  ;;  %v7040_v30 = vld [vmem:[%s14690_s3 + $0x390] sm:$0xff] }
 0x67b   :  { %v3049_v59 = vsel %vm3046_vm4, %v3048_v7, %v3044_v2  ;;  %vm3066_vm8 = vcmp.eq.f32.partialorder %v3065_v36, 8.507059e+37  ;;  %v7019_v12 = vld [vmem:[%s14693_s2 + $0x2f0] sm:$0xff]  ;;  %v3834_v2 = vld [vmem:[%s14690_s3 + $0x128] sm:$0xff] }
 0x67c   :  { %v3238_v21 = vadd.f32 %v3237_v24, %v214_v23  ;;  %v3076_v41 = vmul.f32 %v3075_v34, %v3049_v59  ;;  %v3068_v24 = vor.u32 1.1754944e-38, %v3067_v9  ;;  %3596 = vmatpush.msra.mxu0 %v7019_v12  ;;  %v3831_v7 = vld [vmem:[%s14690_s3 + $0x110] sm:$0xff]  ;;  %v3822_v34 = vld [vmem:[%s14690_s3 + $0xc8] sm:$0xff]  ;;  %v6989_v12 = vld [vmem:[%s14693_s2 + $0x200] sm:$0xff] }
 0x67d   :  { %v7003_v59 = vld [vmem:[%s14693_s2 + $0x270] sm:$0xff]  ;;  %v7010_v9 = vld [vmem:[%s14693_s2 + $0x2a8] sm:$0xff] }
 0x67e   :  { %7698 = vtanh.f32 %v3238_v21  ;;  %v3077_v48 = vadd.f32 %v3076_v41, %v2921_v10  ;;  %3597 = vmatpush.msra.mxu0 %v7016_v22  ;;  %v3816_v41 = vld [vmem:[%s14690_s3 + $0x98] sm:$0xff]  ;;  %v3807_v10 = vld [vmem:[%s14690_s3 + $0x50] sm:$0xff]  ;;  %v6986_v22 = vld [vmem:[%s14693_s2 + $0x1e8] sm:$0xff] }
 0x67f   :  { %7700 = vrcp.f32 %v11752_v28  ;;  %v7011_v36 = vld [vmem:[%s14693_s2 + $0x2b0] sm:$0xff] }
 0x680   :  { %7702 = vtanh.f32 %v3077_v48  ;;  %v3801_v48 = vld [vmem:[%s14690_s3 + $0x20] sm:$0xff] }
 0x684   :  { %v7699_v53 = vpop.eup %7698 }
 0x685   :  { %v3241_v29 = vmul.f32 %v7699_v53, %v3240_v32  ;;  %v7701_v62 = vpop.eup %7700  ;;  %v7022_v32 = vld [vmem:[%s14690_s3 + $0x300] sm:$0xff] }
 0x686   :  { %v3057_v4 = vmul.f32 %v7701_v62, %v11752_v28  ;;  %vm3062_vm5 = vweird.f32 %v7701_v62  ;;  %v7703_v21 = vpop.eup %7702 }
 0x687   :  { %v11756_v44 = vadd.f32 %v3242_v58, %v3241_v29  ;;  %vm3063_vm7 = vmor %vm3061_vm6, %vm3062_vm5  ;;  %v3840_v29 = vld [vmem:[%s14690_s3 + $0x158] sm:$0xff]  ;;  %v7018_v58 = vld [vmem:[%s14693_s2 + $0x2e8] sm:$0xff] }
 0x688   :  { %v3058_v18 = vsub.f32 1.0, %v3057_v4  ;;  %3576 = vmatpush.msra.mxu3 %v7018_v58  ;;  %v7017_v4 = vld [vmem:[%s14693_s2 + $0x2e0] sm:$0xff]  ;;  %v6992_v58 = vld [vmem:[%s14693_s2 + $0x218] sm:$0xff] }
 0x689   :  { %3316 = vmatmul.f32.vlgmr.msrb.gmra.mxu1 %v11756_v44  ;;  %3336 = vmatmul.f32.vlgmr.msra.gmra.mxu2 %v11756_v44 }
 0x68a   :  { %3356 = vmatmul.f32.vlgmr.msrb.gmra.mxu3 %v11756_v44  ;;  %3684 = vmatpush.msra.mxu2 %v7067_v47  ;;  %v3059_v1 = vmul.f32 %v7701_v62, %v3058_v18  ;;  %v7015_v47 = vld [vmem:[%s14693_s2 + $0x2d0] sm:$0xff]  ;;  %v3828_v18 = vld [vmem:[%s14690_s3 + $0xf8] sm:$0xff] }
 0x68b   :  { %3577 = vmatpush.msra.mxu3 %v7015_v47  ;;  %v6993_v47 = vld [vmem:[%s14693_s2 + $0x220] sm:$0xff] }
 0x68c   :  { %3685 = vmatpush.msra.mxu2 %v7064_v11  ;;  %v3060_v5 = vadd.f32 %v7701_v62, %v3059_v1  ;;  %v7020_v11 = vld [vmem:[%s14693_s2 + $0x2f8] sm:$0xff]  ;;  %v3813_v1 = vld [vmem:[%s14690_s3 + $0x80] sm:$0xff] }
 0x68d   :  { %3616 = vmatpush.msrb.mxu1 %v7020_v11  ;;  %3578 = vmatpush.msra.mxu3 %v7012_v26  ;;  %v6990_v26 = vld [vmem:[%s14693_s2 + $0x208] sm:$0xff]  ;;  %v6973_v11 = vld [vmem:[%s14693_s2 + $0x180] sm:$0xff] }
 0x68e   :  { %3686 = vmatpush.msra.mxu2 %v7061_v35  ;;  %v3064_v23 = vsel %vm3063_vm7, %v7701_v62, %v3060_v5  ;;  %v3837_v62 = vld [vmem:[%s14690_s3 + $0x140] sm:$0xff]  ;;  %v3798_v5 = vld [vmem:[%s14690_s3 + $0x8] sm:$0xff] }
 0x68f   :  { %v3069_v50 = vsel %vm3066_vm8, %v3068_v24, %v3064_v23  ;;  %v7013_v35 = vld [vmem:[%s14693_s2 + $0x2c0] sm:$0xff]  ;;  %3617 = vmatpush.msrb.mxu1 %v7017_v4  ;;  %3579 = vmatpush.msra.mxu3 %v7009_v3  ;;  %v7007_v23 = vld [vmem:[%s14693_s2 + $0x290] sm:$0xff]  ;;  %v6984_v3 = vld [vmem:[%s14693_s2 + $0x1d8] sm:$0xff] }
 0x690   :  { %3687 = vmatpush.msra.mxu2 %v7058_v37  ;;  %v3079_v16 = vsub.f32 1.0, %v3069_v50  ;;  %v3081_v45 = vmul.f32 %v3069_v50, %v11022_v38  ;;  %v7006_v37 = vld [vmem:[%s14693_s2 + $0x288] sm:$0xff]  ;;  %3598 = vmatpush.msra.mxu0 %v7013_v35  ;;  %v6991_v24 = vld [vmem:[%s14693_s2 + $0x210] sm:$0xff]  ;;  %v7005_v50 = vld [vmem:[%s14693_s2 + $0x280] sm:$0xff] }
 0x691   :  { %3444 = vmatmul.f32.vlgmr.msra.gmra.mxu1 %v11374_v19  ;;  %3464 = vmatmul.f32.vlgmr.msrb.gmra.mxu2 %v11374_v19  ;;  %v6987_v4 = vld [vmem:[%s14693_s2 + $0x1f0] sm:$0xff] }
 0x692   :  { %3688 = vmatpush.msra.mxu2 %v7055_v56  ;;  %v3080_v28 = vmul.f32 %v7703_v21, %v3079_v16  ;;  %3618 = vmatpush.msrb.mxu1 %v7014_v8  ;;  %v3825_v56 = vld [vmem:[%s14690_s3 + $0xe0] sm:$0xff]  ;;  %v7002_v16 = vld [vmem:[%s14693_s2 + $0x268] sm:$0xff]  ;;  %v7068_v35 = vld [vmem:[%s14690_s3 + $0x470] sm:$0xff] }
 0x693   :  { %3580 = vmatpush.msra.mxu3 %v7006_v37  ;;  %3599 = vmatpush.msra.mxu0 %v7010_v9  ;;  %v7001_v21 = vld [vmem:[%s14693_s2 + $0x260] sm:$0xff]  ;;  %v7065_v8 = vld [vmem:[%s14690_s3 + $0x458] sm:$0xff] }
 0x694   :  { %3689 = vmatpush.msra.mxu2 %v7052_v17  ;;  %v11824_v53 = vadd.f32 %v3081_v45, %v3080_v28  ;;  %v3819_v17 = vld [vmem:[%s14690_s3 + $0xb0] sm:$0xff]  ;;  %3619 = vmatpush.msrb.mxu1 %v7011_v36  ;;  %v6998_v28 = vld [vmem:[%s14693_s2 + $0x248] sm:$0xff]  ;;  %v6981_v37 = vld [vmem:[%s14693_s2 + $0x1c0] sm:$0xff] }
 0x695   :  { %3581 = vmatpush.msra.mxu3 %v7003_v59  ;;  %3600 = vmatpush.msra.mxu0 %v7007_v23  ;;  %v6982_v45 = vld [vmem:[%s14693_s2 + $0x1c8] sm:$0xff]  ;;  %v6977_v59 = vld [vmem:[%s14693_s2 + $0x1a0] sm:$0xff] }
 0x696   :  { %3690 = vmatpush.msra.mxu2 %v7049_v55  ;;  %v3810_v55 = vld [vmem:[%s14690_s3 + $0x68] sm:$0xff]  ;;  %v7050_v9 = vld [vmem:[%s14690_s3 + $0x3e0] sm:$0xff] }
 0x697   :  { %3582 = vmatpush.msra.mxu3 %v7000_v39  ;;  %v7059_v39 = vld [vmem:[%s14690_s3 + $0x428] sm:$0xff] }
 0x698   :  { %3691 = vmatpush.msra.mxu2 %v7046_v25  ;;  %v3804_v25 = vld [vmem:[%s14690_s3 + $0x38] sm:$0xff]  ;;  %v7063_v36 = vld [vmem:[%s14690_s3 + $0x448] sm:$0xff] }
 0x69a   :  { %3692 = vmatpush.msra.mxu2 %v7043_v46  ;;  %v6997_v46 = vld [vmem:[%s14693_s2 + $0x240] sm:$0xff] }
 0x69b   :  { %3583 = vmatpush.msra.mxu3 %v6997_v46 }
 0x69c   :  { %3693 = vmatpush.msra.mxu2 %v7040_v30  ;;  %v6994_v30 = vld [vmem:[%s14693_s2 + $0x228] sm:$0xff] }
 0x69d   :  { %3584 = vmatpush.msra.mxu3 %v6994_v30  ;;  %v3836_v30 = vld [vmem:[%s14690_s3 + $0x138] sm:$0xff] }
 0x69e   :  { %3694 = vmatpush.msra.mxu2 %v7037_v49  ;;  %v7008_v49 = vld [vmem:[%s14693_s2 + $0x298] sm:$0xff] }
 0x69f   :  { %3620 = vmatpush.msrb.mxu1 %v7008_v49  ;;  %3585 = vmatpush.msra.mxu3 %v6991_v24  ;;  %v7047_v49 = vld [vmem:[%s14690_s3 + $0x3c8] sm:$0xff]  ;;  %v7060_v24 = vld [vmem:[%s14690_s3 + $0x430] sm:$0xff] }
 0x6a0   :  { %3695 = vmatpush.msra.mxu2 %v7034_v57  ;;  %v7004_v57 = vld [vmem:[%s14693_s2 + $0x278] sm:$0xff] }
 0x6a1   :  { %3601 = vmatpush.msra.mxu0 %v7004_v57  ;;  %3621 = vmatpush.msrb.mxu1 %v7005_v50  ;;  %v3833_v57 = vld [vmem:[%s14690_s3 + $0x120] sm:$0xff] }
 0x6a2   :  { %3696 = vmatpush.msra.mxu2 %v7031_v54  ;;  %v6988_v54 = vld [vmem:[%s14693_s2 + $0x1f8] sm:$0xff] }
 0x6a3   :  { %3586 = vmatpush.msra.mxu3 %v6988_v54  ;;  %3602 = vmatpush.msra.mxu0 %v7001_v21  ;;  %v3425_v54 = vpop.f32.mrf.mxu0  ;;  %v7044_v21 = vld [vmem:[%s14690_s3 + $0x3b0] sm:$0xff] }
 0x6a4   :  { %3697 = vmatpush.msra.mxu2 %v7028_v42  ;;  %3622 = vmatpush.msrb.mxu1 %v7002_v16  ;;  %v6985_v42 = vld [vmem:[%s14693_s2 + $0x1e0] sm:$0xff]  ;;  %v7057_v16 = vld [vmem:[%s14690_s3 + $0x418] sm:$0xff] }
 0x6a5   :  { %3587 = vmatpush.msra.mxu3 %v6985_v42  ;;  %3603 = vmatpush.msra.mxu0 %v6998_v28  ;;  %v3830_v42 = vld [vmem:[%s14690_s3 + $0x108] sm:$0xff] }
 0x6a6   :  { %3698 = vmatpush.msra.mxu2 %v7025_v51  ;;  %v6999_v51 = vld [vmem:[%s14693_s2 + $0x250] sm:$0xff] }
 0x6a7   :  { %3623 = vmatpush.msrb.mxu1 %v6999_v51  ;;  %3588 = vmatpush.msra.mxu3 %v6982_v45  ;;  %v7041_v45 = vld [vmem:[%s14690_s3 + $0x398] sm:$0xff] }
 0x6a8   :  { %3699 = vmatpush.msra.mxu2 %v7022_v32  ;;  %v6995_v32 = vld [vmem:[%s14693_s2 + $0x230] sm:$0xff] }
 0x6a9   :  { %3700 = vmatmul.f32.vlgmr.msra.gmra.mxu2 %v11824_v53  ;;  %3604 = vmatpush.msra.mxu0 %v6995_v32  ;;  %v7054_v32 = vld [vmem:[%s14690_s3 + $0x400] sm:$0xff] }
 0x6aa   :  { %3865 = vmatpush.msrb.mxu2 %v3843_v33  ;;  %v6996_v33 = vld [vmem:[%s14693_s2 + $0x238] sm:$0xff] }
 0x6ab   :  { %3624 = vmatpush.msrb.mxu1 %v6996_v33  ;;  %3605 = vmatpush.msra.mxu0 %v6992_v58  ;;  %v3827_v33 = vld [vmem:[%s14690_s3 + $0xf0] sm:$0xff] }
 0x6ac   :  { %3866 = vmatpush.msrb.mxu2 %v3840_v29  ;;  %v6979_v29 = vld [vmem:[%s14693_s2 + $0x1b0] sm:$0xff] }
 0x6ad   :  { %3589 = vmatpush.msra.mxu3 %v6979_v29  ;;  %3625 = vmatpush.msrb.mxu1 %v6993_v47  ;;  %v7038_v47 = vld [vmem:[%s14690_s3 + $0x380] sm:$0xff] }
 0x6ae   :  { %3867 = vmatpush.msrb.mxu2 %v3837_v62  ;;  %v6976_v62 = vld [vmem:[%s14693_s2 + $0x198] sm:$0xff]  ;;  %3606 = vmatpush.msra.mxu0 %v6989_v12 }
 0x6af   :  { %3590 = vmatpush.msra.mxu3 %v6976_v62  ;;  %3626 = vmatpush.msrb.mxu1 %v6990_v26  ;;  %v7051_v62 = vld [vmem:[%s14690_s3 + $0x3e8] sm:$0xff]  ;;  %v3824_v12 = vld [vmem:[%s14690_s3 + $0xd8] sm:$0xff] }
 0x6b0   :  { %3868 = vmatpush.msrb.mxu2 %v3834_v2  ;;  %3607 = vmatpush.msra.mxu0 %v6986_v22  ;;  %v6983_v2 = vld [vmem:[%s14693_s2 + $0x1d0] sm:$0xff]  ;;  %v7035_v22 = vld [vmem:[%s14690_s3 + $0x368] sm:$0xff] }
 0x6b1   :  { %3591 = vmatpush.msra.mxu3 %v6973_v11  ;;  %3627 = vmatpush.msrb.mxu1 %v6987_v4  ;;  %v7048_v4 = vld [vmem:[%s14690_s3 + $0x3d0] sm:$0xff] }
 0x6b2   :  { %3869 = vmatpush.msrb.mxu2 %v3831_v7  ;;  %3608 = vmatpush.msra.mxu0 %v6983_v2  ;;  %v6980_v7 = vld [vmem:[%s14693_s2 + $0x1b8] sm:$0xff] }
 0x6b3   :  { %3704 = vmatpush.msrb.mxu3 %v7068_v35  ;;  %3628 = vmatpush.msrb.mxu1 %v6984_v3  ;;  %v3821_v35 = vld [vmem:[%s14690_s3 + $0xc0] sm:$0xff]  ;;  %v7032_v3 = vld [vmem:[%s14690_s3 + $0x350] sm:$0xff] }
 0x6b4   :  { %3870 = vmatpush.msrb.mxu2 %v3828_v18  ;;  %3609 = vmatpush.msra.mxu0 %v6980_v7  ;;  %v7062_v18 = vld [vmem:[%s14690_s3 + $0x440] sm:$0xff]  ;;  %v3818_v7 = vld [vmem:[%s14690_s3 + $0xa8] sm:$0xff] }
 0x6b5   :  { %3705 = vmatpush.msrb.mxu3 %v7065_v8  ;;  %3629 = vmatpush.msrb.mxu1 %v6981_v37  ;;  %v7045_v8 = vld [vmem:[%s14690_s3 + $0x3b8] sm:$0xff] }
 0x6b6   :  { %3871 = vmatpush.msrb.mxu2 %v3825_v56  ;;  %v6978_v56 = vld [vmem:[%s14693_s2 + $0x1a8] sm:$0xff]  ;;  %3610 = vmatpush.msra.mxu0 %v6977_v59  ;;  %v7042_v59 = vld [vmem:[%s14690_s3 + $0x3a0] sm:$0xff] }
 0x6b7   :  { %3706 = vmatpush.msrb.mxu3 %v7062_v18  ;;  %3630 = vmatpush.msrb.mxu1 %v6978_v56  ;;  %v7029_v18 = vld [vmem:[%s14690_s3 + $0x338] sm:$0xff]  ;;  %v3815_v56 = vld [vmem:[%s14690_s3 + $0x90] sm:$0xff] }
 0x6b8   :  { %3872 = vmatpush.msrb.mxu2 %v3822_v34  ;;  %v12029_v34 = vld [vmem:[%s14694_s4 + $0x3] sm:$0x7] }
 0x6b9   :  { %3707 = vmatpush.msrb.mxu3 %v7059_v39  ;;  %v3294_v46 = vperm.slane %v12029_v34, 0  ;;  %v3295_v51 = vperm.slane %v12029_v34, 1 }
 0x6ba   :  { %3873 = vmatpush.msrb.mxu2 %v3819_v17  ;;  %v6974_v17 = vld [vmem:[%s14693_s2 + $0x188] sm:$0xff] }
 0x6bb   :  { %3611 = vmatpush.msra.mxu0 %v6974_v17 }
 0x6bc   :  { %3874 = vmatpush.msrb.mxu2 %v3816_v41  ;;  %v6975_v41 = vld [vmem:[%s14693_s2 + $0x190] sm:$0xff] }
 0x6bd   :  { %3631 = vmatpush.msrb.mxu1 %v6975_v41  ;;  %v7026_v41 = vld [vmem:[%s14690_s3 + $0x320] sm:$0xff] }
 0x6be   :  { %3875 = vmatpush.msrb.mxu2 %v3813_v1  ;;  %v7056_v1 = vld [vmem:[%s14690_s3 + $0x410] sm:$0xff] }
 0x6bf   :  { %3708 = vmatpush.msrb.mxu3 %v7056_v1  ;;  %v7039_v1 = vld [vmem:[%s14690_s3 + $0x388] sm:$0xff] }
 0x6c0   :  { %3876 = vmatpush.msrb.mxu2 %v3810_v55  ;;  %v7069_v55 = vld [vmem:[%s14690_s3 + $0x478] sm:$0xff] }
 0x6c1   :  { %3724 = vmatpush.msrb.mxu0 %v7069_v55  ;;  %v3812_v55 = vld [vmem:[%s14690_s3 + $0x78] sm:$0xff] }
 0x6c2   :  { %3877 = vmatpush.msrb.mxu2 %v3807_v10  ;;  %v3842_v10 = vld [vmem:[%s14690_s3 + $0x168] sm:$0xff] }
 0x6c3   :  { %3845 = vmatpush.msra.mxu1 %v3842_v10  ;;  %v7023_v10 = vld [vmem:[%s14690_s3 + $0x308] sm:$0xff] }
 0x6c4   :  { %3878 = vmatpush.msrb.mxu2 %v3804_v25  ;;  %v7053_v25 = vld [vmem:[%s14690_s3 + $0x3f8] sm:$0xff] }
 0x6c5   :  { %3709 = vmatpush.msrb.mxu3 %v7053_v25  ;;  %v7036_v25 = vld [vmem:[%s14690_s3 + $0x370] sm:$0xff] }
 0x6c6   :  { %3879 = vmatpush.msrb.mxu2 %v3801_v48  ;;  %v7066_v48 = vld [vmem:[%s14690_s3 + $0x460] sm:$0xff] }
 0x6c7   :  { %3725 = vmatpush.msrb.mxu0 %v7066_v48  ;;  %3710 = vmatpush.msrb.mxu3 %v7050_v9  ;;  %v3809_v48 = vld [vmem:[%s14690_s3 + $0x60] sm:$0xff] }
 0x6c8   :  { %3880 = vmatpush.msrb.mxu2 %v3798_v5  ;;  %v3839_v5 = vld [vmem:[%s14690_s3 + $0x150] sm:$0xff] }
 0x6c9   :  { %3881 = vmatmul.f32.vlgmr.msrb.gmra.mxu2 %v11756_v44  ;;  %3846 = vmatpush.msra.mxu1 %v3839_v5  ;;  %v7033_v5 = vld [vmem:[%s14690_s3 + $0x358] sm:$0xff] }
 0x6ca   :  { %3726 = vmatpush.msrb.mxu0 %v7063_v36  ;;  %3711 = vmatpush.msrb.mxu3 %v7047_v49  ;;  %v7030_v36 = vld [vmem:[%s14690_s3 + $0x340] sm:$0xff]  ;;  %v7027_v49 = vld [vmem:[%s14690_s3 + $0x328] sm:$0xff] }
 0x6cb   :  { %3847 = vmatpush.msra.mxu1 %v3836_v30  ;;  %v3803_v30 = vld [vmem:[%s14690_s3 + $0x30] sm:$0xff] }
 0x6cc   :  { %3727 = vmatpush.msrb.mxu0 %v7060_v24  ;;  %3712 = vmatpush.msrb.mxu3 %v7044_v21  ;;  %v3800_v24 = vld [vmem:[%s14690_s3 + $0x18] sm:$0xff]  ;;  %v3797_v21 = vld [vmem:[%s14690_s3] sm:$0xff] }
 0x6cd   :  { %3848 = vmatpush.msra.mxu1 %v3833_v57 }
 0x6ce   :  { %3728 = vmatpush.msrb.mxu0 %v7057_v16  ;;  %3713 = vmatpush.msrb.mxu3 %v7041_v45  ;;  %v7557_v45 = vld [vmem:[%s14692_s5 + $0x1] ss:$0 sm:$0xff] }
 0x6cf   :  { %3849 = vmatpush.msra.mxu1 %v3830_v42 }
 0x6d0   :  { %3729 = vmatpush.msrb.mxu0 %v7054_v32  ;;  %3714 = vmatpush.msrb.mxu3 %v7038_v47 }
 0x6d1   :  { %3850 = vmatpush.msra.mxu1 %v3827_v33  ;;  %v3296_v33 = vperm.slane %v12029_v34, 2 }
 0x6d2   :  { %3730 = vmatpush.msrb.mxu0 %v7051_v62  ;;  %3715 = vmatpush.msrb.mxu3 %v7035_v22 }
 0x6d3   :  { %3851 = vmatpush.msra.mxu1 %v3824_v12 }
 0x6d4   :  { %3731 = vmatpush.msrb.mxu0 %v7048_v4  ;;  %3716 = vmatpush.msrb.mxu3 %v7032_v3 }
 0x6d5   :  { %3852 = vmatpush.msra.mxu1 %v3821_v35 }
 0x6d6   :  { %3732 = vmatpush.msrb.mxu0 %v7045_v8  ;;  %3717 = vmatpush.msrb.mxu3 %v7029_v18 }
 0x6d7   :  { %3853 = vmatpush.msra.mxu1 %v3818_v7 }
 0x6d8   :  { %3733 = vmatpush.msrb.mxu0 %v7042_v59  ;;  %3718 = vmatpush.msrb.mxu3 %v7026_v41 }
 0x6d9   :  { %3854 = vmatpush.msra.mxu1 %v3815_v56 }
 0x6da   :  { %3734 = vmatpush.msrb.mxu0 %v7039_v1  ;;  %3719 = vmatpush.msrb.mxu3 %v7023_v10  ;;  %v3844_v10 = vld [vmem:[%s14690_s3 + $0x178] sm:$0xff] }
 0x6db   :  { %3855 = vmatpush.msra.mxu1 %v3812_v55 }
 0x6dc   :  { %3735 = vmatpush.msrb.mxu0 %v7036_v25  ;;  %v3841_v25 = vld [vmem:[%s14690_s3 + $0x160] sm:$0xff] }
 0x6dd   :  { %3856 = vmatpush.msra.mxu1 %v3809_v48  ;;  %v3835_v48 = vld [vmem:[%s14690_s3 + $0x130] sm:$0xff] }
 0x6de   :  { %3736 = vmatpush.msrb.mxu0 %v7033_v5  ;;  %v3832_v5 = vld [vmem:[%s14690_s3 + $0x118] sm:$0xff] }
 0x6e0   :  { %3737 = vmatpush.msrb.mxu0 %v7030_v36  ;;  %v3823_v36 = vld [vmem:[%s14690_s3 + $0xd0] sm:$0xff] }
 0x6e2   :  { %3738 = vmatpush.msrb.mxu0 %v7027_v49  ;;  %v3814_v49 = vld [vmem:[%s14690_s3 + $0x88] sm:$0xff] }
 0x706   :  { %v3317_v23 = vpop.f32.mrf.mxu1 }
 0x707   :  { %v3318_v50 = vadd.f32 %v3317_v23, %v3294_v46  ;;  %v3806_v46 = vld [vmem:[%s14690_s3 + $0x48] sm:$0xff] }
 0x708   :  { %3857 = vmatpush.msra.mxu1 %v3806_v46  ;;  %v3829_v46 = vld [vmem:[%s14690_s3 + $0x100] sm:$0xff] }
 0x709   :  { %v3468_v28 = vadd.f32 %v3425_v54, %v3318_v50  ;;  %v7024_v54 = vld [vmem:[%s14690_s3 + $0x310] sm:$0xff] }
 0x70a   :  { %3858 = vmatpush.msra.mxu1 %v3803_v30  ;;  %3739 = vmatpush.msrb.mxu0 %v7024_v54  ;;  %v3820_v30 = vld [vmem:[%s14690_s3 + $0xb8] sm:$0xff]  ;;  %v3802_v54 = vld [vmem:[%s14690_s3 + $0x28] sm:$0xff] }
 0x70b   :  { %v6970_v29 = vmul.f32 -1.442695, %v3468_v28 }
 0x70c   :  { %v3337_v58 = vpop.f32.mrf.mxu2  ;;  %3859 = vmatpush.msra.mxu1 %v3800_v24  ;;  %v3811_v24 = vld [vmem:[%s14690_s3 + $0x70] sm:$0xff] }
 0x70d   :  { %7704 = vpow2.f32 %v6970_v29  ;;  %v3338_v26 = vadd.f32 %v3337_v58, %v3295_v51  ;;  %v3357_v58 = vpop.f32.mrf.mxu3 }
 0x70e   :  { %v3445_v11 = vpop.f32.mrf.mxu1  ;;  %3860 = vmatpush.msra.mxu1 %v3797_v21  ;;  %v3358_v4 = vadd.f32 %v3357_v58, %v3296_v33  ;;  %v3799_v21 = vld [vmem:[%s14690_s3 + $0x10] sm:$0xff]  ;;  %v7112_v33 = vld [vmem:[%s14690_s3 + $0x2a0] sm:$0xff]  ;;  %v7109_v58 = vld [vmem:[%s14690_s3 + $0x288] sm:$0xff] }
 0x70f   :  { %v3488_v2 = vadd.f32 %v3445_v11, %v3338_v26 }
 0x711   :  { %v6971_v37 = vmul.f32 -1.442695, %v3488_v2 }
 0x713   :  { %v7705_v39 = vpop.eup %7704  ;;  %7706 = vpow2.f32 %v6971_v37 }
 0x714   :  { %v3472_v17 = vadd.f32 1.0, %v7705_v39  ;;  %v3465_v29 = vpop.f32.mrf.mxu2 }
 0x715   :  { %v3512_v22 = vadd.f32 %v7557_v45, %v3465_v29  ;;  %v7115_v45 = vld [vmem:[%s14690_s3 + $0x2b8] sm:$0xff]  ;;  %v3994_v29 = vld [vmem:[%s14693_s2 + $0x128] sm:$0xff] }
 0x716   :  { %7708 = vrcp.f32 %v3472_v17  ;;  %v3484_v42 = vand.u32 2147483648, %v3472_v17  ;;  %v3482_v51 = vand.u32 2147483647, %v3472_v17  ;;  %vm3478_vm10 = vweird.f32 %v3472_v17 }
 0x718   :  { %v3485_v12 = vor.u32 1.1754944e-38, %v3484_v42  ;;  %vm3483_vm12 = vcmp.eq.f32.partialorder %v3482_v51, 8.507059e+37  ;;  %v7118_v42 = vld [vmem:[%s14690_s3 + $0x2d0] sm:$0xff]  ;;  %v4000_v51 = vld [vmem:[%s14693_s2 + $0x158] sm:$0xff] }
 0x719   :  { %v7707_v9 = vpop.eup %7706 }
 0x71a   :  { %v3492_v23 = vadd.f32 1.0, %v7707_v9  ;;  %v3826_v9 = vld [vmem:[%s14690_s3 + $0xe8] sm:$0xff] }
 0x71c   :  { %v7709_v57 = vpop.eup %7708  ;;  %7710 = vrcp.f32 %v3492_v23  ;;  %v3504_v3 = vand.u32 2147483648, %v3492_v23  ;;  %v3502_v7 = vand.u32 2147483647, %v3492_v23  ;;  %vm3498_vm14 = vweird.f32 %v3492_v23 }
 0x71d   :  { %v3474_v50 = vmul.f32 %v7709_v57, %v3472_v17  ;;  %vm3479_vm9 = vweird.f32 %v7709_v57 }
 0x71e   :  { %vm3480_vm11 = vmor %vm3478_vm10, %vm3479_vm9  ;;  %v3505_v18 = vor.u32 1.1754944e-38, %v3504_v3  ;;  %vm3503_vm0 = vcmp.eq.f32.partialorder %v3502_v7, 8.507059e+37  ;;  %v7079_v3 = vld [vmem:[%s14690_s3 + $0x198] sm:$0xff]  ;;  %v4002_v7 = vld [vmem:[%s14693_s2 + $0x168] sm:$0xff] }
 0x71f   :  { %v3475_v16 = vsub.f32 1.0, %v3474_v50  ;;  %v3805_v50 = vld [vmem:[%s14690_s3 + $0x40] sm:$0xff] }
 0x721   :  { %v3476_v28 = vmul.f32 %v7709_v57, %v3475_v16  ;;  %v7121_v16 = vld [vmem:[%s14690_s3 + $0x2e8] sm:$0xff] }
 0x722   :  { %v7711_v32 = vpop.eup %7710 }
 0x723   :  { %v3494_v47 = vmul.f32 %v7711_v32, %v3492_v23  ;;  %v3477_v62 = vadd.f32 %v7709_v57, %v3476_v28  ;;  %vm3499_vm13 = vweird.f32 %v7711_v32  ;;  %v3817_v23 = vld [vmem:[%s14690_s3 + $0xa0] sm:$0xff]  ;;  %v4003_v28 = vld [vmem:[%s14693_s2 + $0x170] sm:$0xff] }
 0x724   :  { %vm3500_vm15 = vmor %vm3498_vm14, %vm3499_vm13 }
 0x725   :  { %v3495_v26 = vsub.f32 1.0, %v3494_v47  ;;  %v3481_v11 = vsel %vm3480_vm11, %v7709_v57, %v3477_v62  ;;  %v3808_v57 = vld [vmem:[%s14690_s3 + $0x58] sm:$0xff]  ;;  %v7106_v47 = vld [vmem:[%s14690_s3 + $0x270] sm:$0xff] }
 0x726   :  { %v3486_v35 = vsel %vm3483_vm12, %v3485_v12, %v3481_v11  ;;  %v7103_v62 = vld [vmem:[%s14690_s3 + $0x258] sm:$0xff]  ;;  %v7100_v12 = vld [vmem:[%s14690_s3 + $0x240] sm:$0xff]  ;;  %v7094_v11 = vld [vmem:[%s14690_s3 + $0x210] sm:$0xff] }
 0x727   :  { %v3496_v2 = vmul.f32 %v7711_v32, %v3495_v26  ;;  %v3513_v8 = vmul.f32 %v3512_v22, %v3486_v35  ;;  %v7097_v26 = vld [vmem:[%s14690_s3 + $0x228] sm:$0xff]  ;;  %v7091_v22 = vld [vmem:[%s14690_s3 + $0x1f8] sm:$0xff] }
 0x728   :  { %v7085_v35 = vld [vmem:[%s14690_s3 + $0x1c8] sm:$0xff] }
 0x729   :  { %v3497_v37 = vadd.f32 %v7711_v32, %v3496_v2  ;;  %v3514_v34 = vadd.f32 %v3513_v8, %v3358_v4  ;;  %v7088_v4 = vld [vmem:[%s14690_s3 + $0x1e0] sm:$0xff]  ;;  %v7082_v2 = vld [vmem:[%s14690_s3 + $0x1b0] sm:$0xff] }
 0x72a   :  { %v7076_v8 = vld [vmem:[%s14690_s3 + $0x180] sm:$0xff] }
 0x72b   :  { %v3501_v59 = vsel %vm3500_vm15, %v7711_v32, %v3497_v37  ;;  %7712 = vtanh.f32 %v3514_v34  ;;  %v3997_v32 = vld [vmem:[%s14693_s2 + $0x140] sm:$0xff]  ;;  %v3991_v37 = vld [vmem:[%s14693_s2 + $0x110] sm:$0xff] }
 0x72c   :  { %v3506_v56 = vsel %vm3503_vm0, %v3505_v18, %v3501_v59  ;;  %v3999_v34 = vld [vmem:[%s14693_s2 + $0x150] sm:$0xff]  ;;  %v3988_v18 = vld [vmem:[%s14693_s2 + $0xf8] sm:$0xff] }
 0x72d   :  { %v3516_v39 = vsub.f32 1.0, %v3506_v56  ;;  %v3518_v1 = vmul.f32 %v3506_v56, %v11374_v19  ;;  %v3838_v19 = vld [vmem:[%s14690_s3 + $0x148] sm:$0xff]  ;;  %v3996_v59 = vld [vmem:[%s14693_s2 + $0x138] sm:$0xff]  ;;  %v3985_v56 = vld [vmem:[%s14693_s2 + $0xe0] sm:$0xff] }
 0x731   :  { %v7713_v17 = vpop.eup %7712 }
 0x732   :  { %v3517_v41 = vmul.f32 %v7713_v17, %v3516_v39  ;;  %v3993_v39 = vld [vmem:[%s14693_s2 + $0x120] sm:$0xff]  ;;  %v3982_v17 = vld [vmem:[%s14693_s2 + $0xc8] sm:$0xff] }
 0x734   :  { %v12176_v55 = vadd.f32 %v3518_v1, %v3517_v41  ;;  %v3990_v41 = vld [vmem:[%s14693_s2 + $0x108] sm:$0xff]  ;;  %v3979_v1 = vld [vmem:[%s14693_s2 + $0xb0] sm:$0xff] }
 0x736   :  { %3592 = vmatmul.f32.vlgmr.msra.gmra.mxu3 %v12176_v55  ;;  %3612 = vmatmul.f32.vlgmr.msra.gmra.mxu0 %v12176_v55 }
 0x737   :  { %3632 = vmatmul.f32.vlgmr.msrb.gmra.mxu1 %v12176_v55  ;;  %3885 = vmatpush.msra.mxu3 %v3844_v10  ;;  %v3987_v10 = vld [vmem:[%s14693_s2 + $0xf0] sm:$0xff] }
 0x738   :  { %4033 = vmatpush.msrb.mxu1 %v4003_v28  ;;  %4013 = vmatpush.msra.mxu0 %v4002_v7  ;;  %v7108_v7 = vld [vmem:[%s14690_s3 + $0x280] sm:$0xff] }
 0x739   :  { %3886 = vmatpush.msra.mxu3 %v3841_v25  ;;  %v3976_v25 = vld [vmem:[%s14693_s2 + $0x98] sm:$0xff] }
 0x73a   :  { %4034 = vmatpush.msrb.mxu1 %v4000_v51  ;;  %4014 = vmatpush.msra.mxu0 %v3999_v34  ;;  %v4001_v51 = vld [vmem:[%s14693_s2 + $0x160] sm:$0xff] }
 0x73b   :  { %3887 = vmatpush.msra.mxu3 %v3838_v19  ;;  %v3984_v19 = vld [vmem:[%s14693_s2 + $0xd8] sm:$0xff] }
 0x73c   :  { %4035 = vmatpush.msrb.mxu1 %v3997_v32  ;;  %4015 = vmatpush.msra.mxu0 %v3996_v59  ;;  %v176_v32 = vadd.f32 %v8403_v31, %v8483_v13  ;;  %v3960_v31 = vld [vmem:[%s14693_s2 + $0x18] sm:$0xff]  ;;  %v7116_v59 = vld [vmem:[%s14690_s3 + $0x2c0] sm:$0xff] }
 0x73d   :  { %3888 = vmatpush.msra.mxu3 %v3835_v48  ;;  %v3973_v48 = vld [vmem:[%s14693_s2 + $0x80] sm:$0xff] }
 0x73e   :  { %3720 = vmatmul.f32.vlgmr.msrb.gmra.mxu3 %v11824_v53  ;;  %3740 = vmatmul.f32.vlgmr.msrb.gmra.mxu0 %v11824_v53 }
 0x73f   :  { %3861 = vmatmul.f32.vlgmr.msra.gmra.mxu1 %v11756_v44  ;;  %3889 = vmatpush.msra.mxu3 %v3832_v5  ;;  %v3981_v5 = vld [vmem:[%s14693_s2 + $0xc0] sm:$0xff] }
 0x740   :  { %4036 = vmatpush.msrb.mxu1 %v3994_v29  ;;  %4016 = vmatpush.msra.mxu0 %v3993_v39  ;;  %v3998_v29 = vld [vmem:[%s14693_s2 + $0x148] sm:$0xff] }
 0x741   :  { %3890 = vmatpush.msra.mxu3 %v3829_v46  ;;  %v3970_v46 = vld [vmem:[%s14693_s2 + $0x68] sm:$0xff] }
 0x742   :  { %4037 = vmatpush.msrb.mxu1 %v3991_v37  ;;  %4017 = vmatpush.msra.mxu0 %v3990_v41  ;;  %v12429_v37 = vld [vmem:[%s14694_s4 + $0x6] sm:$0x7] }
 0x743   :  { %3891 = vmatpush.msra.mxu3 %v3826_v9  ;;  %v3978_v9 = vld [vmem:[%s14693_s2 + $0xa8] sm:$0xff]  ;;  %v3570_v34 = vperm.slane %v12429_v37, 0 }
 0x744   :  { %4038 = vmatpush.msrb.mxu1 %v3988_v18  ;;  %4018 = vmatpush.msra.mxu0 %v3987_v10  ;;  %v3986_v18 = vld [vmem:[%s14693_s2 + $0xe8] sm:$0xff]  ;;  %v135_v10 = vadd.f32 %v8375_v15, %v8297_v27  ;;  %v3977_v15 = vld [vmem:[%s14693_s2 + $0xa0] sm:$0xff] }
 0x745   :  { %3892 = vmatpush.msra.mxu3 %v3823_v36  ;;  %v3967_v36 = vld [vmem:[%s14693_s2 + $0x50] sm:$0xff]  ;;  %v7113_v41 = vld [vmem:[%s14690_s3 + $0x2a8] sm:$0xff] }
 0x746   :  { %4039 = vmatpush.msrb.mxu1 %v3985_v56  ;;  %4019 = vmatpush.msra.mxu0 %v3984_v19  ;;  %v7105_v56 = vld [vmem:[%s14690_s3 + $0x268] sm:$0xff] }
 0x747   :  { %3893 = vmatpush.msra.mxu3 %v3820_v30  ;;  %v12348_v30 = vpop.f32.mrf.mxu2 }
 0x748   :  { %4040 = vmatpush.msrb.mxu1 %v3982_v17  ;;  %4020 = vmatpush.msra.mxu0 %v3981_v5  ;;  %v3983_v17 = vld [vmem:[%s14693_s2 + $0xd0] sm:$0xff] }
 0x749   :  { %3894 = vmatpush.msra.mxu3 %v3817_v23  ;;  %v3975_v23 = vld [vmem:[%s14693_s2 + $0x90] sm:$0xff] }
 0x74a   :  { %4041 = vmatpush.msrb.mxu1 %v3979_v1  ;;  %4021 = vmatpush.msra.mxu0 %v3978_v9  ;;  %v7102_v1 = vld [vmem:[%s14690_s3 + $0x250] sm:$0xff] }
 0x74b   :  { %3895 = vmatpush.msra.mxu3 %v3814_v49  ;;  %v3964_v49 = vld [vmem:[%s14693_s2 + $0x38] sm:$0xff]  ;;  %v7110_v5 = vld [vmem:[%s14690_s3 + $0x290] sm:$0xff] }
 0x74c   :  { %4042 = vmatpush.msrb.mxu1 %v3976_v25  ;;  %4022 = vmatpush.msra.mxu0 %v3975_v23  ;;  %v7096_v23 = vld [vmem:[%s14690_s3 + $0x220] sm:$0xff] }
 0x74d   :  { %3896 = vmatpush.msra.mxu3 %v3811_v24  ;;  %v3972_v24 = vld [vmem:[%s14693_s2 + $0x78] sm:$0xff] }
 0x74e   :  { %4043 = vmatpush.msrb.mxu1 %v3973_v48  ;;  %4023 = vmatpush.msra.mxu0 %v3972_v24  ;;  %v3980_v48 = vld [vmem:[%s14693_s2 + $0xb8] sm:$0xff] }
 0x74f   :  { %3897 = vmatpush.msra.mxu3 %v3808_v57  ;;  %v3961_v57 = vld [vmem:[%s14693_s2 + $0x20] sm:$0xff]  ;;  %v3882_v28 = vpop.f32.mrf.mxu2 }
 0x750   :  { %4044 = vmatpush.msrb.mxu1 %v3970_v46  ;;  %v7099_v46 = vld [vmem:[%s14690_s3 + $0x238] sm:$0xff] }
 0x751   :  { %3898 = vmatpush.msra.mxu3 %v3805_v50  ;;  %v3969_v50 = vld [vmem:[%s14693_s2 + $0x60] sm:$0xff] }
 0x752   :  { %4045 = vmatpush.msrb.mxu1 %v3967_v36  ;;  %4024 = vmatpush.msra.mxu0 %v3969_v50  ;;  %v7107_v36 = vld [vmem:[%s14690_s3 + $0x278] sm:$0xff]  ;;  %v3974_v50 = vld [vmem:[%s14693_s2 + $0x88] sm:$0xff] }
 0x753   :  { %3899 = vmatpush.msra.mxu3 %v3802_v54  ;;  %v3958_v54 = vld [vmem:[%s14693_s2 + $0x8] sm:$0xff] }
 0x754   :  { %4046 = vmatpush.msrb.mxu1 %v3964_v49 }
 0x755   :  { %3900 = vmatpush.msra.mxu3 %v3799_v21  ;;  %v4004_v21 = vld [vmem:[%s14693_s2 + $0x178] sm:$0xff] }
 0x756   :  { %3901 = vmatmul.f32.vlgmr.msra.gmra.mxu3 %v11756_v44  ;;  %4047 = vmatpush.msrb.mxu1 %v3961_v57 }
 0x757   :  { %4121 = vmatpush.msrb.mxu3 %v7121_v16  ;;  %v7123_v16 = vld [vmem:[%s14690_s3 + $0x2f8] sm:$0xff]  ;;  %4053 = vmatpush.msra.mxu2 %v4004_v21  ;;  %v7093_v21 = vld [vmem:[%s14690_s3 + $0x208] sm:$0xff] }
 0x758   :  { %4048 = vmatpush.msrb.mxu1 %v3958_v54  ;;  %v7104_v54 = vld [vmem:[%s14690_s3 + $0x260] sm:$0xff] }
 0x759   :  { %4122 = vmatpush.msrb.mxu3 %v7118_v42  ;;  %v3966_v42 = vld [vmem:[%s14693_s2 + $0x48] sm:$0xff]  ;;  %4054 = vmatpush.msra.mxu2 %v4001_v51 }
 0x75a   :  { %4161 = vmatpush.msra.mxu1 %v7123_v16  ;;  %4025 = vmatpush.msra.mxu0 %v3966_v42  ;;  %v7101_v42 = vld [vmem:[%s14690_s3 + $0x248] sm:$0xff] }
 0x75b   :  { %4123 = vmatpush.msrb.mxu3 %v7115_v45  ;;  %v7120_v45 = vld [vmem:[%s14690_s3 + $0x2e0] sm:$0xff]  ;;  %4055 = vmatpush.msra.mxu2 %v3998_v29 }
 0x75c   :  { %4162 = vmatpush.msra.mxu1 %v7120_v45  ;;  %v3968_v45 = vld [vmem:[%s14693_s2 + $0x58] sm:$0xff]  ;;  %v3965_v29 = vld [vmem:[%s14693_s2 + $0x40] sm:$0xff] }
 0x75d   :  { %4124 = vmatpush.msrb.mxu3 %v7112_v33  ;;  %v3963_v33 = vld [vmem:[%s14693_s2 + $0x30] sm:$0xff] }
 0x75e   :  { %4026 = vmatpush.msra.mxu0 %v3963_v33  ;;  %v7087_v33 = vld [vmem:[%s14690_s3 + $0x1d8] sm:$0xff] }
 0x75f   :  { %4125 = vmatpush.msrb.mxu3 %v7109_v58  ;;  %v7117_v58 = vld [vmem:[%s14690_s3 + $0x2c8] sm:$0xff] }
 0x760   :  { %4163 = vmatpush.msra.mxu1 %v7117_v58  ;;  %4027 = vmatpush.msra.mxu0 %v3960_v31  ;;  %v7095_v58 = vld [vmem:[%s14690_s3 + $0x218] sm:$0xff] }
 0x761   :  { %4126 = vmatpush.msrb.mxu3 %v7106_v47  ;;  %v3925_v47 = vadd.f32 %v3882_v28, %v176_v32  ;;  %v7090_v28 = vld [vmem:[%s14690_s3 + $0x1f0] sm:$0xff] }
 0x762   :  { %v7098_v32 = vld [vmem:[%s14690_s3 + $0x230] sm:$0xff] }
 0x763   :  { %4127 = vmatpush.msrb.mxu3 %v7103_v62  ;;  %v3995_v62 = vld [vmem:[%s14693_s2 + $0x130] sm:$0xff] }
 0x764   :  { %4056 = vmatpush.msra.mxu2 %v3995_v62 }
 0x765   :  { %4128 = vmatpush.msrb.mxu3 %v7100_v12  ;;  %v7114_v12 = vld [vmem:[%s14690_s3 + $0x2b0] sm:$0xff] }
 0x766   :  { %4164 = vmatpush.msra.mxu1 %v7114_v12  ;;  %v3962_v12 = vld [vmem:[%s14693_s2 + $0x28] sm:$0xff] }
 0x767   :  { %4129 = vmatpush.msrb.mxu3 %v7097_v26  ;;  %v3957_v26 = vld [vmem:[%s14693_s2] sm:$0xff] }
 0x768   :  { %4028 = vmatpush.msra.mxu0 %v3957_v26  ;;  %v7092_v26 = vld [vmem:[%s14690_s3 + $0x200] sm:$0xff] }
 0x769   :  { %4130 = vmatpush.msrb.mxu3 %v7094_v11 }
 0x76b   :  { %4131 = vmatpush.msrb.mxu3 %v7091_v22  ;;  %v3992_v22 = vld [vmem:[%s14693_s2 + $0x118] sm:$0xff] }
 0x76c   :  { %4057 = vmatpush.msra.mxu2 %v3992_v22  ;;  %v7081_v22 = vld [vmem:[%s14690_s3 + $0x1a8] sm:$0xff] }
 0x76d   :  { %4132 = vmatpush.msrb.mxu3 %v7088_v4  ;;  %v7122_v4 = vld [vmem:[%s14690_s3 + $0x2f0] sm:$0xff] }
 0x76e   :  { %4141 = vmatpush.msrb.mxu0 %v7122_v4  ;;  %v3571_v4 = vperm.slane %v12429_v37, 1 }
 0x76f   :  { %4133 = vmatpush.msrb.mxu3 %v7085_v35  ;;  %v7111_v35 = vld [vmem:[%s14690_s3 + $0x298] sm:$0xff] }
 0x770   :  { %4165 = vmatpush.msra.mxu1 %v7111_v35  ;;  %v3959_v35 = vld [vmem:[%s14693_s2 + $0x10] sm:$0xff] }
 0x771   :  { %4134 = vmatpush.msrb.mxu3 %v7082_v2  ;;  %v7074_v2 = vmul.f32 -1.442695, %v3925_v47  ;;  %v7084_v47 = vld [vmem:[%s14690_s3 + $0x1c0] sm:$0xff] }
 0x772   :  { %4166 = vmatpush.msra.mxu1 %v7108_v7 }
 0x773   :  { %4135 = vmatpush.msrb.mxu3 %v7079_v3  ;;  %v3989_v3 = vld [vmem:[%s14693_s2 + $0x100] sm:$0xff]  ;;  %7714 = vpow2.f32 %v7074_v2  ;;  %v7089_v2 = vld [vmem:[%s14690_s3 + $0x1e8] sm:$0xff] }
 0x774   :  { %4058 = vmatpush.msra.mxu2 %v3989_v3  ;;  %4167 = vmatpush.msra.mxu1 %v7105_v56  ;;  %v7078_v3 = vld [vmem:[%s14690_s3 + $0x190] sm:$0xff] }
 0x775   :  { %4136 = vmatpush.msrb.mxu3 %v7076_v8  ;;  %v7119_v8 = vld [vmem:[%s14690_s3 + $0x2d8] sm:$0xff] }
 0x776   :  { %4137 = vmatmul.f32.vlgmr.msrb.gmra.mxu3 %v12176_v55  ;;  %4142 = vmatpush.msrb.mxu0 %v7119_v8 }
 0x777   :  { %4059 = vmatpush.msra.mxu2 %v3986_v18  ;;  %4168 = vmatpush.msra.mxu1 %v7102_v1  ;;  %v7086_v18 = vld [vmem:[%s14690_s3 + $0x1d0] sm:$0xff] }
 0x778   :  { %4143 = vmatpush.msrb.mxu0 %v7116_v59 }
 0x779   :  { %4060 = vmatpush.msra.mxu2 %v3983_v17  ;;  %4169 = vmatpush.msra.mxu1 %v7099_v46  ;;  %v7715_v49 = vpop.eup %7714 }
 0x77a   :  { %4144 = vmatpush.msrb.mxu0 %v7113_v41  ;;  %v12480_v16 = vadd.f32 1.0, %v7715_v49  ;;  %v7559_v49 = vld [vmem:[%s14692_s5] ss:$0 sm:$0xff] }
 0x77b   :  { %4061 = vmatpush.msra.mxu2 %v3980_v48  ;;  %4170 = vmatpush.msra.mxu1 %v7096_v23  ;;  %v7077_v48 = vld [vmem:[%s14690_s3 + $0x188] sm:$0xff] }
 0x77c   :  { %4145 = vmatpush.msrb.mxu0 %v7110_v5  ;;  %vm3935_vm6 = vweird.f32 %v12480_v16 }
 0x77d   :  { %4062 = vmatpush.msra.mxu2 %v3977_v15  ;;  %4171 = vmatpush.msra.mxu1 %v7093_v21 }
 0x77e   :  { %4146 = vmatpush.msrb.mxu0 %v7107_v36 }
 0x77f   :  { %4063 = vmatpush.msra.mxu2 %v3974_v50  ;;  %4172 = vmatpush.msra.mxu1 %v7090_v28 }
 0x780   :  { %4147 = vmatpush.msrb.mxu0 %v7104_v54 }
 0x781   :  { %4173 = vmatpush.msra.mxu1 %v7087_v33 }
 0x782   :  { %4148 = vmatpush.msrb.mxu0 %v7101_v42 }
 0x783   :  { %4174 = vmatpush.msra.mxu1 %v7084_v47 }
 0x784   :  { %4149 = vmatpush.msrb.mxu0 %v7098_v32  ;;  %v3941_v32 = vand.u32 2147483648, %v12480_v16 }
 0x785   :  { %4175 = vmatpush.msra.mxu1 %v7081_v22 }
 0x786   :  { %4150 = vmatpush.msrb.mxu0 %v7095_v58  ;;  %v3939_v58 = vand.u32 2147483647, %v12480_v16 }
 0x787   :  { %4176 = vmatpush.msra.mxu1 %v7078_v3 }
 0x788   :  { %4151 = vmatpush.msrb.mxu0 %v7092_v26  ;;  %vm3940_vm8 = vcmp.eq.f32.partialorder %v3939_v58, 8.507059e+37 }
 0x78a   :  { %4152 = vmatpush.msrb.mxu0 %v7089_v2 }
 0x78c   :  { %4153 = vmatpush.msrb.mxu0 %v7086_v18 }
 0x7b3   :  { %v3613_v8 = vpop.f32.mrf.mxu0 }
 0x7b4   :  { %v12406_v11 = vpop.f32.mrf.mxu1  ;;  %v3614_v59 = vadd.f32 %v3613_v8, %v3571_v4 }
 0x7b9   :  { %v3593_v39 = vpop.f32.mrf.mxu3 }
 0x7ba   :  { %v3594_v25 = vadd.f32 %v3593_v39, %v3570_v34  ;;  %v7083_v39 = vld [vmem:[%s14690_s3 + $0x1b8] sm:$0xff] }
 0x7bb   :  { %4154 = vmatpush.msrb.mxu0 %v7083_v39 }
 0x7bc   :  { %v3862_v19 = vpop.f32.mrf.mxu1  ;;  %v3744_v57 = vadd.f32 %v12348_v30, %v3594_v25  ;;  %v3971_v30 = vld [vmem:[%s14693_s2 + $0x70] sm:$0xff] }
 0x7bd   :  { %v3905_v9 = vadd.f32 %v3862_v19, %v135_v10  ;;  %4064 = vmatpush.msra.mxu2 %v3971_v30  ;;  %v7080_v10 = vld [vmem:[%s14690_s3 + $0x1a0] sm:$0xff] }
 0x7be   :  { %v7070_v51 = vmul.f32 -1.442695, %v3744_v57  ;;  %4155 = vmatpush.msrb.mxu0 %v7080_v10  ;;  %v3741_v10 = vpop.f32.mrf.mxu0 }
 0x7bf   :  { %v7073_v24 = vmul.f32 -1.442695, %v3905_v9  ;;  %4065 = vmatpush.msra.mxu2 %v3968_v45  ;;  %v217_v45 = vadd.f32 %v8734_v60, %v8600_v6 }
 0x7c0   :  { %4156 = vmatpush.msrb.mxu0 %v7077_v48 }
 0x7c1   :  { %7716 = vpow2.f32 %v7073_v24  ;;  %4066 = vmatpush.msra.mxu2 %v3965_v29  ;;  %v3721_v34 = vpop.f32.mrf.mxu3 }
 0x7c2   :  { %7718 = vrcp.f32 %v12480_v16  ;;  %v3764_v41 = vadd.f32 %v3721_v34, %v3614_v59 }
 0x7c3   :  { %7720 = vpow2.f32 %v7070_v51  ;;  %4067 = vmatpush.msra.mxu2 %v3962_v12  ;;  %v3942_v12 = vor.u32 1.1754944e-38, %v3941_v32  ;;  %v7188_v32 = vld [vmem:[%s14690_s3 + $0x360] sm:$0xff] }
 0x7c4   :  { %v7071_v46 = vmul.f32 -1.442695, %v3764_v41 }
 0x7c5   :  { %4068 = vmatpush.msra.mxu2 %v3959_v35 }
 0x7c7   :  { %v7717_v31 = vpop.eup %7716 }
 0x7c8   :  { %v3909_v62 = vadd.f32 1.0, %v7717_v31  ;;  %v7719_v7 = vpop.eup %7718 }
 0x7c9   :  { %v7721_v56 = vpop.eup %7720  ;;  %v3931_v17 = vmul.f32 %v7719_v7, %v12480_v16  ;;  %vm3936_vm5 = vweird.f32 %v7719_v7 }
 0x7ca   :  { %7722 = vrcp.f32 %v3909_v62  ;;  %v12539_v25 = vadd.f32 1.0, %v7721_v56  ;;  %v3921_v15 = vand.u32 2147483648, %v3909_v62  ;;  %v3919_v23 = vand.u32 2147483647, %v3909_v62  ;;  %vm3937_vm7 = vmor %vm3935_vm6, %vm3936_vm5  ;;  %v7218_v56 = vld [vmem:[%s14690_s3 + $0x450] sm:$0xff] }
 0x7cb   :  { %v3932_v5 = vsub.f32 1.0, %v3931_v17  ;;  %vm3915_vm2 = vweird.f32 %v3909_v62  ;;  %v7215_v17 = vld [vmem:[%s14690_s3 + $0x438] sm:$0xff] }
 0x7cc   :  { %7724 = vrcp.f32 %v12539_v25  ;;  %v3922_v50 = vor.u32 1.1754944e-38, %v3921_v15  ;;  %vm3920_vm4 = vcmp.eq.f32.partialorder %v3919_v23, 8.507059e+37  ;;  %v3760_v59 = vand.u32 2147483648, %v12539_v25 }
 0x7cd   :  { %v3933_v24 = vmul.f32 %v7719_v7, %v3932_v5  ;;  %7726 = vpow2.f32 %v7071_v46  ;;  %vm3754_vm10 = vweird.f32 %v12539_v25  ;;  %v7209_v46 = vld [vmem:[%s14690_s3 + $0x408] sm:$0xff] }
 0x7cf   :  { %v3934_v51 = vadd.f32 %v7719_v7, %v3933_v24  ;;  %v7203_v24 = vld [vmem:[%s14690_s3 + $0x3d8] sm:$0xff] }
 0x7d0   :  { %v7723_v1 = vpop.eup %7722 }
 0x7d1   :  { %v3911_v19 = vmul.f32 %v7723_v1, %v3909_v62  ;;  %vm3916_vm1 = vweird.f32 %v7723_v1  ;;  %v3938_v62 = vsel %vm3937_vm7, %v7719_v7, %v3934_v51  ;;  %v7221_v7 = vld [vmem:[%s14690_s3 + $0x468] sm:$0xff]  ;;  %v7191_v51 = vld [vmem:[%s14690_s3 + $0x378] sm:$0xff] }
 0x7d2   :  { %vm3917_vm3 = vmor %vm3915_vm2, %vm3916_vm1  ;;  %v7725_v28 = vpop.eup %7724  ;;  %v3943_v60 = vsel %vm3940_vm8, %v3942_v12, %v3938_v62  ;;  %v7179_v62 = vld [vmem:[%s14690_s3 + $0x318] sm:$0xff] }
 0x7d3   :  { %v3912_v9 = vsub.f32 1.0, %v3911_v19  ;;  %v7727_v29 = vpop.eup %7726  ;;  %v3750_v47 = vmul.f32 %v7725_v28, %v12539_v25  ;;  %v3953_v4 = vsub.f32 1.0, %v3943_v60  ;;  %v3955_v16 = vmul.f32 %v3943_v60, %v11756_v44 }
 0x7d4   :  { %v12554_v26 = vadd.f32 1.0, %v7727_v29  ;;  %vm3755_vm9 = vweird.f32 %v7725_v28  ;;  %v3758_v44 = vand.u32 2147483647, %v12539_v25  ;;  %v3761_v19 = vor.u32 1.1754944e-38, %v3760_v59  ;;  %v7212_v25 = vld [vmem:[%s14690_s3 + $0x420] sm:$0xff]  ;;  %v7185_v29 = vld [vmem:[%s14690_s3 + $0x348] sm:$0xff] }
 0x7d5   :  { %v3913_v36 = vmul.f32 %v7723_v1, %v3912_v9  ;;  %v3751_v22 = vsub.f32 1.0, %v3750_v47  ;;  %vm3756_vm11 = vmor %vm3754_vm10, %vm3755_vm9  ;;  %v3572_v9 = vperm.slane %v12429_v37, 2  ;;  %v7200_v37 = vld [vmem:[%s14690_s3 + $0x3c0] sm:$0xff]  ;;  %v7170_v59 = vld [vmem:[%s14693_s2 + $0x2d8] sm:$0xff] }
 0x7d6   :  { %vm3759_vm12 = vcmp.eq.f32.partialorder %v3758_v44, 8.507059e+37  ;;  %vm3774_vm14 = vweird.f32 %v12554_v26  ;;  %v7167_v44 = vld [vmem:[%s14693_s2 + $0x2c0] sm:$0xff] }
 0x7d7   :  { %v3914_v57 = vadd.f32 %v7723_v1, %v3913_v36  ;;  %v3752_v2 = vmul.f32 %v7725_v28, %v3751_v22  ;;  %v7206_v36 = vld [vmem:[%s14690_s3 + $0x3f0] sm:$0xff] }
 0x7d9   :  { %v3902_v54 = vpop.f32.mrf.mxu3  ;;  %v3918_v21 = vsel %vm3917_vm3, %v7723_v1, %v3914_v57  ;;  %v3753_v18 = vadd.f32 %v7725_v28, %v3752_v2  ;;  %v7558_v1 = vld [vmem:[%s14692_s5 + $0x2] ss:$0 sm:$0xff]  ;;  %v3634_v57 = vadd.f32 %v12406_v11, %v3572_v9  ;;  %v3778_v11 = vand.u32 2147483647, %v12554_v26  ;;  %v7172_v2 = vld [vmem:[%s14693_s2 + $0x2e8] sm:$0xff]  ;;  %v4532_v9 = vld [vmem:[%s14690_s3 + $0xb0] sm:$0xff] }
 0x7da   :  { %v3923_v30 = vsel %vm3920_vm4, %v3922_v50, %v3918_v21  ;;  %v3949_v42 = vadd.f32 %v7559_v49, %v3902_v54  ;;  %v3788_v15 = vadd.f32 %v7558_v1, %v3741_v10  ;;  %v7197_v21 = vld [vmem:[%s14690_s3 + $0x3a8] sm:$0xff]  ;;  %4289 = vmatpush.msrb.mxu2 %v7172_v2  ;;  %v4544_v1 = vld [vmem:[%s14690_s3 + $0x110] sm:$0xff]  ;;  %v7130_v2 = vld [vmem:[%s14693_s2 + $0x198] sm:$0xff] }
 0x7db   :  { %v3757_v41 = vsel %vm3756_vm11, %v7725_v28, %v3753_v18  ;;  %vm3779_vm0 = vcmp.eq.f32.partialorder %v3778_v11, 8.507059e+37  ;;  %v7174_v18 = vld [vmem:[%s14693_s2 + $0x2f8] sm:$0xff]  ;;  %v7160_v10 = vld [vmem:[%s14693_s2 + $0x288] sm:$0xff]  ;;  %v7161_v11 = vld [vmem:[%s14693_s2 + $0x290] sm:$0xff] }
 0x7dc   :  { %v3950_v33 = vmul.f32 %v3949_v42, %v3923_v30  ;;  %v3762_v48 = vsel %vm3759_vm12, %v3761_v19, %v3757_v41  ;;  %v3780_v30 = vand.u32 2147483648, %v12554_v26  ;;  %v7194_v42 = vld [vmem:[%s14690_s3 + $0x390] sm:$0xff]  ;;  %v7168_v41 = vld [vmem:[%s14693_s2 + $0x2c8] sm:$0xff]  ;;  %v4541_v19 = vld [vmem:[%s14690_s3 + $0xf8] sm:$0xff] }
 0x7dd   :  { %v3789_v23 = vmul.f32 %v3788_v15, %v3762_v48  ;;  %v4538_v48 = vld [vmem:[%s14690_s3 + $0xe0] sm:$0xff]  ;;  %v4529_v15 = vld [vmem:[%s14690_s3 + $0x98] sm:$0xff] }
 0x7de   :  { %v3951_v31 = vadd.f32 %v3950_v33, %v217_v45  ;;  %v3781_v45 = vor.u32 1.1754944e-38, %v3780_v30  ;;  %v7148_v30 = vld [vmem:[%s14693_s2 + $0x228] sm:$0xff] }
 0x7df   :  { %v3790_v50 = vadd.f32 %v3789_v23, %v3634_v57  ;;  %v4523_v23 = vld [vmem:[%s14690_s3 + $0x68] sm:$0xff]  ;;  %v4514_v57 = vld [vmem:[%s14690_s3 + $0x20] sm:$0xff] }
 0x7e0   :  { %7728 = vtanh.f32 %v3951_v31  ;;  %v7182_v31 = vld [vmem:[%s14690_s3 + $0x330] sm:$0xff] }
 0x7e1   :  { %7730 = vrcp.f32 %v12554_v26 }
 0x7e2   :  { %7732 = vtanh.f32 %v3790_v50  ;;  %v7151_v50 = vld [vmem:[%s14693_s2 + $0x240] sm:$0xff] }
 0x7e6   :  { %v7729_v35 = vpop.eup %7728 }
 0x7e7   :  { %v3954_v3 = vmul.f32 %v7729_v35, %v3953_v4  ;;  %v7731_v34 = vpop.eup %7730  ;;  %v4556_v4 = vld [vmem:[%s14690_s3 + $0x170] sm:$0xff]  ;;  %v4553_v35 = vld [vmem:[%s14690_s3 + $0x158] sm:$0xff] }
 0x7e8   :  { %v3770_v39 = vmul.f32 %v7731_v34, %v12554_v26  ;;  %vm3775_vm13 = vweird.f32 %v7731_v34  ;;  %v7733_v58 = vpop.eup %7732  ;;  %v7176_v26 = vld [vmem:[%s14690_s3 + $0x300] sm:$0xff] }
 0x7e9   :  { %v12558_v8 = vadd.f32 %v3955_v16, %v3954_v3  ;;  %vm3776_vm15 = vmor %vm3774_vm14, %vm3775_vm13  ;;  %v7169_v3 = vld [vmem:[%s14693_s2 + $0x2d0] sm:$0xff]  ;;  %v4550_v16 = vld [vmem:[%s14690_s3 + $0x140] sm:$0xff] }
 0x7ea   :  { %v3771_v5 = vsub.f32 1.0, %v3770_v39  ;;  %4290 = vmatpush.msrb.mxu2 %v7169_v3  ;;  %v4547_v39 = vld [vmem:[%s14690_s3 + $0x128] sm:$0xff]  ;;  %v7143_v3 = vld [vmem:[%s14693_s2 + $0x200] sm:$0xff] }
 0x7eb   :  { %4029 = vmatmul.f32.vlgmr.msra.gmra.mxu0 %v12558_v8  ;;  %4049 = vmatmul.f32.vlgmr.msrb.gmra.mxu1 %v12558_v8 }
 0x7ec   :  { %4069 = vmatmul.f32.vlgmr.msra.gmra.mxu2 %v12558_v8  ;;  %4397 = vmatpush.msrb.mxu1 %v7221_v7  ;;  %v3772_v49 = vmul.f32 %v7731_v34, %v3771_v5  ;;  %v7173_v7 = vld [vmem:[%s14693_s2 + $0x2f0] sm:$0xff]  ;;  %v7154_v5 = vld [vmem:[%s14693_s2 + $0x258] sm:$0xff] }
 0x7ed   :  { %4309 = vmatpush.msra.mxu3 %v7173_v7  ;;  %4329 = vmatpush.msra.mxu0 %v7174_v18  ;;  %v7127_v7 = vld [vmem:[%s14693_s2 + $0x180] sm:$0xff]  ;;  %v7141_v18 = vld [vmem:[%s14693_s2 + $0x1f0] sm:$0xff] }
 0x7ee   :  { %4398 = vmatpush.msrb.mxu1 %v7218_v56  ;;  %v3773_v54 = vadd.f32 %v7731_v34, %v3772_v49  ;;  %v7171_v56 = vld [vmem:[%s14693_s2 + $0x2e0] sm:$0xff]  ;;  %v4520_v49 = vld [vmem:[%s14690_s3 + $0x50] sm:$0xff] }
 0x7ef   :  { %4310 = vmatpush.msra.mxu3 %v7170_v59  ;;  %4330 = vmatpush.msra.mxu0 %v7171_v56  ;;  %v7222_v59 = vld [vmem:[%s14690_s3 + $0x470] sm:$0xff] }
 0x7f0   :  { %4399 = vmatpush.msrb.mxu1 %v7215_v17  ;;  %v3777_v28 = vsel %vm3776_vm15, %v7731_v34, %v3773_v54  ;;  %v7166_v34 = vld [vmem:[%s14693_s2 + $0x2b8] sm:$0xff]  ;;  %v7163_v17 = vld [vmem:[%s14693_s2 + $0x2a0] sm:$0xff]  ;;  %v7164_v54 = vld [vmem:[%s14693_s2 + $0x2a8] sm:$0xff] }
 0x7f1   :  { %v3782_v33 = vsel %vm3779_vm0, %v3781_v45, %v3777_v28  ;;  %4291 = vmatpush.msrb.mxu2 %v7166_v34  ;;  %4311 = vmatpush.msra.mxu3 %v7167_v44  ;;  %v7145_v28 = vld [vmem:[%s14693_s2 + $0x210] sm:$0xff]  ;;  %v7159_v45 = vld [vmem:[%s14693_s2 + $0x280] sm:$0xff]  ;;  %v7140_v34 = vld [vmem:[%s14693_s2 + $0x1e8] sm:$0xff] }
 0x7f2   :  { %4400 = vmatpush.msrb.mxu1 %v7212_v25  ;;  %v3792_v47 = vsub.f32 1.0, %v3782_v33  ;;  %v3794_v22 = vmul.f32 %v3782_v33, %v11824_v53  ;;  %v7157_v25 = vld [vmem:[%s14693_s2 + $0x270] sm:$0xff]  ;;  %4331 = vmatpush.msra.mxu0 %v7168_v41  ;;  %v7155_v33 = vld [vmem:[%s14693_s2 + $0x260] sm:$0xff]  ;;  %v7138_v44 = vld [vmem:[%s14693_s2 + $0x1d8] sm:$0xff] }
 0x7f3   :  { %4157 = vmatmul.f32.vlgmr.msrb.gmra.mxu0 %v12176_v55  ;;  %4177 = vmatmul.f32.vlgmr.msra.gmra.mxu1 %v12176_v55  ;;  %v7137_v56 = vld [vmem:[%s14693_s2 + $0x1d0] sm:$0xff]  ;;  %v7135_v41 = vld [vmem:[%s14693_s2 + $0x1c0] sm:$0xff] }
 0x7f4   :  { %4401 = vmatpush.msrb.mxu1 %v7209_v46  ;;  %v3793_v12 = vmul.f32 %v7733_v58, %v3792_v47  ;;  %4292 = vmatpush.msrb.mxu2 %v7163_v17  ;;  %v4535_v46 = vld [vmem:[%s14690_s3 + $0xc8] sm:$0xff]  ;;  %v7139_v58 = vld [vmem:[%s14693_s2 + $0x1e0] sm:$0xff]  ;;  %v7134_v17 = vld [vmem:[%s14693_s2 + $0x1b8] sm:$0xff] }
 0x7f5   :  { %4312 = vmatpush.msra.mxu3 %v7164_v54  ;;  %v7152_v47 = vld [vmem:[%s14693_s2 + $0x248] sm:$0xff]  ;;  %v4549_v54 = vld [vmem:[%s14690_s3 + $0x138] sm:$0xff] }
 0x7f6   :  { %4402 = vmatpush.msrb.mxu1 %v7206_v36  ;;  %v12626_v60 = vadd.f32 %v3794_v22, %v3793_v12  ;;  %4293 = vmatpush.msrb.mxu2 %v7160_v10  ;;  %v4526_v36 = vld [vmem:[%s14690_s3 + $0x80] sm:$0xff]  ;;  %v7149_v12 = vld [vmem:[%s14693_s2 + $0x230] sm:$0xff] }
 0x7f7   :  { %4313 = vmatpush.msra.mxu3 %v7161_v11  ;;  %v7133_v22 = vld [vmem:[%s14693_s2 + $0x1b0] sm:$0xff]  ;;  %v7131_v10 = vld [vmem:[%s14693_s2 + $0x1a0] sm:$0xff] }
 0x7f8   :  { %4403 = vmatpush.msrb.mxu1 %v7203_v24  ;;  %4294 = vmatpush.msrb.mxu2 %v7157_v25  ;;  %v4517_v24 = vld [vmem:[%s14690_s3 + $0x38] sm:$0xff]  ;;  %v7213_v25 = vld [vmem:[%s14690_s3 + $0x428] sm:$0xff]  ;;  %v7214_v11 = vld [vmem:[%s14690_s3 + $0x430] sm:$0xff] }
 0x7fa   :  { %4404 = vmatpush.msrb.mxu1 %v7200_v37  ;;  %4295 = vmatpush.msrb.mxu2 %v7154_v5  ;;  %v4511_v37 = vld [vmem:[%s14690_s3 + $0x8] sm:$0xff] }
 0x7fb   :  { %v7128_v5 = vld [vmem:[%s14693_s2 + $0x188] sm:$0xff] }
 0x7fc   :  { %4405 = vmatpush.msrb.mxu1 %v7197_v21  ;;  %v7165_v21 = vld [vmem:[%s14693_s2 + $0x2b0] sm:$0xff]  ;;  %4296 = vmatpush.msrb.mxu2 %v7151_v50  ;;  %v7217_v50 = vld [vmem:[%s14690_s3 + $0x448] sm:$0xff] }
 0x7fd   :  { %4332 = vmatpush.msra.mxu0 %v7165_v21 }
 0x7fe   :  { %4406 = vmatpush.msrb.mxu1 %v7194_v42  ;;  %v7162_v42 = vld [vmem:[%s14693_s2 + $0x298] sm:$0xff]  ;;  %4297 = vmatpush.msrb.mxu2 %v7148_v30  ;;  %v7201_v30 = vld [vmem:[%s14690_s3 + $0x3c8] sm:$0xff] }
 0x7ff   :  { %4333 = vmatpush.msra.mxu0 %v7162_v42  ;;  %v4546_v42 = vld [vmem:[%s14690_s3 + $0x120] sm:$0xff] }
 0x800   :  { %4407 = vmatpush.msrb.mxu1 %v7191_v51  ;;  %v7158_v51 = vld [vmem:[%s14693_s2 + $0x278] sm:$0xff]  ;;  %4298 = vmatpush.msrb.mxu2 %v7145_v28 }
 0x801   :  { %4314 = vmatpush.msra.mxu3 %v7158_v51  ;;  %4334 = vmatpush.msra.mxu0 %v7159_v45  ;;  %v4138_v51 = vpop.f32.mrf.mxu3  ;;  %v7198_v45 = vld [vmem:[%s14690_s3 + $0x3b0] sm:$0xff] }
 0x802   :  { %4408 = vmatpush.msrb.mxu1 %v7188_v32  ;;  %v7142_v32 = vld [vmem:[%s14693_s2 + $0x1f8] sm:$0xff] }
 0x803   :  { %4299 = vmatpush.msrb.mxu2 %v7142_v32  ;;  %4315 = vmatpush.msra.mxu3 %v7155_v33  ;;  %v7211_v32 = vld [vmem:[%s14690_s3 + $0x418] sm:$0xff]  ;;  %v4543_v33 = vld [vmem:[%s14690_s3 + $0x108] sm:$0xff] }
 0x804   :  { %4409 = vmatpush.msrb.mxu1 %v7185_v29  ;;  %v7156_v29 = vld [vmem:[%s14693_s2 + $0x268] sm:$0xff] }
 0x805   :  { %4335 = vmatpush.msra.mxu0 %v7156_v29  ;;  %4300 = vmatpush.msrb.mxu2 %v7139_v58 }
 0x806   :  { %4410 = vmatpush.msrb.mxu1 %v7182_v31  ;;  %4316 = vmatpush.msra.mxu3 %v7152_v47  ;;  %v7153_v31 = vld [vmem:[%s14693_s2 + $0x250] sm:$0xff] }
 0x807   :  { %4336 = vmatpush.msra.mxu0 %v7153_v31  ;;  %v7195_v31 = vld [vmem:[%s14690_s3 + $0x398] sm:$0xff] }
 0x808   :  { %4411 = vmatpush.msrb.mxu1 %v7179_v62  ;;  %v7136_v62 = vld [vmem:[%s14693_s2 + $0x1c8] sm:$0xff]  ;;  %4317 = vmatpush.msra.mxu3 %v7149_v12  ;;  %v4540_v12 = vld [vmem:[%s14690_s3 + $0xf0] sm:$0xff] }
 0x809   :  { %4301 = vmatpush.msrb.mxu2 %v7136_v62  ;;  %v7208_v62 = vld [vmem:[%s14690_s3 + $0x400] sm:$0xff] }
 0x80a   :  { %4412 = vmatpush.msrb.mxu1 %v7176_v26  ;;  %v7150_v26 = vld [vmem:[%s14693_s2 + $0x238] sm:$0xff] }
 0x80b   :  { %4413 = vmatmul.f32.vlgmr.msrb.gmra.mxu1 %v12626_v60  ;;  %4337 = vmatpush.msra.mxu0 %v7150_v26 }
 0x80c   :  { %4578 = vmatpush.msra.mxu1 %v4556_v4  ;;  %v7146_v4 = vld [vmem:[%s14693_s2 + $0x218] sm:$0xff]  ;;  %4302 = vmatpush.msrb.mxu2 %v7133_v22  ;;  %v7192_v22 = vld [vmem:[%s14690_s3 + $0x380] sm:$0xff] }
 0x80d   :  { %4318 = vmatpush.msra.mxu3 %v7146_v4  ;;  %v7205_v4 = vld [vmem:[%s14690_s3 + $0x3e8] sm:$0xff] }
 0x80e   :  { %4579 = vmatpush.msra.mxu1 %v4553_v35  ;;  %v7147_v35 = vld [vmem:[%s14693_s2 + $0x220] sm:$0xff]  ;;  %4303 = vmatpush.msrb.mxu2 %v7130_v2 }
 0x80f   :  { %4338 = vmatpush.msra.mxu0 %v7147_v35  ;;  %4319 = vmatpush.msra.mxu3 %v7143_v3  ;;  %v4537_v35 = vld [vmem:[%s14690_s3 + $0xd8] sm:$0xff] }
 0x810   :  { %4580 = vmatpush.msra.mxu1 %v4550_v16  ;;  %v7144_v16 = vld [vmem:[%s14693_s2 + $0x208] sm:$0xff]  ;;  %4304 = vmatpush.msrb.mxu2 %v7127_v7  ;;  %v7202_v7 = vld [vmem:[%s14690_s3 + $0x3d0] sm:$0xff] }
 0x811   :  { %4339 = vmatpush.msra.mxu0 %v7144_v16  ;;  %4320 = vmatpush.msra.mxu3 %v7140_v34  ;;  %v7189_v16 = vld [vmem:[%s14690_s3 + $0x368] sm:$0xff]  ;;  %v4534_v34 = vld [vmem:[%s14690_s3 + $0xc0] sm:$0xff] }
 0x812   :  { %4581 = vmatpush.msra.mxu1 %v4547_v39  ;;  %4417 = vmatpush.msra.mxu2 %v7222_v59  ;;  %v7219_v39 = vld [vmem:[%s14690_s3 + $0x458] sm:$0xff]  ;;  %v7186_v59 = vld [vmem:[%s14690_s3 + $0x350] sm:$0xff] }
 0x813   :  { %4340 = vmatpush.msra.mxu0 %v7141_v18  ;;  %4321 = vmatpush.msra.mxu3 %v7137_v56  ;;  %v7199_v56 = vld [vmem:[%s14690_s3 + $0x3b8] sm:$0xff] }
 0x814   :  { %4582 = vmatpush.msra.mxu1 %v4544_v1  ;;  %4418 = vmatpush.msra.mxu2 %v7219_v39  ;;  %v7216_v1 = vld [vmem:[%s14690_s3 + $0x440] sm:$0xff] }
 0x815   :  { %4341 = vmatpush.msra.mxu0 %v7138_v44  ;;  %4322 = vmatpush.msra.mxu3 %v7134_v17  ;;  %v4531_v44 = vld [vmem:[%s14690_s3 + $0xa8] sm:$0xff]  ;;  %v7183_v17 = vld [vmem:[%s14690_s3 + $0x338] sm:$0xff] }
 0x816   :  { %4583 = vmatpush.msra.mxu1 %v4541_v19  ;;  %4419 = vmatpush.msra.mxu2 %v7216_v1  ;;  %v7132_v19 = vld [vmem:[%s14693_s2 + $0x1a8] sm:$0xff]  ;;  %v4528_v1 = vld [vmem:[%s14690_s3 + $0x90] sm:$0xff] }
 0x817   :  { %4342 = vmatpush.msra.mxu0 %v7135_v41  ;;  %4323 = vmatpush.msra.mxu3 %v7131_v10  ;;  %v7196_v41 = vld [vmem:[%s14690_s3 + $0x3a0] sm:$0xff] }
 0x818   :  { %4584 = vmatpush.msra.mxu1 %v4538_v48  ;;  %v12831_v48 = vld [vmem:[%s14694_s4 + $0x3] sm:$0x7]  ;;  %4420 = vmatpush.msra.mxu2 %v7213_v25 }
 0x819   :  { %4343 = vmatpush.msra.mxu0 %v7132_v19  ;;  %4324 = vmatpush.msra.mxu3 %v7128_v5  ;;  %v4008_v58 = vperm.slane %v12831_v48, 1  ;;  %v7180_v25 = vld [vmem:[%s14690_s3 + $0x320] sm:$0xff]  ;;  %v7193_v5 = vld [vmem:[%s14690_s3 + $0x388] sm:$0xff] }
 0x81a   :  { %4585 = vmatpush.msra.mxu1 %v4535_v46  ;;  %v7129_v46 = vld [vmem:[%s14693_s2 + $0x190] sm:$0xff] }
 0x81b   :  { %4344 = vmatpush.msra.mxu0 %v7129_v46  ;;  %v4525_v46 = vld [vmem:[%s14690_s3 + $0x78] sm:$0xff] }
 0x81c   :  { %4586 = vmatpush.msra.mxu1 %v4532_v9  ;;  %v7210_v9 = vld [vmem:[%s14690_s3 + $0x410] sm:$0xff] }
 0x81d   :  { %4421 = vmatpush.msra.mxu2 %v7210_v9  ;;  %v7177_v9 = vld [vmem:[%s14690_s3 + $0x308] sm:$0xff] }
 0x81e   :  { %4587 = vmatpush.msra.mxu1 %v4529_v15  ;;  %v7223_v15 = vld [vmem:[%s14690_s3 + $0x478] sm:$0xff] }
 0x81f   :  { %4437 = vmatpush.msrb.mxu3 %v7223_v15  ;;  %v7190_v15 = vld [vmem:[%s14690_s3 + $0x370] sm:$0xff] }
 0x820   :  { %4588 = vmatpush.msra.mxu1 %v4526_v36  ;;  %v4555_v36 = vld [vmem:[%s14690_s3 + $0x168] sm:$0xff] }
 0x821   :  { %4558 = vmatpush.msrb.mxu0 %v4555_v36  ;;  %v4522_v36 = vld [vmem:[%s14690_s3 + $0x60] sm:$0xff] }
 0x822   :  { %4589 = vmatpush.msra.mxu1 %v4523_v23  ;;  %v7207_v23 = vld [vmem:[%s14690_s3 + $0x3f8] sm:$0xff] }
 0x823   :  { %4422 = vmatpush.msra.mxu2 %v7207_v23  ;;  %v7187_v23 = vld [vmem:[%s14690_s3 + $0x358] sm:$0xff] }
 0x824   :  { %4590 = vmatpush.msra.mxu1 %v4520_v49  ;;  %v7220_v49 = vld [vmem:[%s14690_s3 + $0x460] sm:$0xff] }
 0x825   :  { %4438 = vmatpush.msrb.mxu3 %v7220_v49  ;;  %v4519_v49 = vld [vmem:[%s14690_s3 + $0x48] sm:$0xff] }
 0x826   :  { %4591 = vmatpush.msra.mxu1 %v4517_v24  ;;  %v4552_v24 = vld [vmem:[%s14690_s3 + $0x150] sm:$0xff] }
 0x827   :  { %4559 = vmatpush.msrb.mxu0 %v4552_v24  ;;  %4439 = vmatpush.msrb.mxu3 %v7217_v50 }
 0x828   :  { %4592 = vmatpush.msra.mxu1 %v4514_v57  ;;  %v4007_v57 = vperm.slane %v12831_v48, 0 }
 0x829   :  { %4560 = vmatpush.msrb.mxu0 %v4549_v54  ;;  %4440 = vmatpush.msrb.mxu3 %v7214_v11  ;;  %v7181_v54 = vld [vmem:[%s14690_s3 + $0x328] sm:$0xff] }
 0x82a   :  { %4593 = vmatpush.msra.mxu1 %v4511_v37  ;;  %v7204_v37 = vld [vmem:[%s14690_s3 + $0x3e0] sm:$0xff] }
 0x82b   :  { %4594 = vmatmul.f32.vlgmr.msra.gmra.mxu1 %v12558_v8  ;;  %4423 = vmatpush.msra.mxu2 %v7204_v37  ;;  %v4516_v37 = vld [vmem:[%s14690_s3 + $0x30] sm:$0xff] }
 0x82c   :  { %4561 = vmatpush.msrb.mxu0 %v4546_v42  ;;  %4441 = vmatpush.msrb.mxu3 %v7211_v32  ;;  %v7178_v42 = vld [vmem:[%s14690_s3 + $0x310] sm:$0xff] }
 0x82d   :  { %4424 = vmatpush.msra.mxu2 %v7201_v30 }
 0x82e   :  { %4562 = vmatpush.msrb.mxu0 %v4543_v33  ;;  %4442 = vmatpush.msrb.mxu3 %v7208_v62 }
 0x82f   :  { %4425 = vmatpush.msra.mxu2 %v7198_v45 }
 0x830   :  { %4563 = vmatpush.msrb.mxu0 %v4540_v12  ;;  %4443 = vmatpush.msrb.mxu3 %v7205_v4 }
 0x831   :  { %4426 = vmatpush.msra.mxu2 %v7195_v31 }
 0x832   :  { %4564 = vmatpush.msrb.mxu0 %v4537_v35  ;;  %4444 = vmatpush.msrb.mxu3 %v7202_v7 }
 0x833   :  { %4427 = vmatpush.msra.mxu2 %v7192_v22 }
 0x834   :  { %4565 = vmatpush.msrb.mxu0 %v4534_v34  ;;  %4445 = vmatpush.msrb.mxu3 %v7199_v56 }
 0x835   :  { %4428 = vmatpush.msra.mxu2 %v7189_v16 }
 0x836   :  { %4566 = vmatpush.msrb.mxu0 %v4531_v44  ;;  %4446 = vmatpush.msrb.mxu3 %v7196_v41 }
 0x837   :  { %4429 = vmatpush.msra.mxu2 %v7186_v59 }
 0x838   :  { %4567 = vmatpush.msrb.mxu0 %v4528_v1  ;;  %4447 = vmatpush.msrb.mxu3 %v7193_v5  ;;  %v4557_v5 = vld [vmem:[%s14690_s3 + $0x178] sm:$0xff] }
 0x839   :  { %4430 = vmatpush.msra.mxu2 %v7183_v17 }
 0x83a   :  { %4568 = vmatpush.msrb.mxu0 %v4525_v46  ;;  %4448 = vmatpush.msrb.mxu3 %v7190_v15  ;;  %v4554_v46 = vld [vmem:[%s14690_s3 + $0x160] sm:$0xff]  ;;  %v4545_v15 = vld [vmem:[%s14690_s3 + $0x118] sm:$0xff] }
 0x83b   :  { %4431 = vmatpush.msra.mxu2 %v7180_v25 }
 0x83c   :  { %4569 = vmatpush.msrb.mxu0 %v4522_v36  ;;  %4449 = vmatpush.msrb.mxu3 %v7187_v23  ;;  %v4542_v36 = vld [vmem:[%s14690_s3 + $0x100] sm:$0xff]  ;;  %v4539_v23 = vld [vmem:[%s14690_s3 + $0xe8] sm:$0xff] }
 0x83d   :  { %4432 = vmatpush.msra.mxu2 %v7177_v9  ;;  %v4548_v9 = vld [vmem:[%s14690_s3 + $0x130] sm:$0xff] }
 0x83e   :  { %4570 = vmatpush.msrb.mxu0 %v4519_v49  ;;  %v4536_v49 = vld [vmem:[%s14690_s3 + $0xd0] sm:$0xff] }
 0x840   :  { %4571 = vmatpush.msrb.mxu0 %v4516_v37  ;;  %v4527_v37 = vld [vmem:[%s14690_s3 + $0x88] sm:$0xff] }
 0x868   :  { %v4030_v21 = vpop.f32.mrf.mxu0  ;;  %v4050_v47 = vpop.f32.mrf.mxu1 }
 0x869   :  { %v4031_v28 = vadd.f32 %v4030_v21, %v4007_v57  ;;  %v4051_v2 = vadd.f32 %v4050_v47, %v4008_v58  ;;  %v7184_v57 = vld [vmem:[%s14690_s3 + $0x340] sm:$0xff]  ;;  %v4513_v21 = vld [vmem:[%s14690_s3 + $0x18] sm:$0xff]  ;;  %v4009_v47 = vperm.slane %v12831_v48, 2 }
 0x86a   :  { %4450 = vmatpush.msrb.mxu3 %v7184_v57  ;;  %4572 = vmatpush.msrb.mxu0 %v4513_v21  ;;  %v4530_v57 = vld [vmem:[%s14690_s3 + $0xa0] sm:$0xff] }
 0x86b   :  { %v4181_v29 = vadd.f32 %v4138_v51, %v4031_v28  ;;  %v4510_v28 = vld [vmem:[%s14690_s3] sm:$0xff] }
 0x86c   :  { %4451 = vmatpush.msrb.mxu3 %v7181_v54  ;;  %4573 = vmatpush.msrb.mxu0 %v4510_v28  ;;  %v4521_v54 = vld [vmem:[%s14690_s3 + $0x58] sm:$0xff]  ;;  %v4518_v21 = vld [vmem:[%s14690_s3 + $0x40] sm:$0xff]  ;;  %v7272_v28 = vld [vmem:[%s14690_s3 + $0x2d0] sm:$0xff] }
 0x86d   :  { %v7124_v26 = vmul.f32 -1.442695, %v4181_v29  ;;  %v7560_v29 = vld [vmem:[%s14692_s5 + $0x1] ss:$0 sm:$0xff] }
 0x86e   :  { %4452 = vmatpush.msrb.mxu3 %v7178_v42  ;;  %v7275_v42 = vld [vmem:[%s14690_s3 + $0x2e8] sm:$0xff] }
 0x86f   :  { %7734 = vpow2.f32 %v7124_v26  ;;  %v4070_v62 = vpop.f32.mrf.mxu2 }
 0x870   :  { %v4158_v3 = vpop.f32.mrf.mxu0  ;;  %v4178_v31 = vpop.f32.mrf.mxu1 }
 0x871   :  { %v4201_v18 = vadd.f32 %v4158_v3, %v4051_v2  ;;  %v4225_v2 = vadd.f32 %v7560_v29, %v4178_v31  ;;  %v4071_v3 = vadd.f32 %v4070_v62, %v4009_v47  ;;  %v7266_v29 = vld [vmem:[%s14690_s3 + $0x2a0] sm:$0xff]  ;;  %v7263_v47 = vld [vmem:[%s14690_s3 + $0x288] sm:$0xff]  ;;  %v7260_v31 = vld [vmem:[%s14690_s3 + $0x270] sm:$0xff] }
 0x872   :  { %v7257_v62 = vld [vmem:[%s14690_s3 + $0x258] sm:$0xff] }
 0x873   :  { %v7125_v39 = vmul.f32 -1.442695, %v4201_v18 }
 0x875   :  { %v7735_v10 = vpop.eup %7734  ;;  %7736 = vpow2.f32 %v7125_v39 }
 0x876   :  { %v4185_v19 = vadd.f32 1.0, %v7735_v10 }
 0x878   :  { %7738 = vrcp.f32 %v4185_v19  ;;  %v4197_v45 = vand.u32 2147483648, %v4185_v19  ;;  %v4195_v33 = vand.u32 2147483647, %v4185_v19  ;;  %vm4191_vm2 = vweird.f32 %v4185_v19 }
 0x87a   :  { %v4198_v22 = vor.u32 1.1754944e-38, %v4197_v45  ;;  %vm4196_vm4 = vcmp.eq.f32.partialorder %v4195_v33, 8.507059e+37  ;;  %v4713_v45 = vld [vmem:[%s14693_s2 + $0x158] sm:$0xff]  ;;  %v4710_v33 = vld [vmem:[%s14693_s2 + $0x140] sm:$0xff] }
 0x87b   :  { %v7737_v24 = vpop.eup %7736 }
 0x87c   :  { %v4205_v50 = vadd.f32 1.0, %v7737_v24  ;;  %v4533_v24 = vld [vmem:[%s14690_s3 + $0xb8] sm:$0xff] }
 0x87e   :  { %v7739_v30 = vpop.eup %7738  ;;  %7740 = vrcp.f32 %v4205_v50  ;;  %v4217_v34 = vand.u32 2147483648, %v4205_v50  ;;  %v4215_v59 = vand.u32 2147483647, %v4205_v50  ;;  %vm4211_vm6 = vweird.f32 %v4205_v50 }
 0x87f   :  { %v4187_v11 = vmul.f32 %v7739_v30, %v4185_v19  ;;  %vm4192_vm1 = vweird.f32 %v7739_v30 }
 0x880   :  { %vm4193_vm3 = vmor %vm4191_vm2, %vm4192_vm1  ;;  %v4218_v44 = vor.u32 1.1754944e-38, %v4217_v34  ;;  %vm4216_vm8 = vcmp.eq.f32.partialorder %v4215_v59, 8.507059e+37  ;;  %v4715_v34 = vld [vmem:[%s14693_s2 + $0x168] sm:$0xff]  ;;  %v4712_v59 = vld [vmem:[%s14693_s2 + $0x150] sm:$0xff] }
 0x881   :  { %v4188_v51 = vsub.f32 1.0, %v4187_v11  ;;  %v4512_v11 = vld [vmem:[%s14690_s3 + $0x10] sm:$0xff] }
 0x883   :  { %v4189_v32 = vmul.f32 %v7739_v30, %v4188_v51  ;;  %v4716_v51 = vld [vmem:[%s14693_s2 + $0x170] sm:$0xff] }
 0x884   :  { %v7741_v58 = vpop.eup %7740 }
 0x885   :  { %v4207_v12 = vmul.f32 %v7741_v58, %v4205_v50  ;;  %v4190_v26 = vadd.f32 %v7739_v30, %v4189_v32  ;;  %vm4212_vm5 = vweird.f32 %v7741_v58  ;;  %v4524_v50 = vld [vmem:[%s14690_s3 + $0x70] sm:$0xff]  ;;  %v7269_v32 = vld [vmem:[%s14690_s3 + $0x2b8] sm:$0xff] }
 0x886   :  { %vm4213_vm7 = vmor %vm4211_vm6, %vm4212_vm5 }
 0x887   :  { %v4208_v4 = vsub.f32 1.0, %v4207_v12  ;;  %v4194_v35 = vsel %vm4193_vm3, %v7739_v30, %v4190_v26  ;;  %v4515_v30 = vld [vmem:[%s14690_s3 + $0x28] sm:$0xff]  ;;  %v7254_v12 = vld [vmem:[%s14690_s3 + $0x240] sm:$0xff] }
 0x888   :  { %v4199_v16 = vsel %vm4196_vm4, %v4198_v22, %v4194_v35  ;;  %v7251_v26 = vld [vmem:[%s14690_s3 + $0x228] sm:$0xff]  ;;  %v7248_v22 = vld [vmem:[%s14690_s3 + $0x210] sm:$0xff]  ;;  %v7242_v35 = vld [vmem:[%s14690_s3 + $0x1e0] sm:$0xff] }
 0x889   :  { %v4209_v7 = vmul.f32 %v7741_v58, %v4208_v4  ;;  %v4226_v18 = vmul.f32 %v4225_v2, %v4199_v16  ;;  %v7245_v4 = vld [vmem:[%s14690_s3 + $0x1f8] sm:$0xff]  ;;  %v7239_v2 = vld [vmem:[%s14690_s3 + $0x1c8] sm:$0xff] }
 0x88a   :  { %v7233_v16 = vld [vmem:[%s14690_s3 + $0x198] sm:$0xff] }
 0x88b   :  { %v4210_v56 = vadd.f32 %v7741_v58, %v4209_v7  ;;  %v4227_v48 = vadd.f32 %v4226_v18, %v4071_v3  ;;  %v7236_v3 = vld [vmem:[%s14690_s3 + $0x1b0] sm:$0xff]  ;;  %v7230_v7 = vld [vmem:[%s14690_s3 + $0x180] sm:$0xff] }
 0x88c   :  { %v4704_v18 = vld [vmem:[%s14693_s2 + $0x110] sm:$0xff] }
 0x88d   :  { %v4214_v39 = vsel %vm4213_vm7, %v7741_v58, %v4210_v56  ;;  %7742 = vtanh.f32 %v4227_v48  ;;  %v4707_v58 = vld [vmem:[%s14693_s2 + $0x128] sm:$0xff]  ;;  %v4701_v56 = vld [vmem:[%s14693_s2 + $0xf8] sm:$0xff] }
 0x88e   :  { %v4219_v17 = vsel %vm4216_vm8, %v4218_v44, %v4214_v39  ;;  %v4709_v48 = vld [vmem:[%s14693_s2 + $0x138] sm:$0xff]  ;;  %v4698_v44 = vld [vmem:[%s14693_s2 + $0xe0] sm:$0xff] }
 0x88f   :  { %v4229_v41 = vsub.f32 1.0, %v4219_v17  ;;  %v4231_v19 = vmul.f32 %v4219_v17, %v12176_v55  ;;  %v4551_v55 = vld [vmem:[%s14690_s3 + $0x148] sm:$0xff]  ;;  %v4706_v39 = vld [vmem:[%s14693_s2 + $0x120] sm:$0xff] }
 0x890   :  { %v4695_v17 = vld [vmem:[%s14693_s2 + $0xc8] sm:$0xff] }
 0x893   :  { %v7743_v1 = vpop.eup %7742 }
 0x894   :  { %v4230_v10 = vmul.f32 %v7743_v1, %v4229_v41  ;;  %v4703_v41 = vld [vmem:[%s14693_s2 + $0x108] sm:$0xff]  ;;  %v4692_v1 = vld [vmem:[%s14693_s2 + $0xb0] sm:$0xff] }
 0x896   :  { %v12978_v25 = vadd.f32 %v4231_v19, %v4230_v10  ;;  %v4700_v10 = vld [vmem:[%s14693_s2 + $0xf0] sm:$0xff]  ;;  %v4689_v19 = vld [vmem:[%s14693_s2 + $0x98] sm:$0xff] }
 0x898   :  { %4305 = vmatmul.f32.vlgmr.msrb.gmra.mxu2 %v12978_v25  ;;  %4325 = vmatmul.f32.vlgmr.msra.gmra.mxu3 %v12978_v25 }
 0x899   :  { %4345 = vmatmul.f32.vlgmr.msra.gmra.mxu0 %v12978_v25  ;;  %4598 = vmatpush.msrb.mxu2 %v4557_v5  ;;  %v4697_v5 = vld [vmem:[%s14693_s2 + $0xd8] sm:$0xff] }
 0x89a   :  { %4746 = vmatpush.msra.mxu0 %v4716_v51  ;;  %4726 = vmatpush.msra.mxu3 %v4715_v34  ;;  %v7274_v51 = vld [vmem:[%s14690_s3 + $0x2e0] sm:$0xff] }
 0x89b   :  { %4599 = vmatpush.msrb.mxu2 %v4554_v46  ;;  %v4686_v46 = vld [vmem:[%s14693_s2 + $0x80] sm:$0xff] }
 0x89c   :  { %4747 = vmatpush.msra.mxu0 %v4713_v45  ;;  %4727 = vmatpush.msra.mxu3 %v4712_v59  ;;  %v179_v45 = vadd.f32 %v8485_v14, %v8483_v13  ;;  %v4673_v14 = vld [vmem:[%s14693_s2 + $0x18] sm:$0xff]  ;;  %v7270_v59 = vld [vmem:[%s14690_s3 + $0x2c0] sm:$0xff] }
 0x89d   :  { %4600 = vmatpush.msrb.mxu2 %v4551_v55  ;;  %v4694_v55 = vld [vmem:[%s14693_s2 + $0xc0] sm:$0xff] }
 0x89e   :  { %4748 = vmatpush.msra.mxu0 %v4710_v33  ;;  %4728 = vmatpush.msra.mxu3 %v4709_v48  ;;  %v4711_v33 = vld [vmem:[%s14693_s2 + $0x148] sm:$0xff] }
 0x89f   :  { %4601 = vmatpush.msrb.mxu2 %v4548_v9  ;;  %v4683_v9 = vld [vmem:[%s14693_s2 + $0x68] sm:$0xff] }
 0x8a0   :  { %4433 = vmatmul.f32.vlgmr.msra.gmra.mxu2 %v12626_v60  ;;  %4453 = vmatmul.f32.vlgmr.msrb.gmra.mxu3 %v12626_v60 }
 0x8a1   :  { %4574 = vmatmul.f32.vlgmr.msrb.gmra.mxu0 %v12558_v8  ;;  %4602 = vmatpush.msrb.mxu2 %v4545_v15  ;;  %v4691_v15 = vld [vmem:[%s14693_s2 + $0xa8] sm:$0xff] }
 0x8a2   :  { %4749 = vmatpush.msra.mxu0 %v4707_v58  ;;  %4729 = vmatpush.msra.mxu3 %v4706_v39  ;;  %v7267_v39 = vld [vmem:[%s14690_s3 + $0x2a8] sm:$0xff] }
 0x8a3   :  { %4603 = vmatpush.msrb.mxu2 %v4542_v36  ;;  %v4680_v36 = vld [vmem:[%s14693_s2 + $0x50] sm:$0xff] }
 0x8a4   :  { %4750 = vmatpush.msra.mxu0 %v4704_v18  ;;  %4730 = vmatpush.msra.mxu3 %v4703_v41  ;;  %v4699_v18 = vld [vmem:[%s14693_s2 + $0xe8] sm:$0xff]  ;;  %v138_v41 = vadd.f32 %v8448_v63, %v8297_v27  ;;  %v4690_v63 = vld [vmem:[%s14693_s2 + $0xa0] sm:$0xff] }
 0x8a5   :  { %4604 = vmatpush.msrb.mxu2 %v4539_v23  ;;  %v13150_v23 = vpop.f32.mrf.mxu1 }
 0x8a6   :  { %4751 = vmatpush.msra.mxu0 %v4701_v56  ;;  %4731 = vmatpush.msra.mxu3 %v4700_v10  ;;  %v7259_v56 = vld [vmem:[%s14690_s3 + $0x268] sm:$0xff] }
 0x8a7   :  { %4605 = vmatpush.msrb.mxu2 %v4536_v49  ;;  %v4688_v49 = vld [vmem:[%s14693_s2 + $0x90] sm:$0xff] }
 0x8a8   :  { %4752 = vmatpush.msra.mxu0 %v4698_v44  ;;  %4732 = vmatpush.msra.mxu3 %v4697_v5  ;;  %v4696_v44 = vld [vmem:[%s14693_s2 + $0xd0] sm:$0xff] }
 0x8a9   :  { %4606 = vmatpush.msrb.mxu2 %v4533_v24  ;;  %v4677_v24 = vld [vmem:[%s14693_s2 + $0x38] sm:$0xff]  ;;  %v7264_v5 = vld [vmem:[%s14690_s3 + $0x290] sm:$0xff] }
 0x8aa   :  { %4753 = vmatpush.msra.mxu0 %v4695_v17  ;;  %4733 = vmatpush.msra.mxu3 %v4694_v55  ;;  %v7256_v17 = vld [vmem:[%s14690_s3 + $0x250] sm:$0xff] }
 0x8ab   :  { %4607 = vmatpush.msrb.mxu2 %v4530_v57  ;;  %v4685_v57 = vld [vmem:[%s14693_s2 + $0x78] sm:$0xff] }
 0x8ac   :  { %4754 = vmatpush.msra.mxu0 %v4692_v1  ;;  %4734 = vmatpush.msra.mxu3 %v4691_v15  ;;  %v7250_v15 = vld [vmem:[%s14690_s3 + $0x220] sm:$0xff] }
 0x8ad   :  { %4608 = vmatpush.msrb.mxu2 %v4527_v37  ;;  %v4674_v37 = vld [vmem:[%s14693_s2 + $0x20] sm:$0xff] }
 0x8ae   :  { %4755 = vmatpush.msra.mxu0 %v4689_v19  ;;  %4735 = vmatpush.msra.mxu3 %v4688_v49  ;;  %v4693_v19 = vld [vmem:[%s14693_s2 + $0xb8] sm:$0xff] }
 0x8af   :  { %4609 = vmatpush.msrb.mxu2 %v4524_v50  ;;  %v4682_v50 = vld [vmem:[%s14693_s2 + $0x60] sm:$0xff] }
 0x8b0   :  { %4756 = vmatpush.msra.mxu0 %v4686_v46  ;;  %4736 = vmatpush.msra.mxu3 %v4685_v57  ;;  %v7253_v46 = vld [vmem:[%s14690_s3 + $0x238] sm:$0xff]  ;;  %v4687_v57 = vld [vmem:[%s14693_s2 + $0x88] sm:$0xff] }
 0x8b1   :  { %4610 = vmatpush.msrb.mxu2 %v4521_v54  ;;  %v4671_v54 = vld [vmem:[%s14693_s2 + $0x8] sm:$0xff] }
 0x8b2   :  { %4757 = vmatpush.msra.mxu0 %v4683_v9  ;;  %4737 = vmatpush.msra.mxu3 %v4682_v50  ;;  %v7261_v9 = vld [vmem:[%s14690_s3 + $0x278] sm:$0xff]  ;;  %v7247_v50 = vld [vmem:[%s14690_s3 + $0x208] sm:$0xff] }
 0x8b3   :  { %4611 = vmatpush.msrb.mxu2 %v4518_v21  ;;  %v4717_v21 = vld [vmem:[%s14693_s2 + $0x178] sm:$0xff] }
 0x8b4   :  { %4758 = vmatpush.msra.mxu0 %v4680_v36  ;;  %4766 = vmatpush.msrb.mxu1 %v4717_v21  ;;  %v7255_v21 = vld [vmem:[%s14690_s3 + $0x248] sm:$0xff] }
 0x8b5   :  { %4612 = vmatpush.msrb.mxu2 %v4515_v30  ;;  %v7277_v30 = vld [vmem:[%s14690_s3 + $0x2f8] sm:$0xff] }
 0x8b6   :  { %4759 = vmatpush.msra.mxu0 %v4677_v24 }
 0x8b7   :  { %4613 = vmatpush.msrb.mxu2 %v4512_v11  ;;  %v4679_v11 = vld [vmem:[%s14693_s2 + $0x48] sm:$0xff] }
 0x8b8   :  { %4614 = vmatmul.f32.vlgmr.msrb.gmra.mxu2 %v12558_v8  ;;  %4760 = vmatpush.msra.mxu0 %v4674_v37  ;;  %v7258_v37 = vld [vmem:[%s14690_s3 + $0x260] sm:$0xff] }
 0x8b9   :  { %4834 = vmatpush.msra.mxu2 %v7275_v42  ;;  %v4595_v42 = vpop.f32.mrf.mxu1  ;;  %4738 = vmatpush.msra.mxu3 %v4679_v11 }
 0x8ba   :  { %4761 = vmatpush.msra.mxu0 %v4671_v54  ;;  %v4638_v58 = vadd.f32 %v4595_v42, %v179_v45  ;;  %v4681_v42 = vld [vmem:[%s14693_s2 + $0x58] sm:$0xff]  ;;  %v4678_v45 = vld [vmem:[%s14693_s2 + $0x40] sm:$0xff] }
 0x8bb   :  { %4835 = vmatpush.msra.mxu2 %v7272_v28  ;;  %v4714_v28 = vld [vmem:[%s14693_s2 + $0x160] sm:$0xff] }
 0x8bc   :  { %4874 = vmatpush.msrb.mxu0 %v7277_v30  ;;  %4767 = vmatpush.msrb.mxu1 %v4714_v28  ;;  %v7244_v30 = vld [vmem:[%s14690_s3 + $0x1f0] sm:$0xff] }
 0x8bd   :  { %4836 = vmatpush.msra.mxu2 %v7269_v32  ;;  %v4676_v32 = vld [vmem:[%s14693_s2 + $0x30] sm:$0xff] }
 0x8be   :  { %4875 = vmatpush.msrb.mxu0 %v7274_v51  ;;  %4739 = vmatpush.msra.mxu3 %v4676_v32  ;;  %v7252_v28 = vld [vmem:[%s14690_s3 + $0x230] sm:$0xff]  ;;  %v7241_v51 = vld [vmem:[%s14690_s3 + $0x1d8] sm:$0xff] }
 0x8bf   :  { %4837 = vmatpush.msra.mxu2 %v7266_v29  ;;  %v7271_v29 = vld [vmem:[%s14690_s3 + $0x2c8] sm:$0xff]  ;;  %4768 = vmatpush.msrb.mxu1 %v4711_v33  ;;  %v7249_v32 = vld [vmem:[%s14690_s3 + $0x218] sm:$0xff]  ;;  %v7238_v33 = vld [vmem:[%s14690_s3 + $0x1c0] sm:$0xff] }
 0x8c0   :  { %4876 = vmatpush.msrb.mxu0 %v7271_v29  ;;  %4740 = vmatpush.msra.mxu3 %v4673_v14  ;;  %v4675_v14 = vld [vmem:[%s14693_s2 + $0x28] sm:$0xff] }
 0x8c1   :  { %4838 = vmatpush.msra.mxu2 %v7263_v47  ;;  %v4708_v47 = vld [vmem:[%s14693_s2 + $0x130] sm:$0xff] }
 0x8c2   :  { %4769 = vmatpush.msrb.mxu1 %v4708_v47  ;;  %v7246_v47 = vld [vmem:[%s14690_s3 + $0x200] sm:$0xff] }
 0x8c3   :  { %4839 = vmatpush.msra.mxu2 %v7260_v31  ;;  %v7268_v31 = vld [vmem:[%s14690_s3 + $0x2b0] sm:$0xff] }
 0x8c4   :  { %4877 = vmatpush.msrb.mxu0 %v7268_v31  ;;  %v7235_v31 = vld [vmem:[%s14690_s3 + $0x1a8] sm:$0xff] }
 0x8c5   :  { %4840 = vmatpush.msra.mxu2 %v7257_v62  ;;  %v4670_v62 = vld [vmem:[%s14693_s2] sm:$0xff] }
 0x8c6   :  { %4741 = vmatpush.msra.mxu3 %v4670_v62 }
 0x8c7   :  { %4841 = vmatpush.msra.mxu2 %v7254_v12 }
 0x8c9   :  { %4842 = vmatpush.msra.mxu2 %v7251_v26  ;;  %v4705_v26 = vld [vmem:[%s14693_s2 + $0x118] sm:$0xff] }
 0x8ca   :  { %4770 = vmatpush.msrb.mxu1 %v4705_v26  ;;  %v4672_v26 = vld [vmem:[%s14693_s2 + $0x10] sm:$0xff] }
 0x8cb   :  { %4843 = vmatpush.msra.mxu2 %v7248_v22  ;;  %v7276_v22 = vld [vmem:[%s14690_s3 + $0x2f0] sm:$0xff] }
 0x8cc   :  { %4854 = vmatpush.msrb.mxu3 %v7276_v22  ;;  %v7243_v22 = vld [vmem:[%s14690_s3 + $0x1e8] sm:$0xff] }
 0x8cd   :  { %4844 = vmatpush.msra.mxu2 %v7245_v4  ;;  %v7265_v4 = vld [vmem:[%s14690_s3 + $0x298] sm:$0xff] }
 0x8ce   :  { %4878 = vmatpush.msrb.mxu0 %v7265_v4  ;;  %v7232_v4 = vld [vmem:[%s14690_s3 + $0x190] sm:$0xff] }
 0x8cf   :  { %4845 = vmatpush.msra.mxu2 %v7242_v35  ;;  %v7228_v35 = vmul.f32 -1.442695, %v4638_v58 }
 0x8d1   :  { %4846 = vmatpush.msra.mxu2 %v7239_v2  ;;  %v4702_v2 = vld [vmem:[%s14693_s2 + $0x100] sm:$0xff]  ;;  %7744 = vpow2.f32 %v7228_v35 }
 0x8d2   :  { %4771 = vmatpush.msrb.mxu1 %v4702_v2 }
 0x8d3   :  { %4847 = vmatpush.msra.mxu2 %v7236_v3  ;;  %v7273_v3 = vld [vmem:[%s14690_s3 + $0x2d8] sm:$0xff] }
 0x8d4   :  { %4855 = vmatpush.msrb.mxu3 %v7273_v3  ;;  %4772 = vmatpush.msrb.mxu1 %v4699_v18 }
 0x8d5   :  { %4848 = vmatpush.msra.mxu2 %v7233_v16  ;;  %v7262_v16 = vld [vmem:[%s14690_s3 + $0x280] sm:$0xff] }
 0x8d6   :  { %4879 = vmatpush.msrb.mxu0 %v7262_v16  ;;  %4856 = vmatpush.msrb.mxu3 %v7270_v59  ;;  %v7240_v16 = vld [vmem:[%s14690_s3 + $0x1d0] sm:$0xff]  ;;  %v7237_v59 = vld [vmem:[%s14690_s3 + $0x1b8] sm:$0xff] }
 0x8d7   :  { %4849 = vmatpush.msra.mxu2 %v7230_v7  ;;  %v13231_v7 = vld [vmem:[%s14694_s4 + $0x6] sm:$0x7]  ;;  %4773 = vmatpush.msrb.mxu1 %v4696_v44  ;;  %v7745_v36 = vpop.eup %7744 }
 0x8d8   :  { %4850 = vmatmul.f32.vlgmr.msra.gmra.mxu2 %v12978_v25  ;;  %v4283_v34 = vperm.slane %v13231_v7, 0  ;;  %4880 = vmatpush.msrb.mxu0 %v7259_v56  ;;  %v13282_v54 = vadd.f32 1.0, %v7745_v36  ;;  %v4284_v62 = vperm.slane %v13231_v7, 1 }
 0x8d9   :  { %4857 = vmatpush.msrb.mxu3 %v7267_v39  ;;  %4774 = vmatpush.msrb.mxu1 %v4693_v19  ;;  %v7234_v39 = vld [vmem:[%s14690_s3 + $0x1a0] sm:$0xff] }
 0x8da   :  { %4881 = vmatpush.msrb.mxu0 %v7256_v17  ;;  %vm4648_vm14 = vweird.f32 %v13282_v54 }
 0x8db   :  { %4858 = vmatpush.msrb.mxu3 %v7264_v5  ;;  %4775 = vmatpush.msrb.mxu1 %v4690_v63 }
 0x8dc   :  { %4882 = vmatpush.msrb.mxu0 %v7253_v46 }
 0x8dd   :  { %4859 = vmatpush.msrb.mxu3 %v7261_v9  ;;  %4776 = vmatpush.msrb.mxu1 %v4687_v57  ;;  %v7562_v9 = vld [vmem:[%s14692_s5] ss:$0 sm:$0xff] }
 0x8de   :  { %4883 = vmatpush.msrb.mxu0 %v7250_v15 }
 0x8df   :  { %4860 = vmatpush.msrb.mxu3 %v7258_v37 }
 0x8e0   :  { %4884 = vmatpush.msrb.mxu0 %v7247_v50 }
 0x8e1   :  { %4861 = vmatpush.msrb.mxu3 %v7255_v21 }
 0x8e2   :  { %4885 = vmatpush.msrb.mxu0 %v7244_v30  ;;  %v220_v30 = vadd.f32 %v8774_v0, %v8600_v6 }
 0x8e3   :  { %4862 = vmatpush.msrb.mxu3 %v7252_v28 }
 0x8e4   :  { %4886 = vmatpush.msrb.mxu0 %v7241_v51  ;;  %v4652_v51 = vand.u32 2147483647, %v13282_v54 }
 0x8e5   :  { %4863 = vmatpush.msrb.mxu3 %v7249_v32 }
 0x8e6   :  { %4887 = vmatpush.msrb.mxu0 %v7238_v33  ;;  %vm4653_vm0 = vcmp.eq.f32.partialorder %v4652_v51, 8.507059e+37  ;;  %v7336_v51 = vld [vmem:[%s14690_s3 + $0x330] sm:$0xff] }
 0x8e7   :  { %4864 = vmatpush.msrb.mxu3 %v7246_v47 }
 0x8e8   :  { %4888 = vmatpush.msrb.mxu0 %v7235_v31 }
 0x8e9   :  { %4865 = vmatpush.msrb.mxu3 %v7243_v22 }
 0x8ea   :  { %4889 = vmatpush.msrb.mxu0 %v7232_v4  ;;  %v7375_v4 = vld [vmem:[%s14690_s3 + $0x468] sm:$0xff] }
 0x8eb   :  { %4866 = vmatpush.msrb.mxu3 %v7240_v16  ;;  %v7372_v16 = vld [vmem:[%s14690_s3 + $0x450] sm:$0xff] }
 0x8ed   :  { %4867 = vmatpush.msrb.mxu3 %v7237_v59 }
 0x8ef   :  { %4868 = vmatpush.msrb.mxu3 %v7234_v39  ;;  %v7366_v39 = vld [vmem:[%s14690_s3 + $0x420] sm:$0xff] }
 0x916   :  { %v13208_v12 = vpop.f32.mrf.mxu0 }
 0x91b   :  { %v4306_v48 = vpop.f32.mrf.mxu2  ;;  %v4326_v35 = vpop.f32.mrf.mxu3 }
 0x91c   :  { %v4307_v1 = vadd.f32 %v4306_v48, %v4283_v34  ;;  %v4327_v34 = vadd.f32 %v4326_v35, %v4284_v62 }
 0x91e   :  { %v4575_v10 = vpop.f32.mrf.mxu0  ;;  %v4457_v24 = vadd.f32 %v13150_v23, %v4307_v1  ;;  %v4684_v23 = vld [vmem:[%s14693_s2 + $0x70] sm:$0xff]  ;;  %v7231_v1 = vld [vmem:[%s14690_s3 + $0x188] sm:$0xff] }
 0x91f   :  { %v4618_v55 = vadd.f32 %v4575_v10, %v138_v41  ;;  %4777 = vmatpush.msrb.mxu1 %v4684_v23  ;;  %4869 = vmatpush.msrb.mxu3 %v7231_v1  ;;  %v7363_v1 = vld [vmem:[%s14690_s3 + $0x408] sm:$0xff] }
 0x920   :  { %v7224_v11 = vmul.f32 -1.442695, %v4457_v24 }
 0x921   :  { %v7227_v49 = vmul.f32 -1.442695, %v4618_v55  ;;  %4778 = vmatpush.msrb.mxu1 %v4681_v42 }
 0x923   :  { %7746 = vpow2.f32 %v7227_v49  ;;  %4779 = vmatpush.msrb.mxu1 %v4678_v45  ;;  %v4434_v3 = vpop.f32.mrf.mxu2 }
 0x924   :  { %7748 = vrcp.f32 %v13282_v54  ;;  %v4477_v48 = vadd.f32 %v4434_v3, %v4327_v34 }
 0x925   :  { %7750 = vpow2.f32 %v7224_v11  ;;  %4780 = vmatpush.msrb.mxu1 %v4675_v14  ;;  %v4654_v11 = vand.u32 2147483648, %v13282_v54 }
 0x926   :  { %v7225_v19 = vmul.f32 -1.442695, %v4477_v48  ;;  %v4454_v48 = vpop.f32.mrf.mxu3 }
 0x927   :  { %4781 = vmatpush.msrb.mxu1 %v4672_v26 }
 0x929   :  { %v7747_v29 = vpop.eup %7746 }
 0x92a   :  { %v4622_v58 = vadd.f32 1.0, %v7747_v29  ;;  %v7749_v2 = vpop.eup %7748  ;;  %v4655_v29 = vor.u32 1.1754944e-38, %v4654_v11  ;;  %v7339_v11 = vld [vmem:[%s14690_s3 + $0x348] sm:$0xff] }
 0x92b   :  { %v7751_v18 = vpop.eup %7750  ;;  %v4644_v56 = vmul.f32 %v7749_v2, %v13282_v54  ;;  %vm4649_vm13 = vweird.f32 %v7749_v2 }
 0x92c   :  { %7752 = vrcp.f32 %v4622_v58  ;;  %v13341_v17 = vadd.f32 1.0, %v7751_v18  ;;  %v4634_v46 = vand.u32 2147483648, %v4622_v58  ;;  %v4632_v63 = vand.u32 2147483647, %v4622_v58  ;;  %vm4650_vm15 = vmor %vm4648_vm14, %vm4649_vm13  ;;  %v7369_v18 = vld [vmem:[%s14690_s3 + $0x438] sm:$0xff] }
 0x92d   :  { %v4645_v10 = vsub.f32 1.0, %v4644_v56  ;;  %vm4628_vm10 = vweird.f32 %v4622_v58  ;;  %v7561_v56 = vld [vmem:[%s14692_s5 + $0x2] ss:$0 sm:$0xff] }
 0x92e   :  { %7754 = vrcp.f32 %v13341_v17  ;;  %v4635_v49 = vor.u32 1.1754944e-38, %v4634_v46  ;;  %vm4633_vm12 = vcmp.eq.f32.partialorder %v4632_v63, 8.507059e+37  ;;  %v4473_v3 = vand.u32 2147483648, %v13341_v17  ;;  %v7357_v63 = vld [vmem:[%s14690_s3 + $0x3d8] sm:$0xff] }
 0x92f   :  { %v4646_v15 = vmul.f32 %v7749_v2, %v4645_v10  ;;  %7756 = vpow2.f32 %v7225_v19  ;;  %vm4467_vm2 = vweird.f32 %v13341_v17  ;;  %v4285_v10 = vperm.slane %v13231_v7, 2  ;;  %v7354_v7 = vld [vmem:[%s14690_s3 + $0x3c0] sm:$0xff] }
 0x930   :  { %v4501_v19 = vadd.f32 %v7561_v56, %v4454_v48  ;;  %v5233_v56 = vld [vmem:[%s14690_s3 + $0x50] sm:$0xff]  ;;  %v5230_v48 = vld [vmem:[%s14690_s3 + $0x38] sm:$0xff] }
 0x931   :  { %v4647_v21 = vadd.f32 %v7749_v2, %v4646_v15 }
 0x932   :  { %v7753_v44 = vpop.eup %7752 }
 0x933   :  { %v4624_v41 = vmul.f32 %v7753_v44, %v4622_v58  ;;  %vm4629_vm9 = vweird.f32 %v7753_v44  ;;  %v4651_v33 = vsel %vm4650_vm15, %v7749_v2, %v4647_v21  ;;  %v7342_v21 = vld [vmem:[%s14690_s3 + $0x360] sm:$0xff] }
 0x934   :  { %vm4630_vm11 = vmor %vm4628_vm10, %vm4629_vm9  ;;  %v7755_v23 = vpop.eup %7754  ;;  %v4656_v0 = vsel %vm4653_vm0, %v4655_v29, %v4651_v33  ;;  %v7330_v29 = vld [vmem:[%s14690_s3 + $0x300] sm:$0xff] }
 0x935   :  { %v4625_v5 = vsub.f32 1.0, %v4624_v41  ;;  %v7757_v28 = vpop.eup %7756  ;;  %v4463_v45 = vmul.f32 %v7755_v23, %v13341_v17  ;;  %v4666_v47 = vsub.f32 1.0, %v4656_v0  ;;  %v4668_v54 = vmul.f32 %v4656_v0, %v12558_v8  ;;  %v5266_v0 = vld [vmem:[%s14690_s3 + $0x158] sm:$0xff] }
 0x936   :  { %v13356_v58 = vadd.f32 1.0, %v7757_v28  ;;  %vm4468_vm1 = vweird.f32 %v7755_v23  ;;  %v4471_v8 = vand.u32 2147483647, %v13341_v17 }
 0x937   :  { %v4626_v55 = vmul.f32 %v7753_v44, %v4625_v5  ;;  %v4464_v14 = vsub.f32 1.0, %v4463_v45  ;;  %vm4469_vm3 = vmor %vm4467_vm2, %vm4468_vm1  ;;  %v7360_v5 = vld [vmem:[%s14690_s3 + $0x3f0] sm:$0xff] }
 0x938   :  { %vm4472_vm4 = vcmp.eq.f32.partialorder %v4471_v8, 8.507059e+37  ;;  %vm4487_vm6 = vweird.f32 %v13356_v58  ;;  %v5245_v8 = vld [vmem:[%s14690_s3 + $0xb0] sm:$0xff] }
 0x939   :  { %v4627_v36 = vadd.f32 %v7753_v44, %v4626_v55  ;;  %v4465_v62 = vmul.f32 %v7755_v23, %v4464_v14  ;;  %v5269_v14 = vld [vmem:[%s14690_s3 + $0x170] sm:$0xff] }
 0x93b   :  { %v4615_v24 = vpop.f32.mrf.mxu2  ;;  %v4631_v57 = vsel %vm4630_vm11, %v7753_v44, %v4627_v36  ;;  %v4466_v2 = vadd.f32 %v7755_v23, %v4465_v62  ;;  %v4474_v44 = vor.u32 1.1754944e-38, %v4473_v3  ;;  %v5263_v62 = vld [vmem:[%s14690_s3 + $0x140] sm:$0xff] }
 0x93c   :  { %v4636_v37 = vsel %vm4633_vm12, %v4635_v49, %v4631_v57  ;;  %v4662_v50 = vadd.f32 %v7562_v9, %v4615_v24  ;;  %v4347_v9 = vadd.f32 %v13208_v12, %v4285_v10  ;;  %v7351_v49 = vld [vmem:[%s14690_s3 + $0x3a8] sm:$0xff]  ;;  %v4493_v24 = vand.u32 2147483648, %v13356_v58  ;;  %v7348_v57 = vld [vmem:[%s14690_s3 + $0x390] sm:$0xff]  ;;  %v5251_v3 = vld [vmem:[%s14690_s3 + $0xe0] sm:$0xff] }
 0x93d   :  { %v4470_v59 = vsel %vm4469_vm3, %v7755_v23, %v4466_v2  ;;  %v4491_v12 = vand.u32 2147483647, %v13356_v58  ;;  %v5254_v2 = vld [vmem:[%s14690_s3 + $0xf8] sm:$0xff]  ;;  %v7311_v10 = vld [vmem:[%s14693_s2 + $0x270] sm:$0xff] }
 0x93e   :  { %v4663_v42 = vmul.f32 %v4662_v50, %v4636_v37  ;;  %v4475_v41 = vsel %vm4472_vm4, %v4474_v44, %v4470_v59  ;;  %v7345_v50 = vld [vmem:[%s14690_s3 + $0x378] sm:$0xff]  ;;  %v4494_v23 = vor.u32 1.1754944e-38, %v4493_v24  ;;  %v5236_v59 = vld [vmem:[%s14690_s3 + $0x68] sm:$0xff]  ;;  %v5227_v44 = vld [vmem:[%s14690_s3 + $0x20] sm:$0xff] }
 0x93f   :  { %v4502_v46 = vmul.f32 %v4501_v19, %v4475_v41  ;;  %vm4492_vm8 = vcmp.eq.f32.partialorder %v4491_v12, 8.507059e+37  ;;  %v7327_v41 = vld [vmem:[%s14693_s2 + $0x2f0] sm:$0xff]  ;;  %v7324_v19 = vld [vmem:[%s14693_s2 + $0x2d8] sm:$0xff] }
 0x940   :  { %v4664_v32 = vadd.f32 %v4663_v42, %v220_v30  ;;  %5022 = vmatpush.msrb.mxu2 %v7327_v41  ;;  %v7316_v24 = vld [vmem:[%s14693_s2 + $0x298] sm:$0xff]  ;;  %v7299_v12 = vld [vmem:[%s14693_s2 + $0x210] sm:$0xff]  ;;  %v13648_v41 = vld [vmem:[%s14694_s4 + $0x3] sm:$0x7] }
 0x941   :  { %v4503_v15 = vadd.f32 %v4502_v46, %v4347_v9  ;;  %v7308_v46 = vld [vmem:[%s14693_s2 + $0x258] sm:$0xff]  ;;  %v7305_v9 = vld [vmem:[%s14693_s2 + $0x240] sm:$0xff] }
 0x942   :  { %7758 = vtanh.f32 %v4664_v32  ;;  %v7333_v32 = vld [vmem:[%s14690_s3 + $0x318] sm:$0xff]  ;;  %5023 = vmatpush.msrb.mxu2 %v7324_v19  ;;  %v5265_v19 = vld [vmem:[%s14690_s3 + $0x150] sm:$0xff] }
 0x943   :  { %7760 = vrcp.f32 %v13356_v58 }
 0x944   :  { %7762 = vtanh.f32 %v4503_v15  ;;  %v7319_v15 = vld [vmem:[%s14693_s2 + $0x2b0] sm:$0xff] }
 0x948   :  { %v7759_v31 = vpop.eup %7758 }
 0x949   :  { %v4667_v26 = vmul.f32 %v7759_v31, %v4666_v47  ;;  %v7761_v35 = vpop.eup %7760  ;;  %v7326_v47 = vld [vmem:[%s14693_s2 + $0x2e8] sm:$0xff]  ;;  %v7323_v31 = vld [vmem:[%s14693_s2 + $0x2d0] sm:$0xff] }
 0x94a   :  { %v4483_v34 = vmul.f32 %v7761_v35, %v13356_v58  ;;  %vm4488_vm5 = vweird.f32 %v7761_v35  ;;  %v7763_v42 = vpop.eup %7762  ;;  %5002 = vmatpush.msra.mxu1 %v7326_v47  ;;  %v7298_v47 = vld [vmem:[%s14693_s2 + $0x208] sm:$0xff] }
 0x94b   :  { %v13360_v22 = vadd.f32 %v4668_v54, %v4667_v26  ;;  %vm4489_vm7 = vmor %vm4487_vm6, %vm4488_vm5  ;;  %v7320_v26 = vld [vmem:[%s14693_s2 + $0x2b8] sm:$0xff]  ;;  %v5260_v54 = vld [vmem:[%s14690_s3 + $0x128] sm:$0xff] }
 0x94c   :  { %v4484_v17 = vsub.f32 1.0, %v4483_v34  ;;  %5003 = vmatpush.msra.mxu1 %v7323_v31  ;;  %v5242_v34 = vld [vmem:[%s14690_s3 + $0x98] sm:$0xff]  ;;  %v7281_v31 = vld [vmem:[%s14693_s2 + $0x180] sm:$0xff] }
 0x94d   :  { %4742 = vmatmul.f32.vlgmr.msra.gmra.mxu3 %v13360_v22  ;;  %4762 = vmatmul.f32.vlgmr.msra.gmra.mxu0 %v13360_v22 }
 0x94e   :  { %4782 = vmatmul.f32.vlgmr.msrb.gmra.mxu1 %v13360_v22  ;;  %5110 = vmatpush.msra.mxu0 %v7375_v4  ;;  %v4485_v55 = vmul.f32 %v7761_v35, %v4484_v17  ;;  %v7317_v4 = vld [vmem:[%s14693_s2 + $0x2a0] sm:$0xff]  ;;  %v7314_v17 = vld [vmem:[%s14693_s2 + $0x288] sm:$0xff] }
 0x94f   :  { %5004 = vmatpush.msra.mxu1 %v7320_v26  ;;  %v7295_v26 = vld [vmem:[%s14693_s2 + $0x1f0] sm:$0xff] }
 0x950   :  { %5111 = vmatpush.msra.mxu0 %v7372_v16  ;;  %v4486_v36 = vadd.f32 %v7761_v35, %v4485_v55  ;;  %v5248_v16 = vld [vmem:[%s14690_s3 + $0xc8] sm:$0xff]  ;;  %v7321_v55 = vld [vmem:[%s14693_s2 + $0x2c0] sm:$0xff] }
 0x951   :  { %5005 = vmatpush.msra.mxu1 %v7317_v4  ;;  %5024 = vmatpush.msrb.mxu2 %v7321_v55  ;;  %v7291_v4 = vld [vmem:[%s14693_s2 + $0x1d0] sm:$0xff]  ;;  %v7371_v55 = vld [vmem:[%s14690_s3 + $0x448] sm:$0xff] }
 0x952   :  { %5112 = vmatpush.msra.mxu0 %v7369_v18  ;;  %v4490_v37 = vsel %vm4489_vm7, %v7761_v35, %v4486_v36  ;;  %v5257_v35 = vld [vmem:[%s14690_s3 + $0x110] sm:$0xff]  ;;  %v5239_v18 = vld [vmem:[%s14690_s3 + $0x80] sm:$0xff]  ;;  %v7302_v36 = vld [vmem:[%s14693_s2 + $0x228] sm:$0xff] }
 0x953   :  { %v4495_v30 = vsel %vm4492_vm8, %v4494_v23, %v4490_v37  ;;  %5006 = vmatpush.msra.mxu1 %v7314_v17  ;;  %v7313_v37 = vld [vmem:[%s14693_s2 + $0x280] sm:$0xff]  ;;  %v5268_v17 = vld [vmem:[%s14690_s3 + $0x168] sm:$0xff] }
 0x954   :  { %5113 = vmatpush.msra.mxu0 %v7366_v39  ;;  %v4505_v28 = vsub.f32 1.0, %v4495_v30  ;;  %v4507_v33 = vmul.f32 %v4495_v30, %v12626_v60  ;;  %v5224_v39 = vld [vmem:[%s14690_s3 + $0x8] sm:$0xff]  ;;  %v7309_v23 = vld [vmem:[%s14693_s2 + $0x260] sm:$0xff] }
 0x955   :  { %4870 = vmatmul.f32.vlgmr.msrb.gmra.mxu3 %v12978_v25  ;;  %4890 = vmatmul.f32.vlgmr.msrb.gmra.mxu0 %v12978_v25  ;;  %v7293_v30 = vld [vmem:[%s14693_s2 + $0x1e0] sm:$0xff] }
 0x956   :  { %5114 = vmatpush.msra.mxu0 %v7363_v1  ;;  %v4506_v45 = vmul.f32 %v7763_v42, %v4505_v28  ;;  %v7328_v1 = vld [vmem:[%s14693_s2 + $0x2f8] sm:$0xff]  ;;  %5007 = vmatpush.msra.mxu1 %v7311_v10  ;;  %v7307_v42 = vld [vmem:[%s14693_s2 + $0x250] sm:$0xff]  ;;  %v7290_v28 = vld [vmem:[%s14693_s2 + $0x1c8] sm:$0xff] }
 0x957   :  { %5042 = vmatpush.msra.mxu3 %v7328_v1  ;;  %v7361_v1 = vld [vmem:[%s14690_s3 + $0x3f8] sm:$0xff]  ;;  %v7374_v10 = vld [vmem:[%s14690_s3 + $0x460] sm:$0xff] }
 0x958   :  { %5115 = vmatpush.msra.mxu0 %v7360_v5  ;;  %v13428_v58 = vadd.f32 %v4507_v33, %v4506_v45  ;;  %v7325_v5 = vld [vmem:[%s14693_s2 + $0x2e0] sm:$0xff]  ;;  %5008 = vmatpush.msra.mxu1 %v7308_v46  ;;  %v7304_v45 = vld [vmem:[%s14693_s2 + $0x238] sm:$0xff] }
 0x959   :  { %5043 = vmatpush.msra.mxu3 %v7325_v5  ;;  %v7300_v33 = vld [vmem:[%s14693_s2 + $0x218] sm:$0xff]  ;;  %v4720_v5 = vperm.slane %v13648_v41, 0  ;;  %v7358_v46 = vld [vmem:[%s14690_s3 + $0x3e0] sm:$0xff] }
 0x95a   :  { %5116 = vmatpush.msra.mxu0 %v7357_v63  ;;  %v7322_v63 = vld [vmem:[%s14693_s2 + $0x2c8] sm:$0xff]  ;;  %5009 = vmatpush.msra.mxu1 %v7305_v9 }
 0x95b   :  { %5044 = vmatpush.msra.mxu3 %v7322_v63  ;;  %v5262_v63 = vld [vmem:[%s14690_s3 + $0x138] sm:$0xff] }
 0x95c   :  { %5117 = vmatpush.msra.mxu0 %v7354_v7  ;;  %v7318_v7 = vld [vmem:[%s14693_s2 + $0x2a8] sm:$0xff]  ;;  %5010 = vmatpush.msra.mxu1 %v7302_v36  ;;  %v5259_v36 = vld [vmem:[%s14690_s3 + $0x120] sm:$0xff] }
 0x95d   :  { %5025 = vmatpush.msrb.mxu2 %v7318_v7  ;;  %5045 = vmatpush.msra.mxu3 %v7319_v15  ;;  %v7355_v7 = vld [vmem:[%s14690_s3 + $0x3c8] sm:$0xff]  ;;  %v7368_v15 = vld [vmem:[%s14690_s3 + $0x430] sm:$0xff] }
 0x95e   :  { %5118 = vmatpush.msra.mxu0 %v7351_v49  ;;  %v7315_v49 = vld [vmem:[%s14693_s2 + $0x290] sm:$0xff]  ;;  %5011 = vmatpush.msra.mxu1 %v7299_v12 }
 0x95f   :  { %5026 = vmatpush.msrb.mxu2 %v7315_v49  ;;  %5046 = vmatpush.msra.mxu3 %v7316_v24  ;;  %v4851_v24 = vpop.f32.mrf.mxu2  ;;  %v7352_v12 = vld [vmem:[%s14690_s3 + $0x3b0] sm:$0xff] }
 0x960   :  { %5119 = vmatpush.msra.mxu0 %v7348_v57  ;;  %v7312_v57 = vld [vmem:[%s14693_s2 + $0x278] sm:$0xff] }
 0x961   :  { %5027 = vmatpush.msrb.mxu2 %v7312_v57  ;;  %5047 = vmatpush.msra.mxu3 %v7313_v37  ;;  %v7365_v57 = vld [vmem:[%s14690_s3 + $0x418] sm:$0xff]  ;;  %v5256_v37 = vld [vmem:[%s14690_s3 + $0x108] sm:$0xff] }
 0x962   :  { %5120 = vmatpush.msra.mxu0 %v7345_v50  ;;  %v7296_v50 = vld [vmem:[%s14693_s2 + $0x1f8] sm:$0xff] }
 0x963   :  { %5012 = vmatpush.msra.mxu1 %v7296_v50  ;;  %5028 = vmatpush.msrb.mxu2 %v7309_v23  ;;  %v4721_v50 = vperm.slane %v13648_v41, 1 }
 0x964   :  { %5121 = vmatpush.msra.mxu0 %v7342_v21  ;;  %v7310_v21 = vld [vmem:[%s14693_s2 + $0x268] sm:$0xff] }
 0x965   :  { %5048 = vmatpush.msra.mxu3 %v7310_v21  ;;  %5013 = vmatpush.msra.mxu1 %v7293_v30  ;;  %v7349_v30 = vld [vmem:[%s14690_s3 + $0x398] sm:$0xff] }
 0x966   :  { %5122 = vmatpush.msra.mxu0 %v7339_v11  ;;  %v7306_v11 = vld [vmem:[%s14693_s2 + $0x248] sm:$0xff] }
 0x967   :  { %5029 = vmatpush.msrb.mxu2 %v7306_v11  ;;  %5049 = vmatpush.msra.mxu3 %v7307_v42  ;;  %v7362_v11 = vld [vmem:[%s14690_s3 + $0x400] sm:$0xff]  ;;  %v5253_v42 = vld [vmem:[%s14690_s3 + $0xf0] sm:$0xff] }
 0x968   :  { %5123 = vmatpush.msra.mxu0 %v7336_v51  ;;  %v7303_v51 = vld [vmem:[%s14693_s2 + $0x230] sm:$0xff]  ;;  %5014 = vmatpush.msra.mxu1 %v7290_v28 }
 0x969   :  { %5030 = vmatpush.msrb.mxu2 %v7303_v51  ;;  %5050 = vmatpush.msra.mxu3 %v7304_v45  ;;  %v7346_v51 = vld [vmem:[%s14690_s3 + $0x380] sm:$0xff]  ;;  %v7359_v45 = vld [vmem:[%s14690_s3 + $0x3e8] sm:$0xff] }
 0x96a   :  { %5124 = vmatpush.msra.mxu0 %v7333_v32  ;;  %v7287_v32 = vld [vmem:[%s14693_s2 + $0x1b0] sm:$0xff] }
 0x96b   :  { %5015 = vmatpush.msra.mxu1 %v7287_v32  ;;  %5031 = vmatpush.msrb.mxu2 %v7300_v33  ;;  %v5250_v32 = vld [vmem:[%s14690_s3 + $0xd8] sm:$0xff] }
 0x96c   :  { %5125 = vmatpush.msra.mxu0 %v7330_v29  ;;  %v7301_v29 = vld [vmem:[%s14693_s2 + $0x220] sm:$0xff] }
 0x96d   :  { %5126 = vmatmul.f32.vlgmr.msra.gmra.mxu0 %v13428_v58  ;;  %5051 = vmatpush.msra.mxu3 %v7301_v29 }
 0x96e   :  { %5291 = vmatpush.msrb.mxu0 %v5269_v14  ;;  %v7284_v14 = vld [vmem:[%s14693_s2 + $0x198] sm:$0xff] }
 0x96f   :  { %5016 = vmatpush.msra.mxu1 %v7284_v14  ;;  %5052 = vmatpush.msra.mxu3 %v7298_v47  ;;  %v7343_v14 = vld [vmem:[%s14690_s3 + $0x368] sm:$0xff]  ;;  %v5247_v47 = vld [vmem:[%s14690_s3 + $0xc0] sm:$0xff] }
 0x970   :  { %5292 = vmatpush.msrb.mxu0 %v5266_v0  ;;  %v7297_v0 = vld [vmem:[%s14693_s2 + $0x200] sm:$0xff] }
 0x971   :  { %5032 = vmatpush.msrb.mxu2 %v7297_v0  ;;  %5017 = vmatpush.msra.mxu1 %v7281_v31  ;;  %v7356_v0 = vld [vmem:[%s14690_s3 + $0x3d0] sm:$0xff] }
 0x972   :  { %5293 = vmatpush.msrb.mxu0 %v5263_v62  ;;  %v7294_v62 = vld [vmem:[%s14693_s2 + $0x1e8] sm:$0xff]  ;;  %5053 = vmatpush.msra.mxu3 %v7295_v26  ;;  %v7353_v26 = vld [vmem:[%s14690_s3 + $0x3b8] sm:$0xff] }
 0x973   :  { %5033 = vmatpush.msrb.mxu2 %v7294_v62  ;;  %v7340_v62 = vld [vmem:[%s14690_s3 + $0x350] sm:$0xff] }
 0x974   :  { %5294 = vmatpush.msrb.mxu0 %v5260_v54  ;;  %v7376_v54 = vld [vmem:[%s14690_s3 + $0x470] sm:$0xff] }
 0x975   :  { %5130 = vmatpush.msrb.mxu1 %v7376_v54  ;;  %5034 = vmatpush.msrb.mxu2 %v7291_v4  ;;  %v5244_v54 = vld [vmem:[%s14690_s3 + $0xa8] sm:$0xff] }
 0x976   :  { %5295 = vmatpush.msrb.mxu0 %v5257_v35  ;;  %v7292_v35 = vld [vmem:[%s14693_s2 + $0x1d8] sm:$0xff] }
 0x977   :  { %5054 = vmatpush.msra.mxu3 %v7292_v35  ;;  %v7337_v35 = vld [vmem:[%s14690_s3 + $0x338] sm:$0xff] }
 0x978   :  { %5296 = vmatpush.msrb.mxu0 %v5254_v2  ;;  %v7373_v2 = vld [vmem:[%s14690_s3 + $0x458] sm:$0xff] }
 0x979   :  { %5131 = vmatpush.msrb.mxu1 %v7373_v2  ;;  %v7350_v2 = vld [vmem:[%s14690_s3 + $0x3a0] sm:$0xff] }
 0x97a   :  { %5297 = vmatpush.msrb.mxu0 %v5251_v3  ;;  %v7288_v3 = vld [vmem:[%s14693_s2 + $0x1b8] sm:$0xff] }
 0x97b   :  { %5035 = vmatpush.msrb.mxu2 %v7288_v3  ;;  %v5241_v3 = vld [vmem:[%s14690_s3 + $0x90] sm:$0xff] }
 0x97c   :  { %5298 = vmatpush.msrb.mxu0 %v5248_v16  ;;  %v7289_v16 = vld [vmem:[%s14693_s2 + $0x1c0] sm:$0xff] }
 0x97d   :  { %5055 = vmatpush.msra.mxu3 %v7289_v16 }
 0x97e   :  { %5299 = vmatpush.msrb.mxu0 %v5245_v8  ;;  %v7370_v8 = vld [vmem:[%s14690_s3 + $0x440] sm:$0xff] }
 0x97f   :  { %5132 = vmatpush.msrb.mxu1 %v7370_v8 }
 0x980   :  { %5300 = vmatpush.msrb.mxu0 %v5242_v34  ;;  %v7285_v34 = vld [vmem:[%s14693_s2 + $0x1a0] sm:$0xff] }
 0x981   :  { %5036 = vmatpush.msrb.mxu2 %v7285_v34  ;;  %v7334_v34 = vld [vmem:[%s14690_s3 + $0x320] sm:$0xff] }
 0x982   :  { %5301 = vmatpush.msrb.mxu0 %v5239_v18  ;;  %v7286_v18 = vld [vmem:[%s14693_s2 + $0x1a8] sm:$0xff] }
 0x983   :  { %5056 = vmatpush.msra.mxu3 %v7286_v18  ;;  %v7347_v18 = vld [vmem:[%s14690_s3 + $0x388] sm:$0xff] }
 0x984   :  { %5302 = vmatpush.msrb.mxu0 %v5236_v59  ;;  %v7367_v59 = vld [vmem:[%s14690_s3 + $0x428] sm:$0xff] }
 0x985   :  { %5133 = vmatpush.msrb.mxu1 %v7367_v59  ;;  %v5238_v59 = vld [vmem:[%s14690_s3 + $0x78] sm:$0xff] }
 0x986   :  { %5303 = vmatpush.msrb.mxu0 %v5233_v56  ;;  %v7282_v56 = vld [vmem:[%s14693_s2 + $0x188] sm:$0xff] }
 0x987   :  { %5037 = vmatpush.msrb.mxu2 %v7282_v56  ;;  %v7331_v56 = vld [vmem:[%s14690_s3 + $0x308] sm:$0xff] }
 0x988   :  { %5304 = vmatpush.msrb.mxu0 %v5230_v48  ;;  %v7283_v48 = vld [vmem:[%s14693_s2 + $0x190] sm:$0xff] }
 0x989   :  { %5057 = vmatpush.msra.mxu3 %v7283_v48  ;;  %v7344_v48 = vld [vmem:[%s14690_s3 + $0x370] sm:$0xff] }
 0x98a   :  { %5305 = vmatpush.msrb.mxu0 %v5227_v44  ;;  %v7364_v44 = vld [vmem:[%s14690_s3 + $0x410] sm:$0xff] }
 0x98b   :  { %5134 = vmatpush.msrb.mxu1 %v7364_v44  ;;  %5271 = vmatpush.msrb.mxu3 %v5268_v17  ;;  %v5235_v44 = vld [vmem:[%s14690_s3 + $0x60] sm:$0xff]  ;;  %v5232_v17 = vld [vmem:[%s14690_s3 + $0x48] sm:$0xff] }
 0x98c   :  { %5306 = vmatpush.msrb.mxu0 %v5224_v39  ;;  %v7377_v39 = vld [vmem:[%s14690_s3 + $0x478] sm:$0xff] }
 0x98d   :  { %5307 = vmatmul.f32.vlgmr.msrb.gmra.mxu0 %v13360_v22  ;;  %5150 = vmatpush.msra.mxu2 %v7377_v39  ;;  %v7341_v39 = vld [vmem:[%s14690_s3 + $0x358] sm:$0xff] }
 0x98e   :  { %5135 = vmatpush.msrb.mxu1 %v7361_v1  ;;  %5272 = vmatpush.msrb.mxu3 %v5265_v19  ;;  %v5229_v19 = vld [vmem:[%s14690_s3 + $0x30] sm:$0xff] }
 0x98f   :  { %5151 = vmatpush.msra.mxu2 %v7374_v10  ;;  %v7338_v10 = vld [vmem:[%s14690_s3 + $0x340] sm:$0xff] }
 0x990   :  { %5136 = vmatpush.msrb.mxu1 %v7358_v46  ;;  %5273 = vmatpush.msrb.mxu3 %v5262_v63  ;;  %v7335_v46 = vld [vmem:[%s14690_s3 + $0x328] sm:$0xff] }
 0x991   :  { %5152 = vmatpush.msra.mxu2 %v7371_v55  ;;  %v5226_v55 = vld [vmem:[%s14690_s3 + $0x18] sm:$0xff] }
 0x992   :  { %5137 = vmatpush.msrb.mxu1 %v7355_v7  ;;  %5274 = vmatpush.msrb.mxu3 %v5259_v36  ;;  %v7332_v7 = vld [vmem:[%s14690_s3 + $0x310] sm:$0xff] }
 0x993   :  { %5153 = vmatpush.msra.mxu2 %v7368_v15  ;;  %v5223_v15 = vld [vmem:[%s14690_s3] sm:$0xff] }
 0x994   :  { %5138 = vmatpush.msrb.mxu1 %v7352_v12  ;;  %5275 = vmatpush.msrb.mxu3 %v5256_v37 }
 0x995   :  { %5154 = vmatpush.msra.mxu2 %v7365_v57  ;;  %v7563_v57 = vld [vmem:[%s14692_s5 + $0x1] ss:$0 sm:$0xff] }
 0x996   :  { %5139 = vmatpush.msrb.mxu1 %v7349_v30  ;;  %5276 = vmatpush.msrb.mxu3 %v5253_v42 }
 0x997   :  { %5155 = vmatpush.msra.mxu2 %v7362_v11 }
 0x998   :  { %5140 = vmatpush.msrb.mxu1 %v7346_v51  ;;  %5277 = vmatpush.msrb.mxu3 %v5250_v32 }
 0x999   :  { %5156 = vmatpush.msra.mxu2 %v7359_v45 }
 0x99a   :  { %5141 = vmatpush.msrb.mxu1 %v7343_v14  ;;  %5278 = vmatpush.msrb.mxu3 %v5247_v47 }
 0x99b   :  { %5157 = vmatpush.msra.mxu2 %v7356_v0 }
 0x99c   :  { %5142 = vmatpush.msrb.mxu1 %v7340_v62  ;;  %5279 = vmatpush.msrb.mxu3 %v5244_v54 }
 0x99d   :  { %5158 = vmatpush.msra.mxu2 %v7353_v26 }
 0x99e   :  { %5143 = vmatpush.msrb.mxu1 %v7337_v35  ;;  %5280 = vmatpush.msrb.mxu3 %v5241_v3 }
 0x99f   :  { %5159 = vmatpush.msra.mxu2 %v7350_v2 }
 0x9a0   :  { %5144 = vmatpush.msrb.mxu1 %v7334_v34  ;;  %5281 = vmatpush.msrb.mxu3 %v5238_v59  ;;  %v5267_v34 = vld [vmem:[%s14690_s3 + $0x160] sm:$0xff]  ;;  %v5258_v59 = vld [vmem:[%s14690_s3 + $0x118] sm:$0xff] }
 0x9a1   :  { %5160 = vmatpush.msra.mxu2 %v7347_v18  ;;  %v5261_v18 = vld [vmem:[%s14690_s3 + $0x130] sm:$0xff] }
 0x9a2   :  { %5145 = vmatpush.msrb.mxu1 %v7331_v56  ;;  %5282 = vmatpush.msrb.mxu3 %v5235_v44  ;;  %v5255_v56 = vld [vmem:[%s14690_s3 + $0x100] sm:$0xff]  ;;  %v5249_v44 = vld [vmem:[%s14690_s3 + $0xd0] sm:$0xff] }
 0x9a3   :  { %5161 = vmatpush.msra.mxu2 %v7344_v48  ;;  %v5252_v48 = vld [vmem:[%s14690_s3 + $0xe8] sm:$0xff] }
 0x9a4   :  { %5283 = vmatpush.msrb.mxu3 %v5232_v17  ;;  %v5243_v17 = vld [vmem:[%s14690_s3 + $0xa0] sm:$0xff] }
 0x9a5   :  { %5162 = vmatpush.msra.mxu2 %v7341_v39  ;;  %v5246_v39 = vld [vmem:[%s14690_s3 + $0xb8] sm:$0xff] }
 0x9a6   :  { %5284 = vmatpush.msrb.mxu3 %v5229_v19  ;;  %v5234_v19 = vld [vmem:[%s14690_s3 + $0x58] sm:$0xff] }
 0x9a7   :  { %5163 = vmatpush.msra.mxu2 %v7338_v10  ;;  %v5237_v10 = vld [vmem:[%s14690_s3 + $0x70] sm:$0xff] }
 0x9a8   :  { %5285 = vmatpush.msrb.mxu3 %v5226_v55  ;;  %v5225_v55 = vld [vmem:[%s14690_s3 + $0x10] sm:$0xff] }
 0x9a9   :  { %5164 = vmatpush.msra.mxu2 %v7335_v46  ;;  %v5228_v46 = vld [vmem:[%s14690_s3 + $0x28] sm:$0xff] }
 0x9aa   :  { %5286 = vmatpush.msrb.mxu3 %v5223_v15  ;;  %v7423_v15 = vld [vmem:[%s14690_s3 + $0x2b8] sm:$0xff] }
 0x9ab   :  { %5165 = vmatpush.msra.mxu2 %v7332_v7  ;;  %v5429_v7 = vld [vmem:[%s14693_s2 + $0x170] sm:$0xff] }
 0x9ca   :  { %v4763_v21 = vpop.f32.mrf.mxu0 }
 0x9cb   :  { %v4764_v33 = vadd.f32 %v4763_v21, %v4721_v50  ;;  %v4722_v50 = vperm.slane %v13648_v41, 2  ;;  %v4783_v21 = vpop.f32.mrf.mxu1 }
 0x9cd   :  { %v4784_v32 = vadd.f32 %v4783_v21, %v4722_v50  ;;  %v7402_v50 = vld [vmem:[%s14690_s3 + $0x210] sm:$0xff]  ;;  %v7396_v21 = vld [vmem:[%s14690_s3 + $0x1e0] sm:$0xff] }
 0x9d0   :  { %v4743_v9 = vpop.f32.mrf.mxu3 }
 0x9d1   :  { %v4744_v49 = vadd.f32 %v4743_v9, %v4720_v5 }
 0x9d3   :  { %v4894_v23 = vadd.f32 %v4851_v24, %v4744_v49 }
 0x9d5   :  { %v7278_v28 = vmul.f32 -1.442695, %v4894_v23  ;;  %v4891_v23 = vpop.f32.mrf.mxu0 }
 0x9d6   :  { %v4938_v51 = vadd.f32 %v7563_v57, %v4891_v23  ;;  %v7408_v57 = vld [vmem:[%s14690_s3 + $0x240] sm:$0xff]  ;;  %v7399_v23 = vld [vmem:[%s14690_s3 + $0x1f8] sm:$0xff] }
 0x9d7   :  { %7764 = vpow2.f32 %v7278_v28 }
 0x9d8   :  { %v4871_v29 = vpop.f32.mrf.mxu3 }
 0x9d9   :  { %v4914_v31 = vadd.f32 %v4871_v29, %v4764_v33 }
 0x9db   :  { %v7279_v4 = vmul.f32 -1.442695, %v4914_v31 }
 0x9dd   :  { %v7765_v16 = vpop.eup %7764  ;;  %7766 = vpow2.f32 %v7279_v4 }
 0x9de   :  { %v4898_v8 = vadd.f32 1.0, %v7765_v16 }
 0x9e0   :  { %7768 = vrcp.f32 %v4898_v8  ;;  %v4910_v49 = vand.u32 2147483648, %v4898_v8  ;;  %v4908_v12 = vand.u32 2147483647, %v4898_v8  ;;  %vm4904_vm10 = vweird.f32 %v4898_v8 }
 0x9e2   :  { %v4911_v42 = vor.u32 1.1754944e-38, %v4910_v49  ;;  %vm4909_vm12 = vcmp.eq.f32.partialorder %v4908_v12, 8.507059e+37  ;;  %v7417_v49 = vld [vmem:[%s14690_s3 + $0x288] sm:$0xff]  ;;  %v7411_v12 = vld [vmem:[%s14690_s3 + $0x258] sm:$0xff] }
 0x9e3   :  { %v7767_v1 = vpop.eup %7766 }
 0x9e4   :  { %v4918_v5 = vadd.f32 1.0, %v7767_v1  ;;  %v5240_v1 = vld [vmem:[%s14690_s3 + $0x88] sm:$0xff] }
 0x9e6   :  { %v7769_v63 = vpop.eup %7768  ;;  %7770 = vrcp.f32 %v4918_v5  ;;  %v4930_v0 = vand.u32 2147483648, %v4918_v5  ;;  %v4928_v47 = vand.u32 2147483647, %v4918_v5  ;;  %vm4924_vm14 = vweird.f32 %v4918_v5 }
 0x9e7   :  { %v4900_v9 = vmul.f32 %v7769_v63, %v4898_v8  ;;  %vm4905_vm9 = vweird.f32 %v7769_v63  ;;  %v5270_v8 = vld [vmem:[%s14690_s3 + $0x178] sm:$0xff] }
 0x9e8   :  { %vm4906_vm11 = vmor %vm4904_vm10, %vm4905_vm9  ;;  %v4931_v26 = vor.u32 1.1754944e-38, %v4930_v0  ;;  %vm4929_vm0 = vcmp.eq.f32.partialorder %v4928_v47, 8.507059e+37  ;;  %v5414_v0 = vld [vmem:[%s14693_s2 + $0xf8] sm:$0xff] }
 0x9e9   :  { %v4901_v36 = vsub.f32 1.0, %v4900_v9  ;;  %v7426_v9 = vld [vmem:[%s14690_s3 + $0x2d0] sm:$0xff]  ;;  %v5422_v47 = vld [vmem:[%s14693_s2 + $0x138] sm:$0xff] }
 0x9eb   :  { %v4902_v24 = vmul.f32 %v7769_v63, %v4901_v36  ;;  %v7420_v36 = vld [vmem:[%s14690_s3 + $0x2a0] sm:$0xff] }
 0x9ec   :  { %v7771_v37 = vpop.eup %7770 }
 0x9ed   :  { %v4903_v30 = vadd.f32 %v7769_v63, %v4902_v24  ;;  %v4920_v11 = vmul.f32 %v7771_v37, %v4918_v5  ;;  %vm4925_vm13 = vweird.f32 %v7771_v37  ;;  %v5231_v5 = vld [vmem:[%s14690_s3 + $0x40] sm:$0xff]  ;;  %v7414_v24 = vld [vmem:[%s14690_s3 + $0x270] sm:$0xff] }
 0x9ee   :  { %vm4926_vm15 = vmor %vm4924_vm14, %vm4925_vm13 }
 0x9ef   :  { %v4907_v28 = vsel %vm4906_vm11, %v7769_v63, %v4903_v30  ;;  %v4921_v45 = vsub.f32 1.0, %v4920_v11  ;;  %v7429_v63 = vld [vmem:[%s14690_s3 + $0x2e8] sm:$0xff]  ;;  %v7390_v11 = vld [vmem:[%s14690_s3 + $0x1b0] sm:$0xff] }
 0x9f0   :  { %v4912_v33 = vsel %vm4909_vm12, %v4911_v42, %v4907_v28  ;;  %v7393_v30 = vld [vmem:[%s14690_s3 + $0x1c8] sm:$0xff]  ;;  %v7387_v42 = vld [vmem:[%s14690_s3 + $0x198] sm:$0xff]  ;;  %v7384_v28 = vld [vmem:[%s14690_s3 + $0x180] sm:$0xff] }
 0x9f1   :  { %v4939_v29 = vmul.f32 %v4938_v51, %v4912_v33  ;;  %v4922_v14 = vmul.f32 %v7771_v37, %v4921_v45  ;;  %v5426_v51 = vld [vmem:[%s14693_s2 + $0x158] sm:$0xff]  ;;  %v5423_v45 = vld [vmem:[%s14693_s2 + $0x140] sm:$0xff]  ;;  %v5428_v33 = vld [vmem:[%s14693_s2 + $0x168] sm:$0xff] }
 0x9f3   :  { %v4940_v31 = vadd.f32 %v4939_v29, %v4784_v32  ;;  %v4923_v41 = vadd.f32 %v7771_v37, %v4922_v14  ;;  %v5420_v32 = vld [vmem:[%s14693_s2 + $0x128] sm:$0xff]  ;;  %v5417_v29 = vld [vmem:[%s14693_s2 + $0x110] sm:$0xff] }
 0x9f4   :  { %v5425_v14 = vld [vmem:[%s14693_s2 + $0x150] sm:$0xff] }
 0x9f5   :  { %7772 = vtanh.f32 %v4940_v31  ;;  %v4927_v62 = vsel %vm4926_vm15, %v7771_v37, %v4923_v41  ;;  %v7405_v37 = vld [vmem:[%s14690_s3 + $0x228] sm:$0xff]  ;;  %v5411_v31 = vld [vmem:[%s14693_s2 + $0xe0] sm:$0xff] }
 0x9f6   :  { %v4932_v54 = vsel %vm4929_vm0, %v4931_v26, %v4927_v62  ;;  %v5419_v41 = vld [vmem:[%s14693_s2 + $0x120] sm:$0xff]  ;;  %v5408_v62 = vld [vmem:[%s14693_s2 + $0xc8] sm:$0xff] }
 0x9f7   :  { %v4942_v4 = vsub.f32 1.0, %v4932_v54  ;;  %v4944_v3 = vmul.f32 %v4932_v54, %v12978_v25  ;;  %v5264_v25 = vld [vmem:[%s14690_s3 + $0x148] sm:$0xff]  ;;  %v5405_v54 = vld [vmem:[%s14693_s2 + $0xb0] sm:$0xff] }
 0x9f8   :  { %v5416_v26 = vld [vmem:[%s14693_s2 + $0x108] sm:$0xff] }
 0x9fb   :  { %v7773_v35 = vpop.eup %7772 }
 0x9fc   :  { %v4943_v2 = vmul.f32 %v7773_v35, %v4942_v4  ;;  %v5413_v4 = vld [vmem:[%s14693_s2 + $0xf0] sm:$0xff]  ;;  %v5402_v35 = vld [vmem:[%s14693_s2 + $0x98] sm:$0xff] }
 0x9fe   :  { %v13780_v16 = vadd.f32 %v4944_v3, %v4943_v2  ;;  %v5410_v2 = vld [vmem:[%s14693_s2 + $0xd8] sm:$0xff]  ;;  %v5399_v3 = vld [vmem:[%s14693_s2 + $0x80] sm:$0xff] }
 0xa00   :  { %5018 = vmatmul.f32.vlgmr.msra.gmra.mxu1 %v13780_v16  ;;  %5038 = vmatmul.f32.vlgmr.msrb.gmra.mxu2 %v13780_v16 }
 0xa01   :  { %5058 = vmatmul.f32.vlgmr.msra.gmra.mxu3 %v13780_v16  ;;  %5311 = vmatpush.msra.mxu1 %v5270_v8  ;;  %v5407_v8 = vld [vmem:[%s14693_s2 + $0xc0] sm:$0xff] }
 0xa02   :  { %5459 = vmatpush.msra.mxu3 %v5429_v7  ;;  %5439 = vmatpush.msrb.mxu2 %v5428_v33  ;;  %v182_v7 = vadd.f32 %v8568_v20, %v8483_v13  ;;  %v5421_v13 = vld [vmem:[%s14693_s2 + $0x130] sm:$0xff] }
 0xa03   :  { %5312 = vmatpush.msra.mxu1 %v5267_v34  ;;  %v5396_v34 = vld [vmem:[%s14693_s2 + $0x68] sm:$0xff]  ;;  %v7422_v20 = vld [vmem:[%s14690_s3 + $0x2b0] sm:$0xff] }
 0xa04   :  { %5460 = vmatpush.msra.mxu3 %v5426_v51  ;;  %5440 = vmatpush.msrb.mxu2 %v5425_v14  ;;  %v5412_v51 = vld [vmem:[%s14693_s2 + $0xe8] sm:$0xff]  ;;  %v5409_v14 = vld [vmem:[%s14693_s2 + $0xd0] sm:$0xff] }
 0xa05   :  { %5313 = vmatpush.msra.mxu1 %v5264_v25  ;;  %v5404_v25 = vld [vmem:[%s14693_s2 + $0xa8] sm:$0xff] }
 0xa06   :  { %5461 = vmatpush.msra.mxu3 %v5423_v45  ;;  %5441 = vmatpush.msrb.mxu2 %v5422_v47  ;;  %v7424_v45 = vld [vmem:[%s14690_s3 + $0x2c0] sm:$0xff]  ;;  %v7410_v47 = vld [vmem:[%s14690_s3 + $0x250] sm:$0xff] }
 0xa07   :  { %5314 = vmatpush.msra.mxu1 %v5261_v18  ;;  %v5393_v18 = vld [vmem:[%s14693_s2 + $0x50] sm:$0xff] }
 0xa08   :  { %5146 = vmatmul.f32.vlgmr.msrb.gmra.mxu1 %v13428_v58  ;;  %5166 = vmatmul.f32.vlgmr.msra.gmra.mxu2 %v13428_v58 }
 0xa09   :  { %5287 = vmatmul.f32.vlgmr.msrb.gmra.mxu3 %v13360_v22  ;;  %5315 = vmatpush.msra.mxu1 %v5258_v59  ;;  %v13952_v59 = vpop.f32.mrf.mxu0 }
 0xa0a   :  { %5462 = vmatpush.msra.mxu3 %v5420_v32  ;;  %5442 = vmatpush.msrb.mxu2 %v5419_v41  ;;  %v7413_v32 = vld [vmem:[%s14690_s3 + $0x268] sm:$0xff]  ;;  %v7418_v41 = vld [vmem:[%s14690_s3 + $0x290] sm:$0xff] }
 0xa0b   :  { %5316 = vmatpush.msra.mxu1 %v5255_v56  ;;  %v5401_v56 = vld [vmem:[%s14693_s2 + $0x90] sm:$0xff] }
 0xa0c   :  { %5463 = vmatpush.msra.mxu3 %v5417_v29  ;;  %5443 = vmatpush.msrb.mxu2 %v5416_v26  ;;  %v141_v26 = vadd.f32 %v8536_v43, %v8297_v27  ;;  %v5400_v43 = vld [vmem:[%s14693_s2 + $0x88] sm:$0xff] }
 0xa0d   :  { %5317 = vmatpush.msra.mxu1 %v5252_v48  ;;  %v5390_v48 = vld [vmem:[%s14693_s2 + $0x38] sm:$0xff] }
 0xa0e   :  { %5464 = vmatpush.msra.mxu3 %v5414_v0  ;;  %5444 = vmatpush.msrb.mxu2 %v5413_v4  ;;  %v7421_v0 = vld [vmem:[%s14690_s3 + $0x2a8] sm:$0xff] }
 0xa0f   :  { %5318 = vmatpush.msra.mxu1 %v5249_v44  ;;  %v5398_v44 = vld [vmem:[%s14693_s2 + $0x78] sm:$0xff] }
 0xa10   :  { %5465 = vmatpush.msra.mxu3 %v5411_v31  ;;  %5445 = vmatpush.msrb.mxu2 %v5410_v2  ;;  %v5406_v31 = vld [vmem:[%s14693_s2 + $0xb8] sm:$0xff] }
 0xa11   :  { %5319 = vmatpush.msra.mxu1 %v5246_v39  ;;  %v5387_v39 = vld [vmem:[%s14693_s2 + $0x20] sm:$0xff]  ;;  %v7415_v2 = vld [vmem:[%s14690_s3 + $0x278] sm:$0xff] }
 0xa12   :  { %5466 = vmatpush.msra.mxu3 %v5408_v62  ;;  %5446 = vmatpush.msrb.mxu2 %v5407_v8  ;;  %v7407_v62 = vld [vmem:[%s14690_s3 + $0x238] sm:$0xff] }
 0xa13   :  { %5320 = vmatpush.msra.mxu1 %v5243_v17  ;;  %v5395_v17 = vld [vmem:[%s14693_s2 + $0x60] sm:$0xff] }
 0xa14   :  { %5467 = vmatpush.msra.mxu3 %v5405_v54  ;;  %5447 = vmatpush.msrb.mxu2 %v5404_v25  ;;  %v7401_v25 = vld [vmem:[%s14690_s3 + $0x208] sm:$0xff] }
 0xa15   :  { %5321 = vmatpush.msra.mxu1 %v5240_v1  ;;  %v5384_v1 = vld [vmem:[%s14693_s2 + $0x8] sm:$0xff] }
 0xa16   :  { %5468 = vmatpush.msra.mxu3 %v5402_v35  ;;  %5448 = vmatpush.msrb.mxu2 %v5401_v56  ;;  %v5403_v35 = vld [vmem:[%s14693_s2 + $0xa0] sm:$0xff] }
 0xa17   :  { %5322 = vmatpush.msra.mxu1 %v5237_v10  ;;  %v5430_v10 = vld [vmem:[%s14693_s2 + $0x178] sm:$0xff] }
 0xa18   :  { %5469 = vmatpush.msra.mxu3 %v5399_v3  ;;  %5449 = vmatpush.msrb.mxu2 %v5398_v44  ;;  %v7404_v3 = vld [vmem:[%s14690_s3 + $0x220] sm:$0xff]  ;;  %v7409_v44 = vld [vmem:[%s14690_s3 + $0x248] sm:$0xff] }
 0xa19   :  { %5323 = vmatpush.msra.mxu1 %v5234_v19  ;;  %v7431_v19 = vld [vmem:[%s14690_s3 + $0x2f8] sm:$0xff]  ;;  %5479 = vmatpush.msra.mxu0 %v5430_v10 }
 0xa1a   :  { %5470 = vmatpush.msra.mxu3 %v5396_v34  ;;  %5450 = vmatpush.msrb.mxu2 %v5395_v17  ;;  %v7412_v34 = vld [vmem:[%s14690_s3 + $0x260] sm:$0xff]  ;;  %v7395_v10 = vld [vmem:[%s14690_s3 + $0x1d8] sm:$0xff] }
 0xa1b   :  { %5324 = vmatpush.msra.mxu1 %v5231_v5  ;;  %v5392_v5 = vld [vmem:[%s14693_s2 + $0x48] sm:$0xff] }
 0xa1c   :  { %5471 = vmatpush.msra.mxu3 %v5393_v18  ;;  %5451 = vmatpush.msrb.mxu2 %v5392_v5  ;;  %v5391_v5 = vld [vmem:[%s14693_s2 + $0x40] sm:$0xff] }
 0xa1d   :  { %5325 = vmatpush.msra.mxu1 %v5228_v46  ;;  %v5427_v46 = vld [vmem:[%s14693_s2 + $0x160] sm:$0xff] }
 0xa1e   :  { %5472 = vmatpush.msra.mxu3 %v5390_v48  ;;  %5480 = vmatpush.msra.mxu0 %v5427_v46  ;;  %v5397_v48 = vld [vmem:[%s14693_s2 + $0x70] sm:$0xff]  ;;  %v7403_v46 = vld [vmem:[%s14690_s3 + $0x218] sm:$0xff] }
 0xa1f   :  { %5326 = vmatpush.msra.mxu1 %v5225_v55  ;;  %v7428_v55 = vld [vmem:[%s14690_s3 + $0x2e0] sm:$0xff] }
 0xa20   :  { %5327 = vmatmul.f32.vlgmr.msra.gmra.mxu1 %v13360_v22  ;;  %5473 = vmatpush.msra.mxu3 %v5387_v39  ;;  %v7398_v39 = vld [vmem:[%s14690_s3 + $0x1f0] sm:$0xff] }
 0xa21   :  { %5547 = vmatpush.msrb.mxu1 %v7429_v63  ;;  %v5308_v63 = vpop.f32.mrf.mxu0 }
 0xa22   :  { %5474 = vmatpush.msra.mxu3 %v5384_v1  ;;  %v7406_v1 = vld [vmem:[%s14690_s3 + $0x230] sm:$0xff] }
 0xa23   :  { %5548 = vmatpush.msrb.mxu1 %v7426_v9  ;;  %v5389_v9 = vld [vmem:[%s14693_s2 + $0x30] sm:$0xff] }
 0xa24   :  { %5587 = vmatpush.msrb.mxu3 %v7431_v19  ;;  %5452 = vmatpush.msrb.mxu2 %v5389_v9  ;;  %v5388_v9 = vld [vmem:[%s14693_s2 + $0x28] sm:$0xff] }
 0xa25   :  { %5549 = vmatpush.msrb.mxu1 %v7423_v15  ;;  %v5424_v15 = vld [vmem:[%s14693_s2 + $0x148] sm:$0xff] }
 0xa26   :  { %5588 = vmatpush.msrb.mxu3 %v7428_v55  ;;  %5481 = vmatpush.msra.mxu0 %v5424_v15  ;;  %v7392_v55 = vld [vmem:[%s14690_s3 + $0x1c0] sm:$0xff]  ;;  %v7389_v15 = vld [vmem:[%s14690_s3 + $0x1a8] sm:$0xff] }
 0xa27   :  { %5550 = vmatpush.msrb.mxu1 %v7420_v36  ;;  %v7425_v36 = vld [vmem:[%s14690_s3 + $0x2c8] sm:$0xff] }
 0xa28   :  { %5589 = vmatpush.msrb.mxu3 %v7425_v36  ;;  %5482 = vmatpush.msra.mxu0 %v5421_v13  ;;  %v7397_v13 = vld [vmem:[%s14690_s3 + $0x1e8] sm:$0xff] }
 0xa29   :  { %5551 = vmatpush.msrb.mxu1 %v7417_v49  ;;  %v5386_v49 = vld [vmem:[%s14693_s2 + $0x18] sm:$0xff] }
 0xa2a   :  { %5453 = vmatpush.msrb.mxu2 %v5386_v49  ;;  %5590 = vmatpush.msrb.mxu3 %v7422_v20  ;;  %v7386_v20 = vld [vmem:[%s14690_s3 + $0x190] sm:$0xff] }
 0xa2b   :  { %5552 = vmatpush.msrb.mxu1 %v7414_v24  ;;  %v5351_v24 = vadd.f32 %v5308_v63, %v182_v7  ;;  %v7400_v7 = vld [vmem:[%s14690_s3 + $0x200] sm:$0xff] }
 0xa2d   :  { %5553 = vmatpush.msrb.mxu1 %v7411_v12  ;;  %v5383_v12 = vld [vmem:[%s14693_s2] sm:$0xff] }
 0xa2e   :  { %5454 = vmatpush.msrb.mxu2 %v5383_v12 }
 0xa2f   :  { %5554 = vmatpush.msrb.mxu1 %v7408_v57  ;;  %v5418_v57 = vld [vmem:[%s14693_s2 + $0x118] sm:$0xff] }
 0xa30   :  { %5483 = vmatpush.msra.mxu0 %v5418_v57 }
 0xa31   :  { %5555 = vmatpush.msrb.mxu1 %v7405_v37  ;;  %v7430_v37 = vld [vmem:[%s14690_s3 + $0x2f0] sm:$0xff] }
 0xa32   :  { %5567 = vmatpush.msra.mxu2 %v7430_v37 }
 0xa33   :  { %5556 = vmatpush.msrb.mxu1 %v7402_v50  ;;  %v7419_v50 = vld [vmem:[%s14690_s3 + $0x298] sm:$0xff] }
 0xa34   :  { %5591 = vmatpush.msrb.mxu3 %v7419_v50 }
 0xa35   :  { %5557 = vmatpush.msrb.mxu1 %v7399_v23  ;;  %v14022_v23 = vld [vmem:[%s14694_s4 + $0x6] sm:$0x7] }
 0xa36   :  { %v4996_v33 = vperm.slane %v14022_v23, 0  ;;  %v4997_v63 = vperm.slane %v14022_v23, 1 }
 0xa37   :  { %5558 = vmatpush.msrb.mxu1 %v7396_v21 }
 0xa39   :  { %5559 = vmatpush.msrb.mxu1 %v7393_v30  ;;  %v7382_v30 = vmul.f32 -1.442695, %v5351_v24  ;;  %v5385_v24 = vld [vmem:[%s14693_s2 + $0x10] sm:$0xff] }
 0xa3b   :  { %5560 = vmatpush.msrb.mxu1 %v7390_v11  ;;  %v5415_v11 = vld [vmem:[%s14693_s2 + $0x100] sm:$0xff]  ;;  %7774 = vpow2.f32 %v7382_v30  ;;  %v7394_v30 = vld [vmem:[%s14690_s3 + $0x1d0] sm:$0xff] }
 0xa3c   :  { %5484 = vmatpush.msra.mxu0 %v5415_v11 }
 0xa3d   :  { %5561 = vmatpush.msrb.mxu1 %v7387_v42  ;;  %v7427_v42 = vld [vmem:[%s14690_s3 + $0x2d8] sm:$0xff] }
 0xa3e   :  { %5568 = vmatpush.msra.mxu2 %v7427_v42  ;;  %5485 = vmatpush.msra.mxu0 %v5412_v51  ;;  %v7391_v42 = vld [vmem:[%s14690_s3 + $0x1b8] sm:$0xff] }
 0xa3f   :  { %5562 = vmatpush.msrb.mxu1 %v7384_v28  ;;  %v7416_v28 = vld [vmem:[%s14690_s3 + $0x280] sm:$0xff] }
 0xa40   :  { %5563 = vmatmul.f32.vlgmr.msrb.gmra.mxu1 %v13780_v16  ;;  %5592 = vmatpush.msrb.mxu3 %v7416_v28 }
 0xa41   :  { %5569 = vmatpush.msra.mxu2 %v7424_v45  ;;  %5486 = vmatpush.msra.mxu0 %v5409_v14  ;;  %v7775_v27 = vpop.eup %7774  ;;  %v7388_v45 = vld [vmem:[%s14690_s3 + $0x1a0] sm:$0xff]  ;;  %v7385_v14 = vld [vmem:[%s14690_s3 + $0x188] sm:$0xff] }
 0xa42   :  { %5593 = vmatpush.msrb.mxu3 %v7413_v32  ;;  %v14093_v17 = vadd.f32 1.0, %v7775_v27 }
 0xa43   :  { %5570 = vmatpush.msra.mxu2 %v7421_v0  ;;  %5487 = vmatpush.msra.mxu0 %v5406_v31 }
 0xa44   :  { %5594 = vmatpush.msrb.mxu3 %v7410_v47  ;;  %vm5361_vm6 = vweird.f32 %v14093_v17 }
 0xa45   :  { %5571 = vmatpush.msra.mxu2 %v7418_v41  ;;  %5488 = vmatpush.msra.mxu0 %v5403_v35 }
 0xa46   :  { %5595 = vmatpush.msrb.mxu3 %v7407_v62 }
 0xa47   :  { %5572 = vmatpush.msra.mxu2 %v7415_v2  ;;  %5489 = vmatpush.msra.mxu0 %v5400_v43 }
 0xa48   :  { %5596 = vmatpush.msrb.mxu3 %v7404_v3 }
 0xa49   :  { %5573 = vmatpush.msra.mxu2 %v7412_v34  ;;  %5490 = vmatpush.msra.mxu0 %v5397_v48 }
 0xa4a   :  { %5597 = vmatpush.msrb.mxu3 %v7401_v25 }
 0xa4b   :  { %5574 = vmatpush.msra.mxu2 %v7409_v44 }
 0xa4c   :  { %5598 = vmatpush.msrb.mxu3 %v7398_v39  ;;  %v5365_v39 = vand.u32 2147483647, %v14093_v17 }
 0xa4d   :  { %5575 = vmatpush.msra.mxu2 %v7406_v1 }
 0xa4e   :  { %5599 = vmatpush.msrb.mxu3 %v7395_v10  ;;  %vm5366_vm8 = vcmp.eq.f32.partialorder %v5365_v39, 8.507059e+37 }
 0xa4f   :  { %5576 = vmatpush.msra.mxu2 %v7403_v46 }
 0xa50   :  { %5600 = vmatpush.msrb.mxu3 %v7392_v55 }
 0xa51   :  { %5577 = vmatpush.msra.mxu2 %v7400_v7 }
 0xa52   :  { %5601 = vmatpush.msrb.mxu3 %v7389_v15  ;;  %v7529_v15 = vld [vmem:[%s14690_s3 + $0x468] sm:$0xff] }
 0xa53   :  { %5578 = vmatpush.msra.mxu2 %v7397_v13  ;;  %v7526_v13 = vld [vmem:[%s14690_s3 + $0x450] sm:$0xff] }
 0xa54   :  { %5602 = vmatpush.msrb.mxu3 %v7386_v20 }
 0xa55   :  { %5579 = vmatpush.msra.mxu2 %v7394_v30 }
 0xa57   :  { %5580 = vmatpush.msra.mxu2 %v7391_v42 }
 0xa59   :  { %5581 = vmatpush.msra.mxu2 %v7388_v45  ;;  %v4998_v45 = vperm.slane %v14022_v23, 2  ;;  %v7508_v23 = vld [vmem:[%s14690_s3 + $0x3c0] sm:$0xff] }
 0xa5b   :  { %5582 = vmatpush.msra.mxu2 %v7385_v14 }
 0xa7d   :  { %v5019_v29 = vpop.f32.mrf.mxu1 }
 0xa7e   :  { %v5020_v54 = vadd.f32 %v5019_v29, %v4996_v33 }
 0xa80   :  { %v5170_v18 = vadd.f32 %v13952_v59, %v5020_v54  ;;  %v5394_v59 = vld [vmem:[%s14693_s2 + $0x58] sm:$0xff]  ;;  %v7565_v54 = vld [vmem:[%s14692_s5] ss:$0 sm:$0xff] }
 0xa81   :  { %5491 = vmatpush.msra.mxu0 %v5394_v59 }
 0xa82   :  { %v7378_v19 = vmul.f32 -1.442695, %v5170_v18  ;;  %v223_v18 = vadd.f32 %v8831_v61, %v8600_v6 }
 0xa83   :  { %5492 = vmatpush.msra.mxu0 %v5391_v5  ;;  %v5039_v49 = vpop.f32.mrf.mxu2 }
 0xa84   :  { %v14024_v21 = vpop.f32.mrf.mxu3  ;;  %v5040_v57 = vadd.f32 %v5039_v49, %v4997_v63 }
 0xa85   :  { %5493 = vmatpush.msra.mxu0 %v5388_v9  ;;  %v5147_v50 = vpop.f32.mrf.mxu1 }
 0xa86   :  { %v5190_v51 = vadd.f32 %v5147_v50, %v5040_v57 }
 0xa87   :  { %5494 = vmatpush.msra.mxu0 %v5385_v24 }
 0xa88   :  { %v7379_v47 = vmul.f32 -1.442695, %v5190_v51  ;;  %v7517_v51 = vld [vmem:[%s14690_s3 + $0x408] sm:$0xff] }
 0xa8b   :  { %v5167_v50 = vpop.f32.mrf.mxu2 }
 0xa8c   :  { %v5288_v4 = vpop.f32.mrf.mxu3 }
 0xa8d   :  { %v5331_v8 = vadd.f32 %v5288_v4, %v141_v26 }
 0xa8f   :  { %v7381_v56 = vmul.f32 -1.442695, %v5331_v8 }
 0xa91   :  { %7776 = vpow2.f32 %v7381_v56  ;;  %v5367_v56 = vand.u32 2147483648, %v14093_v17 }
 0xa92   :  { %7778 = vrcp.f32 %v14093_v17 }
 0xa93   :  { %7780 = vpow2.f32 %v7378_v19  ;;  %v5368_v19 = vor.u32 1.1754944e-38, %v5367_v56  ;;  %v7487_v56 = vld [vmem:[%s14690_s3 + $0x318] sm:$0xff] }
 0xa97   :  { %v7777_v36 = vpop.eup %7776 }
 0xa98   :  { %v5335_v12 = vadd.f32 1.0, %v7777_v36  ;;  %v7779_v37 = vpop.eup %7778 }
 0xa99   :  { %v7781_v11 = vpop.eup %7780  ;;  %v5357_v28 = vmul.f32 %v7779_v37, %v14093_v17  ;;  %vm5362_vm5 = vweird.f32 %v7779_v37 }
 0xa9a   :  { %7782 = vrcp.f32 %v5335_v12  ;;  %v14143_v33 = vadd.f32 1.0, %v7781_v11  ;;  %v5347_v41 = vand.u32 2147483648, %v5335_v12  ;;  %v5345_v26 = vand.u32 2147483647, %v5335_v12  ;;  %vm5363_vm7 = vmor %vm5361_vm6, %vm5362_vm5  ;;  %v7520_v11 = vld [vmem:[%s14690_s3 + $0x420] sm:$0xff] }
 0xa9b   :  { %v5358_v0 = vsub.f32 1.0, %v5357_v28  ;;  %vm5341_vm2 = vweird.f32 %v5335_v12 }
 0xa9c   :  { %7784 = vrcp.f32 %v14143_v33  ;;  %v5348_v3 = vor.u32 1.1754944e-38, %v5347_v41  ;;  %vm5346_vm4 = vcmp.eq.f32.partialorder %v5345_v26, 8.507059e+37  ;;  %v5186_v24 = vand.u32 2147483648, %v14143_v33 }
 0xa9d   :  { %v5359_v4 = vmul.f32 %v7779_v37, %v5358_v0  ;;  %7786 = vpow2.f32 %v7379_v47  ;;  %v5328_v35 = vpop.f32.mrf.mxu1  ;;  %vm5180_vm10 = vweird.f32 %v14143_v33  ;;  %v7511_v0 = vld [vmem:[%s14690_s3 + $0x3d8] sm:$0xff]  ;;  %v5060_v47 = vadd.f32 %v14024_v21, %v4998_v45  ;;  %v7455_v45 = vld [vmem:[%s14693_s2 + $0x220] sm:$0xff] }
 0xa9e   :  { %v5375_v27 = vadd.f32 %v7565_v54, %v5328_v35  ;;  %v5187_v30 = vor.u32 1.1754944e-38, %v5186_v24  ;;  %v7502_v54 = vld [vmem:[%s14690_s3 + $0x390] sm:$0xff]  ;;  %v7499_v35 = vld [vmem:[%s14690_s3 + $0x378] sm:$0xff] }
 0xa9f   :  { %v5360_v34 = vadd.f32 %v7779_v37, %v5359_v4  ;;  %v7466_v24 = vld [vmem:[%s14693_s2 + $0x278] sm:$0xff] }
 0xaa0   :  { %v7783_v32 = vpop.eup %7782 }
 0xaa1   :  { %v5337_v29 = vmul.f32 %v7783_v32, %v5335_v12  ;;  %vm5342_vm1 = vweird.f32 %v7783_v32  ;;  %v5364_v10 = vsel %vm5363_vm7, %v7779_v37, %v5360_v34  ;;  %v7523_v12 = vld [vmem:[%s14690_s3 + $0x438] sm:$0xff]  ;;  %v7564_v37 = vld [vmem:[%s14692_s5 + $0x2] ss:$0 sm:$0xff] }
 0xaa2   :  { %vm5343_vm3 = vmor %vm5341_vm2, %vm5342_vm1  ;;  %v7785_v43 = vpop.eup %7784  ;;  %v5369_v6 = vsel %vm5366_vm8, %v5368_v19, %v5364_v10  ;;  %v7482_v10 = vld [vmem:[%s14693_s2 + $0x2f8] sm:$0xff]  ;;  %v7477_v19 = vld [vmem:[%s14693_s2 + $0x2d0] sm:$0xff] }
 0xaa3   :  { %v5338_v31 = vsub.f32 1.0, %v5337_v29  ;;  %v7787_v44 = vpop.eup %7786  ;;  %v5176_v59 = vmul.f32 %v7785_v43, %v14143_v33  ;;  %v5379_v61 = vsub.f32 1.0, %v5369_v6  ;;  %v5381_v17 = vmul.f32 %v5369_v6, %v13360_v22  ;;  %v7474_v6 = vld [vmem:[%s14693_s2 + $0x2b8] sm:$0xff] }
 0xaa4   :  { %v14158_v5 = vadd.f32 1.0, %v7787_v44  ;;  %vm5181_vm9 = vweird.f32 %v7785_v43  ;;  %v5184_v22 = vand.u32 2147483647, %v14143_v33  ;;  %v7514_v33 = vld [vmem:[%s14690_s3 + $0x3f0] sm:$0xff]  ;;  %v7484_v44 = vld [vmem:[%s14690_s3 + $0x300] sm:$0xff] }
 0xaa5   :  { %v5339_v62 = vmul.f32 %v7783_v32, %v5338_v31  ;;  %v5177_v46 = vsub.f32 1.0, %v5176_v59  ;;  %vm5182_vm11 = vmor %vm5180_vm10, %vm5181_vm9  ;;  %v7480_v59 = vld [vmem:[%s14693_s2 + $0x2e8] sm:$0xff]  ;;  %vm6025_vm9 = vcmask 261120  }
 0xaa6   :  { %vm5185_vm12 = vcmp.eq.f32.partialorder %v5184_v22, 8.507059e+37  ;;  %v5206_v26 = vand.u32 2147483648, %v14158_v5  ;;  %vm5200_vm14 = vweird.f32 %v14158_v5  ;;  %v5204_v21 = vand.u32 2147483647, %v14158_v5  ;;  %5715 = vmatpush.msrb.mxu0 %v7480_v59  ;;  %v7462_v22 = vld [vmem:[%s14693_s2 + $0x258] sm:$0xff]  ;;  %v7524_v59 = vld [vmem:[%s14690_s3 + $0x440] sm:$0xff] }
 0xaa7   :  { %v5340_v2 = vadd.f32 %v7783_v32, %v5339_v62  ;;  %v5178_v63 = vmul.f32 %v7785_v43, %v5177_v46  ;;  %v7505_v62 = vld [vmem:[%s14690_s3 + $0x3a8] sm:$0xff]  ;;  %v7479_v46 = vld [vmem:[%s14693_s2 + $0x2e0] sm:$0xff] }
 0xaa8   :  { %vm5205_vm0 = vcmp.eq.f32.partialorder %v5204_v21, 8.507059e+37  ;;  %5716 = vmatpush.msrb.mxu0 %v7477_v19  ;;  %v7443_v21 = vld [vmem:[%s14693_s2 + $0x1c0] sm:$0xff]  ;;  %v7521_v19 = vld [vmem:[%s14690_s3 + $0x428] sm:$0xff] }
 0xaa9   :  { %v5344_v8 = vsel %vm5343_vm3, %v7783_v32, %v5340_v2  ;;  %v5179_v49 = vadd.f32 %v7785_v43, %v5178_v63  ;;  %v5214_v32 = vadd.f32 %v7564_v37, %v5167_v50  ;;  %v5207_v2 = vor.u32 1.1754944e-38, %v5206_v26  ;;  %v7471_v63 = vld [vmem:[%s14693_s2 + $0x2a0] sm:$0xff]  ;;  %v7460_v37 = vld [vmem:[%s14693_s2 + $0x248] sm:$0xff]  ;;  %v7461_v50 = vld [vmem:[%s14693_s2 + $0x250] sm:$0xff] }
 0xaaa   :  { %v5349_v25 = vsel %vm5346_vm4, %v5348_v3, %v5344_v8  ;;  %v7496_v3 = vld [vmem:[%s14690_s3 + $0x360] sm:$0xff]  ;;  %5717 = vmatpush.msrb.mxu0 %v7474_v6  ;;  %v7442_v26 = vld [vmem:[%s14693_s2 + $0x1b8] sm:$0xff] }
 0xaab   :  { %v5376_v48 = vmul.f32 %v5375_v27, %v5349_v25  ;;  %v5183_v57 = vsel %vm5182_vm11, %v7785_v43, %v5179_v49  ;;  %v7493_v27 = vld [vmem:[%s14690_s3 + $0x348] sm:$0xff]  ;;  %v7490_v25 = vld [vmem:[%s14690_s3 + $0x330] sm:$0xff] }
 0xaac   :  { %v5188_v28 = vsel %vm5185_vm12, %v5187_v30, %v5183_v57  ;;  %5718 = vmatpush.msrb.mxu0 %v7471_v63  ;;  %v7465_v49 = vld [vmem:[%s14693_s2 + $0x270] sm:$0xff]  ;;  %v7459_v57 = vld [vmem:[%s14693_s2 + $0x240] sm:$0xff]  ;;  %v7456_v30 = vld [vmem:[%s14693_s2 + $0x228] sm:$0xff] }
 0xaad   :  { %v5377_v1 = vadd.f32 %v5376_v48, %v223_v18  ;;  %v5215_v29 = vmul.f32 %v5214_v32, %v5188_v28  ;;  %v7453_v28 = vld [vmem:[%s14693_s2 + $0x210] sm:$0xff]  ;;  %v7450_v32 = vld [vmem:[%s14693_s2 + $0x1f8] sm:$0xff] }
 0xaae   :  { %v7519_v63 = vld [vmem:[%s14690_s3 + $0x418] sm:$0xff] }
 0xaaf   :  { %7788 = vtanh.f32 %v5377_v1  ;;  %v5216_v31 = vadd.f32 %v5215_v29, %v5060_v47  ;;  %v7481_v1 = vld [vmem:[%s14693_s2 + $0x2f0] sm:$0xff]  ;;  %v7452_v29 = vld [vmem:[%s14693_s2 + $0x208] sm:$0xff] }
 0xab0   :  { %7790 = vrcp.f32 %v14158_v5  ;;  %5735 = vmatpush.msra.mxu1 %v7481_v1  ;;  %v7449_v47 = vld [vmem:[%s14693_s2 + $0x1f0] sm:$0xff]  ;;  %v7525_v1 = vld [vmem:[%s14690_s3 + $0x448] sm:$0xff] }
 0xab1   :  { %7792 = vtanh.f32 %v5216_v31  ;;  %v7445_v31 = vld [vmem:[%s14693_s2 + $0x1d0] sm:$0xff] }
 0xab5   :  { %v7789_v55 = vpop.eup %7788 }
 0xab6   :  { %v5380_v9 = vmul.f32 %v7789_v55, %v5379_v61  ;;  %v7791_v36 = vpop.eup %7790  ;;  %v7475_v61 = vld [vmem:[%s14693_s2 + $0x2c0] sm:$0xff]  ;;  %v7476_v55 = vld [vmem:[%s14693_s2 + $0x2c8] sm:$0xff] }
 0xab7   :  { %v5196_v20 = vmul.f32 %v7791_v36, %v14158_v5  ;;  %vm5201_vm13 = vweird.f32 %v7791_v36  ;;  %v7793_v43 = vpop.eup %7792  ;;  %v7478_v5 = vld [vmem:[%s14693_s2 + $0x2d8] sm:$0xff] }
 0xab8   :  { %v5382_v7 = vadd.f32 %v5381_v17, %v5380_v9  ;;  %vm5202_vm15 = vmor %vm5200_vm14, %vm5201_vm13  ;;  %5736 = vmatpush.msra.mxu1 %v7478_v5  ;;  %v7472_v9 = vld [vmem:[%s14693_s2 + $0x2a8] sm:$0xff]  ;;  %v7473_v17 = vld [vmem:[%s14693_s2 + $0x2b0] sm:$0xff] }
 0xab9   :  { %v5197_v42 = vsub.f32 1.0, %v5196_v20  ;;  %v7463_v20 = vld [vmem:[%s14693_s2 + $0x260] sm:$0xff]  ;;  %v7522_v5 = vld [vmem:[%s14690_s3 + $0x430] sm:$0xff] }
 0xaba   :  { %5455 = vmatmul.f32.vlgmr.msrb.gmra.mxu2 %v5382_v7  ;;  %5475 = vmatmul.f32.vlgmr.msra.gmra.mxu3 %v5382_v7 }
 0xabb   :  { %5495 = vmatmul.f32.vlgmr.msra.gmra.mxu0 %v5382_v7  ;;  %5823 = vmatpush.msra.mxu3 %v7529_v15  ;;  %v5198_v14 = vmul.f32 %v7791_v36, %v5197_v42  ;;  %v7468_v7 = vld [vmem:[%s14693_s2 + $0x288] sm:$0xff]  ;;  %v7469_v15 = vld [vmem:[%s14693_s2 + $0x290] sm:$0xff]  ;;  %v7458_v42 = vld [vmem:[%s14693_s2 + $0x238] sm:$0xff] }
 0xabc   :  { %5755 = vmatpush.msrb.mxu2 %v7482_v10  ;;  %5737 = vmatpush.msra.mxu1 %v7475_v61  ;;  %v5957_v10 = vld [vmem:[%s14695_s6 + $0x68] sm:$0xff] }
 0xabd   :  { %5824 = vmatpush.msra.mxu3 %v7526_v13  ;;  %v5199_v41 = vadd.f32 %v7791_v36, %v5198_v14  ;;  %5719 = vmatpush.msrb.mxu0 %v7468_v7  ;;  %v7467_v13 = vld [vmem:[%s14693_s2 + $0x280] sm:$0xff] }
 0xabe   :  { %5756 = vmatpush.msrb.mxu2 %v7479_v46  ;;  %5738 = vmatpush.msra.mxu1 %v7472_v9  ;;  %v7447_v14 = vld [vmem:[%s14693_s2 + $0x1e0] sm:$0xff]  ;;  %v5955_v9 = vld [vmem:[%s14695_s6 + $0x58] sm:$0xff] }
 0xabf   :  { %5825 = vmatpush.msra.mxu3 %v7523_v12  ;;  %v5203_v4 = vsel %vm5202_vm15, %v7791_v36, %v5199_v41  ;;  %v7470_v36 = vld [vmem:[%s14693_s2 + $0x298] sm:$0xff]  ;;  %5720 = vmatpush.msrb.mxu0 %v7465_v49  ;;  %v7464_v12 = vld [vmem:[%s14693_s2 + $0x268] sm:$0xff]  ;;  %v5956_v46 = vld [vmem:[%s14695_s6 + $0x60] sm:$0xff] }
 0xac0   :  { %v5208_v8 = vsel %vm5205_vm0, %v5207_v2, %v5203_v4  ;;  %5757 = vmatpush.msrb.mxu2 %v7476_v55  ;;  %5739 = vmatpush.msra.mxu1 %v7469_v15  ;;  %v7446_v41 = vld [vmem:[%s14693_s2 + $0x1d8] sm:$0xff]  ;;  %v7439_v4 = vld [vmem:[%s14693_s2 + $0x1a0] sm:$0xff]  ;;  %v7518_v55 = vld [vmem:[%s14690_s3 + $0x410] sm:$0xff] }
 0xac1   :  { %5826 = vmatpush.msra.mxu3 %v7520_v11  ;;  %v5218_v34 = vsub.f32 1.0, %v5208_v8  ;;  %v5220_v48 = vmul.f32 %v5208_v8, %v13428_v58  ;;  %5721 = vmatpush.msrb.mxu0 %v7462_v22  ;;  %v7457_v11 = vld [vmem:[%s14693_s2 + $0x230] sm:$0xff]  ;;  %v7435_v2 = vld [vmem:[%s14693_s2 + $0x180] sm:$0xff] }
 0xac2   :  { %5583 = vmatmul.f32.vlgmr.msra.gmra.mxu2 %v13780_v16  ;;  %5603 = vmatmul.f32.vlgmr.msrb.gmra.mxu3 %v13780_v16  ;;  %v7437_v8 = vld [vmem:[%s14693_s2 + $0x190] sm:$0xff]  ;;  %v7516_v49 = vld [vmem:[%s14690_s3 + $0x400] sm:$0xff] }
 0xac3   :  { %5827 = vmatpush.msra.mxu3 %v7517_v51  ;;  %v5219_v18 = vmul.f32 %v7793_v43, %v5218_v34  ;;  %5758 = vmatpush.msrb.mxu2 %v7473_v17  ;;  %v7454_v51 = vld [vmem:[%s14693_s2 + $0x218] sm:$0xff]  ;;  %v5564_v17 = vpop.f32.mrf.mxu1 }
 0xac4   :  { %5740 = vmatpush.msra.mxu1 %v7466_v24  ;;  %5722 = vmatpush.msrb.mxu0 %v7459_v57  ;;  %v7531_v43 = vld [vmem:[%s14690_s3 + $0x478] sm:$0xff]  ;;  %v5954_v24 = vld [vmem:[%s14695_s6 + $0x50] sm:$0xff]  ;;  %v5953_v57 = vld [vmem:[%s14695_s6 + $0x48] sm:$0xff] }
 0xac5   :  { %5828 = vmatpush.msra.mxu3 %v7514_v33  ;;  %v14225_v39 = vadd.f32 %v5220_v48, %v5219_v18  ;;  %5759 = vmatpush.msrb.mxu2 %v7470_v36  ;;  %v7451_v33 = vld [vmem:[%s14693_s2 + $0x200] sm:$0xff]  ;;  %v5959_v34 = vld [vmem:[%s14695_s6 + $0x78] sm:$0xff] }
 0xac6   :  { %5741 = vmatpush.msra.mxu1 %v7463_v20  ;;  %5723 = vmatpush.msrb.mxu0 %v7456_v30  ;;  %v7528_v18 = vld [vmem:[%s14690_s3 + $0x460] sm:$0xff]  ;;  %v7515_v36 = vld [vmem:[%s14690_s3 + $0x3f8] sm:$0xff]  ;;  %v7510_v30 = vld [vmem:[%s14690_s3 + $0x3d0] sm:$0xff] }
 0xac7   :  { %5829 = vmatpush.msra.mxu3 %v7511_v0  ;;  %5760 = vmatpush.msrb.mxu2 %v7467_v13  ;;  %v7448_v0 = vld [vmem:[%s14693_s2 + $0x1e8] sm:$0xff]  ;;  %v14393_v48 = vld [vmem:[%s14694_s4 + $0x3] sm:$0x7] }
 0xac8   :  { %5742 = vmatpush.msra.mxu1 %v7460_v37  ;;  %5724 = vmatpush.msrb.mxu0 %v7453_v28  ;;  %v5434_v15 = vperm.slane %v14393_v48, 1  ;;  %v7512_v20 = vld [vmem:[%s14690_s3 + $0x3e0] sm:$0xff] }
 0xac9   :  { %5830 = vmatpush.msra.mxu3 %v7508_v23  ;;  %5761 = vmatpush.msrb.mxu2 %v7464_v12  ;;  %v7444_v23 = vld [vmem:[%s14693_s2 + $0x1c8] sm:$0xff] }
 0xaca   :  { %5743 = vmatpush.msra.mxu1 %v7457_v11  ;;  %5725 = vmatpush.msrb.mxu0 %v7450_v32  ;;  %v7513_v12 = vld [vmem:[%s14690_s3 + $0x3e8] sm:$0xff]  ;;  %v5952_v11 = vld [vmem:[%s14695_s6 + $0x40] sm:$0xff]  ;;  %v5951_v32 = vld [vmem:[%s14695_s6 + $0x38] sm:$0xff] }
 0xacb   :  { %5831 = vmatpush.msra.mxu3 %v7505_v62  ;;  %5762 = vmatpush.msrb.mxu2 %v7461_v50  ;;  %v7441_v62 = vld [vmem:[%s14693_s2 + $0x1b0] sm:$0xff]  ;;  %v7509_v50 = vld [vmem:[%s14690_s3 + $0x3c8] sm:$0xff] }
 0xacc   :  { %5744 = vmatpush.msra.mxu1 %v7454_v51  ;;  %5726 = vmatpush.msrb.mxu0 %v7447_v14  ;;  %v7506_v51 = vld [vmem:[%s14690_s3 + $0x3b0] sm:$0xff]  ;;  %v7504_v14 = vld [vmem:[%s14690_s3 + $0x3a0] sm:$0xff] }
 0xacd   :  { %5832 = vmatpush.msra.mxu3 %v7502_v54  ;;  %5763 = vmatpush.msrb.mxu2 %v7458_v42  ;;  %v7438_v54 = vld [vmem:[%s14693_s2 + $0x198] sm:$0xff] }
 0xace   :  { %5745 = vmatpush.msra.mxu1 %v7451_v33  ;;  %5727 = vmatpush.msrb.mxu0 %v7444_v23  ;;  %v7501_v23 = vld [vmem:[%s14690_s3 + $0x388] sm:$0xff] }
 0xacf   :  { %5833 = vmatpush.msra.mxu3 %v7499_v35  ;;  %5764 = vmatpush.msrb.mxu2 %v7455_v45  ;;  %v7440_v35 = vld [vmem:[%s14693_s2 + $0x1a8] sm:$0xff]  ;;  %v7507_v45 = vld [vmem:[%s14690_s3 + $0x3b8] sm:$0xff] }
 0xad0   :  { %5746 = vmatpush.msra.mxu1 %v7448_v0  ;;  %5728 = vmatpush.msrb.mxu0 %v7441_v62  ;;  %v5950_v0 = vld [vmem:[%s14695_s6 + $0x30] sm:$0xff]  ;;  %v7497_v62 = vld [vmem:[%s14690_s3 + $0x368] sm:$0xff] }
 0xad1   :  { %5834 = vmatpush.msra.mxu3 %v7496_v3  ;;  %5765 = vmatpush.msrb.mxu2 %v7452_v29  ;;  %v7436_v3 = vld [vmem:[%s14693_s2 + $0x188] sm:$0xff]  ;;  %v7503_v29 = vld [vmem:[%s14690_s3 + $0x398] sm:$0xff] }
 0xad2   :  { %5747 = vmatpush.msra.mxu1 %v7445_v31  ;;  %5729 = vmatpush.msrb.mxu0 %v7438_v54  ;;  %v5949_v31 = vld [vmem:[%s14695_s6 + $0x28] sm:$0xff]  ;;  %v5948_v54 = vld [vmem:[%s14695_s6 + $0x20] sm:$0xff] }
 0xad3   :  { %5835 = vmatpush.msra.mxu3 %v7493_v27  ;;  %5766 = vmatpush.msrb.mxu2 %v7449_v47  ;;  %v7530_v27 = vld [vmem:[%s14690_s3 + $0x470] sm:$0xff]  ;;  %v7500_v47 = vld [vmem:[%s14690_s3 + $0x380] sm:$0xff] }
 0xad4   :  { %5748 = vmatpush.msra.mxu1 %v7442_v26  ;;  %5730 = vmatpush.msrb.mxu0 %v7435_v2  ;;  %v5947_v2 = vld [vmem:[%s14695_s6 + $0x18] sm:$0xff] }
 0xad5   :  { %5836 = vmatpush.msra.mxu3 %v7490_v25  ;;  %5767 = vmatpush.msrb.mxu2 %v7446_v41  ;;  %v7527_v25 = vld [vmem:[%s14690_s3 + $0x458] sm:$0xff] }
 0xad6   :  { %5749 = vmatpush.msra.mxu1 %v7439_v4  ;;  %5843 = vmatpush.msra.mxu0 %v7530_v27  ;;  %v7494_v4 = vld [vmem:[%s14690_s3 + $0x350] sm:$0xff] }
 0xad7   :  { %5837 = vmatpush.msra.mxu3 %v7487_v56  ;;  %5768 = vmatpush.msrb.mxu2 %v7443_v21  ;;  %v5958_v56 = vld [vmem:[%s14695_s6 + $0x70] sm:$0xff] }
 0xad8   :  { %5750 = vmatpush.msra.mxu1 %v7436_v3  ;;  %5844 = vmatpush.msra.mxu0 %v7527_v25  ;;  %v7498_v21 = vld [vmem:[%s14690_s3 + $0x370] sm:$0xff]  ;;  %v7491_v3 = vld [vmem:[%s14690_s3 + $0x338] sm:$0xff] }
 0xad9   :  { %5838 = vmatpush.msra.mxu3 %v7484_v44  ;;  %5769 = vmatpush.msrb.mxu2 %v7440_v35  ;;  %v5433_v44 = vperm.slane %v14393_v48, 0  ;;  %v7495_v35 = vld [vmem:[%s14690_s3 + $0x358] sm:$0xff]  ;;  %v5946_v27 = vld [vmem:[%s14695_s6 + $0x10] sm:$0xff] }
 0xada   :  { %5839 = vmatmul.f32.vlgmr.msra.gmra.mxu3 %v14225_v39  ;;  %5863 = vmatpush.msrb.mxu1 %v7531_v43 }
 0xadb   :  { %5770 = vmatpush.msrb.mxu2 %v7437_v8  ;;  %5845 = vmatpush.msra.mxu0 %v7524_v59  ;;  %v7492_v8 = vld [vmem:[%s14690_s3 + $0x340] sm:$0xff] }
 0xadc   :  { %5864 = vmatpush.msrb.mxu1 %v7528_v18  ;;  %v7489_v18 = vld [vmem:[%s14690_s3 + $0x328] sm:$0xff] }
 0xadd   :  { %5964 = vmatpush.msra.mxu2 %v5959_v34  ;;  %5846 = vmatpush.msra.mxu0 %v7521_v19  ;;  %v7488_v34 = vld [vmem:[%s14690_s3 + $0x320] sm:$0xff] }
 0xade   :  { %5865 = vmatpush.msrb.mxu1 %v7525_v1  ;;  %v7486_v1 = vld [vmem:[%s14690_s3 + $0x310] sm:$0xff] }
 0xadf   :  { %5965 = vmatpush.msra.mxu2 %v5958_v56  ;;  %5847 = vmatpush.msra.mxu0 %v7518_v55  ;;  %v5945_v56 = vld [vmem:[%s14695_s6 + $0x8] sm:$0xff]  ;;  %v7566_v55 = vld [vmem:[%s14692_s5 + $0x1] ss:$0 sm:$0xff] }
 0xae0   :  { %5866 = vmatpush.msrb.mxu1 %v7522_v5 }
 0xae1   :  { %5966 = vmatpush.msra.mxu2 %v5957_v10  ;;  %5848 = vmatpush.msra.mxu0 %v7515_v36  ;;  %v5944_v10 = vld [vmem:[%s14695_s6] sm:$0xff] }
 0xae2   :  { %5867 = vmatpush.msrb.mxu1 %v7519_v63 }
 0xae3   :  { %5967 = vmatpush.msra.mxu2 %v5956_v46  ;;  %5849 = vmatpush.msra.mxu0 %v7512_v20 }
 0xae4   :  { %5868 = vmatpush.msrb.mxu1 %v7516_v49 }
 0xae5   :  { %5968 = vmatpush.msra.mxu2 %v5955_v9  ;;  %5850 = vmatpush.msra.mxu0 %v7509_v50  ;;  %v5435_v9 = vperm.slane %v14393_v48, 2 }
 0xae6   :  { %5869 = vmatpush.msrb.mxu1 %v7513_v12 }
 0xae7   :  { %5969 = vmatpush.msra.mxu2 %v5954_v24  ;;  %5851 = vmatpush.msra.mxu0 %v7506_v51 }
 0xae8   :  { %5870 = vmatpush.msrb.mxu1 %v7510_v30 }
 0xae9   :  { %5970 = vmatpush.msra.mxu2 %v5953_v57  ;;  %5852 = vmatpush.msra.mxu0 %v7503_v29 }
 0xaea   :  { %5871 = vmatpush.msrb.mxu1 %v7507_v45 }
 0xaeb   :  { %5971 = vmatpush.msra.mxu2 %v5952_v11  ;;  %5853 = vmatpush.msra.mxu0 %v7500_v47 }
 0xaec   :  { %5872 = vmatpush.msrb.mxu1 %v7504_v14 }
 0xaed   :  { %5972 = vmatpush.msra.mxu2 %v5951_v32  ;;  %5854 = vmatpush.msra.mxu0 %v7497_v62 }
 0xaee   :  { %5873 = vmatpush.msrb.mxu1 %v7501_v23 }
 0xaef   :  { %5973 = vmatpush.msra.mxu2 %v5950_v0  ;;  %5855 = vmatpush.msra.mxu0 %v7494_v4 }
 0xaf0   :  { %5874 = vmatpush.msrb.mxu1 %v7498_v21 }
 0xaf1   :  { %5974 = vmatpush.msra.mxu2 %v5949_v31  ;;  %5856 = vmatpush.msra.mxu0 %v7491_v3 }
 0xaf2   :  { %5875 = vmatpush.msrb.mxu1 %v7495_v35 }
 0xaf3   :  { %5975 = vmatpush.msra.mxu2 %v5948_v54  ;;  %5857 = vmatpush.msra.mxu0 %v7488_v34 }
 0xaf4   :  { %5876 = vmatpush.msrb.mxu1 %v7492_v8 }
 0xaf5   :  { %5976 = vmatpush.msra.mxu2 %v5947_v2 }
 0xaf6   :  { %5877 = vmatpush.msrb.mxu1 %v7489_v18 }
 0xaf7   :  { %5977 = vmatpush.msra.mxu2 %v5946_v27  ;;  %v14543_v27 = vld [vmem:[%s14696_s7] ss:$0 sm:$0xff] }
 0xaf8   :  { %5878 = vmatpush.msrb.mxu1 %v7486_v1 }
 0xaf9   :  { %5978 = vmatpush.msra.mxu2 %v5945_v56 }
 0xafb   :  { %5979 = vmatpush.msra.mxu2 %v5944_v10 }
 0xb3d   :  { %v5456_v6 = vpop.f32.mrf.mxu2  ;;  %v5476_v13 = vpop.f32.mrf.mxu3 }
 0xb3e   :  { %v5457_v61 = vadd.f32 %v5456_v6, %v5433_v44  ;;  %v5477_v37 = vadd.f32 %v5476_v13, %v5434_v15  ;;  %v7485_v44 = vld [vmem:[%s14690_s3 + $0x308] sm:$0xff] }
 0xb3f   :  { %5858 = vmatpush.msra.mxu0 %v7485_v44 }
 0xb40   :  { %v5607_v7 = vadd.f32 %v5564_v17, %v5457_v61 }
 0xb42   :  { %v7432_v22 = vmul.f32 -1.442695, %v5607_v7  ;;  %v5496_v7 = vpop.f32.mrf.mxu0 }
 0xb43   :  { %v5497_v20 = vadd.f32 %v5496_v7, %v5435_v9  ;;  %v7567_v9 = vld [vmem:[%s14692_s5 + $0x2] ss:$0 sm:$0xff] }
 0xb44   :  { %7794 = vpow2.f32 %v7432_v22 }
 0xb45   :  { %v5584_v42 = vpop.f32.mrf.mxu2  ;;  %v5604_v17 = vpop.f32.mrf.mxu3 }
 0xb46   :  { %v5627_v28 = vadd.f32 %v5584_v42, %v5477_v37  ;;  %v5651_v22 = vadd.f32 %v7566_v55, %v5604_v17 }
 0xb48   :  { %v7433_v33 = vmul.f32 -1.442695, %v5627_v28 }
 0xb4a   :  { %v7795_v41 = vpop.eup %7794  ;;  %7796 = vpow2.f32 %v7433_v33 }
 0xb4b   :  { %v5611_v26 = vadd.f32 1.0, %v7795_v41 }
 0xb4d   :  { %7798 = vrcp.f32 %v5611_v26  ;;  %v5623_v46 = vand.u32 2147483648, %v5611_v26  ;;  %v5621_v61 = vand.u32 2147483647, %v5611_v26  ;;  %vm5617_vm2 = vweird.f32 %v5611_v26 }
 0xb4f   :  { %v5624_v49 = vor.u32 1.1754944e-38, %v5623_v46  ;;  %vm5622_vm4 = vcmp.eq.f32.partialorder %v5621_v61, 8.507059e+37 }
 0xb50   :  { %v7797_v43 = vpop.eup %7796 }
 0xb51   :  { %v5631_v25 = vadd.f32 1.0, %v7797_v43 }
 0xb53   :  { %v7799_v59 = vpop.eup %7798  ;;  %7800 = vrcp.f32 %v5631_v25  ;;  %v5643_v37 = vand.u32 2147483648, %v5631_v25  ;;  %v5641_v30 = vand.u32 2147483647, %v5631_v25  ;;  %vm5637_vm6 = vweird.f32 %v5631_v25 }
 0xb54   :  { %v5613_v19 = vmul.f32 %v7799_v59, %v5611_v26  ;;  %vm5618_vm1 = vweird.f32 %v7799_v59 }
 0xb55   :  { %vm5619_vm3 = vmor %vm5617_vm2, %vm5618_vm1  ;;  %v5644_v42 = vor.u32 1.1754944e-38, %v5643_v37  ;;  %vm5642_vm8 = vcmp.eq.f32.partialorder %v5641_v30, 8.507059e+37  ;;  %vm6217_vm2 = vcmask 523264  }
 0xb56   :  { %v5614_v5 = vsub.f32 1.0, %v5613_v19 }
 0xb58   :  { %v5615_v6 = vmul.f32 %v7799_v59, %v5614_v5 }
 0xb59   :  { %v7801_v63 = vpop.eup %7800 }
 0xb5a   :  { %v5633_v15 = vmul.f32 %v7801_v63, %v5631_v25  ;;  %v5616_v36 = vadd.f32 %v7799_v59, %v5615_v6  ;;  %vm5638_vm5 = vweird.f32 %v7801_v63 }
 0xb5b   :  { %vm5639_vm7 = vmor %vm5637_vm6, %vm5638_vm5 }
 0xb5c   :  { %v5634_v24 = vsub.f32 1.0, %v5633_v15  ;;  %v5620_v13 = vsel %vm5619_vm3, %v7799_v59, %v5616_v36  ;;  %v14549_v59 = vld [vmem:[%s14697_s8] ss:$0 sm:$0xff]  ;;  %vm6273_vm3 = vcmask 31744  }
 0xb5d   :  { %v5625_v12 = vsel %vm5622_vm4, %v5624_v49, %v5620_v13  ;;  %v5840_v31 = vpop.f32.mrf.mxu3 }
 0xb5e   :  { %v5635_v57 = vmul.f32 %v7801_v63, %v5634_v24  ;;  %v5652_v50 = vmul.f32 %v5651_v22, %v5625_v12 }
 0xb60   :  { %v5636_v11 = vadd.f32 %v7801_v63, %v5635_v57  ;;  %v5653_v48 = vadd.f32 %v5652_v50, %v5497_v20 }
 0xb62   :  { %v5640_v28 = vsel %vm5639_vm7, %v7801_v63, %v5636_v11  ;;  %7802 = vtanh.f32 %v5653_v48 }
 0xb63   :  { %v5645_v51 = vsel %vm5642_vm8, %v5644_v42, %v5640_v28 }
 0xb64   :  { %v5655_v45 = vsub.f32 1.0, %v5645_v51  ;;  %v5657_v29 = vmul.f32 %v5645_v51, %v13780_v16  ;;  %v7483_v16 = vld [vmem:[%s14694_s4 + $0x6] sm:$0x7] }
 0xb65   :  { %v5709_v0 = vperm.slane %v7483_v16, 0  ;;  %v5710_v62 = vperm.slane %v7483_v16, 1  ;;  %v5711_v7 = vperm.slane %v7483_v16, 2 }
 0xb68   :  { %v7803_v32 = vpop.eup %7802 }
 0xb69   :  { %v5656_v33 = vmul.f32 %v7803_v32, %v5655_v45 }
 0xb6b   :  { %v5658_v14 = vadd.f32 %v5657_v29, %v5656_v33 }
 0xb6d   :  { %5731 = vmatmul.f32.vlgmr.msrb.gmra.mxu0 %v5658_v14  ;;  %5751 = vmatmul.f32.vlgmr.msra.gmra.mxu1 %v5658_v14 }
 0xb6e   :  { %5771 = vmatmul.f32.vlgmr.msrb.gmra.mxu2 %v5658_v14 }
 0xb75   :  { %5859 = vmatmul.f32.vlgmr.msra.gmra.mxu0 %v14225_v39  ;;  %5879 = vmatmul.f32.vlgmr.msrb.gmra.mxu1 %v14225_v39 }
 0xb76   :  { %5980 = vmatmul.f32.vlgmr.msra.gmra.mxu2 %v9418_v52 }
 0xb7e   :  { %5983 = vmatmul.f32.gmra.mxu2 %v10220_v40 }
 0xb86   :  { %5986 = vmatmul.f32.gmra.mxu2 %v11022_v38 }
 0xb8e   :  { %5989 = vmatmul.f32.gmra.mxu2 %v11824_v53 }
 0xb96   :  { %5992 = vmatmul.f32.gmra.mxu2 %v12626_v60 }
 0xb9e   :  { %5995 = vmatmul.f32.gmra.mxu2 %v13428_v58 }
 0xba6   :  { %5998 = vmatmul.f32.gmra.mxu2 %v14225_v39 }
 0xbea   :  { %v5732_v47 = vpop.f32.mrf.mxu0  ;;  %v5752_v26 = vpop.f32.mrf.mxu1 }
 0xbeb   :  { %v5733_v23 = vadd.f32 %v5732_v47, %v5709_v0  ;;  %v5753_v54 = vadd.f32 %v5752_v26, %v5710_v62 }
 0xbed   :  { %v5883_v41 = vadd.f32 %v5840_v31, %v5733_v23 }
 0xbef   :  { %v7532_v21 = vmul.f32 -1.442695, %v5883_v41 }
 0xbf1   :  { %7804 = vpow2.f32 %v7532_v21  ;;  %v5772_v4 = vpop.f32.mrf.mxu2 }
 0xbf2   :  { %v5860_v35 = vpop.f32.mrf.mxu0  ;;  %v5880_v15 = vpop.f32.mrf.mxu1  ;;  %v5773_v50 = vadd.f32 %v5772_v4, %v5711_v7 }
 0xbf3   :  { %v5903_v2 = vadd.f32 %v5860_v35, %v5753_v54  ;;  %v5927_v12 = vadd.f32 %v7567_v9, %v5880_v15  ;;  %v21_v35 = vstv %s14698_s9 }
 0xbf4   :  { %22 = vst [vmem:[#allocation3] sm:$0x1] %v21_v35 }
 0xbf5   :  { %v7533_v3 = vmul.f32 -1.442695, %v5903_v2 }
 0xbf7   :  { %v7805_v8 = vpop.eup %7804  ;;  %7806 = vpow2.f32 %v7533_v3 }
 0xbf8   :  { %v5887_v43 = vadd.f32 1.0, %v7805_v8 }
 0xbf9   :  { %v5981_v34 = vpop.f32.mrf.mxu2 }
 0xbfa   :  { %7808 = vrcp.f32 %v5887_v43  ;;  %v5982_v25 = vadd.f32 %v14543_v27, %v5981_v34  ;;  %v5899_v6 = vand.u32 2147483648, %v5887_v43  ;;  %v5897_v63 = vand.u32 2147483647, %v5887_v43 }
 0xbfb   :  { %vm5893_vm11 = vweird.f32 %v5887_v43 }
 0xbfc   :  { %7810 = vtanh.f32 %v5982_v25  ;;  %v5900_v13 = vor.u32 1.1754944e-38, %v5899_v6  ;;  %vm5898_vm13 = vcmp.eq.f32.partialorder %v5897_v63, 8.507059e+37 }
 0xbfd   :  { %v7807_v18 = vpop.eup %7806 }
 0xbfe   :  { %v5907_v56 = vadd.f32 1.0, %v7807_v18 }
 0xc00   :  { %v7809_v44 = vpop.eup %7808  ;;  %7812 = vrcp.f32 %v5907_v56  ;;  %v5919_v48 = vand.u32 2147483648, %v5907_v56  ;;  %v5917_v45 = vand.u32 2147483647, %v5907_v56  ;;  %vm5913_vm15 = vweird.f32 %v5907_v56 }
 0xc01   :  { %v5889_v1 = vmul.f32 %v7809_v44, %v5887_v43  ;;  %v5984_v10 = vpop.f32.mrf.mxu2  ;;  %vm5894_vm10 = vweird.f32 %v7809_v44 }
 0xc02   :  { %v5985_v19 = vadd.f32 %v14543_v27, %v5984_v10  ;;  %v7811_v5 = vpop.eup %7810  ;;  %vm5895_vm12 = vmor %vm5893_vm11, %vm5894_vm10  ;;  %v5920_v16 = vor.u32 1.1754944e-38, %v5919_v48  ;;  %vm5918_vm1 = vcmp.eq.f32.partialorder %v5917_v45, 8.507059e+37 }
 0xc03   :  { %v5890_v46 = vsub.f32 1.0, %v5889_v1  ;;  %v6017_v61 = vmul.f32 %v7811_v5, %v14549_v59 }
 0xc04   :  { %7814 = vtanh.f32 %v5985_v19 }
 0xc05   :  { %v5891_v55 = vmul.f32 %v7809_v44, %v5890_v46  ;;  %v6026_v36 = vsel %vm6025_vm9, %v6017_v61, 0.0 }
 0xc06   :  { %v7813_v17 = vpop.eup %7812  ;;  %6027 = vadd.xlane.f32.xlu0 %v6026_v36 }
 0xc07   :  { %v5909_v49 = vmul.f32 %v7813_v17, %v5907_v56  ;;  %v5892_v24 = vadd.f32 %v7809_v44, %v5891_v55  ;;  %vm5914_vm14 = vweird.f32 %v7813_v17 }
 0xc08   :  { %vm5915_vm0 = vmor %vm5913_vm15, %vm5914_vm14 }
 0xc09   :  { %v5910_v22 = vsub.f32 1.0, %v5909_v49  ;;  %v5896_v20 = vsel %vm5895_vm12, %v7809_v44, %v5892_v24  ;;  %v5987_v57 = vpop.f32.mrf.mxu2 }
 0xc0a   :  { %v7815_v37 = vpop.eup %7814  ;;  %v5901_v30 = vsel %vm5898_vm13, %v5900_v13, %v5896_v20  ;;  %v5988_v11 = vadd.f32 %v14543_v27, %v5987_v57 }
 0xc0b   :  { %v5928_v42 = vmul.f32 %v5927_v12, %v5901_v30  ;;  %v6018_v28 = vmul.f32 %v7815_v37, %v14549_v59  ;;  %v5911_v51 = vmul.f32 %v7813_v17, %v5910_v22  ;;  %v7570_v12 = vld [vmem:[#allocation3] ss:$0 sm:$0xff] }
 0xc0c   :  { %7816 = vtanh.f32 %v5988_v11  ;;  %v7852_v11 = vmov 0  }
 0xc0d   :  { %v5929_v32 = vadd.f32 %v5928_v42, %v5773_v50  ;;  %v6029_v33 = vsel %vm6025_vm9, %v6018_v28, 0.0  ;;  %v5912_v29 = vadd.f32 %v7813_v17, %v5911_v51  ;;  %7543 = vset.pattern.permute.xlu1 %v7852_v11  ;;  %7542 = vset.pattern.permute.xlu0 %v7852_v11 }
 0xc0e   :  { %6030 = vadd.xlane.f32.xlu0 %v6029_v33  ;;  %7541 = vset.pattern.permute.xlu2 %v7852_v11  ;;  %v6171_v11 = vld [vmem:[%s14700_s10 + $0x38] sm:$0xff] }
 0xc0f   :  { %7818 = vtanh.f32 %v5929_v32  ;;  %v5916_v14 = vsel %vm5915_vm0, %v7813_v17, %v5912_v29 }
 0xc10   :  { %v5921_v47 = vsel %vm5918_vm1, %v5920_v16, %v5916_v14 }
 0xc11   :  { %v5990_v0 = vpop.f32.mrf.mxu2  ;;  %v5931_v62 = vsub.f32 1.0, %v5921_v47  ;;  %v5933_v4 = vmul.f32 %v5921_v47, %v14225_v39 }
 0xc12   :  { %v7817_v23 = vpop.eup %7816  ;;  %v5991_v31 = vadd.f32 %v14543_v27, %v5990_v0 }
 0xc13   :  { %v6019_v41 = vmul.f32 %v7817_v23, %v14549_v59 }
 0xc14   :  { %7820 = vtanh.f32 %v5991_v31 }
 0xc15   :  { %v7819_v26 = vpop.eup %7818  ;;  %v6032_v21 = vsel %vm6025_vm9, %v6019_v41, 0.0 }
 0xc16   :  { %6033 = vadd.xlane.f32.xlu1 %v6032_v21  ;;  %v5932_v54 = vmul.f32 %v7819_v26, %v5931_v62 }
 0xc18   :  { %v14567_v2 = vadd.f32 %v5933_v4, %v5932_v54 }
 0xc19   :  { %v5993_v3 = vpop.f32.mrf.mxu2 }
 0xc1a   :  { %v7821_v8 = vpop.eup %7820  ;;  %v5994_v43 = vadd.f32 %v14543_v27, %v5993_v3  ;;  %6001 = vmatmul.f32.gmra.mxu2 %v14567_v2 }
 0xc1b   :  { %v6020_v34 = vmul.f32 %v7821_v8, %v14549_v59 }
 0xc1c   :  { %7822 = vtanh.f32 %v5994_v43 }
 0xc1d   :  { %v6035_v25 = vsel %vm6025_vm9, %v6020_v34, 0.0 }
 0xc1e   :  { %6036 = vadd.xlane.f32.xlu1 %v6035_v25 }
 0xc21   :  { %v5996_v18 = vpop.f32.mrf.mxu2 }
 0xc22   :  { %v7823_v56 = vpop.eup %7822  ;;  %v5997_v44 = vadd.f32 %v14543_v27, %v5996_v18 }
 0xc23   :  { %v6021_v1 = vmul.f32 %v7823_v56, %v14549_v59 }
 0xc24   :  { %7824 = vtanh.f32 %v5997_v44 }
 0xc25   :  { %v6038_v10 = vsel %vm6025_vm9, %v6021_v1, 0.0 }
 0xc26   :  { %6039 = vadd.xlane.f32.xlu2 %v6038_v10 }
 0xc29   :  { %v5999_v19 = vpop.f32.mrf.mxu2 }
 0xc2a   :  { %v7825_v5 = vpop.eup %7824  ;;  %v6000_v46 = vadd.f32 %v14543_v27, %v5999_v19 }
 0xc2b   :  { %v6022_v6 = vmul.f32 %v7825_v5, %v14549_v59 }
 0xc2c   :  { %7826 = vtanh.f32 %v6000_v46 }
 0xc2d   :  { %v6041_v61 = vsel %vm6025_vm9, %v6022_v6, 0.0 }
 0xc2e   :  { %6042 = vadd.xlane.f32.xlu2 %v6041_v61 }
 0xc32   :  { %v7827_v55 = vpop.eup %7826 }
 0xc33   :  { %v6023_v63 = vmul.f32 %v7827_v55, %v14549_v59 }
 0xc35   :  { %v6044_v9 = vsel %vm6025_vm9, %v6023_v63, 0.0 }
 0xc36   :  { %6045 = vadd.xlane.f32.xlu0 %v6044_v9 }
 0xc79   :  { %v6028_v24 = vpop.xlane.xlu0 %6027 }
 0xc7a   :  { %v6054_v50 = vadd.f32 %v7570_v12, %v6028_v24 }
 0xc81   :  { %v6031_v20 = vpop.xlane.xlu0 %6030 }
 0xc82   :  { %v6055_v57 = vadd.f32 %v7570_v12, %v6031_v20  ;;  %v6177_v20 = vld [vmem:[%s14700_s10 + $0x68] sm:$0xff] }
 0xc89   :  { %v6034_v13 = vpop.xlane.xlu1 %6033 }
 0xc8a   :  { %v6056_v30 = vadd.f32 %v7570_v12, %v6034_v13  ;;  %v6179_v13 = vld [vmem:[%s14700_s10 + $0x78] sm:$0xff] }
 0xc8b   :  { %6184 = vmatpush.msrb.mxu3 %v6179_v13 }
 0xc91   :  { %v6037_v37 = vpop.xlane.xlu1 %6036 }
 0xc92   :  { %v6057_v48 = vadd.f32 %v7570_v12, %v6037_v37  ;;  %v6174_v37 = vld [vmem:[%s14700_s10 + $0x50] sm:$0xff] }
 0xc99   :  { %v6040_v22 = vpop.xlane.xlu2 %6039 }
 0xc9a   :  { %v6058_v28 = vadd.f32 %v7570_v12, %v6040_v22  ;;  %v6178_v22 = vld [vmem:[%s14700_s10 + $0x70] sm:$0xff] }
 0xc9b   :  { %6185 = vmatpush.msrb.mxu3 %v6178_v22 }
 0xc9d   :  { %v6002_v17 = vpop.f32.mrf.mxu2  ;;  %6186 = vmatpush.msrb.mxu3 %v6177_v20 }
 0xc9e   :  { %v6003_v7 = vadd.f32 %v14543_v27, %v6002_v17  ;;  %v6062_v27 = vmax.f32 %v6054_v50, %v6055_v57 }
 0xca0   :  { %7828 = vtanh.f32 %v6003_v7 }
 0xca1   :  { %v6043_v42 = vpop.xlane.xlu2 %6042 }
 0xca2   :  { %v6059_v32 = vadd.f32 %v7570_v12, %v6043_v42  ;;  %v6169_v42 = vld [vmem:[%s14700_s10 + $0x28] sm:$0xff] }
 0xca6   :  { %v7829_v15 = vpop.eup %7828 }
 0xca7   :  { %v6024_v36 = vmul.f32 %v7829_v15, %v14549_v59  ;;  %v6063_v59 = vmax.f32 %v6062_v27, %v6056_v30  ;;  %v6170_v27 = vld [vmem:[%s14700_s10 + $0x30] sm:$0xff] }
 0xca9   :  { %v6047_v49 = vsel %vm6025_vm9, %v6024_v36, 0.0  ;;  %v6046_v51 = vpop.xlane.xlu0 %6045  ;;  %v6064_v45 = vmax.f32 %v6063_v59, %v6057_v48  ;;  %v6168_v59 = vld [vmem:[%s14700_s10 + $0x20] sm:$0xff] }
 0xcaa   :  { %6048 = vadd.xlane.f32.xlu1 %v6047_v49  ;;  %v6060_v29 = vadd.f32 %v7570_v12, %v6046_v51  ;;  %v6166_v51 = vld [vmem:[%s14700_s10 + $0x10] sm:$0xff] }
 0xcab   :  { %v6065_v33 = vmax.f32 %v6064_v45, %v6058_v28  ;;  %v6165_v45 = vld [vmem:[%s14700_s10 + $0x8] sm:$0xff] }
 0xcad   :  { %v6066_v14 = vmax.f32 %v6065_v33, %v6059_v32  ;;  %v6211_v33 = vld [vmem:[%s14701_s12 + $0x30] sm:$0xff] }
 0xcaf   :  { %v6067_v0 = vmax.f32 %v6066_v14, %v6060_v29  ;;  %v6164_v14 = vld [vmem:[%s14700_s10] sm:$0xff] }
 0xd1d   :  { %v6049_v16 = vpop.xlane.xlu1 %6048 }
 0xd1e   :  { %v6061_v47 = vadd.f32 %v7570_v12, %v6049_v16  ;;  %v6176_v12 = vld [vmem:[%s14700_s10 + $0x60] sm:$0xff]  ;;  %v6210_v16 = vld [vmem:[%s14701_s12 + $0x28] sm:$0xff] }
 0xd1f   :  { %6187 = vmatpush.msrb.mxu3 %v6176_v12 }
 0xd20   :  { %v6068_v23 = vmax.f32 %v6067_v0, %v6061_v47  ;;  %v6209_v0 = vld [vmem:[%s14701_s12 + $0x20] sm:$0xff] }
 0xd22   :  { %v6069_v31 = vsub.f32 %v6054_v50, %v6068_v23  ;;  %v6080_v41 = vsub.f32 %v6055_v57, %v6068_v23  ;;  %v6091_v62 = vsub.f32 %v6056_v30, %v6068_v23  ;;  %v6102_v26 = vsub.f32 %v6057_v48, %v6068_v23  ;;  %v6175_v57 = vld [vmem:[%s14700_s10 + $0x58] sm:$0xff]  ;;  %v6173_v50 = vld [vmem:[%s14700_s10 + $0x48] sm:$0xff]  ;;  %v6172_v30 = vld [vmem:[%s14700_s10 + $0x40] sm:$0xff] }
 0xd23   :  { %v6113_v35 = vsub.f32 %v6058_v28, %v6068_v23  ;;  %v6124_v8 = vsub.f32 %v6059_v32, %v6068_v23  ;;  %v6135_v34 = vsub.f32 %v6060_v29, %v6068_v23  ;;  %v6146_v18 = vsub.f32 %v6061_v47, %v6068_v23  ;;  %6188 = vmatpush.msrb.mxu3 %v6175_v57  ;;  %v6167_v28 = vld [vmem:[%s14700_s10 + $0x18] sm:$0xff] }
 0xd24   :  { %v6070_v21 = vmul.f32 1.442695, %v6069_v31  ;;  %v6081_v54 = vmul.f32 1.442695, %v6080_v41  ;;  %v6092_v4 = vmul.f32 1.442695, %v6091_v62 }
 0xd25   :  { %v6103_v3 = vmul.f32 1.442695, %v6102_v26  ;;  %v6114_v43 = vmul.f32 1.442695, %v6113_v35  ;;  %v6125_v25 = vmul.f32 1.442695, %v6124_v8  ;;  %6189 = vmatpush.msrb.mxu3 %v6174_v37 }
 0xd26   :  { %7830 = vpow2.f32 %v6070_v21  ;;  %v6136_v1 = vmul.f32 1.442695, %v6135_v34  ;;  %v6147_v5 = vmul.f32 1.442695, %v6146_v18  ;;  %v6212_v32 = vld [vmem:[%s14701_s12 + $0x38] sm:$0xff] }
 0xd27   :  { %7832 = vpow2.f32 %v6081_v54  ;;  %6190 = vmatpush.msrb.mxu3 %v6173_v50  ;;  %6229 = vmatpush.msrb.mxu0 %v6212_v32  ;;  %v6208_v47 = vld [vmem:[%s14701_s12 + $0x18] sm:$0xff] }
 0xd28   :  { %7834 = vpow2.f32 %v6092_v4 }
 0xd29   :  { %7836 = vpow2.f32 %v6103_v3  ;;  %6191 = vmatpush.msrb.mxu3 %v6172_v30  ;;  %6230 = vmatpush.msrb.mxu0 %v6211_v33 }
 0xd2a   :  { %7838 = vpow2.f32 %v6114_v43 }
 0xd2b   :  { %7840 = vpow2.f32 %v6125_v25  ;;  %6192 = vmatpush.msrb.mxu3 %v6171_v11  ;;  %6231 = vmatpush.msrb.mxu0 %v6210_v16 }
 0xd2c   :  { %v7831_v56 = vpop.eup %7830  ;;  %7842 = vpow2.f32 %v6136_v1 }
 0xd2d   :  { %v7833_v44 = vpop.eup %7832  ;;  %6075 = vperm.xlu2 %7541, %v7831_v56   ;;  %7844 = vpow2.f32 %v6147_v5  ;;  %6193 = vmatpush.msrb.mxu3 %v6170_v27  ;;  %v7571_v5 = vld [vmem:[%s14699_s11] ss:$0 sm:$0xff] }
 0xd2e   :  { %v7835_v10 = vpop.eup %7834  ;;  %v6083_v19 = vadd.f32 %v7833_v44, %v7831_v56  ;;  %6086 = vperm.xlu0 %7542, %v7833_v44   ;;  %6232 = vmatpush.msrb.mxu0 %v6209_v0 }
 0xd2f   :  { %6097 = vperm.xlu1 %7543, %v7835_v10   ;;  %v7837_v6 = vpop.eup %7836  ;;  %6194 = vmatpush.msrb.mxu3 %v6169_v42 }
 0xd30   :  { %v6094_v46 = vadd.f32 %v7835_v10, %v6083_v19  ;;  %v7839_v55 = vpop.eup %7838  ;;  %6233 = vmatpush.msrb.mxu0 %v6208_v47 }
 0xd31   :  { %v7841_v9 = vpop.eup %7840  ;;  %6195 = vmatpush.msrb.mxu3 %v6168_v59 }
 0xd32   :  { %v6105_v61 = vadd.f32 %v7837_v6, %v6094_v46  ;;  %v7843_v7 = vpop.eup %7842 }
 0xd33   :  { %v7845_v36 = vpop.eup %7844  ;;  %6196 = vmatpush.msrb.mxu3 %v6167_v28 }
 0xd34   :  { %v6116_v63 = vadd.f32 %v7839_v55, %v6105_v61 }
 0xd35   :  { %6108 = vperm.xlu2 %7541, %v7837_v6   ;;  %6197 = vmatpush.msrb.mxu3 %v6166_v51 }
 0xd36   :  { %v6127_v17 = vadd.f32 %v7841_v9, %v6116_v63  ;;  %v6242_v63 = vld [vmem:[%s14703_s14] sm:$0xff] }
 0xd37   :  { %6130 = vperm.xlu1 %7543, %v7841_v9   ;;  %6198 = vmatpush.msrb.mxu3 %v6165_v45  ;;  %v7572_v9 = vld [vmem:[%s14702_s13] ss:$0 sm:$0xff] }
 0xd38   :  { %v6138_v15 = vadd.f32 %v7843_v7, %v6127_v17 }
 0xd39   :  { %6199 = vmatpush.msrb.mxu3 %v6164_v14 }
 0xd3a   :  { %v6149_v49 = vadd.f32 %v7845_v36, %v6138_v15 }
 0xd3c   :  { %7846 = vrcp.f32 %v6149_v49 }
 0xd3d   :  { %6119 = vperm.xlu2 %7541, %v7839_v55   ;;  %v6243_v55 = vld [vmem:[%s14703_s14 + $0x8] sm:$0xff] }
 0xd3f   :  { %6152 = vperm.xlu1 %7543, %v7845_v36   ;;  %v7573_v36 = vld [vmem:[%s14704_s15] ss:$0 sm:$0xff] }
 0xd42   :  { %v7847_v24 = vpop.eup %7846 }
 0xd43   :  { %6160 = vperm.xlu0 %7542, %v7847_v24  }
 0xd45   :  { %6141 = vperm.xlu2 %7541, %v7843_v7  }
 0xd87   :  { %v6076_v48 = vpop.permute.xlu2 %6075 }
 0xd88   :  { %v6078_v31 = vmul.f32 %v6076_v48, %v9418_v52 }
 0xd8f   :  { %v6109_v29 = vpop.permute.xlu2 %6108 }
 0xd90   :  { %v6111_v4 = vmul.f32 %v6109_v29, %v11824_v53  ;;  %v6207_v53 = vld [vmem:[%s14701_s12 + $0x10] sm:$0xff] }
 0xd91   :  { %6234 = vmatpush.msrb.mxu0 %v6207_v53 }
 0xd97   :  { %v6120_v26 = vpop.permute.xlu2 %6119 }
 0xd98   :  { %v6122_v8 = vmul.f32 %v6120_v26, %v12626_v60  ;;  %v6206_v60 = vld [vmem:[%s14701_s12 + $0x8] sm:$0xff] }
 0xd99   :  { %6235 = vmatpush.msrb.mxu0 %v6206_v60 }
 0xd9f   :  { %v6142_v18 = vpop.permute.xlu2 %6141 }
 0xda0   :  { %v6087_v23 = vpop.permute.xlu0 %6086  ;;  %v6144_v56 = vmul.f32 %v6142_v18, %v14225_v39  ;;  %v6245_v39 = vld [vmem:[%s14703_s14 + $0x18] sm:$0xff] }
 0xda1   :  { %v6098_v41 = vpop.permute.xlu1 %6097  ;;  %v6089_v62 = vmul.f32 %v6087_v23, %v10220_v40 }
 0xda2   :  { %v6100_v21 = vmul.f32 %v6098_v41, %v11022_v38 }
 0xda3   :  { %v6090_v54 = vadd.f32 %v6089_v62, %v6078_v31 }
 0xda5   :  { %v6101_v35 = vadd.f32 %v6100_v21, %v6090_v54 }
 0xda7   :  { %v6112_v3 = vadd.f32 %v6111_v4, %v6101_v35 }
 0xda9   :  { %v6131_v43 = vpop.permute.xlu1 %6130  ;;  %v6123_v34 = vadd.f32 %v6122_v8, %v6112_v3 }
 0xdaa   :  { %v6133_v25 = vmul.f32 %v6131_v43, %v13428_v58  ;;  %v6205_v58 = vld [vmem:[%s14701_s12] sm:$0xff] }
 0xdab   :  { %6236 = vmatpush.msrb.mxu0 %v6205_v58 }
 0xdac   :  { %v6134_v52 = vadd.f32 %v6133_v25, %v6123_v34 }
 0xdad   :  { %6265 = vmatpush.msra.mxu0 %v6245_v39 }
 0xdae   :  { %v6145_v1 = vadd.f32 %v6144_v56, %v6134_v52 }
 0xdb1   :  { %v6153_v40 = vpop.permute.xlu1 %6152 }
 0xdb2   :  { %v6155_v44 = vmul.f32 %v6153_v40, %v14567_v2  ;;  %v6244_v2 = vld [vmem:[%s14703_s14 + $0x10] sm:$0xff] }
 0xdb3   :  { %6266 = vmatpush.msra.mxu0 %v6244_v2 }
 0xdb4   :  { %v6156_v38 = vadd.f32 %v6155_v44, %v6145_v1 }
 0xdb5   :  { %v6161_v10 = vpop.permute.xlu0 %6160  ;;  %6267 = vmatpush.msra.mxu0 %v6243_v55 }
 0xdb6   :  { %v6163_v19 = vmul.f32 %v6161_v10, %v6156_v38 }
 0xdb7   :  { %6268 = vmatpush.msra.mxu0 %v6242_v63 }
 0xdb8   :  { %6200 = vmatmul.f32.vlgmr.msrb.gmra.mxu3 %v6163_v19 }
 0xe3b   :  { %v6201_v46 = vpop.f32.mrf.mxu3 }
 0xe3c   :  { %v6202_v6 = vadd.f32 %v7571_v5, %v6201_v46 }
 0xe3e   :  { %v6204_v61 = vmax.f32 %v6202_v6, 0.0 }
 0xe40   :  { %7535 = vmatmul.msk.f32.vlgmr.msrb.gmra.mxu0 %vm6217_vm2, %v6204_v61 }
 0xebd   :  { %v6238_v17 = vpop.f32.mrf.mxu0 }
 0xebe   :  { %v6239_v7 = vadd.f32 %v7572_v9, %v6238_v17 }
 0xec0   :  { %v6241_v15 = vmax.f32 %v6239_v7, 0.0 }
 0xec2   :  { %7536 = vmatmul.msk.f32.vlgmr.msra.gmra.mxu0 %vm6025_vm9, %v6241_v15 }
 0xf3f   :  { %v6270_v49 = vpop.f32.mrf.mxu0 }
 0xf40   :  { %v6271_v24 = vadd.f32 %v7573_v36, %v6270_v49 }
 0xf42   :  { %6274 = vst.msk [vmem:[%s14705_s16] sm:$0xff] %vm6273_vm3, %v6271_v24 }

</bundles_post_ra>
